<compile_context>
chip_gen: v7x
topology: tpu7x:2x2x1
jax: 0.10.0
libtpu: 0.0.40
codegen_flags: <defaults>
</compile_context>

<pallas_src>
import numpy as np
import jax
import jax.numpy as jnp
from jax.experimental import pallas as pl
from jax.experimental.pallas import tpu as pltpu

BN_EPS = 1e-5


# --------------------- bilinear interpolation as an explicit matrix ---------------------
def _linear_interp_matrix(out_size, in_size, align_corners):
    m = np.zeros((out_size, in_size), np.float32)
    for i in range(out_size):
        if align_corners:
            src = 0.0 if out_size == 1 else i * (in_size - 1) / (out_size - 1)
        else:
            src = (i + 0.5) * (in_size / out_size) - 0.5
            src = max(src, 0.0)
        i0 = min(int(np.floor(src)), in_size - 1)
        i1 = min(i0 + 1, in_size - 1)
        f = src - i0
        m[i, i0] += 1.0 - f
        m[i, i1] += f
    return m


def _bilinear_matrix(out_hw, in_hw, align_corners):
    mh = _linear_interp_matrix(out_hw[0], in_hw[0], align_corners)
    mw = _linear_interp_matrix(out_hw[1], in_hw[1], align_corners)
    return jnp.asarray(np.kron(mh, mw), jnp.float32)  # (out_h*out_w, in_h*in_w)


# ----------------------------------- fused JPU kernel -----------------------------------
def _make_jpu_kernel(h2, w2, c4p, h, w, c3p, width):
    hw = h * w
    cw = 2 * width
    f32 = jnp.float32

    def kernel(x4_ref, x3_ref, w4_ref, b4_ref, w3_ref, b3_ref, kup4_ref,
               wdw_ref, wpw_ref, shd_ref, kup2t_ref, wct_ref, bct_ref,
               o_ref, pad4_s, pad3_s, im4_s, im3_s, padf_s):

        def zero_halo(pad_ref, hh, ww, p, c):
            # Zero only the p-wide halo ring; the interior is fully overwritten each grid step.
            pad_ref[pl.ds(0, p), :, :] = jnp.zeros((p, ww + 2 * p, c), f32)
            pad_ref[pl.ds(hh + p, p), :, :] = jnp.zeros((p, ww + 2 * p, c), f32)
            pad_ref[pl.ds(p, hh), pl.ds(0, p), :] = jnp.zeros((hh, p, c), f32)
            pad_ref[pl.ds(p, hh), pl.ds(ww + p, p), :] = jnp.zeros((hh, p, c), f32)

        def conv3x3(pad_ref, im_ref, x, w_ref, b_ref, hh, ww, cin):
            # Conv3x3 (pad=1, bias folded from BN) + ReLU via im2col + ONE deep-K matmul.
            zero_halo(pad_ref, hh, ww, 1, cin)
            pad_ref[pl.ds(1, hh), pl.ds(1, ww), :] = x
            for kh in range(3):
                for kw in range(3):
                    t = kh * 3 + kw
                    im_ref[:, pl.ds(t * cin, cin)] = (
                        pad_ref[pl.ds(kh, hh), pl.ds(kw, ww), :].reshape(hh * ww, cin))
            acc = jnp.dot(im_ref[...], w_ref[...], preferred_element_type=f32)
            return jnp.maximum(acc + b_ref[...], 0.0)

        # ---- conv4 + BN + ReLU on (h2, w2), then bilinear -> (h, w) (align_corners=False) ----
        y4 = conv3x3(pad4_s, im4_s, x4_ref[0], w4_ref, b4_ref, h2, w2, c4p)   # (h2*w2, width)
        u4 = jnp.dot(kup4_ref[...], y4, preferred_element_type=f32)           # (hw, width)

        # ---- conv3 + BN + ReLU on (h, w) ----
        y3 = conv3x3(pad3_s, im3_s, x3_ref[0], w3_ref, b3_ref, h, w, c3p)     # (hw, width)

        # ---- feat = cat([u4, y3], channels): single 128-channel tensor, zero-padded by 2 ----
        zero_halo(padf_s, h, w, 2, cw)
        padf_s[pl.ds(2, h), pl.ds(2, w), pl.ds(0, width)] = u4.reshape(h, w, width)
        padf_s[pl.ds(2, h), pl.ds(2, w), pl.ds(width, width)] = y3.reshape(h, w, width)

        def dilation_branch(bidx, dil):
            # SeparableConv2d(2*width -> width) + BN + ReLU, all BN affines pre-folded.
            taps = wdw_ref[bidx]                      # (9, 2*width), hoisted out of the tap loop
            off = 2 - dil
            acc = jnp.zeros((h, w, cw), f32)
            for kh in range(3):
                for kw in range(3):
                    patch = padf_s[pl.ds(off + kh * dil, h), pl.ds(off + kw * dil, w), :]
                    acc = acc + patch * taps[kh * 3 + kw]
            dw = acc.reshape(hw, cw)
            pw = jnp.dot(dw, wpw_ref[bidx], preferred_element_type=f32) + shd_ref[bidx]
            return jnp.maximum(pw, 0.0)               # (hw, width)

        d_cat = jnp.concatenate([dilation_branch(0, 1), dilation_branch(1, 2)], axis=-1)

        # ---- 1x1 conv commuted before the x2 upsample (both linear; bilinear rows sum to 1) ----
        # out^T = wc^T @ d_cat^T @ kup2^T + b  -> lane-dense (n_out, 4hw) store, no narrow transpose.
        d_cat_t = d_cat.T                                                       # (2*width, hw)
        c_t = jnp.dot(wct_ref[...], d_cat_t, preferred_element_type=f32)        # (n_out, hw)
        out_t = jnp.dot(c_t, kup2t_ref[...], preferred_element_type=f32) + bct_ref[...]
        o_ref[0] = out_t.astype(o_ref.dtype)

    return kernel


# ----------------------------- BatchNorm folding (eval mode) -----------------------------
def _bn_scale_shift(bn):
    s = bn["gamma"] / jnp.sqrt(bn["var"] + BN_EPS)
    return s, bn["beta"] - bn["mean"] * s


def _fold_conv_bn(w_oihw, bn, cpad):
    """Conv3x3 (bias=False) + BN -> im2col weight (9*cpad, Cout) with BN scale folded, shift (1, Cout)."""
    s, t = _bn_scale_shift(bn)
    w = jnp.transpose(w_oihw, (2, 3, 1, 0)) * s[None, None, None, :]   # OIHW -> HWIO, scaled
    kh, kw, ci, co = w.shape
    w = w.reshape(kh * kw, ci, co)
    if ci < cpad:
        w = jnp.pad(w, ((0, 0), (0, cpad - ci), (0, 0)))               # zero rows for padded Cin
    return w.reshape(kh * kw * cpad, co), t.reshape(1, co)


def _fold_separable(branch):
    """SeparableConv2d + BN + ReLU branch -> folded depthwise taps (9, 2w), pointwise (2w, w), shift (w,)."""
    s_in, t_in = _bn_scale_shift(branch["dw_bn"])        # (2*width,)
    s_out, t_out = _bn_scale_shift(branch["out_bn"])     # (width,)
    dw = jnp.transpose(branch["dw_w"][:, 0], (1, 2, 0)).reshape(9, -1)   # (9, 2*width)
    dw = dw * s_in[None, :]                              # fold inner BN scale into depthwise
    pw = jnp.transpose(branch["pw_w"][:, :, 0, 0], (1, 0))               # (2*width, width)
    shift = (t_in @ pw) * s_out + t_out                  # inner shift through pointwise + outer BN
    pw = pw * s_out[None, :]                             # fold outer BN scale into pointwise
    return dw, pw, shift


def _pad_last(x, cp):
    c = x.shape[-1]
    if c == cp:
        return x
    pads = [(0, 0)] * (x.ndim - 1) + [(0, cp - c)]
    return jnp.pad(x, pads)


# ----------------------------------------- wrapper -----------------------------------------
def jpu_forward(inputs, params):
    """JPU.forward: returns (inputs[0], inputs[1], feat) with feat in NCHW, like PyTorch."""
    x4_nchw, x3_nchw = inputs[-1], inputs[-2]
    B, c4, h2, w2 = x4_nchw.shape
    _, c3, h, w = x3_nchw.shape
    width = params["width"]
    n_out = params["conv_w"].shape[0]
    hw = h * w
    cw = 2 * width

    # Pad Cin to a multiple of 64 so every im2col column write is half/fully lane-aligned.
    c4p = -(-c4 // 64) * 64
    c3p = -(-c3 // 64) * 64

    # NCHW -> NHWC (channels-last) + zero channel padding for the kernel.
    x4 = _pad_last(jnp.transpose(x4_nchw, (0, 2, 3, 1)), c4p)
    x3 = _pad_last(jnp.transpose(x3_nchw, (0, 2, 3, 1)), c3p)

    # Fold all eval-mode BatchNorms (tiny, one-time wrapper work).
    w4f, b4f = _fold_conv_bn(params["conv4_w"], params["conv4_bn"], c4p)
    w3f, b3f = _fold_conv_bn(params["conv3_w"], params["conv3_bn"], c3p)
    dw1, pw1, sh1 = _fold_separable(params["dil1"])
    dw2, pw2, sh2 = _fold_separable(params["dil2"])
    wdw = jnp.stack([dw1, dw2])                               # (2, 9, 2*width)   merged taps
    wpw = jnp.stack([pw1, pw2])                               # (2, 2*width, width)
    shd = jnp.stack([sh1, sh2])[:, None, :]                   # (2, 1, width)
    wct = params["conv_w"][:, :, 0, 0]                        # (n_out, 2*width)  already transposed
    bct = params["conv_b"].reshape(-1, 1)                     # (n_out, 1)

    # Exact bilinear interpolation matrices (PyTorch semantics).
    kup4 = _bilinear_matrix((h, w), (h2, w2), align_corners=False)          # (hw, h2*w2)
    kup2t = _bilinear_matrix((2 * h, 2 * w), (h, w), align_corners=True).T  # (hw, 4hw)

    def _const(shape):
        nd = len(shape)
        return pl.BlockSpec(shape, lambda b, _nd=nd: (0,) * _nd)

    kernel = _make_jpu_kernel(h2, w2, c4p, h, w, c3p, width)
    out_flat = pl.pallas_call(
        kernel,
        out_shape=jax.ShapeDtypeStruct((B, n_out, 4 * hw), jnp.float32),
        grid_spec=pltpu.PrefetchScalarGridSpec(
            num_scalar_prefetch=0,
            grid=(B,),
            in_specs=[
                pl.BlockSpec((1, h2, w2, c4p), lambda b: (b, 0, 0, 0)),
                pl.BlockSpec((1, h, w, c3p), lambda b: (b, 0, 0, 0)),
                _const((9 * c4p, width)), _const((1, width)),
                _const((9 * c3p, width)), _const((1, width)),
                _const((hw, h2 * w2)),
                _const((2, 9, cw)), _const((2, cw, width)), _const((2, 1, width)),
                _const((hw, 4 * hw)),
                _const((n_out, cw)), _const((n_out, 1)),
            ],
            out_specs=pl.BlockSpec((1, n_out, 4 * hw), lambda b: (b, 0, 0)),
            scratch_shapes=[
                pltpu.VMEM((h2 + 2, w2 + 2, c4p), jnp.float32),   # conv4 zero-padded input
                pltpu.VMEM((h + 2, w + 2, c3p), jnp.float32),     # conv3 zero-padded input
                pltpu.VMEM((h2 * w2, 9 * c4p), jnp.float32),      # conv4 im2col buffer
                pltpu.VMEM((hw, 9 * c3p), jnp.float32),           # conv3 im2col buffer
                pltpu.VMEM((h + 4, w + 4, cw), jnp.float32),      # padded 128-ch feat (concat)
            ]),
        compiler_params=pltpu.CompilerParams(dimension_semantics=("parallel",)),
    )(x4, x3, w4f, b4f, w3f, b3f, kup4, wdw, wpw, shd, kup2t, wct, bct)

    feat = out_flat.reshape(B, n_out, 2 * h, 2 * w)   # already NCHW (lane-dense kernel store)
    return inputs[0], inputs[1], feat


# ------------------------------------ pure-JAX reference ------------------------------------
def _bn_eval(x, bn):
    s = bn["gamma"] / jnp.sqrt(bn["var"] + BN_EPS)
    return x * s + (bn["beta"] - bn["mean"] * s)


def _conv_nhwc(x, w_oihw, padding, dilation=1, groups=1):
    w = jnp.transpose(w_oihw, (2, 3, 1, 0))   # OIHW -> HWIO
    return jax.lax.conv_general_dilated(
        x, w, (1, 1), ((padding, padding), (padding, padding)),
        rhs_dilation=(dilation, dilation),
        dimension_numbers=("NHWC", "HWIO", "NHWC"),
        feature_group_count=groups)


def _src_index(out_size, in_size, align_corners):
    i = jnp.arange(out_size, dtype=jnp.float32)
    if align_corners:
        s = i * ((in_size - 1) / (out_size - 1)) if out_size > 1 else jnp.zeros_like(i)
    else:
        s = jnp.maximum((i + 0.5) * (in_size / out_size) - 0.5, 0.0)
    i0 = jnp.clip(jnp.floor(s).astype(jnp.int32), 0, in_size - 1)
    i1 = jnp.minimum(i0 + 1, in_size - 1)
    return i0, i1, s - i0.astype(jnp.float32)


def _bilinear_resize_nhwc(x, out_h, out_w, align_corners):
    _, H, W, _ = x.shape
    h0, h1, fh = _src_index(out_h, H, align_corners)
    w0, w1, fw = _src_index(out_w, W, align_corners)
    xr = (jnp.take(x, h0, axis=1) * (1.0 - fh)[None, :, None, None]
          + jnp.take(x, h1, axis=1) * fh[None, :, None, None])
    return (jnp.take(xr, w0, axis=2) * (1.0 - fw)[None, None, :, None]
            + jnp.take(xr, w1, axis=2) * fw[None, None, :, None])


def ref_forward(inputs, params):
    x4 = jnp.transpose(inputs[-1], (0, 2, 3, 1))
    x3 = jnp.transpose(inputs[-2], (0, 2, 3, 1))

    f4 = jax.nn.relu(_bn_eval(_conv_nhwc(x4, params["conv4_w"], 1), params["conv4_bn"]))
    f3 = jax.nn.relu(_bn_eval(_conv_nhwc(x3, params["conv3_w"], 1), params["conv3_bn"]))
    h, w = f3.shape[1], f3.shape[2]
    f4 = _bilinear_resize_nhwc(f4, h, w, align_corners=False)
    feat = jnp.concatenate([f4, f3], axis=-1)

    def sep_branch(x, br, dilation):
        y = _conv_nhwc(x, br["dw_w"], dilation, dilation, groups=x.shape[-1])
        y = _bn_eval(y, br["dw_bn"])
        y = jnp.einsum('bhwc,oc->bhwo', y, br["pw_w"][:, :, 0, 0])
        return jax.nn.relu(_bn_eval(y, br["out_bn"]))

    feat = jnp.concatenate([sep_branch(feat, params["dil1"], 1),
                            sep_branch(feat, params["dil2"], 2)], axis=-1)
    feat = _bilinear_resize_nhwc(feat, 2 * h, 2 * w, align_corners=True)
    feat = jnp.einsum('bhwc,oc->bhwo', feat, params["conv_w"][:, :, 0, 0]) + params["conv_b"]
    return inputs[0], inputs[1], jnp.transpose(feat, (0, 3, 1, 2))


# --------------------------------- deterministic parameters ---------------------------------
def init_params(key, in_channels=(16, 24, 48, 64), width=64):
    c3, c4 = in_channels[-2], in_channels[-1]
    keys = iter(jax.random.split(key, 64))

    def nrm(shape, s=0.1):
        return s * jax.random.normal(next(keys), shape, jnp.float32)

    def bn(c):
        return dict(gamma=1.0 + nrm((c,)), beta=nrm((c,)), mean=nrm((c,)),
                    var=jax.random.uniform(next(keys), (c,), jnp.float32, 0.5, 1.5))

    params = dict(width=width)
    params["conv4_w"] = nrm((width, c4, 3, 3))        # Conv2d(c4, width, 3, p=1, bias=False)
    params["conv4_bn"] = bn(width)
    params["conv3_w"] = nrm((width, c3, 3, 3))        # Conv2d(c3, width, 3, p=1, bias=False)
    params["conv3_bn"] = bn(width)
    for name in ("dil1", "dil2"):
        params[name] = dict(
            dw_w=nrm((2 * width, 1, 3, 3)),           # depthwise (groups=2*width, bias=False)
            dw_bn=bn(2 * width),                      # SeparableConv2d internal BN
            pw_w=nrm((width, 2 * width, 1, 1)),       # pointwise 1x1 (bias=False)
            out_bn=bn(width),                         # BatchNorm2d(width) after SeparableConv2d
        )
    params["conv_w"] = nrm((32, 2 * width, 1, 1))     # nn.Conv2d(128, 32, 1) (bias=True)
    params["conv_b"] = nrm((32,))
    return params


if __name__ == "__main__":
    key = jax.random.PRNGKey(0)
    k_in, k_p = jax.random.split(key)

    B = 2
    in_channels = (16, 24, 48, 64)
    ks = jax.random.split(k_in, 4)
    # FPN-style feature pyramid (NCHW, like PyTorch); only the last two levels are computed on.
    inputs = (
        jax.random.normal(ks[0], (B, in_channels[0], 32, 32), jnp.float32),
        jax.random.normal(ks[1], (B, in_channels[1], 16, 16), jnp.float32),
        jax.random.normal(ks[2], (B, in_channels[2], 16, 16), jnp.float32),
        jax.random.normal(ks[3], (B, in_channels[3], 8, 8), jnp.float32),
    )
    params = init_params(k_p, in_channels=in_channels, width=64)

    _, _, feat = jpu_forward(inputs, params)
    feat = jax.block_until_ready(feat)

    _, _, ref_feat = ref_forward(inputs, params)
    assert feat.shape == ref_feat.shape == (B, 32, 32, 32)
    np.testing.assert_allclose(np.asarray(feat), np.asarray(ref_feat), rtol=5e-4, atol=5e-4)

    print("KERNEL_OK")
</pallas_src>

<mosaic_0001>
module attributes {stable_mosaic.version = 11 : i64} {
  func.func @kernel(%arg0: i32, %arg1: memref<1x8x8x64xf32, #tpu.memory_space<vmem>>, %arg2: memref<1x16x16x64xf32, #tpu.memory_space<vmem>>, %arg3: memref<576x64xf32, #tpu.memory_space<vmem>>, %arg4: memref<1x64xf32, #tpu.memory_space<vmem>>, %arg5: memref<576x64xf32, #tpu.memory_space<vmem>>, %arg6: memref<1x64xf32, #tpu.memory_space<vmem>>, %arg7: memref<256x64xf32, #tpu.memory_space<vmem>>, %arg8: memref<2x9x128xf32, #tpu.memory_space<vmem>>, %arg9: memref<2x128x64xf32, #tpu.memory_space<vmem>>, %arg10: memref<2x1x64xf32, #tpu.memory_space<vmem>>, %arg11: memref<256x1024xf32, #tpu.memory_space<vmem>>, %arg12: memref<32x128xf32, #tpu.memory_space<vmem>>, %arg13: memref<32x1xf32, #tpu.memory_space<vmem>>, %arg14: memref<1x32x1024xf32, #tpu.memory_space<vmem>>, %arg15: memref<10x10x64xf32, #tpu.memory_space<vmem>>, %arg16: memref<18x18x64xf32, #tpu.memory_space<vmem>>, %arg17: memref<64x576xf32, #tpu.memory_space<vmem>>, %arg18: memref<256x576xf32, #tpu.memory_space<vmem>>, %arg19: memref<20x20x128xf32, #tpu.memory_space<vmem>>) attributes {dimension_semantics = [#tpu.dimension_semantics<parallel>], iteration_bounds = array<i64: 2>, scalar_prefetch = 0 : i64, scratch_operands = 5 : i64, tpu.core_type = #tpu.core_type<tc>, window_params = [{transform_indices = @transform_0, window_bounds = array<i64: 1, 8, 8, 64>}, {transform_indices = @transform_1, window_bounds = array<i64: 1, 16, 16, 64>}, {pipeline_mode = #tpu.pipeline_mode<synchronous>, transform_indices = @transform_2, window_bounds = array<i64: 576, 64>}, {pipeline_mode = #tpu.pipeline_mode<synchronous>, transform_indices = @transform_3, window_bounds = array<i64: 1, 64>}, {pipeline_mode = #tpu.pipeline_mode<synchronous>, transform_indices = @transform_4, window_bounds = array<i64: 576, 64>}, {pipeline_mode = #tpu.pipeline_mode<synchronous>, transform_indices = @transform_5, window_bounds = array<i64: 1, 64>}, {pipeline_mode = #tpu.pipeline_mode<synchronous>, transform_indices = @transform_6, window_bounds = array<i64: 256, 64>}, {pipeline_mode = #tpu.pipeline_mode<synchronous>, transform_indices = @transform_7, window_bounds = array<i64: 2, 9, 128>}, {pipeline_mode = #tpu.pipeline_mode<synchronous>, transform_indices = @transform_8, window_bounds = array<i64: 2, 128, 64>}, {pipeline_mode = #tpu.pipeline_mode<synchronous>, transform_indices = @transform_9, window_bounds = array<i64: 2, 1, 64>}, {pipeline_mode = #tpu.pipeline_mode<synchronous>, transform_indices = @transform_10, window_bounds = array<i64: 256, 1024>}, {pipeline_mode = #tpu.pipeline_mode<synchronous>, transform_indices = @transform_11, window_bounds = array<i64: 32, 128>}, {pipeline_mode = #tpu.pipeline_mode<synchronous>, transform_indices = @transform_12, window_bounds = array<i64: 32, 1>}, {transform_indices = @transform_13, window_bounds = array<i64: 1, 32, 1024>}]} {
    %c0 = arith.constant 0 : index
    %c0_0 = arith.constant 0 : index
    %c0_1 = arith.constant 0 : index
    %c0_2 = arith.constant 0 : index
    %0 = vector.load %arg1[%c0, %c0_0, %c0_1, %c0_2] : memref<1x8x8x64xf32, #tpu.memory_space<vmem>>, vector<1x8x8x64xf32>
    %1 = vector.shape_cast %0 : vector<1x8x8x64xf32> to vector<8x8x64xf32>
    %cst = arith.constant 0.000000e+00 : f32
    %2 = vector.broadcast %cst : f32 to vector<1x10x64xf32>
    %c0_3 = arith.constant 0 : index
    %c0_4 = arith.constant 0 : index
    %c0_5 = arith.constant 0 : index
    %3 = vector.load %arg15[%c0_3, %c0_4, %c0_5] : memref<10x10x64xf32, #tpu.memory_space<vmem>>, vector<1x10x64xf32>
    tpu.vector_store %arg15[%c0_3, %c0_4, %c0_5], %2 {strides = array<i32>} : memref<10x10x64xf32, #tpu.memory_space<vmem>>, vector<1x10x64xf32>,
    %cst_6 = arith.constant 0.000000e+00 : f32
    %4 = vector.broadcast %cst_6 : f32 to vector<1x10x64xf32>
    %c9 = arith.constant 9 : index
    %c0_7 = arith.constant 0 : index
    %c0_8 = arith.constant 0 : index
    %5 = vector.load %arg15[%c9, %c0_7, %c0_8] : memref<10x10x64xf32, #tpu.memory_space<vmem>>, vector<1x10x64xf32>
    tpu.vector_store %arg15[%c9, %c0_7, %c0_8], %4 {strides = array<i32>} : memref<10x10x64xf32, #tpu.memory_space<vmem>>, vector<1x10x64xf32>,
    %cst_9 = arith.constant 0.000000e+00 : f32
    %6 = vector.broadcast %cst_9 : f32 to vector<8x1x64xf32>
    %c1 = arith.constant 1 : index
    %c0_10 = arith.constant 0 : index
    %c0_11 = arith.constant 0 : index
    %7 = vector.load %arg15[%c1, %c0_10, %c0_11] : memref<10x10x64xf32, #tpu.memory_space<vmem>>, vector<8x1x64xf32>
    tpu.vector_store %arg15[%c1, %c0_10, %c0_11], %6 {strides = array<i32>} : memref<10x10x64xf32, #tpu.memory_space<vmem>>, vector<8x1x64xf32>,
    %cst_12 = arith.constant 0.000000e+00 : f32
    %8 = vector.broadcast %cst_12 : f32 to vector<8x1x64xf32>
    %c1_13 = arith.constant 1 : index
    %c9_14 = arith.constant 9 : index
    %c0_15 = arith.constant 0 : index
    %9 = vector.load %arg15[%c1_13, %c9_14, %c0_15] : memref<10x10x64xf32, #tpu.memory_space<vmem>>, vector<8x1x64xf32>
    tpu.vector_store %arg15[%c1_13, %c9_14, %c0_15], %8 {strides = array<i32>} : memref<10x10x64xf32, #tpu.memory_space<vmem>>, vector<8x1x64xf32>,
    %c1_16 = arith.constant 1 : index
    %c1_17 = arith.constant 1 : index
    %c0_18 = arith.constant 0 : index
    %10 = vector.load %arg15[%c1_16, %c1_17, %c0_18] : memref<10x10x64xf32, #tpu.memory_space<vmem>>, vector<8x8x64xf32>
    tpu.vector_store %arg15[%c1_16, %c1_17, %c0_18], %1 {strides = array<i32>} : memref<10x10x64xf32, #tpu.memory_space<vmem>>, vector<8x8x64xf32>,
    %c0_19 = arith.constant 0 : index
    %c0_20 = arith.constant 0 : index
    %c0_21 = arith.constant 0 : index
    %11 = vector.load %arg15[%c0_19, %c0_20, %c0_21] : memref<10x10x64xf32, #tpu.memory_space<vmem>>, vector<8x8x64xf32>
    %12 = vector.shape_cast %11 : vector<8x8x64xf32> to vector<64x64xf32>
    %c0_22 = arith.constant 0 : index
    %c0_23 = arith.constant 0 : index
    %13 = vector.load %arg17[%c0_22, %c0_23] : memref<64x576xf32, #tpu.memory_space<vmem>>, vector<64x64xf32>
    tpu.vector_store %arg17[%c0_22, %c0_23], %12 {strides = array<i32>} : memref<64x576xf32, #tpu.memory_space<vmem>>, vector<64x64xf32>,
    %c0_24 = arith.constant 0 : index
    %c1_25 = arith.constant 1 : index
    %c0_26 = arith.constant 0 : index
    %14 = vector.load %arg15[%c0_24, %c1_25, %c0_26] : memref<10x10x64xf32, #tpu.memory_space<vmem>>, vector<8x8x64xf32>
    %15 = vector.shape_cast %14 : vector<8x8x64xf32> to vector<64x64xf32>
    %c0_27 = arith.constant 0 : index
    %c64 = arith.constant 64 : index
    %16 = vector.load %arg17[%c0_27, %c64] : memref<64x576xf32, #tpu.memory_space<vmem>>, vector<64x64xf32>
    tpu.vector_store %arg17[%c0_27, %c64], %15 {strides = array<i32>} : memref<64x576xf32, #tpu.memory_space<vmem>>, vector<64x64xf32>,
    %c0_28 = arith.constant 0 : index
    %c2 = arith.constant 2 : index
    %c0_29 = arith.constant 0 : index
    %17 = vector.load %arg15[%c0_28, %c2, %c0_29] : memref<10x10x64xf32, #tpu.memory_space<vmem>>, vector<8x8x64xf32>
    %18 = vector.shape_cast %17 : vector<8x8x64xf32> to vector<64x64xf32>
    %c0_30 = arith.constant 0 : index
    %c128 = arith.constant 128 : index
    %19 = vector.load %arg17[%c0_30, %c128] : memref<64x576xf32, #tpu.memory_space<vmem>>, vector<64x64xf32>
    tpu.vector_store %arg17[%c0_30, %c128], %18 {strides = array<i32>} : memref<64x576xf32, #tpu.memory_space<vmem>>, vector<64x64xf32>,
    %c1_31 = arith.constant 1 : index
    %c0_32 = arith.constant 0 : index
    %c0_33 = arith.constant 0 : index
    %20 = vector.load %arg15[%c1_31, %c0_32, %c0_33] : memref<10x10x64xf32, #tpu.memory_space<vmem>>, vector<8x8x64xf32>
    %21 = vector.shape_cast %20 : vector<8x8x64xf32> to vector<64x64xf32>
    %c0_34 = arith.constant 0 : index
    %c192 = arith.constant 192 : index
    %22 = vector.load %arg17[%c0_34, %c192] : memref<64x576xf32, #tpu.memory_space<vmem>>, vector<64x64xf32>
    tpu.vector_store %arg17[%c0_34, %c192], %21 {strides = array<i32>} : memref<64x576xf32, #tpu.memory_space<vmem>>, vector<64x64xf32>,
    %c1_35 = arith.constant 1 : index
    %c1_36 = arith.constant 1 : index
    %c0_37 = arith.constant 0 : index
    %23 = vector.load %arg15[%c1_35, %c1_36, %c0_37] : memref<10x10x64xf32, #tpu.memory_space<vmem>>, vector<8x8x64xf32>
    %24 = vector.shape_cast %23 : vector<8x8x64xf32> to vector<64x64xf32>
    %c0_38 = arith.constant 0 : index
    %c256 = arith.constant 256 : index
    %25 = vector.load %arg17[%c0_38, %c256] : memref<64x576xf32, #tpu.memory_space<vmem>>, vector<64x64xf32>
    tpu.vector_store %arg17[%c0_38, %c256], %24 {strides = array<i32>} : memref<64x576xf32, #tpu.memory_space<vmem>>, vector<64x64xf32>,
    %c1_39 = arith.constant 1 : index
    %c2_40 = arith.constant 2 : index
    %c0_41 = arith.constant 0 : index
    %26 = vector.load %arg15[%c1_39, %c2_40, %c0_41] : memref<10x10x64xf32, #tpu.memory_space<vmem>>, vector<8x8x64xf32>
    %27 = vector.shape_cast %26 : vector<8x8x64xf32> to vector<64x64xf32>
    %c0_42 = arith.constant 0 : index
    %c320 = arith.constant 320 : index
    %28 = vector.load %arg17[%c0_42, %c320] : memref<64x576xf32, #tpu.memory_space<vmem>>, vector<64x64xf32>
    tpu.vector_store %arg17[%c0_42, %c320], %27 {strides = array<i32>} : memref<64x576xf32, #tpu.memory_space<vmem>>, vector<64x64xf32>,
    %c2_43 = arith.constant 2 : index
    %c0_44 = arith.constant 0 : index
    %c0_45 = arith.constant 0 : index
    %29 = vector.load %arg15[%c2_43, %c0_44, %c0_45] : memref<10x10x64xf32, #tpu.memory_space<vmem>>, vector<8x8x64xf32>
    %30 = vector.shape_cast %29 : vector<8x8x64xf32> to vector<64x64xf32>
    %c0_46 = arith.constant 0 : index
    %c384 = arith.constant 384 : index
    %31 = vector.load %arg17[%c0_46, %c384] : memref<64x576xf32, #tpu.memory_space<vmem>>, vector<64x64xf32>
    tpu.vector_store %arg17[%c0_46, %c384], %30 {strides = array<i32>} : memref<64x576xf32, #tpu.memory_space<vmem>>, vector<64x64xf32>,
    %c2_47 = arith.constant 2 : index
    %c1_48 = arith.constant 1 : index
    %c0_49 = arith.constant 0 : index
    %32 = vector.load %arg15[%c2_47, %c1_48, %c0_49] : memref<10x10x64xf32, #tpu.memory_space<vmem>>, vector<8x8x64xf32>
    %33 = vector.shape_cast %32 : vector<8x8x64xf32> to vector<64x64xf32>
    %c0_50 = arith.constant 0 : index
    %c448 = arith.constant 448 : index
    %34 = vector.load %arg17[%c0_50, %c448] : memref<64x576xf32, #tpu.memory_space<vmem>>, vector<64x64xf32>
    tpu.vector_store %arg17[%c0_50, %c448], %33 {strides = array<i32>} : memref<64x576xf32, #tpu.memory_space<vmem>>, vector<64x64xf32>,
    %c2_51 = arith.constant 2 : index
    %c2_52 = arith.constant 2 : index
    %c0_53 = arith.constant 0 : index
    %35 = vector.load %arg15[%c2_51, %c2_52, %c0_53] : memref<10x10x64xf32, #tpu.memory_space<vmem>>, vector<8x8x64xf32>
    %36 = vector.shape_cast %35 : vector<8x8x64xf32> to vector<64x64xf32>
    %c0_54 = arith.constant 0 : index
    %c512 = arith.constant 512 : index
    %37 = vector.load %arg17[%c0_54, %c512] : memref<64x576xf32, #tpu.memory_space<vmem>>, vector<64x64xf32>
    tpu.vector_store %arg17[%c0_54, %c512], %36 {strides = array<i32>} : memref<64x576xf32, #tpu.memory_space<vmem>>, vector<64x64xf32>,
    %c0_55 = arith.constant 0 : index
    %c0_56 = arith.constant 0 : index
    %38 = vector.load %arg17[%c0_55, %c0_56] : memref<64x576xf32, #tpu.memory_space<vmem>>, vector<64x576xf32>
    %c0_57 = arith.constant 0 : index
    %c0_58 = arith.constant 0 : index
    %39 = vector.load %arg3[%c0_57, %c0_58] : memref<576x64xf32, #tpu.memory_space<vmem>>, vector<576x64xf32>
    %cst_59 = arith.constant dense<0.000000e+00> : vector<64x64xf32>
    %40 = tpu.matmul %38, %39, %cst_59 {dimension_numbers = #tpu.dot_dimension_numbers<[1], [0], [0], [1], [0, 0, 1, 1], [], []>} : vector<64x576xf32>, vector<576x64xf32>, vector<64x64xf32> -> vector<64x64xf32>
    %c0_60 = arith.constant 0 : index
    %c0_61 = arith.constant 0 : index
    %41 = vector.load %arg4[%c0_60, %c0_61] : memref<1x64xf32, #tpu.memory_space<vmem>>, vector<1x64xf32>
    %42 = vector.broadcast %41 : vector<1x64xf32> to vector<64x64xf32>
    %43 = arith.addf %40, %42 : vector<64x64xf32>
    %cst_62 = arith.constant 0.000000e+00 : f32
    %44 = vector.broadcast %cst_62 : f32 to vector<64x64xf32>
    %45 = arith.maximumf %43, %44 : vector<64x64xf32>
    %c0_63 = arith.constant 0 : index
    %c0_64 = arith.constant 0 : index
    %46 = vector.load %arg7[%c0_63, %c0_64] : memref<256x64xf32, #tpu.memory_space<vmem>>, vector<256x64xf32>
    %cst_65 = arith.constant dense<0.000000e+00> : vector<256x64xf32>
    %47 = tpu.matmul %46, %45, %cst_65 {dimension_numbers = #tpu.dot_dimension_numbers<[1], [0], [0], [1], [0, 0, 1, 1], [], []>} : vector<256x64xf32>, vector<64x64xf32>, vector<256x64xf32> -> vector<256x64xf32>
    %c0_66 = arith.constant 0 : index
    %c0_67 = arith.constant 0 : index
    %c0_68 = arith.constant 0 : index
    %c0_69 = arith.constant 0 : index
    %48 = vector.load %arg2[%c0_66, %c0_67, %c0_68, %c0_69] : memref<1x16x16x64xf32, #tpu.memory_space<vmem>>, vector<1x16x16x64xf32>
    %49 = vector.shape_cast %48 : vector<1x16x16x64xf32> to vector<16x16x64xf32>
    %cst_70 = arith.constant 0.000000e+00 : f32
    %50 = vector.broadcast %cst_70 : f32 to vector<1x18x64xf32>
    %c0_71 = arith.constant 0 : index
    %c0_72 = arith.constant 0 : index
    %c0_73 = arith.constant 0 : index
    %51 = vector.load %arg16[%c0_71, %c0_72, %c0_73] : memref<18x18x64xf32, #tpu.memory_space<vmem>>, vector<1x18x64xf32>
    tpu.vector_store %arg16[%c0_71, %c0_72, %c0_73], %50 {strides = array<i32>} : memref<18x18x64xf32, #tpu.memory_space<vmem>>, vector<1x18x64xf32>,
    %cst_74 = arith.constant 0.000000e+00 : f32
    %52 = vector.broadcast %cst_74 : f32 to vector<1x18x64xf32>
    %c17 = arith.constant 17 : index
    %c0_75 = arith.constant 0 : index
    %c0_76 = arith.constant 0 : index
    %53 = vector.load %arg16[%c17, %c0_75, %c0_76] : memref<18x18x64xf32, #tpu.memory_space<vmem>>, vector<1x18x64xf32>
    tpu.vector_store %arg16[%c17, %c0_75, %c0_76], %52 {strides = array<i32>} : memref<18x18x64xf32, #tpu.memory_space<vmem>>, vector<1x18x64xf32>,
    %cst_77 = arith.constant 0.000000e+00 : f32
    %54 = vector.broadcast %cst_77 : f32 to vector<16x1x64xf32>
    %c1_78 = arith.constant 1 : index
    %c0_79 = arith.constant 0 : index
    %c0_80 = arith.constant 0 : index
    %55 = vector.load %arg16[%c1_78, %c0_79, %c0_80] : memref<18x18x64xf32, #tpu.memory_space<vmem>>, vector<16x1x64xf32>
    tpu.vector_store %arg16[%c1_78, %c0_79, %c0_80], %54 {strides = array<i32>} : memref<18x18x64xf32, #tpu.memory_space<vmem>>, vector<16x1x64xf32>,
    %cst_81 = arith.constant 0.000000e+00 : f32
    %56 = vector.broadcast %cst_81 : f32 to vector<16x1x64xf32>
    %c1_82 = arith.constant 1 : index
    %c17_83 = arith.constant 17 : index
    %c0_84 = arith.constant 0 : index
    %57 = vector.load %arg16[%c1_82, %c17_83, %c0_84] : memref<18x18x64xf32, #tpu.memory_space<vmem>>, vector<16x1x64xf32>
    tpu.vector_store %arg16[%c1_82, %c17_83, %c0_84], %56 {strides = array<i32>} : memref<18x18x64xf32, #tpu.memory_space<vmem>>, vector<16x1x64xf32>,
    %c1_85 = arith.constant 1 : index
    %c1_86 = arith.constant 1 : index
    %c0_87 = arith.constant 0 : index
    %58 = vector.load %arg16[%c1_85, %c1_86, %c0_87] : memref<18x18x64xf32, #tpu.memory_space<vmem>>, vector<16x16x64xf32>
    tpu.vector_store %arg16[%c1_85, %c1_86, %c0_87], %49 {strides = array<i32>} : memref<18x18x64xf32, #tpu.memory_space<vmem>>, vector<16x16x64xf32>,
    %c0_88 = arith.constant 0 : index
    %c0_89 = arith.constant 0 : index
    %c0_90 = arith.constant 0 : index
    %59 = vector.load %arg16[%c0_88, %c0_89, %c0_90] : memref<18x18x64xf32, #tpu.memory_space<vmem>>, vector<16x16x64xf32>
    %60 = vector.shape_cast %59 : vector<16x16x64xf32> to vector<256x64xf32>
    %c0_91 = arith.constant 0 : index
    %c0_92 = arith.constant 0 : index
    %61 = vector.load %arg18[%c0_91, %c0_92] : memref<256x576xf32, #tpu.memory_space<vmem>>, vector<256x64xf32>
    tpu.vector_store %arg18[%c0_91, %c0_92], %60 {strides = array<i32>} : memref<256x576xf32, #tpu.memory_space<vmem>>, vector<256x64xf32>,
    %c0_93 = arith.constant 0 : index
    %c1_94 = arith.constant 1 : index
    %c0_95 = arith.constant 0 : index
    %62 = vector.load %arg16[%c0_93, %c1_94, %c0_95] : memref<18x18x64xf32, #tpu.memory_space<vmem>>, vector<16x16x64xf32>
    %63 = vector.shape_cast %62 : vector<16x16x64xf32> to vector<256x64xf32>
    %c0_96 = arith.constant 0 : index
    %c64_97 = arith.constant 64 : index
    %64 = vector.load %arg18[%c0_96, %c64_97] : memref<256x576xf32, #tpu.memory_space<vmem>>, vector<256x64xf32>
    tpu.vector_store %arg18[%c0_96, %c64_97], %63 {strides = array<i32>} : memref<256x576xf32, #tpu.memory_space<vmem>>, vector<256x64xf32>,
    %c0_98 = arith.constant 0 : index
    %c2_99 = arith.constant 2 : index
    %c0_100 = arith.constant 0 : index
    %65 = vector.load %arg16[%c0_98, %c2_99, %c0_100] : memref<18x18x64xf32, #tpu.memory_space<vmem>>, vector<16x16x64xf32>
    %66 = vector.shape_cast %65 : vector<16x16x64xf32> to vector<256x64xf32>
    %c0_101 = arith.constant 0 : index
    %c128_102 = arith.constant 128 : index
    %67 = vector.load %arg18[%c0_101, %c128_102] : memref<256x576xf32, #tpu.memory_space<vmem>>, vector<256x64xf32>
    tpu.vector_store %arg18[%c0_101, %c128_102], %66 {strides = array<i32>} : memref<256x576xf32, #tpu.memory_space<vmem>>, vector<256x64xf32>,
    %c1_103 = arith.constant 1 : index
    %c0_104 = arith.constant 0 : index
    %c0_105 = arith.constant 0 : index
    %68 = vector.load %arg16[%c1_103, %c0_104, %c0_105] : memref<18x18x64xf32, #tpu.memory_space<vmem>>, vector<16x16x64xf32>
    %69 = vector.shape_cast %68 : vector<16x16x64xf32> to vector<256x64xf32>
    %c0_106 = arith.constant 0 : index
    %c192_107 = arith.constant 192 : index
    %70 = vector.load %arg18[%c0_106, %c192_107] : memref<256x576xf32, #tpu.memory_space<vmem>>, vector<256x64xf32>
    tpu.vector_store %arg18[%c0_106, %c192_107], %69 {strides = array<i32>} : memref<256x576xf32, #tpu.memory_space<vmem>>, vector<256x64xf32>,
    %c1_108 = arith.constant 1 : index
    %c1_109 = arith.constant 1 : index
    %c0_110 = arith.constant 0 : index
    %71 = vector.load %arg16[%c1_108, %c1_109, %c0_110] : memref<18x18x64xf32, #tpu.memory_space<vmem>>, vector<16x16x64xf32>
    %72 = vector.shape_cast %71 : vector<16x16x64xf32> to vector<256x64xf32>
    %c0_111 = arith.constant 0 : index
    %c256_112 = arith.constant 256 : index
    %73 = vector.load %arg18[%c0_111, %c256_112] : memref<256x576xf32, #tpu.memory_space<vmem>>, vector<256x64xf32>
    tpu.vector_store %arg18[%c0_111, %c256_112], %72 {strides = array<i32>} : memref<256x576xf32, #tpu.memory_space<vmem>>, vector<256x64xf32>,
    %c1_113 = arith.constant 1 : index
    %c2_114 = arith.constant 2 : index
    %c0_115 = arith.constant 0 : index
    %74 = vector.load %arg16[%c1_113, %c2_114, %c0_115] : memref<18x18x64xf32, #tpu.memory_space<vmem>>, vector<16x16x64xf32>
    %75 = vector.shape_cast %74 : vector<16x16x64xf32> to vector<256x64xf32>
    %c0_116 = arith.constant 0 : index
    %c320_117 = arith.constant 320 : index
    %76 = vector.load %arg18[%c0_116, %c320_117] : memref<256x576xf32, #tpu.memory_space<vmem>>, vector<256x64xf32>
    tpu.vector_store %arg18[%c0_116, %c320_117], %75 {strides = array<i32>} : memref<256x576xf32, #tpu.memory_space<vmem>>, vector<256x64xf32>,
    %c2_118 = arith.constant 2 : index
    %c0_119 = arith.constant 0 : index
    %c0_120 = arith.constant 0 : index
    %77 = vector.load %arg16[%c2_118, %c0_119, %c0_120] : memref<18x18x64xf32, #tpu.memory_space<vmem>>, vector<16x16x64xf32>
    %78 = vector.shape_cast %77 : vector<16x16x64xf32> to vector<256x64xf32>
    %c0_121 = arith.constant 0 : index
    %c384_122 = arith.constant 384 : index
    %79 = vector.load %arg18[%c0_121, %c384_122] : memref<256x576xf32, #tpu.memory_space<vmem>>, vector<256x64xf32>
    tpu.vector_store %arg18[%c0_121, %c384_122], %78 {strides = array<i32>} : memref<256x576xf32, #tpu.memory_space<vmem>>, vector<256x64xf32>,
    %c2_123 = arith.constant 2 : index
    %c1_124 = arith.constant 1 : index
    %c0_125 = arith.constant 0 : index
    %80 = vector.load %arg16[%c2_123, %c1_124, %c0_125] : memref<18x18x64xf32, #tpu.memory_space<vmem>>, vector<16x16x64xf32>
    %81 = vector.shape_cast %80 : vector<16x16x64xf32> to vector<256x64xf32>
    %c0_126 = arith.constant 0 : index
    %c448_127 = arith.constant 448 : index
    %82 = vector.load %arg18[%c0_126, %c448_127] : memref<256x576xf32, #tpu.memory_space<vmem>>, vector<256x64xf32>
    tpu.vector_store %arg18[%c0_126, %c448_127], %81 {strides = array<i32>} : memref<256x576xf32, #tpu.memory_space<vmem>>, vector<256x64xf32>,
    %c2_128 = arith.constant 2 : index
    %c2_129 = arith.constant 2 : index
    %c0_130 = arith.constant 0 : index
    %83 = vector.load %arg16[%c2_128, %c2_129, %c0_130] : memref<18x18x64xf32, #tpu.memory_space<vmem>>, vector<16x16x64xf32>
    %84 = vector.shape_cast %83 : vector<16x16x64xf32> to vector<256x64xf32>
    %c0_131 = arith.constant 0 : index
    %c512_132 = arith.constant 512 : index
    %85 = vector.load %arg18[%c0_131, %c512_132] : memref<256x576xf32, #tpu.memory_space<vmem>>, vector<256x64xf32>
    tpu.vector_store %arg18[%c0_131, %c512_132], %84 {strides = array<i32>} : memref<256x576xf32, #tpu.memory_space<vmem>>, vector<256x64xf32>,
    %c0_133 = arith.constant 0 : index
    %c0_134 = arith.constant 0 : index
    %86 = vector.load %arg18[%c0_133, %c0_134] : memref<256x576xf32, #tpu.memory_space<vmem>>, vector<256x576xf32>
    %c0_135 = arith.constant 0 : index
    %c0_136 = arith.constant 0 : index
    %87 = vector.load %arg5[%c0_135, %c0_136] : memref<576x64xf32, #tpu.memory_space<vmem>>, vector<576x64xf32>
    %cst_137 = arith.constant dense<0.000000e+00> : vector<256x64xf32>
    %88 = tpu.matmul %86, %87, %cst_137 {dimension_numbers = #tpu.dot_dimension_numbers<[1], [0], [0], [1], [0, 0, 1, 1], [], []>} : vector<256x576xf32>, vector<576x64xf32>, vector<256x64xf32> -> vector<256x64xf32>
    %c0_138 = arith.constant 0 : index
    %c0_139 = arith.constant 0 : index
    %89 = vector.load %arg6[%c0_138, %c0_139] : memref<1x64xf32, #tpu.memory_space<vmem>>, vector<1x64xf32>
    %90 = vector.broadcast %89 : vector<1x64xf32> to vector<256x64xf32>
    %91 = arith.addf %88, %90 : vector<256x64xf32>
    %cst_140 = arith.constant 0.000000e+00 : f32
    %92 = vector.broadcast %cst_140 : f32 to vector<256x64xf32>
    %93 = arith.maximumf %91, %92 : vector<256x64xf32>
    %cst_141 = arith.constant 0.000000e+00 : f32
    %94 = vector.broadcast %cst_141 : f32 to vector<2x20x128xf32>
    %c0_142 = arith.constant 0 : index
    %c0_143 = arith.constant 0 : index
    %c0_144 = arith.constant 0 : index
    %95 = vector.load %arg19[%c0_142, %c0_143, %c0_144] : memref<20x20x128xf32, #tpu.memory_space<vmem>>, vector<2x20x128xf32>
    tpu.vector_store %arg19[%c0_142, %c0_143, %c0_144], %94 {strides = array<i32>} : memref<20x20x128xf32, #tpu.memory_space<vmem>>, vector<2x20x128xf32>,
    %cst_145 = arith.constant 0.000000e+00 : f32
    %96 = vector.broadcast %cst_145 : f32 to vector<2x20x128xf32>
    %c18 = arith.constant 18 : index
    %c0_146 = arith.constant 0 : index
    %c0_147 = arith.constant 0 : index
    %97 = vector.load %arg19[%c18, %c0_146, %c0_147] : memref<20x20x128xf32, #tpu.memory_space<vmem>>, vector<2x20x128xf32>
    tpu.vector_store %arg19[%c18, %c0_146, %c0_147], %96 {strides = array<i32>} : memref<20x20x128xf32, #tpu.memory_space<vmem>>, vector<2x20x128xf32>,
    %cst_148 = arith.constant 0.000000e+00 : f32
    %98 = vector.broadcast %cst_148 : f32 to vector<16x2x128xf32>
    %c2_149 = arith.constant 2 : index
    %c0_150 = arith.constant 0 : index
    %c0_151 = arith.constant 0 : index
    %99 = vector.load %arg19[%c2_149, %c0_150, %c0_151] : memref<20x20x128xf32, #tpu.memory_space<vmem>>, vector<16x2x128xf32>
    tpu.vector_store %arg19[%c2_149, %c0_150, %c0_151], %98 {strides = array<i32>} : memref<20x20x128xf32, #tpu.memory_space<vmem>>, vector<16x2x128xf32>,
    %cst_152 = arith.constant 0.000000e+00 : f32
    %100 = vector.broadcast %cst_152 : f32 to vector<16x2x128xf32>
    %c2_153 = arith.constant 2 : index
    %c18_154 = arith.constant 18 : index
    %c0_155 = arith.constant 0 : index
    %101 = vector.load %arg19[%c2_153, %c18_154, %c0_155] : memref<20x20x128xf32, #tpu.memory_space<vmem>>, vector<16x2x128xf32>
    tpu.vector_store %arg19[%c2_153, %c18_154, %c0_155], %100 {strides = array<i32>} : memref<20x20x128xf32, #tpu.memory_space<vmem>>, vector<16x2x128xf32>,
    %102 = vector.shape_cast %47 : vector<256x64xf32> to vector<16x16x64xf32>
    %c2_156 = arith.constant 2 : index
    %c2_157 = arith.constant 2 : index
    %c0_158 = arith.constant 0 : index
    %103 = vector.load %arg19[%c2_156, %c2_157, %c0_158] : memref<20x20x128xf32, #tpu.memory_space<vmem>>, vector<16x16x64xf32>
    tpu.vector_store %arg19[%c2_156, %c2_157, %c0_158], %102 {strides = array<i32>} : memref<20x20x128xf32, #tpu.memory_space<vmem>>, vector<16x16x64xf32>,
    %104 = vector.shape_cast %93 : vector<256x64xf32> to vector<16x16x64xf32>
    %c2_159 = arith.constant 2 : index
    %c2_160 = arith.constant 2 : index
    %c64_161 = arith.constant 64 : index
    %105 = vector.load %arg19[%c2_159, %c2_160, %c64_161] : memref<20x20x128xf32, #tpu.memory_space<vmem>>, vector<16x16x64xf32>
    tpu.vector_store %arg19[%c2_159, %c2_160, %c64_161], %104 {strides = array<i32>} : memref<20x20x128xf32, #tpu.memory_space<vmem>>, vector<16x16x64xf32>,
    %c0_162 = arith.constant 0 : index
    %c0_163 = arith.constant 0 : index
    %c0_164 = arith.constant 0 : index
    %106 = vector.load %arg8[%c0_162, %c0_163, %c0_164] : memref<2x9x128xf32, #tpu.memory_space<vmem>>, vector<1x9x128xf32>
    %107 = vector.shape_cast %106 : vector<1x9x128xf32> to vector<9x128xf32>
    %cst_165 = arith.constant 0.000000e+00 : f32
    %108 = vector.broadcast %cst_165 : f32 to vector<16x16x128xf32>
    %c1_166 = arith.constant 1 : index
    %c1_167 = arith.constant 1 : index
    %c0_168 = arith.constant 0 : index
    %109 = vector.load %arg19[%c1_166, %c1_167, %c0_168] : memref<20x20x128xf32, #tpu.memory_space<vmem>>, vector<16x16x128xf32>
    %110 = vector.extract_strided_slice %107 {offsets = [0, 0], sizes = [1, 128], strides = [1, 1]} : vector<9x128xf32> to vector<1x128xf32>
    %111 = vector.shape_cast %110 : vector<1x128xf32> to vector<128xf32>
    %112 = vector.shape_cast %111 : vector<128xf32> to vector<1x1x128xf32>
    %113 = vector.broadcast %112 : vector<1x1x128xf32> to vector<16x16x128xf32>
    %114 = arith.mulf %109, %113 : vector<16x16x128xf32>
    %115 = arith.addf %108, %114 : vector<16x16x128xf32>
    %c1_169 = arith.constant 1 : index
    %c2_170 = arith.constant 2 : index
    %c0_171 = arith.constant 0 : index
    %116 = vector.load %arg19[%c1_169, %c2_170, %c0_171] : memref<20x20x128xf32, #tpu.memory_space<vmem>>, vector<16x16x128xf32>
    %117 = vector.extract_strided_slice %107 {offsets = [1, 0], sizes = [1, 128], strides = [1, 1]} : vector<9x128xf32> to vector<1x128xf32>
    %118 = vector.shape_cast %117 : vector<1x128xf32> to vector<128xf32>
    %119 = vector.shape_cast %118 : vector<128xf32> to vector<1x1x128xf32>
    %120 = vector.broadcast %119 : vector<1x1x128xf32> to vector<16x16x128xf32>
    %121 = arith.mulf %116, %120 : vector<16x16x128xf32>
    %122 = arith.addf %115, %121 : vector<16x16x128xf32>
    %c1_172 = arith.constant 1 : index
    %c3 = arith.constant 3 : index
    %c0_173 = arith.constant 0 : index
    %123 = vector.load %arg19[%c1_172, %c3, %c0_173] : memref<20x20x128xf32, #tpu.memory_space<vmem>>, vector<16x16x128xf32>
    %124 = vector.extract_strided_slice %107 {offsets = [2, 0], sizes = [1, 128], strides = [1, 1]} : vector<9x128xf32> to vector<1x128xf32>
    %125 = vector.shape_cast %124 : vector<1x128xf32> to vector<128xf32>
    %126 = vector.shape_cast %125 : vector<128xf32> to vector<1x1x128xf32>
    %127 = vector.broadcast %126 : vector<1x1x128xf32> to vector<16x16x128xf32>
    %128 = arith.mulf %123, %127 : vector<16x16x128xf32>
    %129 = arith.addf %122, %128 : vector<16x16x128xf32>
    %c2_174 = arith.constant 2 : index
    %c1_175 = arith.constant 1 : index
    %c0_176 = arith.constant 0 : index
    %130 = vector.load %arg19[%c2_174, %c1_175, %c0_176] : memref<20x20x128xf32, #tpu.memory_space<vmem>>, vector<16x16x128xf32>
    %131 = vector.extract_strided_slice %107 {offsets = [3, 0], sizes = [1, 128], strides = [1, 1]} : vector<9x128xf32> to vector<1x128xf32>
    %132 = vector.shape_cast %131 : vector<1x128xf32> to vector<128xf32>
    %133 = vector.shape_cast %132 : vector<128xf32> to vector<1x1x128xf32>
    %134 = vector.broadcast %133 : vector<1x1x128xf32> to vector<16x16x128xf32>
    %135 = arith.mulf %130, %134 : vector<16x16x128xf32>
    %136 = arith.addf %129, %135 : vector<16x16x128xf32>
    %c2_177 = arith.constant 2 : index
    %c2_178 = arith.constant 2 : index
    %c0_179 = arith.constant 0 : index
    %137 = vector.load %arg19[%c2_177, %c2_178, %c0_179] : memref<20x20x128xf32, #tpu.memory_space<vmem>>, vector<16x16x128xf32>
    %138 = vector.extract_strided_slice %107 {offsets = [4, 0], sizes = [1, 128], strides = [1, 1]} : vector<9x128xf32> to vector<1x128xf32>
    %139 = vector.shape_cast %138 : vector<1x128xf32> to vector<128xf32>
    %140 = vector.shape_cast %139 : vector<128xf32> to vector<1x1x128xf32>
    %141 = vector.broadcast %140 : vector<1x1x128xf32> to vector<16x16x128xf32>
    %142 = arith.mulf %137, %141 : vector<16x16x128xf32>
    %143 = arith.addf %136, %142 : vector<16x16x128xf32>
    %c2_180 = arith.constant 2 : index
    %c3_181 = arith.constant 3 : index
    %c0_182 = arith.constant 0 : index
    %144 = vector.load %arg19[%c2_180, %c3_181, %c0_182] : memref<20x20x128xf32, #tpu.memory_space<vmem>>, vector<16x16x128xf32>
    %145 = vector.extract_strided_slice %107 {offsets = [5, 0], sizes = [1, 128], strides = [1, 1]} : vector<9x128xf32> to vector<1x128xf32>
    %146 = vector.shape_cast %145 : vector<1x128xf32> to vector<128xf32>
    %147 = vector.shape_cast %146 : vector<128xf32> to vector<1x1x128xf32>
    %148 = vector.broadcast %147 : vector<1x1x128xf32> to vector<16x16x128xf32>
    %149 = arith.mulf %144, %148 : vector<16x16x128xf32>
    %150 = arith.addf %143, %149 : vector<16x16x128xf32>
    %c3_183 = arith.constant 3 : index
    %c1_184 = arith.constant 1 : index
    %c0_185 = arith.constant 0 : index
    %151 = vector.load %arg19[%c3_183, %c1_184, %c0_185] : memref<20x20x128xf32, #tpu.memory_space<vmem>>, vector<16x16x128xf32>
    %152 = vector.extract_strided_slice %107 {offsets = [6, 0], sizes = [1, 128], strides = [1, 1]} : vector<9x128xf32> to vector<1x128xf32>
    %153 = vector.shape_cast %152 : vector<1x128xf32> to vector<128xf32>
    %154 = vector.shape_cast %153 : vector<128xf32> to vector<1x1x128xf32>
    %155 = vector.broadcast %154 : vector<1x1x128xf32> to vector<16x16x128xf32>
    %156 = arith.mulf %151, %155 : vector<16x16x128xf32>
    %157 = arith.addf %150, %156 : vector<16x16x128xf32>
    %c3_186 = arith.constant 3 : index
    %c2_187 = arith.constant 2 : index
    %c0_188 = arith.constant 0 : index
    %158 = vector.load %arg19[%c3_186, %c2_187, %c0_188] : memref<20x20x128xf32, #tpu.memory_space<vmem>>, vector<16x16x128xf32>
    %159 = vector.extract_strided_slice %107 {offsets = [7, 0], sizes = [1, 128], strides = [1, 1]} : vector<9x128xf32> to vector<1x128xf32>
    %160 = vector.shape_cast %159 : vector<1x128xf32> to vector<128xf32>
    %161 = vector.shape_cast %160 : vector<128xf32> to vector<1x1x128xf32>
    %162 = vector.broadcast %161 : vector<1x1x128xf32> to vector<16x16x128xf32>
    %163 = arith.mulf %158, %162 : vector<16x16x128xf32>
    %164 = arith.addf %157, %163 : vector<16x16x128xf32>
    %c3_189 = arith.constant 3 : index
    %c3_190 = arith.constant 3 : index
    %c0_191 = arith.constant 0 : index
    %165 = vector.load %arg19[%c3_189, %c3_190, %c0_191] : memref<20x20x128xf32, #tpu.memory_space<vmem>>, vector<16x16x128xf32>
    %166 = vector.extract_strided_slice %107 {offsets = [8, 0], sizes = [1, 128], strides = [1, 1]} : vector<9x128xf32> to vector<1x128xf32>
    %167 = vector.shape_cast %166 : vector<1x128xf32> to vector<128xf32>
    %168 = vector.shape_cast %167 : vector<128xf32> to vector<1x1x128xf32>
    %169 = vector.broadcast %168 : vector<1x1x128xf32> to vector<16x16x128xf32>
    %170 = arith.mulf %165, %169 : vector<16x16x128xf32>
    %171 = arith.addf %164, %170 : vector<16x16x128xf32>
    %172 = vector.shape_cast %171 : vector<16x16x128xf32> to vector<256x128xf32>
    %c0_192 = arith.constant 0 : index
    %c0_193 = arith.constant 0 : index
    %c0_194 = arith.constant 0 : index
    %173 = vector.load %arg9[%c0_192, %c0_193, %c0_194] : memref<2x128x64xf32, #tpu.memory_space<vmem>>, vector<1x128x64xf32>
    %174 = vector.shape_cast %173 : vector<1x128x64xf32> to vector<128x64xf32>
    %cst_195 = arith.constant dense<0.000000e+00> : vector<256x64xf32>
    %175 = tpu.matmul %172, %174, %cst_195 {dimension_numbers = #tpu.dot_dimension_numbers<[1], [0], [0], [1], [0, 0, 1, 1], [], []>} : vector<256x128xf32>, vector<128x64xf32>, vector<256x64xf32> -> vector<256x64xf32>
    %c0_196 = arith.constant 0 : index
    %c0_197 = arith.constant 0 : index
    %c0_198 = arith.constant 0 : index
    %176 = vector.load %arg10[%c0_196, %c0_197, %c0_198] : memref<2x1x64xf32, #tpu.memory_space<vmem>>, vector<1x1x64xf32>
    %177 = vector.shape_cast %176 : vector<1x1x64xf32> to vector<1x64xf32>
    %178 = vector.broadcast %177 : vector<1x64xf32> to vector<256x64xf32>
    %179 = arith.addf %175, %178 : vector<256x64xf32>
    %cst_199 = arith.constant 0.000000e+00 : f32
    %180 = vector.broadcast %cst_199 : f32 to vector<256x64xf32>
    %181 = arith.maximumf %179, %180 : vector<256x64xf32>
    %c1_200 = arith.constant 1 : index
    %c0_201 = arith.constant 0 : index
    %c0_202 = arith.constant 0 : index
    %182 = vector.load %arg8[%c1_200, %c0_201, %c0_202] : memref<2x9x128xf32, #tpu.memory_space<vmem>>, vector<1x9x128xf32>
    %183 = vector.shape_cast %182 : vector<1x9x128xf32> to vector<9x128xf32>
    %cst_203 = arith.constant 0.000000e+00 : f32
    %184 = vector.broadcast %cst_203 : f32 to vector<16x16x128xf32>
    %c0_204 = arith.constant 0 : index
    %c0_205 = arith.constant 0 : index
    %c0_206 = arith.constant 0 : index
    %185 = vector.load %arg19[%c0_204, %c0_205, %c0_206] : memref<20x20x128xf32, #tpu.memory_space<vmem>>, vector<16x16x128xf32>
    %186 = vector.extract_strided_slice %183 {offsets = [0, 0], sizes = [1, 128], strides = [1, 1]} : vector<9x128xf32> to vector<1x128xf32>
    %187 = vector.shape_cast %186 : vector<1x128xf32> to vector<128xf32>
    %188 = vector.shape_cast %187 : vector<128xf32> to vector<1x1x128xf32>
    %189 = vector.broadcast %188 : vector<1x1x128xf32> to vector<16x16x128xf32>
    %190 = arith.mulf %185, %189 : vector<16x16x128xf32>
    %191 = arith.addf %184, %190 : vector<16x16x128xf32>
    %c0_207 = arith.constant 0 : index
    %c2_208 = arith.constant 2 : index
    %c0_209 = arith.constant 0 : index
    %192 = vector.load %arg19[%c0_207, %c2_208, %c0_209] : memref<20x20x128xf32, #tpu.memory_space<vmem>>, vector<16x16x128xf32>
    %193 = vector.extract_strided_slice %183 {offsets = [1, 0], sizes = [1, 128], strides = [1, 1]} : vector<9x128xf32> to vector<1x128xf32>
    %194 = vector.shape_cast %193 : vector<1x128xf32> to vector<128xf32>
    %195 = vector.shape_cast %194 : vector<128xf32> to vector<1x1x128xf32>
    %196 = vector.broadcast %195 : vector<1x1x128xf32> to vector<16x16x128xf32>
    %197 = arith.mulf %192, %196 : vector<16x16x128xf32>
    %198 = arith.addf %191, %197 : vector<16x16x128xf32>
    %c0_210 = arith.constant 0 : index
    %c4 = arith.constant 4 : index
    %c0_211 = arith.constant 0 : index
    %199 = vector.load %arg19[%c0_210, %c4, %c0_211] : memref<20x20x128xf32, #tpu.memory_space<vmem>>, vector<16x16x128xf32>
    %200 = vector.extract_strided_slice %183 {offsets = [2, 0], sizes = [1, 128], strides = [1, 1]} : vector<9x128xf32> to vector<1x128xf32>
    %201 = vector.shape_cast %200 : vector<1x128xf32> to vector<128xf32>
    %202 = vector.shape_cast %201 : vector<128xf32> to vector<1x1x128xf32>
    %203 = vector.broadcast %202 : vector<1x1x128xf32> to vector<16x16x128xf32>
    %204 = arith.mulf %199, %203 : vector<16x16x128xf32>
    %205 = arith.addf %198, %204 : vector<16x16x128xf32>
    %c2_212 = arith.constant 2 : index
    %c0_213 = arith.constant 0 : index
    %c0_214 = arith.constant 0 : index
    %206 = vector.load %arg19[%c2_212, %c0_213, %c0_214] : memref<20x20x128xf32, #tpu.memory_space<vmem>>, vector<16x16x128xf32>
    %207 = vector.extract_strided_slice %183 {offsets = [3, 0], sizes = [1, 128], strides = [1, 1]} : vector<9x128xf32> to vector<1x128xf32>
    %208 = vector.shape_cast %207 : vector<1x128xf32> to vector<128xf32>
    %209 = vector.shape_cast %208 : vector<128xf32> to vector<1x1x128xf32>
    %210 = vector.broadcast %209 : vector<1x1x128xf32> to vector<16x16x128xf32>
    %211 = arith.mulf %206, %210 : vector<16x16x128xf32>
    %212 = arith.addf %205, %211 : vector<16x16x128xf32>
    %c2_215 = arith.constant 2 : index
    %c2_216 = arith.constant 2 : index
    %c0_217 = arith.constant 0 : index
    %213 = vector.load %arg19[%c2_215, %c2_216, %c0_217] : memref<20x20x128xf32, #tpu.memory_space<vmem>>, vector<16x16x128xf32>
    %214 = vector.extract_strided_slice %183 {offsets = [4, 0], sizes = [1, 128], strides = [1, 1]} : vector<9x128xf32> to vector<1x128xf32>
    %215 = vector.shape_cast %214 : vector<1x128xf32> to vector<128xf32>
    %216 = vector.shape_cast %215 : vector<128xf32> to vector<1x1x128xf32>
    %217 = vector.broadcast %216 : vector<1x1x128xf32> to vector<16x16x128xf32>
    %218 = arith.mulf %213, %217 : vector<16x16x128xf32>
    %219 = arith.addf %212, %218 : vector<16x16x128xf32>
    %c2_218 = arith.constant 2 : index
    %c4_219 = arith.constant 4 : index
    %c0_220 = arith.constant 0 : index
    %220 = vector.load %arg19[%c2_218, %c4_219, %c0_220] : memref<20x20x128xf32, #tpu.memory_space<vmem>>, vector<16x16x128xf32>
    %221 = vector.extract_strided_slice %183 {offsets = [5, 0], sizes = [1, 128], strides = [1, 1]} : vector<9x128xf32> to vector<1x128xf32>
    %222 = vector.shape_cast %221 : vector<1x128xf32> to vector<128xf32>
    %223 = vector.shape_cast %222 : vector<128xf32> to vector<1x1x128xf32>
    %224 = vector.broadcast %223 : vector<1x1x128xf32> to vector<16x16x128xf32>
    %225 = arith.mulf %220, %224 : vector<16x16x128xf32>
    %226 = arith.addf %219, %225 : vector<16x16x128xf32>
    %c4_221 = arith.constant 4 : index
    %c0_222 = arith.constant 0 : index
    %c0_223 = arith.constant 0 : index
    %227 = vector.load %arg19[%c4_221, %c0_222, %c0_223] : memref<20x20x128xf32, #tpu.memory_space<vmem>>, vector<16x16x128xf32>
    %228 = vector.extract_strided_slice %183 {offsets = [6, 0], sizes = [1, 128], strides = [1, 1]} : vector<9x128xf32> to vector<1x128xf32>
    %229 = vector.shape_cast %228 : vector<1x128xf32> to vector<128xf32>
    %230 = vector.shape_cast %229 : vector<128xf32> to vector<1x1x128xf32>
    %231 = vector.broadcast %230 : vector<1x1x128xf32> to vector<16x16x128xf32>
    %232 = arith.mulf %227, %231 : vector<16x16x128xf32>
    %233 = arith.addf %226, %232 : vector<16x16x128xf32>
    %c4_224 = arith.constant 4 : index
    %c2_225 = arith.constant 2 : index
    %c0_226 = arith.constant 0 : index
    %234 = vector.load %arg19[%c4_224, %c2_225, %c0_226] : memref<20x20x128xf32, #tpu.memory_space<vmem>>, vector<16x16x128xf32>
    %235 = vector.extract_strided_slice %183 {offsets = [7, 0], sizes = [1, 128], strides = [1, 1]} : vector<9x128xf32> to vector<1x128xf32>
    %236 = vector.shape_cast %235 : vector<1x128xf32> to vector<128xf32>
    %237 = vector.shape_cast %236 : vector<128xf32> to vector<1x1x128xf32>
    %238 = vector.broadcast %237 : vector<1x1x128xf32> to vector<16x16x128xf32>
    %239 = arith.mulf %234, %238 : vector<16x16x128xf32>
    %240 = arith.addf %233, %239 : vector<16x16x128xf32>
    %c4_227 = arith.constant 4 : index
    %c4_228 = arith.constant 4 : index
    %c0_229 = arith.constant 0 : index
    %241 = vector.load %arg19[%c4_227, %c4_228, %c0_229] : memref<20x20x128xf32, #tpu.memory_space<vmem>>, vector<16x16x128xf32>
    %242 = vector.extract_strided_slice %183 {offsets = [8, 0], sizes = [1, 128], strides = [1, 1]} : vector<9x128xf32> to vector<1x128xf32>
    %243 = vector.shape_cast %242 : vector<1x128xf32> to vector<128xf32>
    %244 = vector.shape_cast %243 : vector<128xf32> to vector<1x1x128xf32>
    %245 = vector.broadcast %244 : vector<1x1x128xf32> to vector<16x16x128xf32>
    %246 = arith.mulf %241, %245 : vector<16x16x128xf32>
    %247 = arith.addf %240, %246 : vector<16x16x128xf32>
    %248 = vector.shape_cast %247 : vector<16x16x128xf32> to vector<256x128xf32>
    %c1_230 = arith.constant 1 : index
    %c0_231 = arith.constant 0 : index
    %c0_232 = arith.constant 0 : index
    %249 = vector.load %arg9[%c1_230, %c0_231, %c0_232] : memref<2x128x64xf32, #tpu.memory_space<vmem>>, vector<1x128x64xf32>
    %250 = vector.shape_cast %249 : vector<1x128x64xf32> to vector<128x64xf32>
    %cst_233 = arith.constant dense<0.000000e+00> : vector<256x64xf32>
    %251 = tpu.matmul %248, %250, %cst_233 {dimension_numbers = #tpu.dot_dimension_numbers<[1], [0], [0], [1], [0, 0, 1, 1], [], []>} : vector<256x128xf32>, vector<128x64xf32>, vector<256x64xf32> -> vector<256x64xf32>
    %c1_234 = arith.constant 1 : index
    %c0_235 = arith.constant 0 : index
    %c0_236 = arith.constant 0 : index
    %252 = vector.load %arg10[%c1_234, %c0_235, %c0_236] : memref<2x1x64xf32, #tpu.memory_space<vmem>>, vector<1x1x64xf32>
    %253 = vector.shape_cast %252 : vector<1x1x64xf32> to vector<1x64xf32>
    %254 = vector.broadcast %253 : vector<1x64xf32> to vector<256x64xf32>
    %255 = arith.addf %251, %254 : vector<256x64xf32>
    %cst_237 = arith.constant 0.000000e+00 : f32
    %256 = vector.broadcast %cst_237 : f32 to vector<256x64xf32>
    %257 = arith.maximumf %255, %256 : vector<256x64xf32>
    %258 = tpu.concatenate %181, %257 in 1 : vector<256x64xf32>, vector<256x64xf32> -> vector<256x128xf32>
    %259 = tpu.transpose %258, [1, 0] : vector<256x128xf32> -> vector<128x256xf32>
    %c0_238 = arith.constant 0 : index
    %c0_239 = arith.constant 0 : index
    %260 = vector.load %arg12[%c0_238, %c0_239] : memref<32x128xf32, #tpu.memory_space<vmem>>, vector<32x128xf32>
    %cst_240 = arith.constant dense<0.000000e+00> : vector<32x256xf32>
    %261 = tpu.matmul %260, %259, %cst_240 {dimension_numbers = #tpu.dot_dimension_numbers<[1], [0], [0], [1], [0, 0, 1, 1], [], []>} : vector<32x128xf32>, vector<128x256xf32>, vector<32x256xf32> -> vector<32x256xf32>
    %c0_241 = arith.constant 0 : index
    %c0_242 = arith.constant 0 : index
    %262 = vector.load %arg11[%c0_241, %c0_242] : memref<256x1024xf32, #tpu.memory_space<vmem>>, vector<256x1024xf32>
    %cst_243 = arith.constant dense<0.000000e+00> : vector<32x1024xf32>
    %263 = tpu.matmul %261, %262, %cst_243 {dimension_numbers = #tpu.dot_dimension_numbers<[1], [0], [0], [1], [0, 0, 1, 1], [], []>} : vector<32x256xf32>, vector<256x1024xf32>, vector<32x1024xf32> -> vector<32x1024xf32>
    %c0_244 = arith.constant 0 : index
    %c0_245 = arith.constant 0 : index
    %264 = vector.load %arg13[%c0_244, %c0_245] : memref<32x1xf32, #tpu.memory_space<vmem>>, vector<32x1xf32>
    %265 = vector.broadcast %264 : vector<32x1xf32> to vector<32x1024xf32>
    %266 = arith.addf %263, %265 : vector<32x1024xf32>
    %c0_246 = arith.constant 0 : index
    %c0_247 = arith.constant 0 : index
    %c0_248 = arith.constant 0 : index
    %267 = vector.load %arg14[%c0_246, %c0_247, %c0_248] : memref<1x32x1024xf32, #tpu.memory_space<vmem>>, vector<1x32x1024xf32>
    %268 = vector.shape_cast %267 : vector<1x32x1024xf32> to vector<32x1024xf32>
    %269 = vector.shape_cast %266 : vector<32x1024xf32> to vector<1x32x1024xf32>
    tpu.vector_store %arg14[%c0_246, %c0_247, %c0_248], %269 {strides = array<i32>} : memref<1x32x1024xf32, #tpu.memory_space<vmem>>, vector<1x32x1024xf32>,
    return
  }
  func.func @transform_0(%arg0: i32) -> (i32, i32, i32, i32) {
    %c0_i32 = arith.constant 0 : i32
    %c0_i32_0 = arith.constant 0 : i32
    %c0_i32_1 = arith.constant 0 : i32
    %c0_i32_2 = arith.constant 0 : i32
    return %arg0, %c0_i32, %c0_i32_0, %c0_i32_1 : i32, i32, i32, i32
  }
  func.func @transform_1(%arg0: i32) -> (i32, i32, i32, i32) {
    %c0_i32 = arith.constant 0 : i32
    %c0_i32_0 = arith.constant 0 : i32
    %c0_i32_1 = arith.constant 0 : i32
    %c0_i32_2 = arith.constant 0 : i32
    return %arg0, %c0_i32, %c0_i32_0, %c0_i32_1 : i32, i32, i32, i32
  }
  func.func @transform_2(%arg0: i32) -> (i32, i32) {
    %c0_i32 = arith.constant 0 : i32
    %c0_i32_0 = arith.constant 0 : i32
    %c0_i32_1 = arith.constant 0 : i32
    return %c0_i32, %c0_i32_0 : i32, i32
  }
  func.func @transform_3(%arg0: i32) -> (i32, i32) {
    %c0_i32 = arith.constant 0 : i32
    %c0_i32_0 = arith.constant 0 : i32
    %c0_i32_1 = arith.constant 0 : i32
    return %c0_i32, %c0_i32_0 : i32, i32
  }
  func.func @transform_4(%arg0: i32) -> (i32, i32) {
    %c0_i32 = arith.constant 0 : i32
    %c0_i32_0 = arith.constant 0 : i32
    %c0_i32_1 = arith.constant 0 : i32
    return %c0_i32, %c0_i32_0 : i32, i32
  }
  func.func @transform_5(%arg0: i32) -> (i32, i32) {
    %c0_i32 = arith.constant 0 : i32
    %c0_i32_0 = arith.constant 0 : i32
    %c0_i32_1 = arith.constant 0 : i32
    return %c0_i32, %c0_i32_0 : i32, i32
  }
  func.func @transform_6(%arg0: i32) -> (i32, i32) {
    %c0_i32 = arith.constant 0 : i32
    %c0_i32_0 = arith.constant 0 : i32
    %c0_i32_1 = arith.constant 0 : i32
    return %c0_i32, %c0_i32_0 : i32, i32
  }
  func.func @transform_7(%arg0: i32) -> (i32, i32, i32) {
    %c0_i32 = arith.constant 0 : i32
    %c0_i32_0 = arith.constant 0 : i32
    %c0_i32_1 = arith.constant 0 : i32
    %c0_i32_2 = arith.constant 0 : i32
    return %c0_i32, %c0_i32_0, %c0_i32_1 : i32, i32, i32
  }
  func.func @transform_8(%arg0: i32) -> (i32, i32, i32) {
    %c0_i32 = arith.constant 0 : i32
    %c0_i32_0 = arith.constant 0 : i32
    %c0_i32_1 = arith.constant 0 : i32
    %c0_i32_2 = arith.constant 0 : i32
    return %c0_i32, %c0_i32_0, %c0_i32_1 : i32, i32, i32
  }
  func.func @transform_9(%arg0: i32) -> (i32, i32, i32) {
    %c0_i32 = arith.constant 0 : i32
    %c0_i32_0 = arith.constant 0 : i32
    %c0_i32_1 = arith.constant 0 : i32
    %c0_i32_2 = arith.constant 0 : i32
    return %c0_i32, %c0_i32_0, %c0_i32_1 : i32, i32, i32
  }
  func.func @transform_10(%arg0: i32) -> (i32, i32) {
    %c0_i32 = arith.constant 0 : i32
    %c0_i32_0 = arith.constant 0 : i32
    %c0_i32_1 = arith.constant 0 : i32
    return %c0_i32, %c0_i32_0 : i32, i32
  }
  func.func @transform_11(%arg0: i32) -> (i32, i32) {
    %c0_i32 = arith.constant 0 : i32
    %c0_i32_0 = arith.constant 0 : i32
    %c0_i32_1 = arith.constant 0 : i32
    return %c0_i32, %c0_i32_0 : i32, i32
  }
  func.func @transform_12(%arg0: i32) -> (i32, i32) {
    %c0_i32 = arith.constant 0 : i32
    %c0_i32_0 = arith.constant 0 : i32
    %c0_i32_1 = arith.constant 0 : i32
    return %c0_i32, %c0_i32_0 : i32, i32
  }
  func.func @transform_13(%arg0: i32) -> (i32, i32, i32) {
    %c0_i32 = arith.constant 0 : i32
    %c0_i32_0 = arith.constant 0 : i32
    %c0_i32_1 = arith.constant 0 : i32
    return %arg0, %c0_i32, %c0_i32_0 : i32, i32, i32
  }
}

</mosaic_0001>

<bundles_post_ra>
// kernel: tpu_custom_call.1
= control target key start
LH: loop header
LB: loop body
LE: loop exit
PB: predicated region body
PF: predicated region fallthrough
CT: control target
= control target key end

     0   :  { %s14244_s0 = inlined_call_operand.hbm [shape: f32[2,8,8,64], index: 0, kind: input, shape index: {}]   ;;  %s14245_s1 = inlined_call_operand.vmem [shape: f32[2,16,16,64], index: 1, kind: input, shape index: {}]   ;;  %s14246_s2 = inlined_call_operand.vmem [shape: f32[576,64], index: 2, kind: input, shape index: {}]   ;;  %s14247_s3 = inlined_call_operand.vmem [shape: f32[1,64], index: 3, kind: input, shape index: {}]   ;;  %s14248_s4 = inlined_call_operand.vmem [shape: f32[576,64], index: 4, kind: input, shape index: {}]   ;;  %s14249_s5 = inlined_call_operand.vmem [shape: f32[1,64], index: 5, kind: input, shape index: {}]   ;;  %s14250_s6 = inlined_call_operand.vmem [shape: f32[256,64], index: 6, kind: input, shape index: {}]   ;;  %s14251_s7 = inlined_call_operand.vmem [shape: f32[2,9,128], index: 7, kind: input, shape index: {}]   ;;  %s14252_s8 = inlined_call_operand.vmem [shape: f32[2,128,64], index: 8, kind: input, shape index: {}]   ;;  %s14253_s9 = inlined_call_operand.vmem [shape: f32[2,1,64], index: 9, kind: input, shape index: {}]   ;;  %s14254_s10 = inlined_call_operand.vmem [shape: f32[256,1024], index: 10, kind: input, shape index: {}]   ;;  %s14255_s11 = inlined_call_operand.vmem [shape: f32[32,128], index: 11, kind: input, shape index: {}]   ;;  %s14256_s12 = inlined_call_operand.vmem [shape: f32[32,1], index: 12, kind: input, shape index: {}]   ;;  %s14257_s13 = inlined_call_operand.hbm [shape: f32[2,32,1024], index: 13, kind: output, shape index: {}]  }
   0x1   :  { %14265 = sst [smem:[#allocation17_spill]] %s14244_s0 }
   0x2   :  { %14266 = sst [smem:[#allocation18_spill]] %s14245_s1 }
   0x3   :  { %18 = vsyncpa [#allocation8], 0 }
   0x4   :  { %20 = vsyncpa [#allocation8 + $0x1], 0 }
   0x5   :  { %21 = vsyncpa [#allocation9], 0 }
   0x6   :  { %23 = vsyncpa [#allocation9 + $0x1], 0  ;;  %s9225_s25 = smov 0   ;;  %s9227_s26 = smov 0  }
   0x7   :  { %s9229_s27 = smov 0   ;;  %s9231_s28 = smov 0  }
   0x8 LB: > { %14267 = sst [smem:[#allocation13_spill]] %s9132_s25  ;;  %s9246_s29 = sadd.s32 4294967295, %s9144_s28   ;;  %s9144_s28 = sphi %s9231_s28, %s14283_s28   ;;  %s9140_s27 = sphi %s9229_s27, %s14285_s27   ;;  %s9136_s26 = sphi %s9227_s26, %s14287_s26   ;;  %s9132_s25 = sphi %s9225_s25, %s14286_s25  }
   0x9   : > { %14268 = sst [smem:[#allocation14_spill]] %s9140_s27  ;;  %s7444_s30 = sadd.s32 4294967294, %s9144_s28  }
   0xa   : > { %s9250_s14 = sadd.s32 1, %s9144_s28   ;;  %s36_s15 = sadd.s32 1, %s9140_s27 }
   0xb   : > { %14269 = sst [smem:[#allocation15_spill]] %s9250_s14  ;;  %s33_s16 = ssub.s32 %s9144_s28, %s9250_s14 }
   0xc   : > { %p43_p0 = scmp.ne.s32.totalorder %s9140_s27, %s9136_s26  ;;  %p34_p1 = scmp.eq.s32.totalorder %s33_s16, 0 }
   0xd   : > { %p44_p2 = scmp.eq.s32.totalorder %s9144_s28, 0  ;;  %p49_p3 = scmp.ne.s32.totalorder %s9136_s26, %s9132_s25 }
   0xe   : > { %p50_p4 = scmp.eq.s32.totalorder %s9246_s29, 0  ;;  %p330_p7 = scmp.eq.s32.totalorder %s9246_s29, 1 }
   0xf   : > { %s9262_s17 = scalar_select %p34_p1, %s9140_s27, %s36_s15  }
  0x10   : > { %p9264_p5 = por %p44_p2, %p43_p0  ;;  %p9268_p6 = por %p50_p4, %p49_p3 }
  0x11   : > { %14270 = sst [smem:[#allocation16_spill]] %s9262_s17  ;;  %p336_p8 = scmp.eq.s32.totalorder %s7444_s30, 1 }
  0x12   : > { %p8888_p10 = scmp.lt.s32.totalorder %s9144_s28, 2  ;;  %p9275_p11 = por %p330_p7, %p43_p0 }
  0x13   : > { %p9279_p12 = por %p336_p8, %p49_p3  ;;  %s389_s22 = sand.u32 1, %s9140_s27  }
  0x14   : > { %s14273_s20 = scalar_select %p9275_p11, 1, 0 }
  0x15   : > { %s14274_s21 = scalar_select %p9279_p12, 1, 0 }
  0x16   : > { %s7557_s23 = sshll.u32 %s9144_s28, 10  ;;  %s7447_s24 = sshll.u32 %s389_s22, 6 }
  0x17   : > { %s14275_s0 = sld [smem:[#allocation17_spill]]  ;;  %s393_s30 = scalar_lea.vmem [#allocation7], %s7447_s24 }
  0x18   : > { %s400_s14 = sshll.u32 %s393_s30, 4  ;;  %p9292_p13 = pnand %p8888_p10, %p9264_p5  ;;  %s9296_s14 = int_to_ptr.vmem [resolvable:$true] %s400_s14 }
  0x19   : > { %s9298_s27 = scalar_lea.sflag [#allocation8], %s389_s22 }
  0x1a   : > { %p9050_p1 = pneg %p9292_p13 }
  0x1d   : > { %s9288_s17 = scalar_lea.hbm %s14275_s0, %s7557_s23  ;;  %s9053_s24 = scalar_lea.hbm %s14275_s0, 2048 }
  0x1e   : > { %s9048_s15 = scalar_lea.hbm %s9288_s17, 1024  ;;  %p9054_p4 = scmp.lt.u32.totalorder %s9288_s17, %s14275_s0 }
  0x1f   : > { %p9049_p0 = scmp.ne.s32.totalorder %s9288_s17, %s9048_s15  ;;  %p9055_p5 = scmp.lt.u32.totalorder %s9053_s24, %s9048_s15 }
  0x20   : > { %p9057_p8 = scmp.lt.u32.totalorder %s9048_s15, %s9288_s17 }
  0x21   : > { %p9051_p2 = pnand %p9050_p1, %p9049_p0  ;;  %p9056_p7 = por %p9055_p5, %p9054_p4 }
  0x23   : > { %p9052_p3 = pneg %p9051_p2  ;;  %p9058_p10 = por %p9057_p8, %p9056_p7 }
  0x25   : > { %p9059_p9 = pnand %p9058_p10, %p9052_p3 }
  0x27   : > { %9062 = shalt.err (!%p9059_p9)
}
  0x28   : > { %s9063_s22 = scalar_lea.vmem %s9296_s14, 1024  ;;  %s9146_s23 = smov [#allocation7]  }
  0x29   : > { %p9064_p0 = scmp.ne.s32.totalorder %s9296_s14, %s9063_s22  ;;  %s9068_s18 = sshll.u32 %s9146_s23, 4  ;;  %s9069_s18 = int_to_ptr.vmem [resolvable:$false] %s9068_s18 }
  0x2a   : > { %s9070_s16 = scalar_lea.vmem %s9069_s18, 2048  ;;  %p9071_p11 = scmp.lt.s32.totalorder %s9296_s14, %s9069_s18 }
  0x2b   : > { %p9066_p2 = pnand %p9064_p0, %p9050_p1  ;;  %p9072_p4 = scmp.lt.s32.totalorder %s9070_s16, %s9063_s22 }
  0x2d   : > { %p9067_p12 = pneg %p9066_p2  ;;  %p9073_p5 = por %p9072_p4, %p9071_p11 }
  0x2f   : > { %p9074_p7 = pnand %p9073_p5, %p9067_p12 }
  0x31   : > { %9077 = shalt.err (!%p9074_p7)
}
  0x32   : > { %s9147_s15 = smov 128   ;;  %s9148_s24 = smov 8  }
  0x33   : > { %8883 = dma.hbm_to_vmem [thread:$0]  (!%p9292_p13), %s9288_s17, 1024, %s9296_s14, %s9298_s27, %s9147_s15, %s9147_s15, %s9148_s24  }
  0x34   : > { %p7450_p9 = scmp.ge.s32.totalorder %s9144_s28, 1  ;;  %p416_p1 = scmp.lt.s32.totalorder %s9144_s28, 3 }
  0x36   : > { %p417_p3 = pnand %p7450_p9, %p416_p1 }
  0x37   : > { %s9329_s30 = sand.u32 (!%p417_p3), 1, %s9136_s26  }
  0x38   : > { %420 = sbr.rel (%p417_p3) target bundleno = 2085 (0x825), region = 72  ;;  %s7451_s22 = sshll.u32 (!%p417_p3), %s9329_s30, 6 }
  0x39   : > { %s423_s23 = scalar_lea.sflag (!%p417_p3), [#allocation8], %s9329_s30  ;;  %s9333_s18 = scalar_lea.vmem (!%p417_p3), [#allocation7], %s7451_s22 }
  0x3f   : > { %9123 = dma.done.wait (%p9268_p6), %s423_s23, 1024  }
  0x40   : > { %9125 = vsyncadd (%p9268_p6), %s423_s23, 4294966272  ;;  %vm487_vm0 = vcmask 523264   ;;  %vm489_vm1 = vcmask 517120   ;;  %vm495_vm2 = vcmask 516096   ;;  %v9149_v0 = vmov 0.0   ;;  %v480_v1 = vld [vmem:[%s9333_s18 + $0x8] sm:$0xff] }
  0x41   : > { %488 = vst.msk [vmem:[#allocation2] sm:$0xff] %vm487_vm0, %v9149_v0  ;;  %492 = vst.msk [vmem:[#allocation2 + $0x90] sm:$0xff] %vm487_vm0, %v9149_v0  ;;  %v479_v2 = vld [vmem:[%s9333_s18] sm:$0xff]  ;;  %v481_v3 = vld [vmem:[%s9333_s18 + $0x10] sm:$0xff]  ;;  %s14263_s25 = smov 64   ;;  %p474_p6 = scmp.lt.s32.totalorder %s9246_s29, 1 }
  0x42   : > { %490 = vst.msk [vmem:[#allocation2 + $0x8] sm:$0x3] %vm489_vm1, %v9149_v0  ;;  %493 = vst.msk [vmem:[#allocation2 + $0x98] sm:$0x3] %vm489_vm1, %v9149_v0  ;;  %v482_v5 = vld [vmem:[%s9333_s18 + $0x18] sm:$0xff]  ;;  %v483_v6 = vld [vmem:[%s9333_s18 + $0x20] sm:$0xff] }
  0x43   : > { %1645 = vst.msk [vmem:[#allocation3] sm:$0xff] %vm487_vm0, %v9149_v0  ;;  %1646 = vst.msk [vmem:[#allocation3 + $0x8] sm:$0xff] %vm487_vm0, %v9149_v0  ;;  %v484_v7 = vld [vmem:[%s9333_s18 + $0x28] sm:$0xff]  ;;  %v485_v8 = vld [vmem:[%s9333_s18 + $0x30] sm:$0xff]  ;;  %s14277_s24 = smov 64   ;;  %s14278_s1 = sld [smem:[#allocation18_spill]] }
  0x44   : > { %1647 = vst.msk [vmem:[#allocation3 + $0x10] sm:$0x3] %vm489_vm1, %v9149_v0  ;;  %1651 = vst.msk [vmem:[#allocation3 + $0x1a8] sm:$0x3] %vm489_vm1, %v9149_v0  ;;  %v486_v9 = vld [vmem:[%s9333_s18 + $0x38] sm:$0xff]  ;;  %v850_v10 = vld [vmem:[%s14246_s2 + $0x80] sm:$0xff] }
  0x45   : > { %1649 = vst.msk [vmem:[#allocation3 + $0x198] sm:$0xff] %vm487_vm0, %v9149_v0  ;;  %1650 = vst.msk [vmem:[#allocation3 + $0x1a0] sm:$0xff] %vm487_vm0, %v9149_v0  ;;  %v851_v11 = vld [vmem:[%s14246_s2 + $0x88] sm:$0xff]  ;;  %v834_v13 = vld [vmem:[%s14246_s2] sm:$0xff]  ;;  %s9572_s22 = scalar_select %p474_p6, %s9246_s29, 1  ;;  %vm576_vm3 = vcmask 1048064  }
  0x46   : > { %3848 = vst [vmem:[#allocation6] sm:$0xff] %v9149_v0  ;;  %3849 = vst [vmem:[#allocation6 + $0x8] sm:$0xff] %v9149_v0  ;;  %v8220_v12 = vpack.c.bf16 %v851_v11, %v850_v10  ;;  %v835_v14 = vld [vmem:[%s14246_s2 + $0x8] sm:$0xff]  ;;  %v852_v15 = vld [vmem:[%s14246_s2 + $0x90] sm:$0xff]  ;;  %s7559_s16 = sshll.u32 %s9246_s29, 12  ;;  %s7346_s27 = scalar_lea.sflag [#allocation9], %s9329_s30 }
  0x47   : > { %3850 = vst [vmem:[#allocation6 + $0x10] sm:$0xf] %v9149_v0  ;;  %3851 = vst [vmem:[#allocation6 + $0x18] sm:$0xff] %v9149_v0  ;;  %v8222_v16 = vpack.c.bf16 %v835_v14, %v834_v13  ;;  %v853_v17 = vld [vmem:[%s14246_s2 + $0x98] sm:$0xff]  ;;  %v836_v18 = vld [vmem:[%s14246_s2 + $0x10] sm:$0xff]  ;;  %s7558_s23 = sshll.u32 %s9572_s22, 8  ;;  %s14191_s18 = scalar_lea.hbm %s14257_s13, %s7559_s16 }
  0x48   : > { %3852 = vst [vmem:[#allocation6 + $0x20] sm:$0xff] %v9149_v0  ;;  %3853 = vst [vmem:[#allocation6 + $0x28] sm:$0xf] %v9149_v0  ;;  %v837_v19 = vld [vmem:[%s14246_s2 + $0x18] sm:$0xff]  ;;  %8221 = vmatprep.subr.bf16.mxu0 %v8220_v12  ;;  %v8224_v20 = vpack.c.bf16 %v853_v17, %v852_v15  ;;  %v854_v21 = vld [vmem:[%s14246_s2 + $0xa0] sm:$0xff]  ;;  %p14279_p12 = scmp.ne.s32.totalorder %s14273_s20, 0 }
  0x49   : > { %3855 = vst [vmem:[#allocation6 + $0x1b0] sm:$0xff] %v9149_v0  ;;  %3856 = vst [vmem:[#allocation6 + $0x1b8] sm:$0xff] %v9149_v0  ;;  %v536_v4 = vld [vmem:[#allocation2 + $0x1] sm:$0xff]  ;;  %8223 = vmatpush3.bf16.msra.mxu0 %v8222_v16  ;;  %v8226_v24 = vpack.c.bf16 %v837_v19, %v836_v18  ;;  %v9556_v26 = vld [vmem:[%s14246_s2 + $0xb0] sm:$0xff]  ;;  %s9687_s22 = scalar_lea.vmem %s14278_s1, %s7558_s23  ;;  %s7452_s1 = sshll.u32 %s9329_s30, 8 }
  0x4a   : > { %3857 = vst [vmem:[#allocation6 + $0x1c0] sm:$0xf] %v9149_v0  ;;  %3858 = vst [vmem:[#allocation6 + $0x1c8] sm:$0xff] %v9149_v0  ;;  %552 = vrot.lane.b32.xlu0 %v536_v4, %s14263_s25  ;;  %v855_v22 = vld [vmem:[%s14246_s2 + $0xa8] sm:$0xff]  ;;  %v9546_v23 = vld [vmem:[%s14246_s2 + $0x20] sm:$0xff]  ;;  %8225 = vmatprep.subr.bf16.mxu0 %v8224_v20  ;;  %s9153_s0 = smov [#allocation10]  }
  0x4b   : > { %3859 = vst [vmem:[#allocation6 + $0x1d0] sm:$0xff] %v9149_v0  ;;  %3860 = vst [vmem:[#allocation6 + $0x1d8] sm:$0xf] %v9149_v0  ;;  %v9551_v25 = vld [vmem:[%s14246_s2 + $0x28] sm:$0xff]  ;;  %v9561_v27 = vld [vmem:[%s14246_s2 + $0xb8] sm:$0xff]  ;;  %v8228_v31 = vpack.c.bf16 %v855_v22, %v854_v21  ;;  %s9082_s14 = sshll.u32 %s9153_s0, 4  ;;  %s9083_s14 = int_to_ptr.vmem [resolvable:$false] %s9082_s14 }
  0x4c   : > { %3862 = vst [vmem:[#allocation6 + $0x30] sm:$0x3] %v9149_v0  ;;  %3863 = vst [vmem:[#allocation6 + $0x48] sm:$0x3] %v9149_v0  ;;  %v8230_v41 = vpack.c.bf16 %v9551_v25, %v9546_v23  ;;  %v8232_v45 = vpack.c.bf16 %v9561_v27, %v9556_v26  ;;  %v840_v55 = vld [vmem:[%s14246_s2 + $0x30] sm:$0xff]  ;;  %v841_v56 = vld [vmem:[%s14246_s2 + $0x38] sm:$0xff] }
  0x4d   : > { %3864 = vst [vmem:[#allocation6 + $0x60] sm:$0x3] %v9149_v0  ;;  %3865 = vst [vmem:[#allocation6 + $0x78] sm:$0x3] %v9149_v0  ;;  %8227 = vmatpush3.bf16.msra.mxu0 %v8226_v24  ;;  %v882_v57 = vld [vmem:[%s14246_s2 + $0x180] sm:$0xff]  ;;  %v8234_v58 = vpack.c.bf16 %v841_v56, %v840_v55  ;;  %v883_v59 = vld [vmem:[%s14246_s2 + $0x188] sm:$0xff] }
  0x4e   : > { %3866 = vst [vmem:[#allocation6 + $0x90] sm:$0x3] %v9149_v0  ;;  %3867 = vst [vmem:[#allocation6 + $0xa8] sm:$0x3] %v9149_v0  ;;  %8229 = vmatprep.subr.bf16.mxu0 %v8228_v31  ;;  %v858_v60 = vld [vmem:[%s14246_s2 + $0xc0] sm:$0xff]  ;;  %v8252_v62 = vpack.c.bf16 %v883_v59, %v882_v57  ;;  %v859_v63 = vld [vmem:[%s14246_s2 + $0xc8] sm:$0xff] }
  0x4f   : > { %3868 = vst [vmem:[#allocation6 + $0xc0] sm:$0x3] %v9149_v0  ;;  %3869 = vst [vmem:[#allocation6 + $0xd8] sm:$0x3] %v9149_v0  ;;  %v520_v61 = vld [vmem:[#allocation2] sm:$0xff]  ;;  %v860_v11 = vld [vmem:[%s14246_s2 + $0xd0] sm:$0xff] }
  0x50   : > { %3870 = vst [vmem:[#allocation6 + $0xf0] sm:$0x3] %v9149_v0  ;;  %3871 = vst [vmem:[#allocation6 + $0x108] sm:$0x3] %v9149_v0  ;;  %v842_v4 = vld [vmem:[%s14246_s2 + $0x40] sm:$0xff]  ;;  %8253 = vmatprep.subr.bf16.mxu1 %v8252_v62  ;;  %v861_v12 = vld [vmem:[%s14246_s2 + $0xd8] sm:$0xff] }
  0x51   : > { %3872 = vst [vmem:[#allocation6 + $0x120] sm:$0x3] %v9149_v0  ;;  %3873 = vst [vmem:[#allocation6 + $0x138] sm:$0x3] %v9149_v0  ;;  %8231 = vmatpush3.bf16.msra.mxu0 %v8230_v41  ;;  %v585_v13 = vld [vmem:[#allocation2 + $0x2] sm:$0xff]  ;;  %v8240_v14 = vpack.c.bf16 %v861_v12, %v860_v11  ;;  %v868_v15 = vld [vmem:[%s14246_s2 + $0x110] sm:$0xff] }
  0x52   : > { %3874 = vst [vmem:[#allocation6 + $0x150] sm:$0x3] %v9149_v0  ;;  %3875 = vst [vmem:[#allocation6 + $0x168] sm:$0x3] %v9149_v0  ;;  %8233 = vmatprep.subr.bf16.mxu0 %v8232_v45  ;;  %v869_v16 = vld [vmem:[%s14246_s2 + $0x118] sm:$0xff]  ;;  %v844_v17 = vld [vmem:[%s14246_s2 + $0x50] sm:$0xff] }
  0x53   : > { %3876 = vst [vmem:[#allocation6 + $0x180] sm:$0x3] %v9149_v0  ;;  %3877 = vst [vmem:[#allocation6 + $0x198] sm:$0x3] %v9149_v0  ;;  %v8258_v18 = vpack.c.bf16 %v869_v16, %v868_v15  ;;  %v845_v19 = vld [vmem:[%s14246_s2 + $0x58] sm:$0xff]  ;;  %v1614_v20 = vld [vmem:[%s9687_s22 + $0x8] sm:$0xff] }
  0x54   : > { %3878 = vst [vmem:[#allocation6 + $0x42] sm:$0x3] %v9149_v0  ;;  %3879 = vst [vmem:[#allocation6 + $0x5a] sm:$0x3] %v9149_v0  ;;  %v886_v21 = vld [vmem:[%s14246_s2 + $0x1a0] sm:$0xff]  ;;  %v8242_v22 = vpack.c.bf16 %v845_v19, %v844_v17  ;;  %v887_v23 = vld [vmem:[%s14246_s2 + $0x1a8] sm:$0xff] }
  0x55   : > { %3880 = vst [vmem:[#allocation6 + $0x72] sm:$0x3] %v9149_v0  ;;  %3881 = vst [vmem:[#allocation6 + $0x8a] sm:$0x3] %v9149_v0  ;;  %8235 = vmatpush3.bf16.msra.mxu0 %v8234_v58  ;;  %v862_v24 = vld [vmem:[%s14246_s2 + $0xe0] sm:$0xff]  ;;  %v8260_v25 = vpack.c.bf16 %v887_v23, %v886_v21  ;;  %v863_v26 = vld [vmem:[%s14246_s2 + $0xe8] sm:$0xff] }
  0x56   : > { %3882 = vst [vmem:[#allocation6 + $0xa2] sm:$0x3] %v9149_v0  ;;  %3883 = vst [vmem:[#allocation6 + $0xba] sm:$0x3] %v9149_v0  ;;  %v870_v27 = vld [vmem:[%s14246_s2 + $0x120] sm:$0xff]  ;;  %v847_v31 = vld [vmem:[%s14246_s2 + $0x68] sm:$0xff] }
  0x57   : > { %3884 = vst [vmem:[#allocation6 + $0xd2] sm:$0x3] %v9149_v0  ;;  %3885 = vst [vmem:[#allocation6 + $0xea] sm:$0x3] %v9149_v0  ;;  %v864_v41 = vld [vmem:[%s14246_s2 + $0xf0] sm:$0xff]  ;;  %v865_v55 = vld [vmem:[%s14246_s2 + $0xf8] sm:$0xff] }
  0x58   : > { %3886 = vst [vmem:[#allocation6 + $0x102] sm:$0x3] %v9149_v0  ;;  %3887 = vst [vmem:[#allocation6 + $0x11a] sm:$0x3] %v9149_v0  ;;  %v872_v56 = vld [vmem:[%s14246_s2 + $0x130] sm:$0xff]  ;;  %v8248_v57 = vpack.c.bf16 %v865_v55, %v864_v41  ;;  %v873_v58 = vld [vmem:[%s14246_s2 + $0x138] sm:$0xff] }
  0x59   : > { %3888 = vst [vmem:[#allocation6 + $0x132] sm:$0x3] %v9149_v0  ;;  %3889 = vst [vmem:[#allocation6 + $0x14a] sm:$0x3] %v9149_v0  ;;  %v848_v59 = vld [vmem:[%s14246_s2 + $0x70] sm:$0xff]  ;;  %v1616_v62 = vld [vmem:[%s9687_s22 + $0x18] sm:$0xff] }
  0x5a   : > { %3890 = vst [vmem:[#allocation6 + $0x162] sm:$0x3] %v9149_v0  ;;  %3891 = vst [vmem:[#allocation6 + $0x17a] sm:$0x3] %v9149_v0  ;;  %v895_v11 = vld [vmem:[%s14246_s2 + $0x1e8] sm:$0xff]  ;;  %v878_v15 = vld [vmem:[%s14246_s2 + $0x160] sm:$0xff] }
  0x5b   : > { %3892 = vst [vmem:[#allocation6 + $0x192] sm:$0x3] %v9149_v0  ;;  %3893 = vst [vmem:[#allocation6 + $0x1aa] sm:$0x3] %v9149_v0  ;;  %v879_v16 = vld [vmem:[%s14246_s2 + $0x168] sm:$0xff]  ;;  %v897_v17 = vld [vmem:[%s14246_s2 + $0x1f8] sm:$0xff] }
  0x5c   : > { %497 = vst.msk [vmem:[#allocation2 + $0x20] sm:$0x1] %vm495_vm2, %v9149_v0  ;;  %496 = vst.msk [vmem:[#allocation2 + $0x10] sm:$0x1] %vm495_vm2, %v9149_v0  ;;  %v1621_v19 = vld [vmem:[%s9687_s22 + $0x40] sm:$0xff]  ;;  %v1622_v21 = vld [vmem:[%s9687_s22 + $0x48] sm:$0xff] }
  0x5d   : > { %498 = vst.msk [vmem:[#allocation2 + $0x30] sm:$0x1] %vm495_vm2, %v9149_v0  ;;  %499 = vst.msk [vmem:[#allocation2 + $0x40] sm:$0x1] %vm495_vm2, %v9149_v0  ;;  %v899_v23 = vld [vmem:[%s14246_s2 + $0x208] sm:$0xff]  ;;  %v1632_v41 = vld [vmem:[%s9687_s22 + $0x98] sm:$0xff] }
  0x5e   : > { %500 = vst.msk [vmem:[#allocation2 + $0x50] sm:$0x1] %vm495_vm2, %v9149_v0  ;;  %501 = vst.msk [vmem:[#allocation2 + $0x60] sm:$0x1] %vm495_vm2, %v9149_v0  ;;  %s9084_s17 = scalar_lea.vmem %s9083_s14, 8192 }
  0x5f   : > { %502 = vst.msk [vmem:[#allocation2 + $0x70] sm:$0x1] %vm495_vm2, %v9149_v0  ;;  %503 = vst.msk [vmem:[#allocation2 + $0x80] sm:$0x1] %vm495_vm2, %v9149_v0 }
  0x60   : > { %504 = vst.msk [vmem:[#allocation2 + $0x19] sm:$0x1] %vm495_vm2, %v9149_v0  ;;  %505 = vst.msk [vmem:[#allocation2 + $0x29] sm:$0x1] %vm495_vm2, %v9149_v0 }
  0x61   : > { %506 = vst.msk [vmem:[#allocation2 + $0x39] sm:$0x1] %vm495_vm2, %v9149_v0  ;;  %507 = vst.msk [vmem:[#allocation2 + $0x49] sm:$0x1] %vm495_vm2, %v9149_v0 }
  0x62   : > { %508 = vst.msk [vmem:[#allocation2 + $0x59] sm:$0x1] %vm495_vm2, %v9149_v0  ;;  %509 = vst.msk [vmem:[#allocation2 + $0x69] sm:$0x1] %vm495_vm2, %v9149_v0 }
  0x63   : > { %510 = vst.msk [vmem:[#allocation2 + $0x79] sm:$0x1] %vm495_vm2, %v9149_v0  ;;  %511 = vst.msk [vmem:[#allocation2 + $0x89] sm:$0x1] %vm495_vm2, %v9149_v0 }
  0x64   : > { %1653 = vst.msk [vmem:[#allocation3 + $0x18] sm:$0x1] %vm495_vm2, %v9149_v0  ;;  %1654 = vst.msk [vmem:[#allocation3 + $0x30] sm:$0x1] %vm495_vm2, %v9149_v0 }
  0x65   : > { %1655 = vst.msk [vmem:[#allocation3 + $0x48] sm:$0x1] %vm495_vm2, %v9149_v0  ;;  %1656 = vst.msk [vmem:[#allocation3 + $0x60] sm:$0x1] %vm495_vm2, %v9149_v0 }
  0x66   : > { %1657 = vst.msk [vmem:[#allocation3 + $0x78] sm:$0x1] %vm495_vm2, %v9149_v0  ;;  %1658 = vst.msk [vmem:[#allocation3 + $0x90] sm:$0x1] %vm495_vm2, %v9149_v0 }
  0x67   : > { %1659 = vst.msk [vmem:[#allocation3 + $0xa8] sm:$0x1] %vm495_vm2, %v9149_v0  ;;  %1660 = vst.msk [vmem:[#allocation3 + $0xc0] sm:$0x1] %vm495_vm2, %v9149_v0 }
  0x68   : > { %1661 = vst.msk [vmem:[#allocation3 + $0xd8] sm:$0x1] %vm495_vm2, %v9149_v0  ;;  %1662 = vst.msk [vmem:[#allocation3 + $0xf0] sm:$0x1] %vm495_vm2, %v9149_v0 }
  0x69   : > { %1663 = vst.msk [vmem:[#allocation3 + $0x108] sm:$0x1] %vm495_vm2, %v9149_v0  ;;  %1664 = vst.msk [vmem:[#allocation3 + $0x120] sm:$0x1] %vm495_vm2, %v9149_v0 }
  0x6a   : > { %1665 = vst.msk [vmem:[#allocation3 + $0x138] sm:$0x1] %vm495_vm2, %v9149_v0  ;;  %1666 = vst.msk [vmem:[#allocation3 + $0x150] sm:$0x1] %vm495_vm2, %v9149_v0 }
  0x6b   : > { %1667 = vst.msk [vmem:[#allocation3 + $0x168] sm:$0x1] %vm495_vm2, %v9149_v0  ;;  %1668 = vst.msk [vmem:[#allocation3 + $0x180] sm:$0x1] %vm495_vm2, %v9149_v0 }
  0x6c   : > { %1669 = vst.msk [vmem:[#allocation3 + $0x29] sm:$0x1] %vm495_vm2, %v9149_v0  ;;  %1670 = vst.msk [vmem:[#allocation3 + $0x41] sm:$0x1] %vm495_vm2, %v9149_v0 }
  0x6d   : > { %1671 = vst.msk [vmem:[#allocation3 + $0x59] sm:$0x1] %vm495_vm2, %v9149_v0  ;;  %1672 = vst.msk [vmem:[#allocation3 + $0x71] sm:$0x1] %vm495_vm2, %v9149_v0 }
  0x6e   : > { %1673 = vst.msk [vmem:[#allocation3 + $0x89] sm:$0x1] %vm495_vm2, %v9149_v0  ;;  %1674 = vst.msk [vmem:[#allocation3 + $0xa1] sm:$0x1] %vm495_vm2, %v9149_v0 }
  0x6f   : > { %1675 = vst.msk [vmem:[#allocation3 + $0xb9] sm:$0x1] %vm495_vm2, %v9149_v0  ;;  %1676 = vst.msk [vmem:[#allocation3 + $0xd1] sm:$0x1] %vm495_vm2, %v9149_v0 }
  0x70   : > { %1677 = vst.msk [vmem:[#allocation3 + $0xe9] sm:$0x1] %vm495_vm2, %v9149_v0  ;;  %1678 = vst.msk [vmem:[#allocation3 + $0x101] sm:$0x1] %vm495_vm2, %v9149_v0 }
  0x71   : > { %1679 = vst.msk [vmem:[#allocation3 + $0x119] sm:$0x1] %vm495_vm2, %v9149_v0  ;;  %1680 = vst.msk [vmem:[#allocation3 + $0x131] sm:$0x1] %vm495_vm2, %v9149_v0 }
  0x72   : > { %1681 = vst.msk [vmem:[#allocation3 + $0x149] sm:$0x1] %vm495_vm2, %v9149_v0  ;;  %1682 = vst.msk [vmem:[#allocation3 + $0x161] sm:$0x1] %vm495_vm2, %v9149_v0 }
  0x73   : > { %1683 = vst.msk [vmem:[#allocation3 + $0x179] sm:$0x1] %vm495_vm2, %v9149_v0  ;;  %1684 = vst.msk [vmem:[#allocation3 + $0x191] sm:$0x1] %vm495_vm2, %v9149_v0  ;;  %v866_v0 = vld [vmem:[%s14246_s2 + $0x100] sm:$0xff] }
  0x74   : > { %513 = vst.msk [vmem:[#allocation2 + $0x21] sm:$0xff] %vm487_vm0, %v480_v1  ;;  %512 = vst.msk [vmem:[#allocation2 + $0x11] sm:$0xff] %vm487_vm0, %v479_v2  ;;  %v867_v1 = vld [vmem:[%s14246_s2 + $0x108] sm:$0xff]  ;;  %v8236_v2 = vpack.c.bf16 %v859_v63, %v858_v60  ;;  %v8266_v60 = vpack.c.bf16 %v873_v58, %v872_v56  ;;  %v890_v63 = vld [vmem:[%s14246_s2 + $0x1c0] sm:$0xff] }
  0x75   : > { %514 = vst.msk [vmem:[#allocation2 + $0x31] sm:$0xff] %vm487_vm0, %v481_v3  ;;  %515 = vst.msk [vmem:[#allocation2 + $0x41] sm:$0xff] %vm487_vm0, %v482_v5  ;;  %v8254_v3 = vpack.c.bf16 %v867_v1, %v866_v0  ;;  %v843_v5 = vld [vmem:[%s14246_s2 + $0x48] sm:$0xff]  ;;  %v874_v1 = vld [vmem:[%s14246_s2 + $0x140] sm:$0xff] }
  0x76   : > { %516 = vst.msk [vmem:[#allocation2 + $0x51] sm:$0xff] %vm487_vm0, %v483_v6  ;;  %517 = vst.msk [vmem:[#allocation2 + $0x61] sm:$0xff] %vm487_vm0, %v484_v7  ;;  %v1613_v6 = vld [vmem:[%s9687_s22] sm:$0xff]  ;;  %v8238_v7 = vpack.c.bf16 %v843_v5, %v842_v4  ;;  %8237 = vmatprep.subr.bf16.mxu0 %v8236_v2  ;;  %v891_v0 = vld [vmem:[%s14246_s2 + $0x1c8] sm:$0xff] }
  0x77   : > { %518 = vst.msk [vmem:[#allocation2 + $0x71] sm:$0xff] %vm487_vm0, %v485_v8  ;;  %519 = vst.msk [vmem:[#allocation2 + $0x81] sm:$0xff] %vm487_vm0, %v486_v9  ;;  %v884_v8 = vld [vmem:[%s14246_s2 + $0x190] sm:$0xff]  ;;  %v885_v9 = vld [vmem:[%s14246_s2 + $0x198] sm:$0xff]  ;;  %8255 = vmatpush3.bf16.msra.mxu1 %v8254_v3  ;;  %v8268_v2 = vpack.c.bf16 %v891_v0, %v890_v63 }
  0x78   : > { %528 = vst.msk [vmem:[#allocation4] sm:$0xff] %vm487_vm0, %v520_v61  ;;  %1685 = vst.msk [vmem:[#allocation3 + $0x19] sm:$0xff] %vm487_vm0, %v1613_v6  ;;  %v8256_v10 = vpack.c.bf16 %v885_v9, %v884_v8  ;;  %8239 = vmatpush3.bf16.msra.mxu0 %v8238_v7  ;;  %v875_v3 = vld [vmem:[%s14246_s2 + $0x148] sm:$0xff]  ;;  %v1617_v4 = vld [vmem:[%s9687_s22 + $0x20] sm:$0xff] }
  0x79   : > { %593 = vst.msk [vmem:[#allocation4 + $0x8] sm:$0xff] %vm487_vm0, %v585_v13  ;;  %8241 = vmatprep.subr.bf16.mxu0 %v8240_v14  ;;  %1686 = vst.msk [vmem:[#allocation3 + $0x21] sm:$0xff] %vm487_vm0, %v1614_v20  ;;  %v8270_v5 = vpack.c.bf16 %v875_v3, %v874_v1  ;;  %v892_v6 = vld [vmem:[%s14246_s2 + $0x1d0] sm:$0xff]  ;;  %v877_v8 = vld [vmem:[%s14246_s2 + $0x158] sm:$0xff] }
  0x7a   : > { %8257 = vmatprep.subr.bf16.mxu1 %v8256_v10  ;;  %1688 = vst.msk [vmem:[#allocation3 + $0x39] sm:$0xff] %vm487_vm0, %v1616_v62  ;;  %1689 = vst.msk [vmem:[#allocation3 + $0x49] sm:$0xff] %vm487_vm0, %v1617_v4  ;;  %v876_v7 = vld [vmem:[%s14246_s2 + $0x150] sm:$0xff]  ;;  %v1618_v9 = vld [vmem:[%s9687_s22 + $0x28] sm:$0xff] }
  0x7b   : > { %v602_v28 = vld [vmem:[#allocation2 + $0x20] sm:$0xff]  ;;  %v601_v29 = vld [vmem:[#allocation2 + $0x10] sm:$0xff]  ;;  %8259 = vmatpush3.bf16.msra.mxu1 %v8258_v18  ;;  %1690 = vst.msk [vmem:[#allocation3 + $0x51] sm:$0xff] %vm487_vm0, %v1618_v9  ;;  %v8274_v12 = vpack.c.bf16 %v877_v8, %v876_v7  ;;  %v1620_v18 = vld [vmem:[%s9687_s22 + $0x38] sm:$0xff] }
  0x7c   : > { %v603_v30 = vld [vmem:[#allocation2 + $0x30] sm:$0xff]  ;;  %619 = vrot.lane.b32.xlu1 %v602_v28, %s14277_s24  ;;  %617 = vrot.lane.b32.xlu0 %v601_v29, %s14277_s24  ;;  %v9565_v33 = vld [vmem:[#allocation2 + $0x40] sm:$0xff]  ;;  %529 = vst.msk [vmem:[#allocation4 + $0x28] sm:$0xff] %vm487_vm0, %v601_v29  ;;  %530 = vst.msk [vmem:[#allocation4 + $0x50] sm:$0xff] %vm487_vm0, %v602_v28 }
  0x7d   : > { %v537_v32 = vld [vmem:[#allocation2 + $0x11] sm:$0xff]  ;;  %v9567_v34 = vld [vmem:[#allocation2 + $0x21] sm:$0xff]  ;;  %531 = vst.msk [vmem:[#allocation4 + $0x78] sm:$0xff] %vm487_vm0, %v603_v30  ;;  %722 = vst.msk [vmem:[#allocation4 + $0x18] sm:$0xff] %vm487_vm0, %v602_v28  ;;  %v8244_v28 = vpack.c.bf16 %v863_v26, %v862_v24  ;;  %8243 = vmatpush3.bf16.msra.mxu0 %v8242_v22  ;;  %8261 = vmatprep.subr.bf16.mxu1 %v8260_v25  ;;  %v8278_v22 = vpack.c.bf16 %v879_v16, %v878_v15 }
  0x7e   : > { %723 = vst.msk [vmem:[#allocation4 + $0x40] sm:$0xff] %vm487_vm0, %v603_v30  ;;  %v9579_v35 = vld [vmem:[#allocation2 + $0x31] sm:$0xff]  ;;  %657 = vst.msk [vmem:[#allocation4 + $0x10] sm:$0xff] %vm487_vm0, %v537_v32  ;;  %v9592_v38 = vld [vmem:[#allocation2 + $0x41] sm:$0xff] }
  0x7f   : > { %v9581_v36 = vld [vmem:[#allocation2 + $0x50] sm:$0xff]  ;;  %532 = vst.msk [vmem:[#allocation4 + $0xa0] sm:$0xff] %vm487_vm0, %v9565_v33  ;;  %658 = vst.msk [vmem:[#allocation4 + $0x38] sm:$0xff] %vm487_vm0, %v9567_v34  ;;  %v9594_v39 = vld [vmem:[#allocation2 + $0x60] sm:$0xff]  ;;  %8245 = vmatprep.subr.bf16.mxu0 %v8244_v28 }
  0x80   : > { %v9583_v37 = vld [vmem:[#allocation2 + $0x12] sm:$0xff]  ;;  %724 = vst.msk [vmem:[#allocation4 + $0x68] sm:$0xff] %vm487_vm0, %v9565_v33  ;;  %v9596_v40 = vld [vmem:[#allocation2 + $0x22] sm:$0xff]  ;;  %533 = vst.msk [vmem:[#allocation4 + $0xc8] sm:$0xff] %vm487_vm0, %v9581_v36  ;;  %621 = vrot.lane.b32.xlu0 %v603_v30, %s14277_s24  ;;  %554 = vrot.lane.b32.xlu1 %v537_v32, %s14277_s24 }
  0x81   : > { %594 = vst.msk [vmem:[#allocation4 + $0x30] sm:$0xff] %vm487_vm0, %v9583_v37  ;;  %659 = vst.msk [vmem:[#allocation4 + $0x60] sm:$0xff] %vm487_vm0, %v9579_v35  ;;  %v9608_v42 = vld [vmem:[#allocation2 + $0x51] sm:$0xff]  ;;  %v9628_v46 = vld [vmem:[#allocation2 + $0x61] sm:$0xff] }
  0x82   : > { %725 = vst.msk [vmem:[#allocation4 + $0x90] sm:$0xff] %vm487_vm0, %v9581_v36  ;;  %v9610_v43 = vld [vmem:[#allocation2 + $0x70] sm:$0xff]  ;;  %595 = vst.msk [vmem:[#allocation4 + $0x58] sm:$0xff] %vm487_vm0, %v9596_v40  ;;  %v9630_v47 = vld [vmem:[#allocation2 + $0x80] sm:$0xff] }
  0x83   : > { %v9612_v44 = vld [vmem:[#allocation2 + $0x32] sm:$0xff]  ;;  %534 = vst.msk [vmem:[#allocation4 + $0xf0] sm:$0xff] %vm487_vm0, %v9594_v39  ;;  %660 = vst.msk [vmem:[#allocation4 + $0x88] sm:$0xff] %vm487_vm0, %v9592_v38  ;;  %v9632_v48 = vld [vmem:[#allocation2 + $0x42] sm:$0xff] }
  0x84   : > { %726 = vst.msk [vmem:[#allocation4 + $0xb8] sm:$0xff] %vm487_vm0, %v9594_v39  ;;  %786 = vst.msk [vmem:[#allocation4 + $0x20] sm:$0xff] %vm487_vm0, %v9596_v40  ;;  %v9645_v49 = vld [vmem:[#allocation2 + $0x71] sm:$0xff]  ;;  %v9649_v51 = vld [vmem:[#allocation2 + $0x62] sm:$0xff]  ;;  %623 = vrot.lane.b32.xlu0 %v9565_v33, %s14277_s24  ;;  %556 = vrot.lane.b32.xlu1 %v9567_v34, %s14277_s24 }
  0x85   : > { %596 = vst.msk [vmem:[#allocation4 + $0x80] sm:$0xff] %vm487_vm0, %v9612_v44  ;;  %535 = vst.msk [vmem:[#allocation4 + $0x118] sm:$0xff] %vm487_vm0, %v9610_v43  ;;  %v9647_v50 = vld [vmem:[#allocation2 + $0x52] sm:$0xff]  ;;  %v9659_v52 = vld [vmem:[#allocation2 + $0x81] sm:$0xff] }
  0x86   : > { %661 = vst.msk [vmem:[#allocation4 + $0xb0] sm:$0xff] %vm487_vm0, %v9608_v42  ;;  %727 = vst.msk [vmem:[#allocation4 + $0xe0] sm:$0xff] %vm487_vm0, %v9610_v43  ;;  %v9661_v53 = vld [vmem:[#allocation2 + $0x72] sm:$0xff]  ;;  %v9663_v54 = vld [vmem:[#allocation2 + $0x82] sm:$0xff] }
  0x87   : > { %787 = vst.msk [vmem:[#allocation4 + $0x48] sm:$0xff] %vm487_vm0, %v9612_v44  ;;  %597 = vst.msk [vmem:[#allocation4 + $0xa8] sm:$0xff] %vm487_vm0, %v9632_v48  ;;  %v871_v29 = vld [vmem:[%s14246_s2 + $0x128] sm:$0xff]  ;;  %v846_v30 = vld [vmem:[%s14246_s2 + $0x60] sm:$0xff] }
  0x88   : > { %662 = vst.msk [vmem:[#allocation4 + $0xd8] sm:$0xff] %vm487_vm0, %v9628_v46  ;;  %728 = vst.msk [vmem:[#allocation4 + $0x108] sm:$0xff] %vm487_vm0, %v9630_v47  ;;  %558 = vrot.lane.b32.xlu0 %v9579_v35, %s14277_s24  ;;  %746 = vrot.lane.b32.xlu1 %v9567_v34, %s14277_s24  ;;  %v8262_v32 = vpack.c.bf16 %v871_v29, %v870_v27  ;;  %v8246_v33 = vpack.c.bf16 %v847_v31, %v846_v30  ;;  %v1615_v34 = vld [vmem:[%s9687_s22 + $0x10] sm:$0xff]  ;;  %v894_v10 = vld [vmem:[%s14246_s2 + $0x1e0] sm:$0xff] }
  0x89   : > { %788 = vst.msk [vmem:[#allocation4 + $0x70] sm:$0xff] %vm487_vm0, %v9632_v48  ;;  %598 = vst.msk [vmem:[#allocation4 + $0xd0] sm:$0xff] %vm487_vm0, %v9647_v50  ;;  %v1619_v13 = vld [vmem:[%s9687_s22 + $0x30] sm:$0xff]  ;;  %v8276_v14 = vpack.c.bf16 %v895_v11, %v894_v10  ;;  %v881_v25 = vld [vmem:[%s14246_s2 + $0x178] sm:$0xff] }
  0x8a   : > { %599 = vst.msk [vmem:[#allocation4 + $0xf8] sm:$0xff] %vm487_vm0, %v9649_v51  ;;  %663 = vst.msk [vmem:[#allocation4 + $0x100] sm:$0xff] %vm487_vm0, %v9645_v49  ;;  %8263 = vmatpush3.bf16.msra.mxu1 %v8262_v32  ;;  %8247 = vmatpush3.bf16.msra.mxu0 %v8246_v33  ;;  %v880_v20 = vld [vmem:[%s14246_s2 + $0x170] sm:$0xff]  ;;  %v1624_v27 = vld [vmem:[%s9687_s22 + $0x58] sm:$0xff] }
  0x8b   : > { %789 = vst.msk [vmem:[#allocation4 + $0x98] sm:$0xff] %vm487_vm0, %v9647_v50  ;;  %790 = vst.msk [vmem:[#allocation4 + $0xc0] sm:$0xff] %vm487_vm0, %v9649_v51  ;;  %8249 = vmatprep.subr.bf16.mxu0 %v8248_v57  ;;  %v1625_v28 = vld [vmem:[%s9687_s22 + $0x60] sm:$0xff]  ;;  %v1626_v29 = vld [vmem:[%s9687_s22 + $0x68] sm:$0xff]  ;;  %v8282_v30 = vpack.c.bf16 %v881_v25, %v880_v20 }
  0x8c   : > { %600 = vst.msk [vmem:[#allocation4 + $0x120] sm:$0xff] %vm487_vm0, %v9661_v53  ;;  %664 = vst.msk [vmem:[#allocation4 + $0x128] sm:$0xff] %vm487_vm0, %v9659_v52  ;;  %625 = vrot.lane.b32.xlu0 %v9581_v36, %s14277_s24  ;;  %681 = vrot.lane.b32.xlu1 %v9583_v37, %s14277_s24  ;;  %v888_v36 = vld [vmem:[%s14246_s2 + $0x1b0] sm:$0xff]  ;;  %v889_v37 = vld [vmem:[%s14246_s2 + $0x1b8] sm:$0xff] }
  0x8d   : > { %791 = vst.msk [vmem:[#allocation4 + $0xe8] sm:$0xff] %vm487_vm0, %v9661_v53  ;;  %792 = vst.msk [vmem:[#allocation4 + $0x110] sm:$0xff] %vm487_vm0, %v9663_v54  ;;  %v8264_v45 = vpack.c.bf16 %v889_v37, %v888_v36  ;;  %v1627_v31 = vld [vmem:[%s9687_s22 + $0x70] sm:$0xff]  ;;  %v1634_v57 = vld [vmem:[%s9687_s22 + $0xa8] sm:$0xff] }
  0x8e   : > { %1687 = vst.msk [vmem:[#allocation3 + $0x31] sm:$0xff] %vm487_vm0, %v1615_v34  ;;  %1691 = vst.msk [vmem:[#allocation3 + $0x61] sm:$0xff] %vm487_vm0, %v1619_v13  ;;  %v721_v33 = vld [vmem:[#allocation2 + $0x90] sm:$0xff]  ;;  %v2038_v58 = vld [vmem:[#allocation3 + $0x20] sm:$0xff] }
  0x8f   : > { %8265 = vmatprep.subr.bf16.mxu1 %v8264_v45  ;;  %1692 = vst.msk [vmem:[#allocation3 + $0x69] sm:$0xff] %vm487_vm0, %v1620_v18  ;;  %1693 = vst.msk [vmem:[#allocation3 + $0x79] sm:$0xff] %vm487_vm0, %v1621_v19  ;;  %v1631_v34 = vld [vmem:[%s9687_s22 + $0x90] sm:$0xff]  ;;  %v1633_v45 = vld [vmem:[%s9687_s22 + $0xa0] sm:$0xff] }
  0x90   : > { %560 = vrot.lane.b32.xlu0 %v9592_v38, %s14277_s24  ;;  %748 = vrot.lane.b32.xlu1 %v9579_v35, %s14277_s24  ;;  %v849_v35 = vld [vmem:[%s14246_s2 + $0x78] sm:$0xff]  ;;  %1694 = vst.msk [vmem:[#allocation3 + $0x81] sm:$0xff] %vm487_vm0, %v1622_v21  ;;  %1696 = vst.msk [vmem:[#allocation3 + $0x99] sm:$0xff] %vm487_vm0, %v1624_v27  ;;  %v1784_v3 = vld [vmem:[#allocation3 + $0x21] sm:$0xff] }
  0x91   : > { %v8250_v61 = vpack.c.bf16 %v849_v35, %v848_v59  ;;  %8267 = vmatpush3.bf16.msra.mxu1 %v8266_v60  ;;  %1697 = vst.msk [vmem:[#allocation3 + $0xa9] sm:$0xff] %vm487_vm0, %v1625_v28  ;;  %1698 = vst.msk [vmem:[#allocation3 + $0xb1] sm:$0xff] %vm487_vm0, %v1626_v29  ;;  %v785_v37 = vld [vmem:[#allocation2 + $0x92] sm:$0xff]  ;;  %v1782_v60 = vld [vmem:[#allocation3 + $0x9] sm:$0xff] }
  0x92   : > { %8269 = vmatprep.subr.bf16.mxu1 %v8268_v2  ;;  %1699 = vst.msk [vmem:[#allocation3 + $0xc1] sm:$0xff] %vm487_vm0, %v1627_v31  ;;  %729 = vst.msk [vmem:[#allocation4 + $0x130] sm:$0xff] %vm487_vm0, %v721_v33  ;;  %v1635_v35 = vld [vmem:[%s9687_s22 + $0xb0] sm:$0xff]  ;;  %v1636_v62 = vld [vmem:[%s9687_s22 + $0xb8] sm:$0xff] }
  0x93   : > { %8251 = vmatpush3.bf16.msra.mxu0 %v8250_v61  ;;  %1703 = vst.msk [vmem:[#allocation3 + $0xf1] sm:$0xff] %vm487_vm0, %v1631_v34  ;;  %793 = vst.msk [vmem:[#allocation4 + $0x138] sm:$0xff] %vm487_vm0, %v785_v37  ;;  %v1783_v63 = vld [vmem:[#allocation3 + $0x19] sm:$0xff]  ;;  %v2041_v4 = vld [vmem:[#allocation3 + $0x48] sm:$0xff] }
  0x94   : > { %627 = vrot.lane.b32.xlu0 %v9594_v39, %s14277_s24  ;;  %683 = vrot.lane.b32.xlu1 %v9596_v40, %s14277_s24  ;;  %v893_v39 = vld [vmem:[%s14246_s2 + $0x1d8] sm:$0xff]  ;;  %1704 = vst.msk [vmem:[#allocation3 + $0xf9] sm:$0xff] %vm487_vm0, %v1632_v41  ;;  %1705 = vst.msk [vmem:[#allocation3 + $0x109] sm:$0xff] %vm487_vm0, %v1633_v45  ;;  %v1637_v2 = vld [vmem:[%s9687_s22 + $0xc0] sm:$0xff] }
  0x95   : > { %v8272_v40 = vpack.c.bf16 %v893_v39, %v892_v6  ;;  %8271 = vmatpush3.bf16.msra.mxu1 %v8270_v5  ;;  %1706 = vst.msk [vmem:[#allocation3 + $0x111] sm:$0xff] %vm487_vm0, %v1634_v57  ;;  %1707 = vst.msk [vmem:[#allocation3 + $0x121] sm:$0xff] %vm487_vm0, %v1635_v35  ;;  %v2039_v61 = vld [vmem:[#allocation3 + $0x30] sm:$0xff]  ;;  %v2040_v0 = vld [vmem:[#allocation3 + $0x38] sm:$0xff] }
  0x96   : > { %1708 = vst.msk [vmem:[#allocation3 + $0x129] sm:$0xff] %vm487_vm0, %v1636_v62  ;;  %1709 = vst.msk [vmem:[#allocation3 + $0x139] sm:$0xff] %vm487_vm0, %v1637_v2  ;;  %v1638_v6 = vld [vmem:[%s9687_s22 + $0xc8] sm:$0xff]  ;;  %v10009_v39 = vld [vmem:[#allocation3 + $0x31] sm:$0xff] }
  0x97   : > { %8273 = vmatprep.subr.bf16.mxu1 %v8272_v40  ;;  %1710 = vst.msk [vmem:[#allocation3 + $0x141] sm:$0xff] %vm487_vm0, %v1638_v6  ;;  %v2042_v40 = vld [vmem:[#allocation3 + $0x50] sm:$0xff]  ;;  %v10016_v8 = vld [vmem:[#allocation3 + $0x39] sm:$0xff]  ;;  %v1642_v16 = vld [vmem:[%s9687_s22 + $0xe8] sm:$0xff] }
  0x98   : > { %562 = vrot.lane.b32.xlu0 %v9608_v42, %s14277_s24  ;;  %750 = vrot.lane.b32.xlu1 %v9592_v38, %s14277_s24  ;;  %v896_v38 = vld [vmem:[%s14246_s2 + $0x1f0] sm:$0xff]  ;;  %v2043_v9 = vld [vmem:[#allocation3 + $0x60] sm:$0xff]  ;;  %v1640_v10 = vld [vmem:[%s9687_s22 + $0xd8] sm:$0xff]  ;;  %1714 = vst.msk [vmem:[#allocation3 + $0x171] sm:$0xff] %vm487_vm0, %v1642_v16 }
  0x99   : > { %8275 = vmatpush3.bf16.msra.mxu1 %v8274_v12  ;;  %v8280_v24 = vpack.c.bf16 %v897_v17, %v896_v38  ;;  %v9921_v32 = vld [vmem:[#allocation3 + $0xb0] sm:$0xff]  ;;  %1712 = vst.msk [vmem:[#allocation3 + $0x159] sm:$0xff] %vm487_vm0, %v1640_v10  ;;  %v2044_v12 = vld [vmem:[#allocation3 + $0x68] sm:$0xff]  ;;  %v1641_v13 = vld [vmem:[%s9687_s22 + $0xe0] sm:$0xff] }
  0x9a   : > { %8277 = vmatprep.subr.bf16.mxu1 %v8276_v14  ;;  %1764 = vst.msk [vmem:[#allocation5 + $0x258] sm:$0xff] %vm487_vm0, %v9921_v32  ;;  %v1639_v7 = vld [vmem:[%s9687_s22 + $0xd0] sm:$0xff]  ;;  %1713 = vst.msk [vmem:[#allocation3 + $0x169] sm:$0xff] %vm487_vm0, %v1641_v13  ;;  %v2045_v15 = vld [vmem:[#allocation3 + $0x78] sm:$0xff] }
  0x9b   : > { %v9968_v56 = vld [vmem:[#allocation3 + $0xf8] sm:$0xff]  ;;  %v9977_v59 = vld [vmem:[#allocation3 + $0x108] sm:$0xff]  ;;  %1711 = vst.msk [vmem:[#allocation3 + $0x151] sm:$0xff] %vm487_vm0, %v1639_v7  ;;  %v2046_v17 = vld [vmem:[#allocation3 + $0x80] sm:$0xff] }
  0x9c   : > { %629 = vrot.lane.b32.xlu0 %v9610_v43, %s14277_s24  ;;  %685 = vrot.lane.b32.xlu1 %v9612_v44, %s14277_s24  ;;  %v1623_v43 = vld [vmem:[%s9687_s22 + $0x50] sm:$0xff]  ;;  %v898_v44 = vld [vmem:[%s14246_s2 + $0x200] sm:$0xff]  ;;  %1770 = vst.msk [vmem:[#allocation5 + $0x348] sm:$0xff] %vm487_vm0, %v9968_v56  ;;  %1771 = vst.msk [vmem:[#allocation5 + $0x370] sm:$0xff] %vm487_vm0, %v9977_v59 }
  0x9d   : > { %1695 = vst.msk [vmem:[#allocation3 + $0x91] sm:$0xff] %vm487_vm0, %v1623_v43  ;;  %v9896_v26 = vpack.c.bf16 %v899_v23, %v898_v44  ;;  %8279 = vmatpush3.bf16.msra.mxu1 %v8278_v22  ;;  %v9993_v1 = vld [vmem:[#allocation3 + $0x120] sm:$0xff]  ;;  %v10001_v5 = vld [vmem:[#allocation3 + $0x128] sm:$0xff]  ;;  %v10030_v14 = vld [vmem:[#allocation3 + $0x51] sm:$0xff] }
  0x9e   : > { %8281 = vmatprep.subr.bf16.mxu1 %v8280_v24  ;;  %1773 = vst.msk [vmem:[#allocation5 + $0x3c0] sm:$0xff] %vm487_vm0, %v9993_v1  ;;  %1774 = vst.msk [vmem:[#allocation5 + $0x3e8] sm:$0xff] %vm487_vm0, %v10001_v5  ;;  %v10023_v11 = vld [vmem:[#allocation3 + $0x49] sm:$0xff]  ;;  %v10037_v38 = vld [vmem:[#allocation3 + $0x61] sm:$0xff] }
  0x9f   : > { %8285 = vmatprep.subr.bf16.mxu0 %v9896_v26  ;;  %v1643_v18 = vld [vmem:[%s9687_s22 + $0xf0] sm:$0xff]  ;;  %v1973_v19 = vld [vmem:[#allocation3 + $0x2] sm:$0xff]  ;;  %v1644_v43 = vld [vmem:[%s9687_s22 + $0xf8] sm:$0xff] }
  0xa0   : > { %564 = vrot.lane.b32.xlu0 %v9628_v46, %s14277_s24  ;;  %752 = vrot.lane.b32.xlu1 %v9608_v42, %s14277_s24  ;;  %v1628_v42 = vld [vmem:[%s9687_s22 + $0x78] sm:$0xff]  ;;  %1715 = vst.msk [vmem:[#allocation3 + $0x181] sm:$0xff] %vm487_vm0, %v1643_v18  ;;  %v1717_v20 = vld [vmem:[#allocation3] sm:$0xff]  ;;  %v10044_v21 = vld [vmem:[#allocation3 + $0x69] sm:$0xff] }
  0xa1   : > { %8283 = vmatpush3.bf16.msra.mxu1 %v8282_v30  ;;  %1700 = vst.msk [vmem:[#allocation3 + $0xc9] sm:$0xff] %vm487_vm0, %v1628_v42  ;;  %2005 = vst.msk [vmem:[#allocation5 + $0x8] sm:$0xff] %vm487_vm0, %v1973_v19  ;;  %v1974_v44 = vld [vmem:[#allocation3 + $0xa] sm:$0xff]  ;;  %v10053_v24 = vld [vmem:[#allocation3 + $0x79] sm:$0xff] }
  0xa2   : > { %1749 = vst.msk [vmem:[#allocation5] sm:$0xff] %vm487_vm0, %v1717_v20  ;;  %1716 = vst.msk [vmem:[#allocation3 + $0x189] sm:$0xff] %vm487_vm0, %v1644_v43  ;;  %v1718_v23 = vld [vmem:[#allocation3 + $0x8] sm:$0xff]  ;;  %v10060_v27 = vld [vmem:[#allocation3 + $0x1a] sm:$0xff] }
  0xa3   : > { %2006 = vst.msk [vmem:[#allocation5 + $0x30] sm:$0xff] %vm487_vm0, %v1974_v44  ;;  %1750 = vst.msk [vmem:[#allocation5 + $0x28] sm:$0xff] %vm487_vm0, %v1718_v23  ;;  %v1719_v28 = vld [vmem:[#allocation3 + $0x18] sm:$0xff]  ;;  %v10062_v29 = vld [vmem:[#allocation3 + $0x81] sm:$0xff] }
  0xa4   : > { %631 = vrot.lane.b32.xlu0 %v9630_v47, %s14277_s24  ;;  %687 = vrot.lane.b32.xlu1 %v9632_v48, %s14277_s24  ;;  %v1629_v47 = vld [vmem:[%s9687_s22 + $0x80] sm:$0xff]  ;;  %v2047_v22 = vld [vmem:[#allocation3 + $0x90] sm:$0xff]  ;;  %v2048_v25 = vld [vmem:[#allocation3 + $0x98] sm:$0xff]  ;;  %2007 = vst.msk [vmem:[#allocation5 + $0x58] sm:$0xff] %vm487_vm0, %v10060_v27 }
  0xa5   : > { %v9926_v48 = vld [vmem:[#allocation3 + $0xc0] sm:$0xff]  ;;  %1701 = vst.msk [vmem:[#allocation3 + $0xd9] sm:$0xff] %vm487_vm0, %v1629_v47  ;;  %v2049_v30 = vld [vmem:[#allocation3 + $0xa8] sm:$0xff]  ;;  %1751 = vst.msk [vmem:[#allocation5 + $0x50] sm:$0xff] %vm487_vm0, %v1719_v28 }
  0xa6   : > { %1765 = vst.msk [vmem:[#allocation5 + $0x280] sm:$0xff] %vm487_vm0, %v9926_v48  ;;  %v10067_v42 = vld [vmem:[#allocation3 + $0x22] sm:$0xff]  ;;  %v10076_v47 = vld [vmem:[#allocation3 + $0x91] sm:$0xff]  ;;  %v10087_v37 = vld [vmem:[#allocation3 + $0x99] sm:$0xff] }
  0xa7   : > { %v1720_v33 = vld [vmem:[#allocation3 + $0x20] sm:$0xff]  ;;  %2008 = vst.msk [vmem:[#allocation5 + $0x80] sm:$0xff] %vm487_vm0, %v10067_v42  ;;  %v1721_v34 = vld [vmem:[#allocation3 + $0x30] sm:$0xff]  ;;  %v1726_v28 = vld [vmem:[#allocation3 + $0x68] sm:$0xff] }
  0xa8   : > { %566 = vrot.lane.b32.xlu0 %v9645_v49, %s14277_s24  ;;  %754 = vrot.lane.b32.xlu1 %v9628_v46, %s14277_s24  ;;  %v1630_v46 = vld [vmem:[%s9687_s22 + $0x88] sm:$0xff]  ;;  %1752 = vst.msk [vmem:[#allocation5 + $0x78] sm:$0xff] %vm487_vm0, %v1720_v33  ;;  %1753 = vst.msk [vmem:[#allocation5 + $0xa0] sm:$0xff] %vm487_vm0, %v1721_v34  ;;  %v10091_v45 = vld [vmem:[#allocation3 + $0x3a] sm:$0xff]  ;;  %s14140_s22 = scalar_lea.vmem [#allocation10], %s7452_s1 }
  0xa9   : > { %v9938_v36 = vld [vmem:[#allocation3 + $0xc8] sm:$0xff]  ;;  %1702 = vst.msk [vmem:[#allocation3 + $0xe1] sm:$0xff] %vm487_vm0, %v1630_v46  ;;  %v10078_v46 = vld [vmem:[#allocation3 + $0x32] sm:$0xff]  ;;  %2010 = vst.msk [vmem:[#allocation5 + $0xd0] sm:$0xff] %vm487_vm0, %v10091_v45  ;;  %s7359_s15 = sshll.u32 %s14140_s22, 4  ;;  %s14195_s15 = int_to_ptr.vmem [resolvable:$true] %s7359_s15 }
  0xaa   : > { %1766 = vst.msk [vmem:[#allocation5 + $0x2a8] sm:$0xff] %vm487_vm0, %v9938_v36  ;;  %2009 = vst.msk [vmem:[#allocation5 + $0xa8] sm:$0xff] %vm487_vm0, %v10078_v46  ;;  %v10110_v35 = vld [vmem:[#allocation3 + $0x4a] sm:$0xff]  ;;  %v10129_v6 = vld [vmem:[#allocation3 + $0x52] sm:$0xff]  ;;  %s9078_s25 = scalar_lea.vmem %s14195_s15, 4096  ;;  %p9085_p10 = scmp.lt.s32.totalorder %s14195_s15, %s9083_s14 }
  0xab   : > { %2011 = vst.msk [vmem:[#allocation5 + $0xf8] sm:$0xff] %vm487_vm0, %v10110_v35  ;;  %2012 = vst.msk [vmem:[#allocation5 + $0x120] sm:$0xff] %vm487_vm0, %v10129_v6  ;;  %v10149_v18 = vld [vmem:[#allocation3 + $0x62] sm:$0xff]  ;;  %p9079_p11 = scmp.ne.s32.totalorder %s14195_s15, %s9078_s25  ;;  %p9086_p0 = scmp.lt.s32.totalorder %s9084_s17, %s9078_s25 }
  0xac   : > { %689 = vrot.lane.b32.xlu1 %v9647_v50, %s14277_s24  ;;  %756 = vrot.lane.b32.xlu0 %v9645_v49, %s14277_s24  ;;  %v737_v49 = vld [vmem:[#allocation2 + $0x91] sm:$0xff]  ;;  %v1725_v19 = vld [vmem:[#allocation3 + $0x60] sm:$0xff]  ;;  %2013 = vst.msk [vmem:[#allocation5 + $0x148] sm:$0xff] %vm487_vm0, %v10149_v18  ;;  %1758 = vst.msk [vmem:[#allocation5 + $0x168] sm:$0xff] %vm487_vm0, %v1726_v28 }
  0xad   : > { %v9951_v50 = vld [vmem:[#allocation3 + $0xd8] sm:$0xff]  ;;  %1757 = vst.msk [vmem:[#allocation5 + $0x140] sm:$0xff] %vm487_vm0, %v1725_v19  ;;  %p9080_p13 = pnand %p9079_p11, %p14279_p12  ;;  %p9087_p2 = por %p9086_p0, %p9085_p10 }
  0xae   : > { %1767 = vst.msk [vmem:[#allocation5 + $0x2d0] sm:$0xff] %vm487_vm0, %v9951_v50 }
  0xaf   : > { %p9081_p8 = pneg %p9080_p13 }
  0xb0   : > { %691 = vrot.lane.b32.xlu1 %v9649_v51, %s14277_s24  ;;  %758 = vrot.lane.b32.xlu0 %v9659_v52, %s14277_s24  ;;  %v9960_v55 = vld [vmem:[#allocation3 + $0xe0] sm:$0xff]  ;;  %v9962_v51 = vld [vmem:[#allocation3 + $0xf0] sm:$0xff]  ;;  %v2037_v52 = vld [vmem:[#allocation3 + $0x18] sm:$0xff] }
  0xb1   : > { %1768 = vst.msk [vmem:[#allocation5 + $0x2f8] sm:$0xff] %vm487_vm0, %v9960_v55  ;;  %1769 = vst.msk [vmem:[#allocation5 + $0x320] sm:$0xff] %vm487_vm0, %v9962_v51  ;;  %p9088_p4 = pnand %p9087_p2, %p9081_p8 }
  0xb4   : > { %693 = vrot.lane.b32.xlu1 %v9661_v53, %s14277_s24  ;;  %760 = vrot.lane.b32.xlu0 %v737_v49, %s14277_s24  ;;  %v1781_v53 = vld [vmem:[#allocation3 + $0x1] sm:$0xff] }
  0xb8   : > { %695 = vrot.lane.b32.xlu1 %v9663_v54, %s14277_s24  ;;  %2101 = vrot.lane.b32.xlu0 %v2037_v52, %s14277_s24  ;;  %v9985_v54 = vld [vmem:[#allocation3 + $0x110] sm:$0xff]  ;;  %v1722_v52 = vld [vmem:[#allocation3 + $0x38] sm:$0xff] }
  0xb9   : > { %1772 = vst.msk [vmem:[#allocation5 + $0x398] sm:$0xff] %vm487_vm0, %v9985_v54  ;;  %1754 = vst.msk [vmem:[#allocation5 + $0xc8] sm:$0xff] %vm487_vm0, %v1722_v52  ;;  %v10182_v52 = vld [vmem:[#allocation3 + $0xe1] sm:$0xff] }
  0xbc   : > { %1845 = vrot.lane.b32.xlu1 %v1781_v53, %s14277_s24  ;;  %2103 = vrot.lane.b32.xlu0 %v2038_v58, %s14277_s24  ;;  %v553_v31 = vpop.permute.xlu0 %552  ;;  %v900_v58 = vld [vmem:[%s14246_s2 + $0x210] sm:$0xff] }
  0xbd   : > { %577 = vst.msk [vmem:[#allocation4] sm:$0xff] %vm576_vm3, %v553_v31 }
  0xc0   : > { %1847 = vrot.lane.b32.xlu1 %v1782_v60, %s14277_s24  ;;  %2105 = vrot.lane.b32.xlu0 %v2039_v61, %s14277_s24  ;;  %v1723_v60 = vld [vmem:[#allocation3 + $0x48] sm:$0xff]  ;;  %v10119_v61 = vld [vmem:[#allocation3 + $0xb1] sm:$0xff] }
  0xc1   : > { %1755 = vst.msk [vmem:[#allocation5 + $0xf0] sm:$0xff] %vm487_vm0, %v1723_v60  ;;  %v10189_v60 = vld [vmem:[#allocation3 + $0x82] sm:$0xff] }
  0xc2   : > { %2016 = vst.msk [vmem:[#allocation5 + $0x1c0] sm:$0xff] %vm487_vm0, %v10189_v60 }
  0xc4   : > { %1849 = vrot.lane.b32.xlu1 %v1783_v63, %s14277_s24  ;;  %2107 = vrot.lane.b32.xlu0 %v2040_v0, %s14277_s24 }
  0xc8   : > { %1851 = vrot.lane.b32.xlu1 %v1784_v3, %s14277_s24  ;;  %2109 = vrot.lane.b32.xlu0 %v2041_v4, %s14277_s24  ;;  %v902_v3 = vld [vmem:[%s14246_s2 + $0x220] sm:$0xff]  ;;  %v903_v4 = vld [vmem:[%s14246_s2 + $0x228] sm:$0xff] }
  0xc9   : > { %v8292_v16 = vpack.c.bf16 %v903_v4, %v902_v3  ;;  %v10202_v4 = vld [vmem:[#allocation3 + $0x92] sm:$0xff] }
  0xca   : > { %2017 = vst.msk [vmem:[#allocation5 + $0x1e8] sm:$0xff] %vm487_vm0, %v10202_v4 }
  0xcc   : > { %1853 = vrot.lane.b32.xlu1 %v10009_v39, %s14277_s24  ;;  %2111 = vrot.lane.b32.xlu0 %v2042_v40, %s14277_s24  ;;  %v1724_v40 = vld [vmem:[#allocation3 + $0x50] sm:$0xff] }
  0xcd   : > { %1756 = vst.msk [vmem:[#allocation5 + $0x118] sm:$0xff] %vm487_vm0, %v1724_v40  ;;  %v10209_v40 = vld [vmem:[#allocation3 + $0xf9] sm:$0xff] }
  0xd0   : > { %1855 = vrot.lane.b32.xlu1 %v10016_v8, %s14277_s24  ;;  %2113 = vrot.lane.b32.xlu0 %v2043_v9, %s14277_s24  ;;  %v10137_v9 = vld [vmem:[#allocation3 + $0xc1] sm:$0xff] }
  0xd4   : > { %1857 = vrot.lane.b32.xlu1 %v10023_v11, %s14277_s24  ;;  %2115 = vrot.lane.b32.xlu0 %v2044_v12, %s14277_s24 }
  0xd8   : > { %1859 = vrot.lane.b32.xlu1 %v10030_v14, %s14277_s24  ;;  %2117 = vrot.lane.b32.xlu0 %v2045_v15, %s14277_s24 }
  0xdc   : > { %1861 = vrot.lane.b32.xlu1 %v10037_v38, %s14277_s24  ;;  %2119 = vrot.lane.b32.xlu0 %v2046_v17, %s14277_s24  ;;  %v904_v17 = vld [vmem:[%s14246_s2 + $0x230] sm:$0xff] }
  0xe0   : > { %1863 = vrot.lane.b32.xlu1 %v10044_v21, %s14277_s24  ;;  %2121 = vrot.lane.b32.xlu0 %v2047_v22, %s14277_s24 }
  0xe4   : > { %1865 = vrot.lane.b32.xlu1 %v10053_v24, %s14277_s24  ;;  %2123 = vrot.lane.b32.xlu0 %v2048_v25, %s14277_s24  ;;  %v10162_v25 = vld [vmem:[#allocation3 + $0x6a] sm:$0xff] }
  0xe5   : > { %2014 = vst.msk [vmem:[#allocation5 + $0x170] sm:$0xff] %vm487_vm0, %v10162_v25 }
  0xe8   : > { %1867 = vrot.lane.b32.xlu1 %v10062_v29, %s14277_s24  ;;  %2125 = vrot.lane.b32.xlu0 %v2049_v30, %s14277_s24  ;;  %v10169_v30 = vld [vmem:[#allocation3 + $0xd9] sm:$0xff] }
  0xec   : > { %1869 = vrot.lane.b32.xlu1 %v10076_v47, %s14277_s24  ;;  %2127 = vrot.lane.b32.xlu0 %v9921_v32, %s14277_s24  ;;  %v10100_v32 = vld [vmem:[#allocation3 + $0xa9] sm:$0xff] }
  0xee   : > { %v620_v41 = vpop.permute.xlu1 %619  ;;  %v618_v49 = vpop.permute.xlu0 %617 }
  0xef   : > { %642 = vst.msk [vmem:[#allocation4 + $0x30] sm:$0xff] %vm576_vm3, %v620_v41  ;;  %641 = vst.msk [vmem:[#allocation4 + $0x8] sm:$0xff] %vm576_vm3, %v618_v49  ;;  %v10175_v41 = vld [vmem:[#allocation3 + $0x7a] sm:$0xff] }
  0xf0   : > { %1871 = vrot.lane.b32.xlu1 %v10087_v37, %s14277_s24  ;;  %2129 = vrot.lane.b32.xlu0 %v9926_v48, %s14277_s24  ;;  %v901_v48 = vld [vmem:[%s14246_s2 + $0x218] sm:$0xff]  ;;  %2015 = vst.msk [vmem:[#allocation5 + $0x198] sm:$0xff] %vm487_vm0, %v10175_v41 }
  0xf1   : > { %v8288_v2 = vpack.c.bf16 %v901_v48, %v900_v58  ;;  %v1727_v49 = vld [vmem:[#allocation3 + $0x78] sm:$0xff]  ;;  %v9151_v48 = vmov 0.0|0.0  }
  0xf2   : > { %v622_v57 = vpop.permute.xlu0 %621  ;;  %v555_v53 = vpop.permute.xlu1 %554  ;;  %1759 = vst.msk [vmem:[#allocation5 + $0x190] sm:$0xff] %vm487_vm0, %v1727_v49 }
  0xf3   : > { %643 = vst.msk [vmem:[#allocation4 + $0x58] sm:$0xff] %vm576_vm3, %v622_v57  ;;  %578 = vst.msk [vmem:[#allocation4 + $0x28] sm:$0xff] %vm576_vm3, %v555_v53 }
  0xf4   : > { %1873 = vrot.lane.b32.xlu1 %v10100_v32, %s14277_s24  ;;  %2131 = vrot.lane.b32.xlu0 %v9938_v36, %s14277_s24  ;;  %v794_v36 = vld [vmem:[#allocation4] sm:$0xff] }
  0xf6   : > { %v624_v62 = vpop.permute.xlu0 %623  ;;  %v557_v63 = vpop.permute.xlu1 %556  ;;  %v795_v0 = vld [vmem:[#allocation4 + $0x8] sm:$0xff]  ;;  %v800_v7 = vld [vmem:[#allocation4 + $0x30] sm:$0xff] }
  0xf7   : > { %644 = vst.msk [vmem:[#allocation4 + $0x80] sm:$0xff] %vm576_vm3, %v624_v62  ;;  %579 = vst.msk [vmem:[#allocation4 + $0x50] sm:$0xff] %vm576_vm3, %v557_v63  ;;  %1001 = vmatprep.mubr.f32.mxu0 %v795_v0  ;;  %v1728_v62 = vld [vmem:[#allocation3 + $0x80] sm:$0xff]  ;;  %v10196_v63 = vld [vmem:[#allocation3 + $0xf1] sm:$0xff] }
  0xf8   : > { %1002 = vmatmul.mubr.f32.vlgmr.msra.gmra.mrb[0].mxu0 %v794_v36  ;;  %1875 = vrot.lane.b32.xlu1 %v10119_v61, %s14277_s24  ;;  %1760 = vst.msk [vmem:[#allocation5 + $0x1b8] sm:$0xff] %vm487_vm0, %v1728_v62  ;;  %v1729_v36 = vld [vmem:[#allocation3 + $0x90] sm:$0xff] }
  0xf9   : > { %1006 = vmatprep.mubr.f32.mxu0 %v800_v7  ;;  %8287 = vmatpush3.bf16.msra.mxu0 %v9896_v26  ;;  %v905_v26 = vld [vmem:[%s14246_s2 + $0x238] sm:$0xff]  ;;  %1761 = vst.msk [vmem:[#allocation5 + $0x1e0] sm:$0xff] %vm487_vm0, %v1729_v36  ;;  %v10263_v36 = vld [vmem:[#allocation3 + $0xca] sm:$0xff] }
  0xfa   : > { %v559_v10 = vpop.permute.xlu0 %558  ;;  %v747_v12 = vpop.permute.xlu1 %746  ;;  %v799_v13 = vld [vmem:[#allocation4 + $0x28] sm:$0xff]  ;;  %v805_v15 = vld [vmem:[#allocation4 + $0x58] sm:$0xff]  ;;  %8289 = vmatprep.subr.bf16.mxu0 %v8288_v2  ;;  %2133 = vrot.lane.b32.xlu0 %v9951_v50, %s14277_s24  ;;  %v8296_v23 = vpack.c.bf16 %v905_v26, %v904_v17  ;;  %2022 = vst.msk [vmem:[#allocation5 + $0x2b0] sm:$0xff] %vm487_vm0, %v10263_v36 }
  0xfb   : > { %580 = vst.msk [vmem:[#allocation4 + $0x78] sm:$0xff] %vm576_vm3, %v559_v10  ;;  %770 = vst.msk [vmem:[#allocation4 + $0x18] sm:$0xff] %vm576_vm3, %v747_v12  ;;  %v10156_v50 = vld [vmem:[#allocation3 + $0xc9] sm:$0xff] }
  0xfc   : > { %1007 = vmatmul.mubr.f32.gmra.mrb[2].mxu0 %v799_v13  ;;  %1877 = vrot.lane.b32.xlu1 %v10137_v9, %s14277_s24  ;;  %v10215_v13 = vld [vmem:[#allocation3 + $0x9a] sm:$0xff] }
  0xfd   : > { %1011 = vmatprep.mubr.f32.mxu0 %v805_v15  ;;  %8291 = vmatpush3.bf16.msra.mxu0 %v8288_v2  ;;  %v1730_v15 = vld [vmem:[#allocation3 + $0x98] sm:$0xff]  ;;  %2018 = vst.msk [vmem:[#allocation5 + $0x210] sm:$0xff] %vm487_vm0, %v10215_v13 }
  0xfe   : > { %v626_v20 = vpop.permute.xlu0 %625  ;;  %v682_v22 = vpop.permute.xlu1 %681  ;;  %v804_v43 = vld [vmem:[#allocation4 + $0x50] sm:$0xff]  ;;  %v810_v44 = vld [vmem:[#allocation4 + $0x80] sm:$0xff]  ;;  %8293 = vmatprep.subr.bf16.mxu0 %v8292_v16  ;;  %2135 = vrot.lane.b32.xlu0 %v9960_v55, %s14277_s24  ;;  %1762 = vst.msk [vmem:[#allocation5 + $0x208] sm:$0xff] %vm487_vm0, %v1730_v15 }
  0xff   : > { %645 = vst.msk [vmem:[#allocation4 + $0xa8] sm:$0xff] %vm576_vm3, %v626_v20  ;;  %705 = vst.msk [vmem:[#allocation4 + $0x10] sm:$0xff] %vm576_vm3, %v682_v22  ;;  %v10228_v20 = vld [vmem:[#allocation3 + $0xaa] sm:$0xff] }
 0x100   : > { %1012 = vmatmul.mubr.f32.gmra.mrb[4].mxu0 %v804_v43  ;;  %1879 = vrot.lane.b32.xlu1 %v10156_v50, %s14277_s24  ;;  %v1731_v22 = vld [vmem:[#allocation3 + $0xa8] sm:$0xff]  ;;  %2019 = vst.msk [vmem:[#allocation5 + $0x238] sm:$0xff] %vm487_vm0, %v10228_v20  ;;  %v10235_v43 = vld [vmem:[#allocation3 + $0x111] sm:$0xff] }
 0x101   : > { %1016 = vmatprep.mubr.f32.mxu0 %v810_v44  ;;  %8295 = vmatpush3.bf16.msra.mxu0 %v8292_v16  ;;  %v10222_v16 = vld [vmem:[#allocation3 + $0x109] sm:$0xff]  ;;  %1763 = vst.msk [vmem:[#allocation5 + $0x230] sm:$0xff] %vm487_vm0, %v1731_v22  ;;  %v10280_v22 = vld [vmem:[#allocation3 + $0xda] sm:$0xff] }
 0x102   : > { %v561_v55 = vpop.permute.xlu0 %560  ;;  %v749_v31 = vpop.permute.xlu1 %748  ;;  %v809_v33 = vld [vmem:[#allocation4 + $0x78] sm:$0xff]  ;;  %8297 = vmatprep.subr.bf16.mxu0 %v8296_v23  ;;  %2137 = vrot.lane.b32.xlu0 %v9962_v51, %s14277_s24  ;;  %2023 = vst.msk [vmem:[#allocation5 + $0x2d8] sm:$0xff] %vm487_vm0, %v10280_v22 }
 0x103   : > { %v797_v34 = vld [vmem:[#allocation4 + $0x18] sm:$0xff]  ;;  %581 = vst.msk [vmem:[#allocation4 + $0xa0] sm:$0xff] %vm576_vm3, %v561_v55  ;;  %771 = vst.msk [vmem:[#allocation4 + $0x40] sm:$0xff] %vm576_vm3, %v749_v31  ;;  %v2061_v55 = vld [vmem:[#allocation3 + $0x138] sm:$0xff] }
 0x104   : > { %1106 = vmatprep.mubr.f32.mxu1 %v797_v34  ;;  %1017 = vmatmul.mubr.f32.gmra.mrb[6].mxu0 %v809_v33  ;;  %v10241_v31 = vld [vmem:[#allocation3 + $0xb2] sm:$0xff]  ;;  %v10247_v33 = vld [vmem:[#allocation3 + $0x121] sm:$0xff] }
 0x105   : > { %1881 = vrot.lane.b32.xlu1 %v10169_v30, %s14277_s24  ;;  %8299 = vmatpush3.bf16.msra.mxu0 %v8296_v23  ;;  %2020 = vst.msk [vmem:[#allocation5 + $0x260] sm:$0xff] %vm487_vm0, %v10241_v31 }
 0x106   : > { %v628_v51 = vpop.permute.xlu0 %627  ;;  %v684_v57 = vpop.permute.xlu1 %683  ;;  %v815_v53 = vld [vmem:[#allocation4 + $0xa8] sm:$0xff]  ;;  %v796_v58 = vld [vmem:[#allocation4 + $0x10] sm:$0xff]  ;;  %8316 = vmatprep.subr.bf16.mxu0 %v9151_v48  ;;  %2139 = vrot.lane.b32.xlu0 %v9968_v56, %s14277_s24 }
 0x107   : > { %646 = vst.msk [vmem:[#allocation4 + $0xd0] sm:$0xff] %vm576_vm3, %v628_v51  ;;  %706 = vst.msk [vmem:[#allocation4 + $0x38] sm:$0xff] %vm576_vm3, %v684_v57  ;;  %1021 = vmatprep.mubr.f32.mxu0 %v815_v53  ;;  %1107 = vmatmul.mubr.f32.vlgmr.msra.gmra.mrb[0].mxu1 %v796_v58  ;;  %v2062_v57 = vld [vmem:[#allocation3 + $0x140] sm:$0xff]  ;;  %v10258_v58 = vld [vmem:[#allocation3 + $0x129] sm:$0xff] }
 0x108   : > { %v10252_v53 = vld [vmem:[#allocation3 + $0xc2] sm:$0xff] }
 0x109   : > { %1883 = vrot.lane.b32.xlu1 %v10182_v52, %s14277_s24  ;;  %2021 = vst.msk [vmem:[#allocation5 + $0x288] sm:$0xff] %vm487_vm0, %v10252_v53 }
 0x10a   : > { %v563_v56 = vpop.permute.xlu0 %562  ;;  %v751_v0 = vpop.permute.xlu1 %750  ;;  %v814_v2 = vld [vmem:[#allocation4 + $0xa0] sm:$0xff]  ;;  %2141 = vrot.lane.b32.xlu0 %v9977_v59, %s14277_s24 }
 0x10b   : > { %v802_v3 = vld [vmem:[#allocation4 + $0x40] sm:$0xff]  ;;  %582 = vst.msk [vmem:[#allocation4 + $0xc8] sm:$0xff] %vm576_vm3, %v563_v56  ;;  %772 = vst.msk [vmem:[#allocation4 + $0x68] sm:$0xff] %vm576_vm3, %v751_v0  ;;  %1022 = vmatmul.mubr.f32.gmra.mrb[8].mxu0 %v814_v2 }
 0x10c   : > { %1111 = vmatprep.mubr.f32.mxu1 %v802_v3  ;;  %v2063_v3 = vld [vmem:[#allocation3 + $0x150] sm:$0xff] }
 0x10d   : > { %1885 = vrot.lane.b32.xlu1 %v10196_v63, %s14277_s24 }
 0x10e   : > { %v630_v59 = vpop.permute.xlu0 %629  ;;  %v686_v7 = vpop.permute.xlu1 %685  ;;  %v820_v10 = vld [vmem:[#allocation4 + $0xd0] sm:$0xff]  ;;  %v801_v12 = vld [vmem:[#allocation4 + $0x38] sm:$0xff]  ;;  %2143 = vrot.lane.b32.xlu0 %v9985_v54, %s14277_s24 }
 0x10f   : > { %647 = vst.msk [vmem:[#allocation4 + $0xf8] sm:$0xff] %vm576_vm3, %v630_v59  ;;  %707 = vst.msk [vmem:[#allocation4 + $0x60] sm:$0xff] %vm576_vm3, %v686_v7  ;;  %1026 = vmatprep.mubr.f32.mxu0 %v820_v10  ;;  %1112 = vmatmul.mubr.f32.gmra.mrb[2].mxu1 %v801_v12  ;;  %v798_v59 = vld [vmem:[#allocation4 + $0x20] sm:$0xff]  ;;  %v2966_v7 = vld [vmem:[%s14248_s4] sm:$0xff] }
 0x110   : > { %v2967_v10 = vld [vmem:[%s14248_s4 + $0x8] sm:$0xff]  ;;  %v10275_v12 = vld [vmem:[#allocation3 + $0x139] sm:$0xff] }
 0x111   : > { %1887 = vrot.lane.b32.xlu1 %v10209_v40, %s14277_s24 }
 0x112   : > { %v565_v54 = vpop.permute.xlu0 %564  ;;  %v753_v17 = vpop.permute.xlu1 %752  ;;  %v819_v26 = vld [vmem:[#allocation4 + $0xc8] sm:$0xff]  ;;  %2145 = vrot.lane.b32.xlu0 %v9993_v1, %s14277_s24 }
 0x113   : > { %v807_v19 = vld [vmem:[#allocation4 + $0x68] sm:$0xff]  ;;  %583 = vst.msk [vmem:[#allocation4 + $0xf0] sm:$0xff] %vm576_vm3, %v565_v54  ;;  %773 = vst.msk [vmem:[#allocation4 + $0x90] sm:$0xff] %vm576_vm3, %v753_v17  ;;  %1027 = vmatmul.mubr.f32.gmra.mrb[10].mxu0 %v819_v26 }
 0x114   : > { %1116 = vmatprep.mubr.f32.mxu1 %v807_v19  ;;  %v2064_v19 = vld [vmem:[#allocation3 + $0x158] sm:$0xff] }
 0x115   : > { %1889 = vrot.lane.b32.xlu1 %v10222_v16, %s14277_s24 }
 0x116   : > { %v632_v1 = vpop.permute.xlu0 %631  ;;  %v688_v44 = vpop.permute.xlu1 %687  ;;  %v825_v23 = vld [vmem:[#allocation4 + $0xf8] sm:$0xff]  ;;  %v806_v28 = vld [vmem:[#allocation4 + $0x60] sm:$0xff]  ;;  %2147 = vrot.lane.b32.xlu0 %v10001_v5, %s14277_s24 }
 0x117   : > { %648 = vst.msk [vmem:[#allocation4 + $0x120] sm:$0xff] %vm576_vm3, %v632_v1  ;;  %708 = vst.msk [vmem:[#allocation4 + $0x88] sm:$0xff] %vm576_vm3, %v688_v44  ;;  %1031 = vmatprep.mubr.f32.mxu0 %v825_v23  ;;  %1117 = vmatmul.mubr.f32.gmra.mrb[4].mxu1 %v806_v28  ;;  %v803_v1 = vld [vmem:[#allocation4 + $0x48] sm:$0xff]  ;;  %v8317_v44 = vpack.c.bf16 %v2967_v10, %v2966_v7  ;;  %v2968_v23 = vld [vmem:[%s14248_s4 + $0x10] sm:$0xff] }
 0x118   : > { %v2969_v28 = vld [vmem:[%s14248_s4 + $0x18] sm:$0xff] }
 0x119   : > { %1891 = vrot.lane.b32.xlu1 %v10235_v43, %s14277_s24 }
 0x11a   : > { %v567_v34 = vpop.permute.xlu0 %566  ;;  %v755_v49 = vpop.permute.xlu1 %754  ;;  %v824_v5 = vld [vmem:[#allocation4 + $0xf0] sm:$0xff]  ;;  %2149 = vrot.lane.b32.xlu0 %v2061_v55, %s14277_s24 }
 0x11b   : > { %v812_v51 = vld [vmem:[#allocation4 + $0x90] sm:$0xff]  ;;  %584 = vst.msk [vmem:[#allocation4 + $0x118] sm:$0xff] %vm576_vm3, %v567_v34  ;;  %774 = vst.msk [vmem:[#allocation4 + $0xb8] sm:$0xff] %vm576_vm3, %v755_v49  ;;  %1032 = vmatmul.mubr.f32.gmra.mrb[12].mxu0 %v824_v5 }
 0x11c   : > { %1121 = vmatprep.mubr.f32.mxu1 %v812_v51  ;;  %v808_v51 = vld [vmem:[#allocation4 + $0x70] sm:$0xff] }
 0x11d   : > { %1893 = vrot.lane.b32.xlu1 %v10247_v33, %s14277_s24 }
 0x11e   : > { %v690_v62 = vpop.permute.xlu1 %689  ;;  %v830_v56 = vld [vmem:[#allocation4 + $0x120] sm:$0xff]  ;;  %v811_v0 = vld [vmem:[#allocation4 + $0x88] sm:$0xff]  ;;  %v757_v2 = vpop.permute.xlu0 %756  ;;  %2151 = vrot.lane.b32.xlu0 %v2062_v57, %s14277_s24  ;;  %v10297_v57 = vld [vmem:[#allocation3 + $0x141] sm:$0xff] }
 0x11f   : > { %709 = vst.msk [vmem:[#allocation4 + $0xb0] sm:$0xff] %vm576_vm3, %v690_v62  ;;  %1036 = vmatprep.mubr.f32.mxu0 %v830_v56  ;;  %1122 = vmatmul.mubr.f32.gmra.mrb[6].mxu1 %v811_v0  ;;  %775 = vst.msk [vmem:[#allocation4 + $0xe0] sm:$0xff] %vm576_vm3, %v757_v2  ;;  %v2065_v62 = vld [vmem:[#allocation3 + $0x168] sm:$0xff]  ;;  %v8320_v2 = vpack.c.bf16 %v2969_v28, %v2968_v23  ;;  %v2972_v28 = vld [vmem:[%s14248_s4 + $0x30] sm:$0xff] }
 0x120   : > { %v10299_v56 = vld [vmem:[#allocation3 + $0xe2] sm:$0xff] }
 0x121   : > { %1895 = vrot.lane.b32.xlu1 %v10258_v58, %s14277_s24  ;;  %v813_v0 = vld [vmem:[#allocation4 + $0x98] sm:$0xff]  ;;  %2024 = vst.msk [vmem:[#allocation5 + $0x300] sm:$0xff] %vm487_vm0, %v10299_v56 }
 0x122   : > { %v692_v15 = vpop.permute.xlu1 %691  ;;  %v829_v54 = vld [vmem:[#allocation4 + $0x118] sm:$0xff]  ;;  %v759_v17 = vpop.permute.xlu0 %758  ;;  %2153 = vrot.lane.b32.xlu0 %v2063_v3, %s14277_s24  ;;  %v2970_v3 = vld [vmem:[%s14248_s4 + $0x20] sm:$0xff] }
 0x123   : > { %v817_v26 = vld [vmem:[#allocation4 + $0xb8] sm:$0xff]  ;;  %710 = vst.msk [vmem:[#allocation4 + $0xd8] sm:$0xff] %vm576_vm3, %v692_v15  ;;  %1037 = vmatmul.mubr.f32.gmra.mrb[14].mxu0 %v829_v54  ;;  %776 = vst.msk [vmem:[#allocation4 + $0x108] sm:$0xff] %vm576_vm3, %v759_v17  ;;  %v818_v54 = vld [vmem:[#allocation4 + $0xc0] sm:$0xff] }
 0x124   : > { %1126 = vmatprep.mubr.f32.mxu1 %v817_v26  ;;  %7920 = vmatprep.mubr.msk.f32.mxu0 %vm487_vm0, %v798_v59  ;;  %v2971_v59 = vld [vmem:[%s14248_s4 + $0x28] sm:$0xff]  ;;  %v10316_v26 = vld [vmem:[#allocation3 + $0x151] sm:$0xff] }
 0x125   : > { %1897 = vrot.lane.b32.xlu1 %v10275_v12, %s14277_s24  ;;  %v8323_v23 = vpack.c.bf16 %v2971_v59, %v2970_v3  ;;  %v10339_v3 = vld [vmem:[#allocation3 + $0xfa] sm:$0xff]  ;;  %v833_v59 = vld [vmem:[#allocation4 + $0x138] sm:$0xff] }
 0x126   : > { %v694_v55 = vpop.permute.xlu1 %693  ;;  %v816_v34 = vld [vmem:[#allocation4 + $0xb0] sm:$0xff]  ;;  %v761_v49 = vpop.permute.xlu0 %760  ;;  %v822_v5 = vld [vmem:[#allocation4 + $0xe0] sm:$0xff]  ;;  %2155 = vrot.lane.b32.xlu0 %v2064_v19, %s14277_s24  ;;  %2026 = vst.msk [vmem:[#allocation5 + $0x350] sm:$0xff] %vm487_vm0, %v10339_v3 }
 0x127   : > { %711 = vst.msk [vmem:[#allocation4 + $0x100] sm:$0xff] %vm576_vm3, %v694_v55  ;;  %1127 = vmatmul.mubr.f32.gmra.mrb[8].mxu1 %v816_v34  ;;  %7921 = vmatmul.mubr.msk.f32.vlgmr.msra.gmra.mrb[16].mxu0 %vm487_vm0, %v803_v1  ;;  %777 = vst.msk [vmem:[#allocation4 + $0x130] sm:$0xff] %vm576_vm3, %v761_v49  ;;  %v2066_v19 = vld [vmem:[#allocation3 + $0x170] sm:$0xff]  ;;  %v2973_v55 = vld [vmem:[%s14248_s4 + $0x38] sm:$0xff] }
 0x128   : > { %8318 = vmatpush1.bf16.msra.mxu0 %v8317_v44  ;;  %1131 = vmatprep.mubr.f32.mxu1 %v822_v5  ;;  %v10319_v1 = vld [vmem:[#allocation3 + $0xf2] sm:$0xff]  ;;  %v828_v5 = vld [vmem:[#allocation4 + $0x110] sm:$0xff] }
 0x129   : > { %7923 = vmatprep.mubr.msk.f32.mxu0 %vm487_vm0, %v808_v51  ;;  %8319 = vmatprep.subr.bf16.mxu0 %v9151_v48  ;;  %v823_v44 = vld [vmem:[#allocation4 + $0xe8] sm:$0xff]  ;;  %2025 = vst.msk [vmem:[#allocation5 + $0x328] sm:$0xff] %vm487_vm0, %v10319_v1 }
 0x12a   : > { %v696_v7 = vpop.permute.xlu1 %695  ;;  %v821_v10 = vld [vmem:[#allocation4 + $0xd8] sm:$0xff]  ;;  %v827_v15 = vld [vmem:[#allocation4 + $0x108] sm:$0xff]  ;;  %1899 = vrot.lane.b32.xlu1 %v10297_v57, %s14277_s24  ;;  %2157 = vrot.lane.b32.xlu0 %v2065_v62, %s14277_s24  ;;  %v2102_v17 = vpop.permute.xlu0 %2101 }
 0x12b   : > { %712 = vst.msk [vmem:[#allocation4 + $0x128] sm:$0xff] %vm576_vm3, %v696_v7  ;;  %1132 = vmatmul.mubr.f32.gmra.mrb[10].mxu1 %v821_v10  ;;  %7924 = vmatmul.mubr.msk.f32.gmra.mrb[18].mxu0 %vm487_vm0, %v813_v0  ;;  %2197 = vst.msk [vmem:[#allocation5 + $0x8] sm:$0xff] %vm576_vm3, %v2102_v17  ;;  %v10336_v0 = vld [vmem:[#allocation3 + $0x159] sm:$0xff]  ;;  %v8326_v7 = vpack.c.bf16 %v2973_v55, %v2972_v28  ;;  %v2068_v28 = vld [vmem:[#allocation3 + $0x188] sm:$0xff] }
 0x12c   : > { %8321 = vmatpush1.bf16.msra.mxu0 %v8320_v2  ;;  %1136 = vmatprep.mubr.f32.mxu1 %v827_v15  ;;  %v2067_v2 = vld [vmem:[#allocation3 + $0x180] sm:$0xff]  ;;  %v2975_v15 = vld [vmem:[%s14248_s4 + $0x48] sm:$0xff] }
 0x12d   : > { %7926 = vmatprep.mubr.msk.f32.mxu0 %vm487_vm0, %v818_v54  ;;  %8322 = vmatprep.subr.bf16.mxu0 %v9151_v48  ;;  %v2974_v10 = vld [vmem:[%s14248_s4 + $0x40] sm:$0xff]  ;;  %v10359_v55 = vld [vmem:[#allocation3 + $0x10a] sm:$0xff] }
 0x12e   : > { %v826_v34 = vld [vmem:[#allocation4 + $0x100] sm:$0xff]  ;;  %v832_v49 = vld [vmem:[#allocation4 + $0x130] sm:$0xff]  ;;  %1901 = vrot.lane.b32.xlu1 %v10316_v26, %s14277_s24  ;;  %v1846_v51 = vpop.permute.xlu1 %1845  ;;  %2159 = vrot.lane.b32.xlu0 %v2066_v19, %s14277_s24  ;;  %v2104_v62 = vpop.permute.xlu0 %2103  ;;  %2027 = vst.msk [vmem:[#allocation5 + $0x378] sm:$0xff] %vm487_vm0, %v10359_v55 }
 0x12f   : > { %1137 = vmatmul.mubr.f32.gmra.mrb[12].mxu1 %v826_v34  ;;  %7927 = vmatmul.mubr.msk.f32.gmra.mrb[20].mxu0 %vm487_vm0, %v823_v44  ;;  %1941 = vst.msk [vmem:[#allocation5] sm:$0xff] %vm576_vm3, %v1846_v51  ;;  %2198 = vst.msk [vmem:[#allocation5 + $0x30] sm:$0xff] %vm576_vm3, %v2104_v62  ;;  %v8329_v34 = vpack.c.bf16 %v2975_v15, %v2974_v10  ;;  %v2978_v10 = vld [vmem:[%s14248_s4 + $0x60] sm:$0xff]  ;;  %v2979_v15 = vld [vmem:[%s14248_s4 + $0x68] sm:$0xff] }
 0x130   : > { %8324 = vmatpush1.bf16.msra.mxu0 %v8323_v23  ;;  %1141 = vmatprep.mubr.f32.mxu1 %v832_v49  ;;  %v10356_v23 = vld [vmem:[#allocation3 + $0x169] sm:$0xff] }
 0x131   : > { %7929 = vmatprep.mubr.msk.f32.mxu0 %vm487_vm0, %v828_v5  ;;  %8325 = vmatprep.subr.bf16.mxu0 %v9151_v48  ;;  %v2976_v49 = vld [vmem:[%s14248_s4 + $0x50] sm:$0xff]  ;;  %v2977_v5 = vld [vmem:[%s14248_s4 + $0x58] sm:$0xff] }
 0x132   : > { %v831_v54 = vld [vmem:[#allocation4 + $0x128] sm:$0xff]  ;;  %1903 = vrot.lane.b32.xlu1 %v10336_v0, %s14277_s24  ;;  %v1848_v17 = vpop.permute.xlu1 %1847  ;;  %2161 = vrot.lane.b32.xlu0 %v2067_v2, %s14277_s24  ;;  %v2106_v19 = vpop.permute.xlu0 %2105 }
 0x133   : > { %v2807_v44 = vld [vmem:[#allocation5 + $0x8] sm:$0xff]  ;;  %1142 = vmatmul.mubr.f32.gmra.mrb[14].mxu1 %v831_v54  ;;  %7930 = vmatmul.mubr.msk.f32.gmra.mrb[22].mxu0 %vm487_vm0, %v833_v59  ;;  %1942 = vst.msk [vmem:[#allocation5 + $0x28] sm:$0xff] %vm576_vm3, %v1848_v17  ;;  %2199 = vst.msk [vmem:[#allocation5 + $0x58] sm:$0xff] %vm576_vm3, %v2106_v19  ;;  %v10391_v19 = vld [vmem:[#allocation3 + $0x122] sm:$0xff] }
 0x134   : > { %8327 = vmatpush1.bf16.msra.mxu0 %v8326_v7  ;;  %3205 = vmatprep.mubr.f32.mxu0 %v2807_v44  ;;  %v1812_v2 = vld [vmem:[#allocation3 + $0x171] sm:$0xff]  ;;  %v8332_v7 = vpack.c.bf16 %v2977_v5, %v2976_v49  ;;  %v8335_v44 = vpack.c.bf16 %v2979_v15, %v2978_v10  ;;  %2029 = vst.msk [vmem:[#allocation5 + $0x3c8] sm:$0xff] %vm487_vm0, %v10391_v19 }
 0x135   : > { %8328 = vmatprep.subr.bf16.mxu0 %v9151_v48  ;;  %v10375_v59 = vld [vmem:[#allocation3 + $0x112] sm:$0xff]  ;;  %v10408_v5 = vld [vmem:[#allocation3 + $0x12a] sm:$0xff] }
 0x136   : > { %1905 = vrot.lane.b32.xlu1 %v10356_v23, %s14277_s24  ;;  %v1850_v51 = vpop.permute.xlu1 %1849  ;;  %2163 = vrot.lane.b32.xlu0 %v2068_v28, %s14277_s24  ;;  %v2108_v62 = vpop.permute.xlu0 %2107  ;;  %2028 = vst.msk [vmem:[#allocation5 + $0x3a0] sm:$0xff] %vm487_vm0, %v10375_v59  ;;  %v2980_v28 = vld [vmem:[%s14248_s4 + $0x70] sm:$0xff]  ;;  %2030 = vst.msk [vmem:[#allocation5 + $0x3f0] sm:$0xff] %vm487_vm0, %v10408_v5  ;;  %v1743_v10 = vld [vmem:[#allocation3 + $0x138] sm:$0xff] }
 0x137   : > { %1943 = vst.msk [vmem:[#allocation5 + $0x50] sm:$0xff] %vm576_vm3, %v1850_v51  ;;  %2200 = vst.msk [vmem:[#allocation5 + $0x80] sm:$0xff] %vm576_vm3, %v2108_v62 }
 0x138   : > { %8330 = vmatpush1.bf16.msra.mxu0 %v8329_v34  ;;  %1775 = vst.msk [vmem:[#allocation5 + $0x410] sm:$0xff] %vm487_vm0, %v1743_v10  ;;  %v10479_v10 = vld [vmem:[#allocation3 + $0x15a] sm:$0xff] }
 0x139   : > { %8331 = vmatprep.subr.bf16.mxu0 %v9151_v48  ;;  %2034 = vst.msk [vmem:[#allocation5 + $0x490] sm:$0xff] %vm487_vm0, %v10479_v10 }
 0x13a   : > { %1907 = vrot.lane.b32.xlu1 %v1812_v2, %s14277_s24  ;;  %v1852_v54 = vpop.permute.xlu1 %1851  ;;  %2614 = vrot.lane.b32.xlu0 %v10009_v39, %s14277_s24  ;;  %v2110_v17 = vpop.permute.xlu0 %2109  ;;  %v2981_v39 = vld [vmem:[%s14248_s4 + $0x78] sm:$0xff] }
 0x13b   : > { %1944 = vst.msk [vmem:[#allocation5 + $0x78] sm:$0xff] %vm576_vm3, %v1852_v54  ;;  %2201 = vst.msk [vmem:[#allocation5 + $0xa8] sm:$0xff] %vm576_vm3, %v2110_v17  ;;  %v8338_v51 = vpack.c.bf16 %v2981_v39, %v2980_v28  ;;  %v1744_v28 = vld [vmem:[#allocation3 + $0x140] sm:$0xff] }
 0x13c   : > { %8333 = vmatpush1.bf16.msra.mxu0 %v8332_v7  ;;  %v10425_v7 = vld [vmem:[#allocation3 + $0x13a] sm:$0xff]  ;;  %1776 = vst.msk [vmem:[#allocation5 + $0x438] sm:$0xff] %vm487_vm0, %v1744_v28  ;;  %v1747_v28 = vld [vmem:[#allocation3 + $0x168] sm:$0xff] }
 0x13d   : > { %8334 = vmatprep.subr.bf16.mxu0 %v9151_v48  ;;  %2031 = vst.msk [vmem:[#allocation5 + $0x418] sm:$0xff] %vm487_vm0, %v10425_v7  ;;  %1779 = vst.msk [vmem:[#allocation5 + $0x4b0] sm:$0xff] %vm487_vm0, %v1747_v28 }
 0x13e   : > { %2357 = vrot.lane.b32.xlu1 %v10060_v27, %s14277_s24  ;;  %v1854_v34 = vpop.permute.xlu1 %1853  ;;  %2616 = vrot.lane.b32.xlu0 %v10016_v8, %s14277_s24  ;;  %v2112_v49 = vpop.permute.xlu0 %2111  ;;  %v2982_v27 = vld [vmem:[%s14248_s4 + $0x80] sm:$0xff]  ;;  %v2983_v8 = vld [vmem:[%s14248_s4 + $0x88] sm:$0xff] }
 0x13f   : > { %1945 = vst.msk [vmem:[#allocation5 + $0xa0] sm:$0xff] %vm576_vm3, %v1854_v34  ;;  %2202 = vst.msk [vmem:[#allocation5 + $0xd0] sm:$0xff] %vm576_vm3, %v2112_v49  ;;  %v8341_v15 = vpack.c.bf16 %v2983_v8, %v2982_v27  ;;  %v10461_v27 = vld [vmem:[#allocation3 + $0x152] sm:$0xff] }
 0x140   : > { %8336 = vmatpush1.bf16.msra.mxu0 %v8335_v44  ;;  %v10443_v44 = vld [vmem:[#allocation3 + $0x142] sm:$0xff]  ;;  %v2988_v8 = vld [vmem:[%s14248_s4 + $0xb0] sm:$0xff]  ;;  %2033 = vst.msk [vmem:[#allocation5 + $0x468] sm:$0xff] %vm487_vm0, %v10461_v27 }
 0x141   : > { %8337 = vmatprep.subr.bf16.mxu0 %v9151_v48  ;;  %2032 = vst.msk [vmem:[#allocation5 + $0x440] sm:$0xff] %vm487_vm0, %v10443_v44 }
 0x142   : > { %2359 = vrot.lane.b32.xlu1 %v10067_v42, %s14277_s24  ;;  %v1856_v62 = vpop.permute.xlu1 %1855  ;;  %2618 = vrot.lane.b32.xlu0 %v10023_v11, %s14277_s24  ;;  %v2114_v2 = vpop.permute.xlu0 %2113  ;;  %v2984_v11 = vld [vmem:[%s14248_s4 + $0x90] sm:$0xff]  ;;  %v2985_v42 = vld [vmem:[%s14248_s4 + $0x98] sm:$0xff] }
 0x143   : > { %1946 = vst.msk [vmem:[#allocation5 + $0xc8] sm:$0xff] %vm576_vm3, %v1856_v62  ;;  %2203 = vst.msk [vmem:[#allocation5 + $0xf8] sm:$0xff] %vm576_vm3, %v2114_v2  ;;  %v8344_v39 = vpack.c.bf16 %v2985_v42, %v2984_v11 }
 0x144   : > { %8339 = vmatpush1.bf16.msra.mxu0 %v8338_v51 }
 0x145   : > { %8340 = vmatprep.subr.bf16.mxu0 %v9151_v48 }
 0x146   : > { %2361 = vrot.lane.b32.xlu1 %v10078_v46, %s14277_s24  ;;  %v1858_v54 = vpop.permute.xlu1 %1857  ;;  %2620 = vrot.lane.b32.xlu0 %v10030_v14, %s14277_s24  ;;  %v2116_v17 = vpop.permute.xlu0 %2115  ;;  %v2986_v14 = vld [vmem:[%s14248_s4 + $0xa0] sm:$0xff]  ;;  %v2987_v46 = vld [vmem:[%s14248_s4 + $0xa8] sm:$0xff] }
 0x147   : > { %1947 = vst.msk [vmem:[#allocation5 + $0xf0] sm:$0xff] %vm576_vm3, %v1858_v54  ;;  %2204 = vst.msk [vmem:[#allocation5 + $0x120] sm:$0xff] %vm576_vm3, %v2116_v17  ;;  %v8347_v51 = vpack.c.bf16 %v2987_v46, %v2986_v14  ;;  %v10497_v17 = vld [vmem:[#allocation3 + $0x16a] sm:$0xff] }
 0x148   : > { %8342 = vmatpush1.bf16.msra.mxu0 %v8341_v15  ;;  %v1746_v15 = vld [vmem:[#allocation3 + $0x158] sm:$0xff]  ;;  %2035 = vst.msk [vmem:[#allocation5 + $0x4b8] sm:$0xff] %vm487_vm0, %v10497_v17 }
 0x149   : > { %8343 = vmatprep.subr.bf16.mxu0 %v9151_v48  ;;  %1778 = vst.msk [vmem:[#allocation5 + $0x488] sm:$0xff] %vm487_vm0, %v1746_v15 }
 0x14a   : > { %2363 = vrot.lane.b32.xlu1 %v10091_v45, %s14277_s24  ;;  %v1860_v34 = vpop.permute.xlu1 %1859  ;;  %2622 = vrot.lane.b32.xlu0 %v10037_v38, %s14277_s24  ;;  %v2118_v49 = vpop.permute.xlu0 %2117  ;;  %v2989_v45 = vld [vmem:[%s14248_s4 + $0xb8] sm:$0xff]  ;;  %v1745_v38 = vld [vmem:[#allocation3 + $0x150] sm:$0xff] }
 0x14b   : > { %1948 = vst.msk [vmem:[#allocation5 + $0x118] sm:$0xff] %vm576_vm3, %v1860_v34  ;;  %2205 = vst.msk [vmem:[#allocation5 + $0x148] sm:$0xff] %vm576_vm3, %v2118_v49  ;;  %v8350_v11 = vpack.c.bf16 %v2989_v45, %v2988_v8  ;;  %v10515_v34 = vld [vmem:[#allocation3 + $0x172] sm:$0xff] }
 0x14c   : > { %8345 = vmatpush1.bf16.msra.mxu0 %v8344_v39  ;;  %1777 = vst.msk [vmem:[#allocation5 + $0x460] sm:$0xff] %vm487_vm0, %v1745_v38  ;;  %2036 = vst.msk [vmem:[#allocation5 + $0x4e0] sm:$0xff] %vm487_vm0, %v10515_v34 }
 0x14d   : > { %8346 = vmatprep.subr.bf16.mxu0 %v9151_v48 }
 0x14e   : > { %2365 = vrot.lane.b32.xlu1 %v10110_v35, %s14277_s24  ;;  %v1862_v62 = vpop.permute.xlu1 %1861  ;;  %2624 = vrot.lane.b32.xlu0 %v10044_v21, %s14277_s24  ;;  %v2120_v2 = vpop.permute.xlu0 %2119  ;;  %v2990_v21 = vld [vmem:[%s14248_s4 + $0xc0] sm:$0xff]  ;;  %v2991_v35 = vld [vmem:[%s14248_s4 + $0xc8] sm:$0xff] }
 0x14f   : > { %1949 = vst.msk [vmem:[#allocation5 + $0x140] sm:$0xff] %vm576_vm3, %v1862_v62  ;;  %2206 = vst.msk [vmem:[#allocation5 + $0x170] sm:$0xff] %vm576_vm3, %v2120_v2  ;;  %v8353_v39 = vpack.c.bf16 %v2991_v35, %v2990_v21  ;;  %v2486_v62 = vld [vmem:[#allocation3 + $0x30] sm:$0xff]  ;;  %v2229_v2 = vld [vmem:[#allocation3 + $0x19] sm:$0xff] }
 0x150   : > { %8348 = vmatpush1.bf16.msra.mxu0 %v8347_v51  ;;  %v1748_v51 = vld [vmem:[#allocation3 + $0x170] sm:$0xff]  ;;  %2518 = vst.msk [vmem:[#allocation5 + $0x18] sm:$0xff] %vm487_vm0, %v2486_v62  ;;  %2261 = vst.msk [vmem:[#allocation5 + $0x10] sm:$0xff] %vm487_vm0, %v2229_v2  ;;  %v2487_v35 = vld [vmem:[#allocation3 + $0x38] sm:$0xff] }
 0x151   : > { %8349 = vmatprep.subr.bf16.mxu0 %v9151_v48  ;;  %1780 = vst.msk [vmem:[#allocation5 + $0x4d8] sm:$0xff] %vm487_vm0, %v1748_v51  ;;  %2519 = vst.msk [vmem:[#allocation5 + $0x40] sm:$0xff] %vm487_vm0, %v2487_v35  ;;  %v2816_v2 = vld [vmem:[#allocation5 + $0x50] sm:$0xff] }
 0x152   : > { %2367 = vrot.lane.b32.xlu1 %v10129_v6, %s14277_s24  ;;  %v1864_v42 = vpop.permute.xlu1 %1863  ;;  %2626 = vrot.lane.b32.xlu0 %v10053_v24, %s14277_s24  ;;  %v2122_v54 = vpop.permute.xlu0 %2121  ;;  %v2992_v24 = vld [vmem:[%s14248_s4 + $0xd0] sm:$0xff]  ;;  %v2993_v6 = vld [vmem:[%s14248_s4 + $0xd8] sm:$0xff] }
 0x153   : > { %1950 = vst.msk [vmem:[#allocation5 + $0x168] sm:$0xff] %vm576_vm3, %v1864_v42  ;;  %2207 = vst.msk [vmem:[#allocation5 + $0x198] sm:$0xff] %vm576_vm3, %v2122_v54  ;;  %v8356_v49 = vpack.c.bf16 %v2993_v6, %v2992_v24  ;;  %v2998_v42 = vld [vmem:[%s14248_s4 + $0x100] sm:$0xff]  ;;  %v2488_v6 = vld [vmem:[#allocation3 + $0x48] sm:$0xff] }
 0x154   : > { %8351 = vmatpush1.bf16.msra.mxu0 %v8350_v11  ;;  %2520 = vst.msk [vmem:[#allocation5 + $0x68] sm:$0xff] %vm487_vm0, %v2488_v6  ;;  %v2826_v6 = vld [vmem:[#allocation5 + $0xa0] sm:$0xff] }
 0x155   : > { %8352 = vmatprep.subr.bf16.mxu0 %v9151_v48 }
 0x156   : > { %2369 = vrot.lane.b32.xlu1 %v10149_v18, %s14277_s24  ;;  %v1866_v14 = vpop.permute.xlu1 %1865  ;;  %2628 = vrot.lane.b32.xlu0 %v10062_v29, %s14277_s24  ;;  %v2124_v46 = vpop.permute.xlu0 %2123  ;;  %v2994_v18 = vld [vmem:[%s14248_s4 + $0xe0] sm:$0xff]  ;;  %v2995_v29 = vld [vmem:[%s14248_s4 + $0xe8] sm:$0xff] }
 0x157   : > { %1951 = vst.msk [vmem:[#allocation5 + $0x190] sm:$0xff] %vm576_vm3, %v1866_v14  ;;  %2208 = vst.msk [vmem:[#allocation5 + $0x1c0] sm:$0xff] %vm576_vm3, %v2124_v46  ;;  %v8359_v38 = vpack.c.bf16 %v2995_v29, %v2994_v18  ;;  %v2231_v14 = vld [vmem:[#allocation3 + $0x31] sm:$0xff]  ;;  %v2812_v46 = vld [vmem:[#allocation5 + $0x30] sm:$0xff] }
 0x158   : > { %8354 = vmatpush1.bf16.msra.mxu0 %v8353_v39  ;;  %v2806_v39 = vld [vmem:[#allocation5] sm:$0xff]  ;;  %2263 = vst.msk [vmem:[#allocation5 + $0x60] sm:$0xff] %vm487_vm0, %v2231_v14  ;;  %v2811_v29 = vld [vmem:[#allocation5 + $0x28] sm:$0xff] }
 0x159   : > { %8355 = vmatprep.subr.bf16.mxu0 %v9151_v48 }
 0x15a   : > { %2371 = vrot.lane.b32.xlu1 %v10162_v25, %s14277_s24  ;;  %v1868_v8 = vpop.permute.xlu1 %1867  ;;  %2630 = vrot.lane.b32.xlu0 %v10076_v47, %s14277_s24  ;;  %v2126_v45 = vpop.permute.xlu0 %2125  ;;  %v2996_v25 = vld [vmem:[%s14248_s4 + $0xf0] sm:$0xff]  ;;  %v2997_v47 = vld [vmem:[%s14248_s4 + $0xf8] sm:$0xff] }
 0x15b   : > { %1952 = vst.msk [vmem:[#allocation5 + $0x1b8] sm:$0xff] %vm576_vm3, %v1868_v8  ;;  %2209 = vst.msk [vmem:[#allocation5 + $0x1e8] sm:$0xff] %vm576_vm3, %v2126_v45  ;;  %v8362_v21 = vpack.c.bf16 %v2997_v47, %v2996_v25  ;;  %v3002_v8 = vld [vmem:[%s14248_s4 + $0x120] sm:$0xff]  ;;  %v2489_v45 = vld [vmem:[#allocation3 + $0x50] sm:$0xff] }
 0x15c   : > { %8357 = vmatpush1.bf16.msra.mxu0 %v8356_v49  ;;  %2521 = vst.msk [vmem:[#allocation5 + $0x90] sm:$0xff] %vm487_vm0, %v2489_v45  ;;  %v3010_v45 = vld [vmem:[%s14248_s4 + $0x160] sm:$0xff] }
 0x15d   : > { %8358 = vmatprep.subr.bf16.mxu0 %v9151_v48 }
 0x15e   : > { %2373 = vrot.lane.b32.xlu1 %v10175_v41, %s14277_s24  ;;  %v1870_v15 = vpop.permute.xlu1 %1869  ;;  %2632 = vrot.lane.b32.xlu0 %v10087_v37, %s14277_s24  ;;  %v2128_v11 = vpop.permute.xlu0 %2127  ;;  %v2999_v41 = vld [vmem:[%s14248_s4 + $0x108] sm:$0xff] }
 0x15f   : > { %1953 = vst.msk [vmem:[#allocation5 + $0x1e0] sm:$0xff] %vm576_vm3, %v1870_v15  ;;  %2210 = vst.msk [vmem:[#allocation5 + $0x210] sm:$0xff] %vm576_vm3, %v2128_v11  ;;  %v2230_v37 = vld [vmem:[#allocation3 + $0x21] sm:$0xff]  ;;  %v8365_v24 = vpack.c.bf16 %v2999_v41, %v2998_v42  ;;  %v2233_v11 = vld [vmem:[#allocation3 + $0x49] sm:$0xff] }
 0x160   : > { %8360 = vmatpush1.bf16.msra.mxu0 %v8359_v38  ;;  %2262 = vst.msk [vmem:[#allocation5 + $0x38] sm:$0xff] %vm487_vm0, %v2230_v37  ;;  %v2232_v38 = vld [vmem:[#allocation3 + $0x39] sm:$0xff]  ;;  %2265 = vst.msk [vmem:[#allocation5 + $0xb0] sm:$0xff] %vm487_vm0, %v2233_v11  ;;  %v2821_v42 = vld [vmem:[#allocation5 + $0x78] sm:$0xff] }
 0x161   : > { %8361 = vmatprep.subr.bf16.mxu0 %v9151_v48  ;;  %2264 = vst.msk [vmem:[#allocation5 + $0x88] sm:$0xff] %vm487_vm0, %v2232_v38  ;;  %v2490_v15 = vld [vmem:[#allocation3 + $0x60] sm:$0xff] }
 0x162   : > { %2375 = vrot.lane.b32.xlu1 %v10189_v60, %s14277_s24  ;;  %v1872_v54 = vpop.permute.xlu1 %1871  ;;  %2634 = vrot.lane.b32.xlu0 %v10100_v32, %s14277_s24  ;;  %v2130_v28 = vpop.permute.xlu0 %2129  ;;  %v3000_v60 = vld [vmem:[%s14248_s4 + $0x110] sm:$0xff]  ;;  %v3001_v32 = vld [vmem:[%s14248_s4 + $0x118] sm:$0xff]  ;;  %2522 = vst.msk [vmem:[#allocation5 + $0xb8] sm:$0xff] %vm487_vm0, %v2490_v15 }
 0x163   : > { %1954 = vst.msk [vmem:[#allocation5 + $0x208] sm:$0xff] %vm576_vm3, %v1872_v54  ;;  %2211 = vst.msk [vmem:[#allocation5 + $0x238] sm:$0xff] %vm576_vm3, %v2130_v28  ;;  %v8368_v51 = vpack.c.bf16 %v3001_v32, %v3000_v60  ;;  %v3006_v54 = vld [vmem:[%s14248_s4 + $0x140] sm:$0xff]  ;;  %v2491_v28 = vld [vmem:[#allocation3 + $0x68] sm:$0xff] }
 0x164   : > { %8363 = vmatpush1.bf16.msra.mxu0 %v8362_v21  ;;  %v2822_v21 = vld [vmem:[#allocation5 + $0x80] sm:$0xff]  ;;  %2523 = vst.msk [vmem:[#allocation5 + $0xe0] sm:$0xff] %vm487_vm0, %v2491_v28  ;;  %v2492_v60 = vld [vmem:[#allocation3 + $0x78] sm:$0xff]  ;;  %v2235_v32 = vld [vmem:[#allocation3 + $0x61] sm:$0xff] }
 0x165   : > { %8364 = vmatprep.subr.bf16.mxu0 %v9151_v48  ;;  %2524 = vst.msk [vmem:[#allocation5 + $0x108] sm:$0xff] %vm487_vm0, %v2492_v60  ;;  %2267 = vst.msk [vmem:[#allocation5 + $0x100] sm:$0xff] %vm487_vm0, %v2235_v32  ;;  %v2494_v15 = vld [vmem:[#allocation3 + $0x90] sm:$0xff]  ;;  %v2237_v11 = vld [vmem:[#allocation3 + $0x79] sm:$0xff] }
 0x166   : > { %2377 = vrot.lane.b32.xlu1 %v10202_v4, %s14277_s24  ;;  %v1874_v49 = vpop.permute.xlu1 %1873  ;;  %2636 = vrot.lane.b32.xlu0 %v10119_v61, %s14277_s24  ;;  %v2132_v18 = vpop.permute.xlu0 %2131  ;;  %v2817_v4 = vld [vmem:[#allocation5 + $0x58] sm:$0xff]  ;;  %2526 = vst.msk [vmem:[#allocation5 + $0x158] sm:$0xff] %vm487_vm0, %v2494_v15  ;;  %2269 = vst.msk [vmem:[#allocation5 + $0x150] sm:$0xff] %vm487_vm0, %v2237_v11  ;;  %v2846_v28 = vld [vmem:[#allocation5 + $0x140] sm:$0xff] }
 0x167   : > { %3206 = vmatmul.mubr.f32.vlgmr.msra.gmra.mrb[24].mxu0 %v2806_v39  ;;  %1955 = vst.msk [vmem:[#allocation5 + $0x230] sm:$0xff] %vm576_vm3, %v1874_v49  ;;  %2212 = vst.msk [vmem:[#allocation5 + $0x260] sm:$0xff] %vm576_vm3, %v2132_v18  ;;  %v3003_v61 = vld [vmem:[%s14248_s4 + $0x128] sm:$0xff]  ;;  %v2827_v39 = vld [vmem:[#allocation5 + $0xa8] sm:$0xff] }
 0x168   : > { %3210 = vmatprep.mubr.f32.mxu0 %v2812_v46  ;;  %8366 = vmatpush1.bf16.msra.mxu0 %v8365_v24  ;;  %v8371_v47 = vpack.c.bf16 %v3003_v61, %v3002_v8  ;;  %v2832_v49 = vld [vmem:[#allocation5 + $0xd0] sm:$0xff]  ;;  %v2837_v61 = vld [vmem:[#allocation5 + $0xf8] sm:$0xff] }
 0x169   : > { %8367 = vmatprep.subr.bf16.mxu0 %v9151_v48  ;;  %v2243_v11 = vld [vmem:[#allocation3 + $0xc1] sm:$0xff] }
 0x16a   : > { %2379 = vrot.lane.b32.xlu1 %v10215_v13, %s14277_s24  ;;  %v1876_v62 = vpop.permute.xlu1 %1875  ;;  %2638 = vrot.lane.b32.xlu0 %v10137_v9, %s14277_s24  ;;  %v3004_v9 = vld [vmem:[%s14248_s4 + $0x130] sm:$0xff]  ;;  %v3005_v13 = vld [vmem:[%s14248_s4 + $0x138] sm:$0xff]  ;;  %2275 = vst.msk [vmem:[#allocation5 + $0x240] sm:$0xff] %vm487_vm0, %v2243_v11 }
 0x16b   : > { %3211 = vmatmul.mubr.f32.gmra.mrb[26].mxu0 %v2811_v29  ;;  %1956 = vst.msk [vmem:[#allocation5 + $0x258] sm:$0xff] %vm576_vm3, %v1876_v62  ;;  %v8374_v37 = vpack.c.bf16 %v3005_v13, %v3004_v9  ;;  %v2831_v29 = vld [vmem:[#allocation5 + $0xc8] sm:$0xff]  ;;  %v2836_v62 = vld [vmem:[#allocation5 + $0xf0] sm:$0xff]  ;;  %v2841_v9 = vld [vmem:[#allocation5 + $0x118] sm:$0xff] }
 0x16c   : > { %3215 = vmatprep.mubr.f32.mxu0 %v2817_v4  ;;  %v2134_v25 = vpop.permute.xlu0 %2133  ;;  %8369 = vmatpush1.bf16.msra.mxu0 %v8368_v51  ;;  %v2493_v4 = vld [vmem:[#allocation3 + $0x80] sm:$0xff] }
 0x16d   : > { %2213 = vst.msk [vmem:[#allocation5 + $0x288] sm:$0xff] %vm576_vm3, %v2134_v25  ;;  %8370 = vmatprep.subr.bf16.mxu0 %v9151_v48 }
 0x16e   : > { %2381 = vrot.lane.b32.xlu1 %v10228_v20, %s14277_s24  ;;  %v1878_v35 = vpop.permute.xlu1 %1877  ;;  %2640 = vrot.lane.b32.xlu0 %v10156_v50, %s14277_s24  ;;  %v3007_v50 = vld [vmem:[%s14248_s4 + $0x148] sm:$0xff]  ;;  %v2234_v20 = vld [vmem:[#allocation3 + $0x51] sm:$0xff]  ;;  %2525 = vst.msk [vmem:[#allocation5 + $0x130] sm:$0xff] %vm487_vm0, %v2493_v4  ;;  %v2498_v4 = vld [vmem:[#allocation3 + $0xc0] sm:$0xff] }
 0x16f   : > { %3216 = vmatmul.mubr.f32.gmra.mrb[28].mxu0 %v2816_v2  ;;  %1957 = vst.msk [vmem:[#allocation5 + $0x280] sm:$0xff] %vm576_vm3, %v1878_v35  ;;  %v8377_v46 = vpack.c.bf16 %v3007_v50, %v3006_v54 }
 0x170   : > { %3220 = vmatprep.mubr.f32.mxu0 %v2822_v21  ;;  %v2136_v41 = vpop.permute.xlu0 %2135  ;;  %8372 = vmatpush1.bf16.msra.mxu0 %v8371_v47  ;;  %2266 = vst.msk [vmem:[#allocation5 + $0xd8] sm:$0xff] %vm487_vm0, %v2234_v20  ;;  %v3012_v47 = vld [vmem:[%s14248_s4 + $0x170] sm:$0xff]  ;;  %2530 = vst.msk [vmem:[#allocation5 + $0x1f8] sm:$0xff] %vm487_vm0, %v2498_v4 }
 0x171   : > { %2214 = vst.msk [vmem:[#allocation5 + $0x2b0] sm:$0xff] %vm576_vm3, %v2136_v41  ;;  %8373 = vmatprep.subr.bf16.mxu0 %v9151_v48  ;;  %v2495_v41 = vld [vmem:[#allocation3 + $0x98] sm:$0xff]  ;;  %v3016_v20 = vld [vmem:[%s14248_s4 + $0x190] sm:$0xff] }
 0x172   : > { %2383 = vrot.lane.b32.xlu1 %v10241_v31, %s14277_s24  ;;  %v1880_v24 = vpop.permute.xlu1 %1879  ;;  %2642 = vrot.lane.b32.xlu0 %v10169_v30, %s14277_s24  ;;  %v3008_v30 = vld [vmem:[%s14248_s4 + $0x150] sm:$0xff]  ;;  %v3009_v31 = vld [vmem:[%s14248_s4 + $0x158] sm:$0xff]  ;;  %2527 = vst.msk [vmem:[#allocation5 + $0x180] sm:$0xff] %vm487_vm0, %v2495_v41  ;;  %v2501_v41 = vld [vmem:[#allocation3 + $0xe0] sm:$0xff] }
 0x173   : > { %3221 = vmatmul.mubr.f32.gmra.mrb[30].mxu0 %v2821_v42  ;;  %1958 = vst.msk [vmem:[#allocation5 + $0x2a8] sm:$0xff] %vm576_vm3, %v1880_v24  ;;  %v8380_v8 = vpack.c.bf16 %v3009_v31, %v3008_v30  ;;  %v3014_v42 = vld [vmem:[%s14248_s4 + $0x180] sm:$0xff]  ;;  %v2496_v24 = vld [vmem:[#allocation3 + $0xa8] sm:$0xff]  ;;  %v2497_v30 = vld [vmem:[#allocation3 + $0xb0] sm:$0xff] }
 0x174   : > { %3225 = vmatprep.mubr.f32.mxu0 %v2827_v39  ;;  %v2138_v14 = vpop.permute.xlu0 %2137  ;;  %8375 = vmatpush1.bf16.msra.mxu0 %v8374_v37  ;;  %v2238_v37 = vld [vmem:[#allocation3 + $0x81] sm:$0xff]  ;;  %2528 = vst.msk [vmem:[#allocation5 + $0x1a8] sm:$0xff] %vm487_vm0, %v2496_v24  ;;  %2529 = vst.msk [vmem:[#allocation5 + $0x1d0] sm:$0xff] %vm487_vm0, %v2497_v30  ;;  %v2240_v31 = vld [vmem:[#allocation3 + $0x99] sm:$0xff] }
 0x175   : > { %2215 = vst.msk [vmem:[#allocation5 + $0x2d8] sm:$0xff] %vm576_vm3, %v2138_v14  ;;  %8376 = vmatprep.subr.bf16.mxu0 %v9151_v48 }
 0x176   : > { %2385 = vrot.lane.b32.xlu1 %v10252_v53, %s14277_s24  ;;  %2644 = vrot.lane.b32.xlu0 %v10182_v52, %s14277_s24  ;;  %v3011_v52 = vld [vmem:[%s14248_s4 + $0x168] sm:$0xff]  ;;  %2270 = vst.msk [vmem:[#allocation5 + $0x178] sm:$0xff] %vm487_vm0, %v2238_v37  ;;  %2272 = vst.msk [vmem:[#allocation5 + $0x1c8] sm:$0xff] %vm487_vm0, %v2240_v31 }
 0x177   : > { %v1882_v18 = vpop.permute.xlu1 %1881  ;;  %3226 = vmatmul.mubr.f32.gmra.mrb[32].mxu0 %v2826_v6  ;;  %v2236_v53 = vld [vmem:[#allocation3 + $0x69] sm:$0xff]  ;;  %v8383_v25 = vpack.c.bf16 %v3011_v52, %v3010_v45  ;;  %v2239_v6 = vld [vmem:[#allocation3 + $0x91] sm:$0xff]  ;;  %2533 = vst.msk [vmem:[#allocation5 + $0x270] sm:$0xff] %vm487_vm0, %v2501_v41 }
 0x178   : > { %1959 = vst.msk [vmem:[#allocation5 + $0x2d0] sm:$0xff] %vm576_vm3, %v1882_v18  ;;  %3230 = vmatprep.mubr.f32.mxu0 %v2832_v49  ;;  %v2140_v51 = vpop.permute.xlu0 %2139  ;;  %8378 = vmatpush1.bf16.msra.mxu0 %v8377_v46  ;;  %v2851_v46 = vld [vmem:[#allocation5 + $0x168] sm:$0xff]  ;;  %v3018_v49 = vld [vmem:[%s14248_s4 + $0x1a0] sm:$0xff]  ;;  %v3020_v45 = vld [vmem:[%s14248_s4 + $0x1b0] sm:$0xff] }
 0x179   : > { %2216 = vst.msk [vmem:[#allocation5 + $0x300] sm:$0xff] %vm576_vm3, %v2140_v51  ;;  %8379 = vmatprep.subr.bf16.mxu0 %v9151_v48 }
 0x17a   : > { %2387 = vrot.lane.b32.xlu1 %v10263_v36, %s14277_s24  ;;  %2646 = vrot.lane.b32.xlu0 %v10196_v63, %s14277_s24  ;;  %2268 = vst.msk [vmem:[#allocation5 + $0x128] sm:$0xff] %vm487_vm0, %v2236_v53  ;;  %v2842_v36 = vld [vmem:[#allocation5 + $0x120] sm:$0xff]  ;;  %v3013_v63 = vld [vmem:[%s14248_s4 + $0x178] sm:$0xff]  ;;  %2271 = vst.msk [vmem:[#allocation5 + $0x1a0] sm:$0xff] %vm487_vm0, %v2239_v6 }
 0x17b   : > { %v1884_v38 = vpop.permute.xlu1 %1883  ;;  %3231 = vmatmul.mubr.f32.gmra.mrb[34].mxu0 %v2831_v29  ;;  %v8386_v35 = vpack.c.bf16 %v3013_v63, %v3012_v47  ;;  %v2856_v29 = vld [vmem:[#allocation5 + $0x190] sm:$0xff]  ;;  %v2861_v53 = vld [vmem:[#allocation5 + $0x1b8] sm:$0xff]  ;;  %v2867_v47 = vld [vmem:[#allocation5 + $0x1e8] sm:$0xff] }
 0x17c   : > { %1960 = vst.msk [vmem:[#allocation5 + $0x2f8] sm:$0xff] %vm576_vm3, %v1884_v38  ;;  %3235 = vmatprep.mubr.f32.mxu0 %v2837_v61  ;;  %v2142_v2 = vpop.permute.xlu0 %2141  ;;  %8381 = vmatpush1.bf16.msra.mxu0 %v8380_v8  ;;  %v2241_v61 = vld [vmem:[#allocation3 + $0xa9] sm:$0xff]  ;;  %v1260_v63 = vld [vmem:[%s14250_s6] sm:$0xff] }
 0x17d   : > { %2217 = vst.msk [vmem:[#allocation5 + $0x328] sm:$0xff] %vm576_vm3, %v2142_v2  ;;  %8382 = vmatprep.subr.bf16.mxu0 %v9151_v48  ;;  %v2499_v2 = vld [vmem:[#allocation3 + $0xc8] sm:$0xff]  ;;  %7948 = vmatprep.mubr.msk.f32.mxu1 %vm487_vm0, %v1260_v63  ;;  %v2882_v6 = vld [vmem:[#allocation5 + $0x260] sm:$0xff]  ;;  %v2508_v63 = vld [vmem:[#allocation3 + $0x138] sm:$0xff] }
 0x17e   : > { %2389 = vrot.lane.b32.xlu1 %v10280_v22, %s14277_s24  ;;  %2648 = vrot.lane.b32.xlu0 %v10209_v40, %s14277_s24  ;;  %v2847_v22 = vld [vmem:[#allocation5 + $0x148] sm:$0xff]  ;;  %v3015_v40 = vld [vmem:[%s14248_s4 + $0x188] sm:$0xff]  ;;  %2273 = vst.msk [vmem:[#allocation5 + $0x1f0] sm:$0xff] %vm487_vm0, %v2241_v61  ;;  %2531 = vst.msk [vmem:[#allocation5 + $0x220] sm:$0xff] %vm487_vm0, %v2499_v2 }
 0x17f   : > { %v1886_v21 = vpop.permute.xlu1 %1885  ;;  %3236 = vmatmul.mubr.f32.gmra.mrb[36].mxu0 %v2836_v62  ;;  %v8389_v50 = vpack.c.bf16 %v3015_v40, %v3014_v42  ;;  %v2871_v40 = vld [vmem:[#allocation5 + $0x208] sm:$0xff]  ;;  %v2249_v61 = vld [vmem:[#allocation3 + $0x109] sm:$0xff]  ;;  %2540 = vst.msk [vmem:[#allocation5 + $0x388] sm:$0xff] %vm487_vm0, %v2508_v63 }
 0x180   : > { %1961 = vst.msk [vmem:[#allocation5 + $0x320] sm:$0xff] %vm576_vm3, %v1886_v21  ;;  %3240 = vmatprep.mubr.f32.mxu0 %v2842_v36  ;;  %v2144_v13 = vpop.permute.xlu0 %2143  ;;  %8384 = vmatpush1.bf16.msra.mxu0 %v8383_v25  ;;  %v2242_v25 = vld [vmem:[#allocation3 + $0xb1] sm:$0xff]  ;;  %v2507_v2 = vld [vmem:[#allocation3 + $0x128] sm:$0xff] }
 0x181   : > { %2218 = vst.msk [vmem:[#allocation5 + $0x350] sm:$0xff] %vm576_vm3, %v2144_v13  ;;  %8385 = vmatprep.subr.bf16.mxu0 %v9151_v48  ;;  %v2500_v36 = vld [vmem:[#allocation3 + $0xd8] sm:$0xff]  ;;  %v2866_v21 = vld [vmem:[#allocation5 + $0x1e0] sm:$0xff] }
 0x182   : > { %2391 = vrot.lane.b32.xlu1 %v10299_v56, %s14277_s24  ;;  %2650 = vrot.lane.b32.xlu0 %v10222_v16, %s14277_s24  ;;  %v2852_v56 = vld [vmem:[#allocation5 + $0x170] sm:$0xff]  ;;  %v3017_v16 = vld [vmem:[%s14248_s4 + $0x198] sm:$0xff]  ;;  %2274 = vst.msk [vmem:[#allocation5 + $0x218] sm:$0xff] %vm487_vm0, %v2242_v25  ;;  %2532 = vst.msk [vmem:[#allocation5 + $0x248] sm:$0xff] %vm487_vm0, %v2500_v36 }
 0x183   : > { %v1888_v54 = vpop.permute.xlu1 %1887  ;;  %3241 = vmatmul.mubr.f32.gmra.mrb[38].mxu0 %v2841_v9  ;;  %v8392_v32 = vpack.c.bf16 %v3017_v16, %v3016_v20  ;;  %v2876_v20 = vld [vmem:[#allocation5 + $0x230] sm:$0xff]  ;;  %2281 = vst.msk [vmem:[#allocation5 + $0x330] sm:$0xff] %vm487_vm0, %v2249_v61  ;;  %v2250_v25 = vld [vmem:[#allocation3 + $0x111] sm:$0xff]  ;;  %2539 = vst.msk [vmem:[#allocation5 + $0x360] sm:$0xff] %vm487_vm0, %v2507_v2 }
 0x184   : > { %1962 = vst.msk [vmem:[#allocation5 + $0x348] sm:$0xff] %vm576_vm3, %v1888_v54  ;;  %3245 = vmatprep.mubr.f32.mxu0 %v2847_v22  ;;  %v2146_v39 = vpop.permute.xlu0 %2145  ;;  %8387 = vmatpush1.bf16.msra.mxu0 %v8386_v35  ;;  %v3025_v35 = vld [vmem:[%s14248_s4 + $0x1d8] sm:$0xff]  ;;  %v2244_v22 = vld [vmem:[#allocation3 + $0xc9] sm:$0xff]  ;;  %v2581_v36 = vld [vmem:[#allocation3 + $0x1a1] sm:$0xff] }
 0x185   : > { %2219 = vst.msk [vmem:[#allocation5 + $0x378] sm:$0xff] %vm576_vm3, %v2146_v39  ;;  %8388 = vmatprep.subr.bf16.mxu0 %v9151_v48  ;;  %v2502_v39 = vld [vmem:[#allocation3 + $0xf0] sm:$0xff] }
 0x186   : > { %2393 = vrot.lane.b32.xlu1 %v10319_v1, %s14277_s24  ;;  %2652 = vrot.lane.b32.xlu0 %v10235_v43, %s14277_s24  ;;  %v2857_v1 = vld [vmem:[#allocation5 + $0x198] sm:$0xff]  ;;  %2276 = vst.msk [vmem:[#allocation5 + $0x268] sm:$0xff] %vm487_vm0, %v2244_v22  ;;  %2534 = vst.msk [vmem:[#allocation5 + $0x298] sm:$0xff] %vm487_vm0, %v2502_v39  ;;  %v2258_v61 = vld [vmem:[#allocation3 + $0x171] sm:$0xff] }
 0x187   : > { %v1890_v14 = vpop.permute.xlu1 %1889  ;;  %3246 = vmatmul.mubr.f32.gmra.mrb[40].mxu0 %v2846_v28  ;;  %v3019_v43 = vld [vmem:[%s14248_s4 + $0x1a8] sm:$0xff]  ;;  %2282 = vst.msk [vmem:[#allocation5 + $0x358] sm:$0xff] %vm487_vm0, %v2250_v25  ;;  %v2906_v11 = vld [vmem:[#allocation5 + $0x320] sm:$0xff]  ;;  %2290 = vst.msk [vmem:[#allocation5 + $0x498] sm:$0xff] %vm487_vm0, %v2258_v61 }
 0x188   : > { %1963 = vst.msk [vmem:[#allocation5 + $0x370] sm:$0xff] %vm576_vm3, %v1890_v14  ;;  %3250 = vmatprep.mubr.f32.mxu0 %v2852_v56  ;;  %v2148_v60 = vpop.permute.xlu0 %2147  ;;  %8390 = vmatpush1.bf16.msra.mxu0 %v8389_v50  ;;  %v8395_v8 = vpack.c.bf16 %v3019_v43, %v3018_v49  ;;  %v2877_v28 = vld [vmem:[#allocation5 + $0x238] sm:$0xff]  ;;  %v2245_v50 = vld [vmem:[#allocation3 + $0xd9] sm:$0xff]  ;;  %v2886_v43 = vld [vmem:[#allocation5 + $0x280] sm:$0xff] }
 0x189   : > { %2220 = vst.msk [vmem:[#allocation5 + $0x3a0] sm:$0xff] %vm576_vm3, %v2148_v60  ;;  %8391 = vmatprep.subr.bf16.mxu0 %v9151_v48  ;;  %v2503_v14 = vld [vmem:[#allocation3 + $0xf8] sm:$0xff]  ;;  %v2881_v60 = vld [vmem:[#allocation5 + $0x258] sm:$0xff] }
 0x18a   : > { %2395 = vrot.lane.b32.xlu1 %v10339_v3, %s14277_s24  ;;  %2654 = vrot.lane.b32.xlu0 %v10247_v33, %s14277_s24  ;;  %v2862_v3 = vld [vmem:[#allocation5 + $0x1c0] sm:$0xff]  ;;  %v3021_v33 = vld [vmem:[%s14248_s4 + $0x1b8] sm:$0xff]  ;;  %2277 = vst.msk [vmem:[#allocation5 + $0x290] sm:$0xff] %vm487_vm0, %v2245_v50  ;;  %2535 = vst.msk [vmem:[#allocation5 + $0x2c0] sm:$0xff] %vm487_vm0, %v2503_v14 }
 0x18b   : > { %v1892_v18 = vpop.permute.xlu1 %1891  ;;  %3251 = vmatmul.mubr.f32.gmra.mrb[42].mxu0 %v2851_v46  ;;  %v8398_v62 = vpack.c.bf16 %v3021_v33, %v3020_v45  ;;  %v2246_v46 = vld [vmem:[#allocation3 + $0xe1] sm:$0xff]  ;;  %v2511_v50 = vld [vmem:[#allocation3 + $0x158] sm:$0xff]  ;;  %v2744_v25 = vld [vmem:[#allocation3 + $0x4a] sm:$0xff] }
 0x18c   : > { %1964 = vst.msk [vmem:[#allocation5 + $0x398] sm:$0xff] %vm576_vm3, %v1892_v18  ;;  %3255 = vmatprep.mubr.f32.mxu0 %v2857_v1  ;;  %v2150_v51 = vpop.permute.xlu0 %2149  ;;  %8393 = vmatpush1.bf16.msra.mxu0 %v8392_v32  ;;  %v2887_v1 = vld [vmem:[#allocation5 + $0x288] sm:$0xff]  ;;  %v2506_v33 = vld [vmem:[#allocation3 + $0x120] sm:$0xff] }
 0x18d   : > { %2221 = vst.msk [vmem:[#allocation5 + $0x3c8] sm:$0xff] %vm576_vm3, %v2150_v51  ;;  %8394 = vmatprep.subr.bf16.mxu0 %v9151_v48  ;;  %v2892_v51 = vld [vmem:[#allocation5 + $0x2b0] sm:$0xff] }
 0x18e   : > { %2397 = vrot.lane.b32.xlu1 %v10359_v55, %s14277_s24  ;;  %2656 = vrot.lane.b32.xlu0 %v10258_v58, %s14277_s24  ;;  %v3022_v58 = vld [vmem:[%s14248_s4 + $0x1c0] sm:$0xff]  ;;  %v3023_v55 = vld [vmem:[%s14248_s4 + $0x1c8] sm:$0xff]  ;;  %2278 = vst.msk [vmem:[#allocation5 + $0x2b8] sm:$0xff] %vm487_vm0, %v2246_v46  ;;  %2538 = vst.msk [vmem:[#allocation5 + $0x338] sm:$0xff] %vm487_vm0, %v2506_v33 }
 0x18f   : > { %v1894_v52 = vpop.permute.xlu1 %1893  ;;  %3256 = vmatmul.mubr.f32.gmra.mrb[44].mxu0 %v2856_v29  ;;  %v8401_v13 = vpack.c.bf16 %v3023_v55, %v3022_v58  ;;  %v2247_v29 = vld [vmem:[#allocation3 + $0xf1] sm:$0xff]  ;;  %2543 = vst.msk [vmem:[#allocation5 + $0x400] sm:$0xff] %vm487_vm0, %v2511_v50  ;;  %v2515_v33 = vld [vmem:[#allocation3 + $0x188] sm:$0xff]  ;;  %2776 = vst.msk [vmem:[#allocation5 + $0x70] sm:$0xff] %vm487_vm0, %v2744_v25 }
 0x190   : > { %1965 = vst.msk [vmem:[#allocation5 + $0x3c0] sm:$0xff] %vm576_vm3, %v1894_v52  ;;  %3260 = vmatprep.mubr.f32.mxu0 %v2862_v3  ;;  %v2152_v38 = vpop.permute.xlu0 %2151  ;;  %8396 = vmatpush1.bf16.msra.mxu0 %v8395_v8  ;;  %v2891_v8 = vld [vmem:[#allocation5 + $0x2a8] sm:$0xff]  ;;  %v2897_v3 = vld [vmem:[#allocation5 + $0x2d8] sm:$0xff]  ;;  %v2896_v52 = vld [vmem:[#allocation5 + $0x2d0] sm:$0xff] }
 0x191   : > { %2222 = vst.msk [vmem:[#allocation5 + $0x3f0] sm:$0xff] %vm576_vm3, %v2152_v38  ;;  %8397 = vmatprep.subr.bf16.mxu0 %v9151_v48  ;;  %v2922_v39 = vld [vmem:[#allocation5 + $0x3a0] sm:$0xff] }
 0x192   : > { %2399 = vrot.lane.b32.xlu1 %v10375_v59, %s14277_s24  ;;  %2658 = vrot.lane.b32.xlu0 %v10275_v12, %s14277_s24  ;;  %v2872_v59 = vld [vmem:[#allocation5 + $0x210] sm:$0xff]  ;;  %v3024_v12 = vld [vmem:[%s14248_s4 + $0x1d0] sm:$0xff]  ;;  %2279 = vst.msk [vmem:[#allocation5 + $0x2e0] sm:$0xff] %vm487_vm0, %v2247_v29  ;;  %2547 = vst.msk [vmem:[#allocation5 + $0x4a0] sm:$0xff] %vm487_vm0, %v2515_v33 }
 0x193   : > { %v1896_v15 = vpop.permute.xlu1 %1895  ;;  %3261 = vmatmul.mubr.f32.gmra.mrb[46].mxu0 %v2861_v53  ;;  %v8404_v54 = vpack.c.bf16 %v3025_v35, %v3024_v12  ;;  %v2509_v12 = vld [vmem:[#allocation3 + $0x140] sm:$0xff]  ;;  %v2252_v35 = vld [vmem:[#allocation3 + $0x129] sm:$0xff] }
 0x194   : > { %1966 = vst.msk [vmem:[#allocation5 + $0x3e8] sm:$0xff] %vm576_vm3, %v1896_v15  ;;  %3265 = vmatprep.mubr.f32.mxu0 %v2867_v47  ;;  %v2154_v9 = vpop.permute.xlu0 %2153  ;;  %8399 = vmatpush1.bf16.msra.mxu0 %v8398_v62  ;;  %v2902_v62 = vld [vmem:[#allocation5 + $0x300] sm:$0xff]  ;;  %v2901_v47 = vld [vmem:[#allocation5 + $0x2f8] sm:$0xff]  ;;  %v2907_v15 = vld [vmem:[#allocation5 + $0x328] sm:$0xff] }
 0x195   : > { %2223 = vst.msk [vmem:[#allocation5 + $0x418] sm:$0xff] %vm576_vm3, %v2154_v9  ;;  %8400 = vmatprep.subr.bf16.mxu0 %v9151_v48  ;;  %v2257_v29 = vld [vmem:[#allocation3 + $0x169] sm:$0xff] }
 0x196   : > { %2401 = vrot.lane.b32.xlu1 %v10391_v19, %s14277_s24  ;;  %2660 = vrot.lane.b32.xlu0 %v10297_v57, %s14277_s24  ;;  %v3026_v57 = vld [vmem:[%s14248_s4 + $0x1e0] sm:$0xff]  ;;  %v3027_v19 = vld [vmem:[%s14248_s4 + $0x1e8] sm:$0xff]  ;;  %2541 = vst.msk [vmem:[#allocation5 + $0x3b0] sm:$0xff] %vm487_vm0, %v2509_v12  ;;  %2284 = vst.msk [vmem:[#allocation5 + $0x3a8] sm:$0xff] %vm487_vm0, %v2252_v35 }
 0x197   : > { %v1898_v42 = vpop.permute.xlu1 %1897  ;;  %3266 = vmatmul.mubr.f32.gmra.mrb[48].mxu0 %v2866_v21  ;;  %v8407_v16 = vpack.c.bf16 %v3027_v19, %v3026_v57  ;;  %2289 = vst.msk [vmem:[#allocation5 + $0x470] sm:$0xff] %vm487_vm0, %v2257_v29  ;;  %v2517_v12 = vld [vmem:[#allocation3 + $0x1a0] sm:$0xff]  ;;  %v2260_v35 = vld [vmem:[#allocation3 + $0x189] sm:$0xff] }
 0x198   : > { %1967 = vst.msk [vmem:[#allocation5 + $0x410] sm:$0xff] %vm576_vm3, %v1898_v42  ;;  %3270 = vmatprep.mubr.f32.mxu0 %v2872_v59  ;;  %v2156_v37 = vpop.permute.xlu0 %2155  ;;  %8402 = vmatpush1.bf16.msra.mxu0 %v8401_v13  ;;  %v2251_v13 = vld [vmem:[#allocation3 + $0x121] sm:$0xff]  ;;  %v2911_v42 = vld [vmem:[#allocation5 + $0x348] sm:$0xff]  ;;  %v2755_v33 = vld [vmem:[#allocation3 + $0xca] sm:$0xff] }
 0x199   : > { %2224 = vst.msk [vmem:[#allocation5 + $0x440] sm:$0xff] %vm576_vm3, %v2156_v37  ;;  %8403 = vmatprep.subr.bf16.mxu0 %v9151_v48  ;;  %v2912_v59 = vld [vmem:[#allocation5 + $0x350] sm:$0xff]  ;;  %v2510_v37 = vld [vmem:[#allocation3 + $0x150] sm:$0xff] }
 0x19a   : > { %2403 = vrot.lane.b32.xlu1 %v10408_v5, %s14277_s24  ;;  %2662 = vrot.lane.b32.xlu0 %v10316_v26, %s14277_s24  ;;  %v3028_v26 = vld [vmem:[%s14248_s4 + $0x1f0] sm:$0xff]  ;;  %v3029_v5 = vld [vmem:[%s14248_s4 + $0x1f8] sm:$0xff]  ;;  %2283 = vst.msk [vmem:[#allocation5 + $0x380] sm:$0xff] %vm487_vm0, %v2251_v13  ;;  %2542 = vst.msk [vmem:[#allocation5 + $0x3d8] sm:$0xff] %vm487_vm0, %v2510_v37 }
 0x19b   : > { %3271 = vmatmul.mubr.f32.gmra.mrb[50].mxu0 %v2871_v40  ;;  %v8410_v30 = vpack.c.bf16 %v3029_v5, %v3028_v26  ;;  %v2917_v40 = vld [vmem:[#allocation5 + $0x378] sm:$0xff]  ;;  %v2926_v5 = vld [vmem:[#allocation5 + $0x3c0] sm:$0xff]  ;;  %2549 = vst.msk [vmem:[#allocation5 + $0x4f0] sm:$0xff] %vm487_vm0, %v2517_v12  ;;  %2292 = vst.msk [vmem:[#allocation5 + $0x4e8] sm:$0xff] %vm487_vm0, %v2260_v35 }
 0x19c   : > { %3275 = vmatprep.mubr.f32.mxu0 %v2877_v28  ;;  %v1900_v24 = vpop.permute.xlu1 %1899  ;;  %v2158_v56 = vpop.permute.xlu0 %2157  ;;  %8405 = vmatpush1.bf16.msra.mxu0 %v8404_v54  ;;  %v2253_v54 = vld [vmem:[#allocation3 + $0x139] sm:$0xff]  ;;  %v2512_v26 = vld [vmem:[#allocation3 + $0x168] sm:$0xff]  ;;  %2787 = vst.msk [vmem:[#allocation5 + $0x228] sm:$0xff] %vm487_vm0, %v2755_v33 }
 0x19d   : > { %1968 = vst.msk [vmem:[#allocation5 + $0x438] sm:$0xff] %vm576_vm3, %v1900_v24  ;;  %2225 = vst.msk [vmem:[#allocation5 + $0x468] sm:$0xff] %vm576_vm3, %v2158_v56  ;;  %8406 = vmatprep.subr.bf16.mxu0 %v9151_v48  ;;  %v2916_v28 = vld [vmem:[#allocation5 + $0x370] sm:$0xff]  ;;  %v2921_v24 = vld [vmem:[#allocation5 + $0x398] sm:$0xff] }
 0x19e   : > { %2405 = vrot.lane.b32.xlu1 %v10425_v7, %s14277_s24  ;;  %2664 = vrot.lane.b32.xlu0 %v10336_v0, %s14277_s24  ;;  %v2577_v0 = vld [vmem:[#allocation3 + $0x171] sm:$0xff]  ;;  %v2504_v7 = vld [vmem:[#allocation3 + $0x108] sm:$0xff]  ;;  %2285 = vst.msk [vmem:[#allocation5 + $0x3d0] sm:$0xff] %vm487_vm0, %v2253_v54  ;;  %2544 = vst.msk [vmem:[#allocation5 + $0x428] sm:$0xff] %vm487_vm0, %v2512_v26 }
 0x19f   : > { %3276 = vmatmul.mubr.f32.gmra.mrb[52].mxu0 %v2876_v20  ;;  %2536 = vst.msk [vmem:[#allocation5 + $0x2e8] sm:$0xff] %vm487_vm0, %v2504_v7  ;;  %v2254_v20 = vld [vmem:[#allocation3 + $0x141] sm:$0xff] }
 0x1a0   : > { %3280 = vmatprep.mubr.f32.mxu0 %v2882_v6  ;;  %v1902_v32 = vpop.permute.xlu1 %1901  ;;  %v2160_v49 = vpop.permute.xlu0 %2159  ;;  %8408 = vmatpush1.bf16.msra.mxu0 %v8407_v16  ;;  %2286 = vst.msk [vmem:[#allocation5 + $0x3f8] sm:$0xff] %vm487_vm0, %v2254_v20  ;;  %v2927_v6 = vld [vmem:[#allocation5 + $0x3c8] sm:$0xff]  ;;  %v2746_v13 = vld [vmem:[#allocation3 + $0x62] sm:$0xff] }
 0x1a1   : > { %1969 = vst.msk [vmem:[#allocation5 + $0x460] sm:$0xff] %vm576_vm3, %v1902_v32  ;;  %2226 = vst.msk [vmem:[#allocation5 + $0x490] sm:$0xff] %vm576_vm3, %v2160_v49  ;;  %8409 = vmatprep.subr.bf16.mxu0 %v9151_v48  ;;  %v2578_v48 = vld [vmem:[#allocation3 + $0x181] sm:$0xff]  ;;  %v2513_v49 = vld [vmem:[#allocation3 + $0x170] sm:$0xff] }
 0x1a2   : > { %2407 = vrot.lane.b32.xlu1 %v10443_v44, %s14277_s24  ;;  %2666 = vrot.lane.b32.xlu0 %v10356_v23, %s14277_s24  ;;  %v2505_v23 = vld [vmem:[#allocation3 + $0x110] sm:$0xff]  ;;  %v2248_v44 = vld [vmem:[#allocation3 + $0xf9] sm:$0xff]  ;;  %2545 = vst.msk [vmem:[#allocation5 + $0x450] sm:$0xff] %vm487_vm0, %v2513_v49  ;;  %2778 = vst.msk [vmem:[#allocation5 + $0xc0] sm:$0xff] %vm487_vm0, %v2746_v13 }
 0x1a3   : > { %3281 = vmatmul.mubr.f32.gmra.mrb[54].mxu0 %v2881_v60  ;;  %2537 = vst.msk [vmem:[#allocation5 + $0x310] sm:$0xff] %vm487_vm0, %v2505_v23  ;;  %2280 = vst.msk [vmem:[#allocation5 + $0x308] sm:$0xff] %vm487_vm0, %v2248_v44  ;;  %v2255_v60 = vld [vmem:[#allocation3 + $0x151] sm:$0xff]  ;;  %v2932_v32 = vld [vmem:[#allocation5 + $0x3f0] sm:$0xff] }
 0x1a4   : > { %3285 = vmatprep.mubr.f32.mxu0 %v2887_v1  ;;  %v1904_v31 = vpop.permute.xlu1 %1903  ;;  %v2162_v18 = vpop.permute.xlu0 %2161  ;;  %8411 = vmatpush1.bf16.msra.mxu0 %v8410_v30  ;;  %2287 = vst.msk [vmem:[#allocation5 + $0x420] sm:$0xff] %vm487_vm0, %v2255_v60  ;;  %v2256_v30 = vld [vmem:[#allocation3 + $0x159] sm:$0xff] }
 0x1a5   : > { %1970 = vst.msk [vmem:[#allocation5 + $0x488] sm:$0xff] %vm576_vm3, %v1904_v31  ;;  %2227 = vst.msk [vmem:[#allocation5 + $0x4b8] sm:$0xff] %vm576_vm3, %v2162_v18  ;;  %v2931_v1 = vld [vmem:[#allocation5 + $0x3e8] sm:$0xff]  ;;  %v2514_v18 = vld [vmem:[#allocation3 + $0x180] sm:$0xff] }
 0x1a6   : > { %2409 = vrot.lane.b32.xlu1 %v10461_v27, %s14277_s24  ;;  %2668 = vrot.lane.b32.xlu0 %v2577_v0, %s14277_s24  ;;  %v2579_v27 = vld [vmem:[#allocation3 + $0x189] sm:$0xff]  ;;  %2288 = vst.msk [vmem:[#allocation5 + $0x448] sm:$0xff] %vm487_vm0, %v2256_v30  ;;  %2546 = vst.msk [vmem:[#allocation5 + $0x478] sm:$0xff] %vm487_vm0, %v2514_v18  ;;  %v2751_v60 = vld [vmem:[#allocation3 + $0x9a] sm:$0xff] }
 0x1a7   : > { %3286 = vmatmul.mubr.f32.gmra.mrb[56].mxu0 %v2886_v43  ;;  %v2937_v43 = vld [vmem:[#allocation5 + $0x418] sm:$0xff]  ;;  %2783 = vst.msk [vmem:[#allocation5 + $0x188] sm:$0xff] %vm487_vm0, %v2751_v60  ;;  %v2753_v18 = vld [vmem:[#allocation3 + $0xb2] sm:$0xff] }
 0x1a8   : > { %3290 = vmatprep.mubr.f32.mxu0 %v2892_v51  ;;  %v1906_v45 = vpop.permute.xlu1 %1905  ;;  %v2164_v4 = vpop.permute.xlu0 %2163  ;;  %2785 = vst.msk [vmem:[#allocation5 + $0x1d8] sm:$0xff] %vm487_vm0, %v2753_v18  ;;  %v2765_v18 = vld [vmem:[#allocation3 + $0x142] sm:$0xff] }
 0x1a9   : > { %1971 = vst.msk [vmem:[#allocation5 + $0x4b0] sm:$0xff] %vm576_vm3, %v1906_v45  ;;  %2228 = vst.msk [vmem:[#allocation5 + $0x4e0] sm:$0xff] %vm576_vm3, %v2164_v4  ;;  %v2742_v4 = vld [vmem:[#allocation3 + $0x32] sm:$0xff] }
 0x1aa   : > { %2411 = vrot.lane.b32.xlu1 %v10479_v10, %s14277_s24  ;;  %2670 = vrot.lane.b32.xlu0 %v2578_v48, %s14277_s24  ;;  %v2580_v10 = vld [vmem:[#allocation3 + $0x199] sm:$0xff]  ;;  %2774 = vst.msk [vmem:[#allocation5 + $0x20] sm:$0xff] %vm487_vm0, %v2742_v4  ;;  %v2754_v4 = vld [vmem:[#allocation3 + $0xc2] sm:$0xff]  ;;  %2797 = vst.msk [vmem:[#allocation5 + $0x3b8] sm:$0xff] %vm487_vm0, %v2765_v18 }
 0x1ab   : > { %3291 = vmatmul.mubr.f32.gmra.mrb[58].mxu0 %v2891_v8  ;;  %v2936_v48 = vld [vmem:[#allocation5 + $0x410] sm:$0xff]  ;;  %v2942_v8 = vld [vmem:[#allocation5 + $0x440] sm:$0xff]  ;;  %2786 = vst.msk [vmem:[#allocation5 + $0x200] sm:$0xff] %vm487_vm0, %v2754_v4 }
 0x1ac   : > { %3295 = vmatprep.mubr.f32.mxu0 %v2897_v3  ;;  %v1908_v53 = vpop.permute.xlu1 %1907  ;;  %v2615_v38 = vpop.permute.xlu0 %2614  ;;  %v2743_v3 = vld [vmem:[#allocation3 + $0x3a] sm:$0xff]  ;;  %v2957_v54 = vld [vmem:[#allocation5 + $0x4b8] sm:$0xff] }
 0x1ad   : > { %1972 = vst.msk [vmem:[#allocation5 + $0x4d8] sm:$0xff] %vm576_vm3, %v1908_v53  ;;  %2710 = vst.msk [vmem:[#allocation5 + $0x18] sm:$0xff] %vm576_vm3, %v2615_v38 }
 0x1ae   : > { %2413 = vrot.lane.b32.xlu1 %v10497_v17, %s14277_s24  ;;  %2672 = vrot.lane.b32.xlu0 %v2579_v27, %s14277_s24  ;;  %v2323_v17 = vld [vmem:[#allocation3 + $0x182] sm:$0xff]  ;;  %2775 = vst.msk [vmem:[#allocation5 + $0x48] sm:$0xff] %vm487_vm0, %v2743_v3 }
 0x1af   : > { %3296 = vmatmul.mubr.f32.gmra.mrb[60].mxu0 %v2896_v52  ;;  %v2941_v52 = vld [vmem:[#allocation5 + $0x438] sm:$0xff] }
 0x1b0   : > { %3300 = vmatprep.mubr.f32.mxu0 %v2902_v62  ;;  %v2358_v58 = vpop.permute.xlu1 %2357  ;;  %v2617_v55 = vpop.permute.xlu0 %2616 }
 0x1b1   : > { %2453 = vst.msk [vmem:[#allocation5 + $0x10] sm:$0xff] %vm576_vm3, %v2358_v58  ;;  %2711 = vst.msk [vmem:[#allocation5 + $0x40] sm:$0xff] %vm576_vm3, %v2617_v55  ;;  %v2516_v55 = vld [vmem:[#allocation3 + $0x198] sm:$0xff] }
 0x1b2   : > { %2415 = vrot.lane.b32.xlu1 %v10515_v34, %s14277_s24  ;;  %2674 = vrot.lane.b32.xlu0 %v2580_v10, %s14277_s24  ;;  %v2324_v34 = vld [vmem:[#allocation3 + $0x18a] sm:$0xff]  ;;  %v2947_v10 = vld [vmem:[#allocation5 + $0x468] sm:$0xff]  ;;  %2548 = vst.msk [vmem:[#allocation5 + $0x4c8] sm:$0xff] %vm487_vm0, %v2516_v55 }
 0x1b3   : > { %3301 = vmatmul.mubr.f32.gmra.mrb[62].mxu0 %v2901_v47  ;;  %v2745_v47 = vld [vmem:[#allocation3 + $0x52] sm:$0xff] }
 0x1b4   : > { %3305 = vmatprep.mubr.f32.mxu0 %v2907_v15  ;;  %v2360_v21 = vpop.permute.xlu1 %2359  ;;  %v2619_v9 = vpop.permute.xlu0 %2618  ;;  %v2259_v15 = vld [vmem:[#allocation3 + $0x181] sm:$0xff]  ;;  %2777 = vst.msk [vmem:[#allocation5 + $0x98] sm:$0xff] %vm487_vm0, %v2745_v47 }
 0x1b5   : > { %2454 = vst.msk [vmem:[#allocation5 + $0x38] sm:$0xff] %vm576_vm3, %v2360_v21  ;;  %2712 = vst.msk [vmem:[#allocation5 + $0x68] sm:$0xff] %vm576_vm3, %v2619_v9  ;;  %v2952_v21 = vld [vmem:[#allocation5 + $0x490] sm:$0xff]  ;;  %v2961_v30 = vld [vmem:[#allocation5 + $0x4d8] sm:$0xff] }
 0x1b6   : > { %2417 = vrot.lane.b32.xlu1 %v2323_v17, %s14277_s24  ;;  %2676 = vrot.lane.b32.xlu0 %v2581_v36, %s14277_s24  ;;  %v2946_v36 = vld [vmem:[#allocation5 + $0x460] sm:$0xff]  ;;  %2291 = vst.msk [vmem:[#allocation5 + $0x4c0] sm:$0xff] %vm487_vm0, %v2259_v15  ;;  %v2757_v47 = vld [vmem:[#allocation3 + $0xe2] sm:$0xff] }
 0x1b7   : > { %3306 = vmatmul.mubr.f32.gmra.mrb[64].mxu0 %v2906_v11  ;;  %2789 = vst.msk [vmem:[#allocation5 + $0x278] sm:$0xff] %vm487_vm0, %v2757_v47 }
 0x1b8   : > { %3310 = vmatprep.mubr.f32.mxu0 %v2912_v59  ;;  %v2362_v41 = vpop.permute.xlu1 %2361  ;;  %v2621_v22 = vpop.permute.xlu0 %2620  ;;  %v2747_v59 = vld [vmem:[#allocation3 + $0x6a] sm:$0xff] }
 0x1b9   : > { %2455 = vst.msk [vmem:[#allocation5 + $0x60] sm:$0xff] %vm576_vm3, %v2362_v41  ;;  %2713 = vst.msk [vmem:[#allocation5 + $0x90] sm:$0xff] %vm576_vm3, %v2621_v22  ;;  %v2951_v41 = vld [vmem:[#allocation5 + $0x488] sm:$0xff] }
 0x1ba   : > { %2419 = vrot.lane.b32.xlu1 %v2324_v34, %s14277_s24  ;;  %2779 = vst.msk [vmem:[#allocation5 + $0xe8] sm:$0xff] %vm487_vm0, %v2747_v59 }
 0x1bb   : > { %3311 = vmatmul.mubr.f32.gmra.mrb[66].mxu0 %v2911_v42 }
 0x1bc   : > { %3315 = vmatprep.mubr.f32.mxu0 %v2917_v40  ;;  %v2364_v57 = vpop.permute.xlu1 %2363  ;;  %v2623_v19 = vpop.permute.xlu0 %2622  ;;  %v10883_v40 = vld [vmem:[%s14247_s3] ss:$0 sm:$0xff] }
 0x1bd   : > { %2456 = vst.msk [vmem:[#allocation5 + $0x88] sm:$0xff] %vm576_vm3, %v2364_v57  ;;  %2714 = vst.msk [vmem:[#allocation5 + $0xb8] sm:$0xff] %vm576_vm3, %v2623_v19  ;;  %v2748_v57 = vld [vmem:[#allocation3 + $0x7a] sm:$0xff] }
 0x1be   : > { %2780 = vst.msk [vmem:[#allocation5 + $0x110] sm:$0xff] %vm487_vm0, %v2748_v57  ;;  %v2761_v57 = vld [vmem:[#allocation3 + $0x112] sm:$0xff] }
 0x1bf   : > { %3316 = vmatmul.mubr.f32.gmra.mrb[68].mxu0 %v2916_v28  ;;  %2793 = vst.msk [vmem:[#allocation5 + $0x318] sm:$0xff] %vm487_vm0, %v2761_v57 }
 0x1c0   : > { %3320 = vmatprep.mubr.f32.mxu0 %v2922_v39  ;;  %v2366_v56 = vpop.permute.xlu1 %2365  ;;  %v2625_v16 = vpop.permute.xlu0 %2624  ;;  %v2749_v39 = vld [vmem:[#allocation3 + $0x82] sm:$0xff] }
 0x1c1   : > { %2457 = vst.msk [vmem:[#allocation5 + $0xb0] sm:$0xff] %vm576_vm3, %v2366_v56  ;;  %2715 = vst.msk [vmem:[#allocation5 + $0xe0] sm:$0xff] %vm576_vm3, %v2625_v16  ;;  %v2956_v56 = vld [vmem:[#allocation5 + $0x4b0] sm:$0xff] }
 0x1c2   : > { %2781 = vst.msk [vmem:[#allocation5 + $0x138] sm:$0xff] %vm487_vm0, %v2749_v39 }
 0x1c3   : > { %3321 = vmatmul.mubr.f32.gmra.mrb[70].mxu0 %v2921_v24 }
 0x1c4   : > { %3325 = vmatprep.mubr.f32.mxu0 %v2927_v6  ;;  %v2368_v14 = vpop.permute.xlu1 %2367  ;;  %v2627_v46 = vpop.permute.xlu0 %2626  ;;  %v2962_v6 = vld [vmem:[#allocation5 + $0x4e0] sm:$0xff]  ;;  %v2823_v35 = vld [vmem:[#allocation5 + $0x88] sm:$0xff] }
 0x1c5   : > { %2458 = vst.msk [vmem:[#allocation5 + $0xd8] sm:$0xff] %vm576_vm3, %v2368_v14  ;;  %2716 = vst.msk [vmem:[#allocation5 + $0x108] sm:$0xff] %vm576_vm3, %v2627_v46 }
 0x1c7   : > { %3326 = vmatmul.mubr.f32.gmra.mrb[72].mxu0 %v2926_v5  ;;  %v2750_v5 = vld [vmem:[#allocation3 + $0x92] sm:$0xff] }
 0x1c8   : > { %3330 = vmatprep.mubr.f32.mxu0 %v2932_v32  ;;  %v2370_v0 = vpop.permute.xlu1 %2369  ;;  %v2629_v7 = vpop.permute.xlu0 %2628  ;;  %2782 = vst.msk [vmem:[#allocation5 + $0x160] sm:$0xff] %vm487_vm0, %v2750_v5 }
 0x1c9   : > { %2459 = vst.msk [vmem:[#allocation5 + $0x100] sm:$0xff] %vm576_vm3, %v2370_v0  ;;  %2717 = vst.msk [vmem:[#allocation5 + $0x130] sm:$0xff] %vm576_vm3, %v2629_v7  ;;  %v2809_v0 = vld [vmem:[#allocation5 + $0x18] sm:$0xff] }
 0x1cb   : > { %3331 = vmatmul.mubr.f32.gmra.mrb[74].mxu0 %v2931_v1  ;;  %v7592_v31 = vpop.f32.mrb[0].mxu0 }
 0x1cc   : > { %v7593_v51 = vpop.f32.mrb[1].mxu0  ;;  %3335 = vmatprep.mubr.f32.mxu0 %v2937_v43  ;;  %v2372_v23 = vpop.permute.xlu1 %2371  ;;  %v2752_v43 = vld [vmem:[#allocation3 + $0xaa] sm:$0xff] }
 0x1cd   : > { %v10856_v44 = vadd.f32 %v7593_v51, %v7592_v31  ;;  %2460 = vst.msk [vmem:[#allocation5 + $0x128] sm:$0xff] %vm576_vm3, %v2372_v23  ;;  %v2631_v45 = vpop.permute.xlu0 %2630  ;;  %v2808_v23 = vld [vmem:[#allocation5 + $0x10] sm:$0xff] }
 0x1ce   : > { %2718 = vst.msk [vmem:[#allocation5 + $0x158] sm:$0xff] %vm576_vm3, %v2631_v45 }
 0x1cf   : > { %3336 = vmatmul.mubr.f32.gmra.mrb[76].mxu0 %v2936_v48  ;;  %v7595_v27 = vpop.f32.mrb[2].mxu0  ;;  %v1004_v20 = vadd.f32 %v10856_v44, %v10883_v40  ;;  %2784 = vst.msk [vmem:[#allocation5 + $0x1b0] sm:$0xff] %vm487_vm0, %v2752_v43 }
 0x1d0   : > { %3340 = vmatprep.mubr.f32.mxu0 %v2942_v8  ;;  %v7596_v53 = vpop.f32.mrb[3].mxu0  ;;  %v2374_v38 = vpop.permute.xlu1 %2373  ;;  %v2814_v8 = vld [vmem:[#allocation5 + $0x40] sm:$0xff]  ;;  %v2844_v33 = vld [vmem:[#allocation5 + $0x130] sm:$0xff] }
 0x1d1   : > { %v10864_v62 = vadd.f32 %v7596_v53, %v7595_v27  ;;  %2461 = vst.msk [vmem:[#allocation5 + $0x150] sm:$0xff] %vm576_vm3, %v2374_v38  ;;  %v2633_v2 = vpop.permute.xlu0 %2632  ;;  %v2813_v53 = vld [vmem:[#allocation5 + $0x38] sm:$0xff] }
 0x1d2   : > { %2719 = vst.msk [vmem:[#allocation5 + $0x180] sm:$0xff] %vm576_vm3, %v2633_v2  ;;  %v2756_v2 = vld [vmem:[#allocation3 + $0xda] sm:$0xff] }
 0x1d3   : > { %3341 = vmatmul.mubr.f32.gmra.mrb[78].mxu0 %v2941_v52  ;;  %v7598_v58 = vpop.f32.mrb[4].mxu0  ;;  %v1009_v51 = vadd.f32 %v10864_v62, %v10883_v40  ;;  %v2819_v62 = vld [vmem:[#allocation5 + $0x68] sm:$0xff]  ;;  %2788 = vst.msk [vmem:[#allocation5 + $0x250] sm:$0xff] %vm487_vm0, %v2756_v2 }
 0x1d4   : > { %3345 = vmatprep.mubr.f32.mxu0 %v2947_v10  ;;  %v7599_v17 = vpop.f32.mrb[5].mxu0  ;;  %v2376_v63 = vpop.permute.xlu1 %2375 }
 0x1d5   : > { %v10872_v11 = vadd.f32 %v7599_v17, %v7598_v58  ;;  %2462 = vst.msk [vmem:[#allocation5 + $0x178] sm:$0xff] %vm576_vm3, %v2376_v63  ;;  %v2635_v9 = vpop.permute.xlu0 %2634  ;;  %v2818_v17 = vld [vmem:[#allocation5 + $0x60] sm:$0xff]  ;;  %v2824_v63 = vld [vmem:[#allocation5 + $0x90] sm:$0xff] }
 0x1d6   : > { %2720 = vst.msk [vmem:[#allocation5 + $0x1a8] sm:$0xff] %vm576_vm3, %v2635_v9  ;;  %v2758_v9 = vld [vmem:[#allocation3 + $0xf2] sm:$0xff] }
 0x1d7   : > { %3346 = vmatmul.mubr.f32.gmra.mrb[80].mxu0 %v2946_v36  ;;  %v7601_v34 = vpop.f32.mrb[6].mxu0  ;;  %v1014_v55 = vadd.f32 %v10872_v11, %v10883_v40  ;;  %2790 = vst.msk [vmem:[#allocation5 + $0x2a0] sm:$0xff] %vm487_vm0, %v2758_v9 }
 0x1d8   : > { %v7602_v42 = vpop.f32.mrb[7].mxu0  ;;  %3350 = vmatprep.mubr.f32.mxu0 %v2952_v21  ;;  %v2378_v22 = vpop.permute.xlu1 %2377 }
 0x1d9   : > { %v10885_v37 = vadd.f32 %v7602_v42, %v7601_v34  ;;  %2463 = vst.msk [vmem:[#allocation5 + $0x1a0] sm:$0xff] %vm576_vm3, %v2378_v22  ;;  %v2637_v28 = vpop.permute.xlu0 %2636  ;;  %v2759_v34 = vld [vmem:[#allocation3 + $0xfa] sm:$0xff] }
 0x1da   : > { %v7648_v19 = vpop.f32.mrb[0].mxu1  ;;  %2721 = vst.msk [vmem:[#allocation5 + $0x1d0] sm:$0xff] %vm576_vm3, %v2637_v28 }
 0x1db   : > { %3351 = vmatmul.mubr.f32.gmra.mrb[82].mxu0 %v2951_v41  ;;  %v7649_v50 = vpop.f32.mrb[1].mxu1  ;;  %2791 = vst.msk [vmem:[#allocation5 + $0x2c8] sm:$0xff] %vm487_vm0, %v2759_v34  ;;  %v2829_v41 = vld [vmem:[#allocation5 + $0xb8] sm:$0xff]  ;;  %v1019_v39 = vadd.f32 %v10885_v37, %v10883_v40 }
 0x1dc   : > { %v7650_v24 = vadd.f32 %v7649_v50, %v7648_v19  ;;  %3355 = vmatprep.mubr.f32.mxu0 %v2957_v54  ;;  %v2380_v16 = vpop.permute.xlu1 %2379  ;;  %v2760_v54 = vld [vmem:[#allocation3 + $0x10a] sm:$0xff] }
 0x1dd   : > { %2464 = vst.msk [vmem:[#allocation5 + $0x1c8] sm:$0xff] %vm576_vm3, %v2380_v16  ;;  %v2639_v26 = vpop.permute.xlu0 %2638  ;;  %v2859_v18 = vld [vmem:[#allocation5 + $0x1a8] sm:$0xff] }
 0x1de   : > { %v7604_v14 = vpop.f32.mrb[8].mxu0  ;;  %v10894_v46 = vadd.f32 %v7650_v24, %v1004_v20  ;;  %2722 = vst.msk [vmem:[#allocation5 + $0x1f8] sm:$0xff] %vm576_vm3, %v2639_v26  ;;  %v2828_v20 = vld [vmem:[#allocation5 + $0xb0] sm:$0xff] }
 0x1df   : > { %3356 = vmatmul.mubr.f32.gmra.mrb[84].mxu0 %v2956_v56  ;;  %v7605_v32 = vpop.f32.mrb[9].mxu0  ;;  %2792 = vst.msk [vmem:[#allocation5 + $0x2f0] sm:$0xff] %vm487_vm0, %v2760_v54  ;;  %v2834_v56 = vld [vmem:[#allocation5 + $0xe0] sm:$0xff] }
 0x1e0   : > { %v10899_v49 = vadd.f32 %v7605_v32, %v7604_v14  ;;  %3360 = vmatprep.mubr.f32.mxu0 %v2962_v6  ;;  %v2382_v1 = vpop.permute.xlu1 %2381  ;;  %v2762_v6 = vld [vmem:[#allocation3 + $0x122] sm:$0xff]  ;;  %v2763_v14 = vld [vmem:[#allocation3 + $0x12a] sm:$0xff] }
 0x1e1   : > { %2465 = vst.msk [vmem:[#allocation5 + $0x1f0] sm:$0xff] %vm576_vm3, %v2382_v1  ;;  %v2641_v7 = vpop.permute.xlu0 %2640  ;;  %v2833_v32 = vld [vmem:[#allocation5 + $0xd8] sm:$0xff]  ;;  %v2839_v1 = vld [vmem:[#allocation5 + $0x108] sm:$0xff] }
 0x1e2   : > { %v7651_v31 = vpop.f32.mrb[2].mxu1  ;;  %2723 = vst.msk [vmem:[#allocation5 + $0x220] sm:$0xff] %vm576_vm3, %v2641_v7  ;;  %v2764_v7 = vld [vmem:[#allocation3 + $0x13a] sm:$0xff] }
 0x1e3   : > { %3361 = vmatmul.mubr.f32.gmra.mrb[86].mxu0 %v2961_v30  ;;  %v7652_v29 = vpop.f32.mrb[3].mxu1  ;;  %2794 = vst.msk [vmem:[#allocation5 + $0x340] sm:$0xff] %vm487_vm0, %v2762_v6  ;;  %2795 = vst.msk [vmem:[#allocation5 + $0x368] sm:$0xff] %vm487_vm0, %v2763_v14  ;;  %v2771_v14 = vld [vmem:[#allocation3 + $0x18a] sm:$0xff] }
 0x1e4   : > { %v7653_v48 = vadd.f32 %v7652_v29, %v7651_v31  ;;  %3430 = vmatprep.mubr.f32.mxu0 %v2809_v0  ;;  %v2384_v44 = vpop.permute.xlu1 %2383  ;;  %2796 = vst.msk [vmem:[#allocation5 + $0x390] sm:$0xff] %vm487_vm0, %v2764_v7  ;;  %2803 = vst.msk [vmem:[#allocation5 + $0x4a8] sm:$0xff] %vm487_vm0, %v2771_v14  ;;  %v1270_v14 = vld [vmem:[%s14250_s6 + $0x50] sm:$0xff] }
 0x1e5   : > { %2466 = vst.msk [vmem:[#allocation5 + $0x218] sm:$0xff] %vm576_vm3, %v2384_v44  ;;  %v2643_v45 = vpop.permute.xlu0 %2642 }
 0x1e6   : > { %v7607_v3 = vpop.f32.mrb[10].mxu0  ;;  %v10908_v27 = vadd.f32 %v7653_v48, %v1009_v51  ;;  %2724 = vst.msk [vmem:[#allocation5 + $0x248] sm:$0xff] %vm576_vm3, %v2643_v45  ;;  %v2838_v45 = vld [vmem:[#allocation5 + $0x100] sm:$0xff] }
 0x1e7   : > { %3431 = vmatmul.mubr.f32.vlgmr.msra.gmra.mrb[24].mxu0 %v2808_v23  ;;  %v7608_v61 = vpop.f32.mrb[11].mxu0  ;;  %v1024_v23 = vadd.f32 %v10899_v49, %v10883_v40  ;;  %v2767_v49 = vld [vmem:[#allocation3 + $0x15a] sm:$0xff] }
 0x1e8   : > { %v10913_v52 = vadd.f32 %v7608_v61, %v7607_v3  ;;  %3435 = vmatprep.mubr.f32.mxu0 %v2814_v8  ;;  %v2386_v38 = vpop.permute.xlu1 %2385  ;;  %2799 = vst.msk [vmem:[#allocation5 + $0x408] sm:$0xff] %vm487_vm0, %v2767_v49 }
 0x1e9   : > { %2467 = vst.msk [vmem:[#allocation5 + $0x240] sm:$0xff] %vm576_vm3, %v2386_v38  ;;  %v2645_v10 = vpop.permute.xlu0 %2644 }
 0x1ea   : > { %v7654_v25 = vpop.f32.mrb[4].mxu1  ;;  %2725 = vst.msk [vmem:[#allocation5 + $0x270] sm:$0xff] %vm576_vm3, %v2645_v10  ;;  %v1029_v47 = vadd.f32 %v10913_v52, %v10883_v40  ;;  %v2769_v52 = vld [vmem:[#allocation3 + $0x172] sm:$0xff] }
 0x1eb   : > { %3436 = vmatmul.mubr.f32.gmra.mrb[26].mxu0 %v2813_v53  ;;  %v7655_v58 = vpop.f32.mrb[5].mxu1  ;;  %2801 = vst.msk [vmem:[#allocation5 + $0x458] sm:$0xff] %vm487_vm0, %v2769_v52 }
 0x1ec   : > { %v7656_v15 = vadd.f32 %v7655_v58, %v7654_v25  ;;  %3440 = vmatprep.mubr.f32.mxu0 %v2819_v62  ;;  %v2388_v36 = vpop.permute.xlu1 %2387 }
 0x1ed   : > { %2468 = vst.msk [vmem:[#allocation5 + $0x268] sm:$0xff] %vm576_vm3, %v2388_v36  ;;  %v2647_v21 = vpop.permute.xlu0 %2646 }
 0x1ee   : > { %v7610_v13 = vpop.f32.mrb[12].mxu0  ;;  %v10922_v59 = vadd.f32 %v7656_v15, %v1014_v55  ;;  %2726 = vst.msk [vmem:[#allocation5 + $0x298] sm:$0xff] %vm576_vm3, %v2647_v21  ;;  %v2849_v21 = vld [vmem:[#allocation5 + $0x158] sm:$0xff] }
 0x1ef   : > { %3441 = vmatmul.mubr.f32.gmra.mrb[28].mxu0 %v2818_v17  ;;  %v7611_v12 = vpop.f32.mrb[13].mxu0  ;;  %v2843_v17 = vld [vmem:[#allocation5 + $0x128] sm:$0xff] }
 0x1f0   : > { %v10927_v11 = vadd.f32 %v7611_v12, %v7610_v13  ;;  %3445 = vmatprep.mubr.f32.mxu0 %v2824_v63  ;;  %v2390_v42 = vpop.permute.xlu1 %2389  ;;  %v2768_v13 = vld [vmem:[#allocation3 + $0x16a] sm:$0xff] }
 0x1f1   : > { %2469 = vst.msk [vmem:[#allocation5 + $0x290] sm:$0xff] %vm576_vm3, %v2390_v42  ;;  %v2649_v22 = vpop.permute.xlu0 %2648 }
 0x1f2   : > { %v7657_v28 = vpop.f32.mrb[6].mxu1  ;;  %2727 = vst.msk [vmem:[#allocation5 + $0x2c0] sm:$0xff] %vm576_vm3, %v2649_v22 }
 0x1f3   : > { %3446 = vmatmul.mubr.f32.gmra.mrb[30].mxu0 %v2823_v35  ;;  %v7658_v19 = vpop.f32.mrb[7].mxu1  ;;  %2800 = vst.msk [vmem:[#allocation5 + $0x430] sm:$0xff] %vm487_vm0, %v2768_v13  ;;  %v2873_v13 = vld [vmem:[#allocation5 + $0x218] sm:$0xff] }
 0x1f4   : > { %v7659_v50 = vadd.f32 %v7658_v19, %v7657_v28  ;;  %3450 = vmatprep.mubr.f32.mxu0 %v2829_v41  ;;  %v2392_v24 = vpop.permute.xlu1 %2391 }
 0x1f5   : > { %2470 = vst.msk [vmem:[#allocation5 + $0x2b8] sm:$0xff] %vm576_vm3, %v2392_v24  ;;  %v2651_v16 = vpop.permute.xlu0 %2650 }
 0x1f6   : > { %v7613_v26 = vpop.f32.mrb[14].mxu0  ;;  %v1124_v5 = vadd.f32 %v7659_v50, %v1019_v39  ;;  %2728 = vst.msk [vmem:[#allocation5 + $0x2e8] sm:$0xff] %vm576_vm3, %v2651_v16  ;;  %v2848_v39 = vld [vmem:[#allocation5 + $0x150] sm:$0xff] }
 0x1f7   : > { %3451 = vmatmul.mubr.f32.gmra.mrb[32].mxu0 %v2828_v20  ;;  %v7614_v60 = vpop.f32.mrb[15].mxu0  ;;  %v2854_v20 = vld [vmem:[#allocation5 + $0x180] sm:$0xff] }
 0x1f8   : > { %v10939_v37 = vadd.f32 %v7614_v60, %v7613_v26  ;;  %3455 = vmatprep.mubr.f32.mxu0 %v2834_v56  ;;  %v2394_v30 = vpop.permute.xlu1 %2393  ;;  %v2770_v56 = vld [vmem:[#allocation3 + $0x182] sm:$0xff] }
 0x1f9   : > { %2471 = vst.msk [vmem:[#allocation5 + $0x2e0] sm:$0xff] %vm576_vm3, %v2394_v30  ;;  %v2653_v0 = vpop.permute.xlu0 %2652 }
 0x1fa   : > { %v7660_v43 = vpop.f32.mrb[8].mxu1  ;;  %v7922_v31 = vpop.f32.mrb[16].mxu0  ;;  %2729 = vst.msk [vmem:[#allocation5 + $0x310] sm:$0xff] %vm576_vm3, %v2653_v0  ;;  %v1039_v30 = vadd.f32 %v10939_v37, %v10883_v40  ;;  %v2858_v37 = vld [vmem:[#allocation5 + $0x1a0] sm:$0xff] }
 0x1fb   : > { %v1219_v29 = vadd.f32 %v7922_v31, %v10908_v27  ;;  %3456 = vmatmul.mubr.f32.gmra.mrb[34].mxu0 %v2833_v32  ;;  %v7661_v51 = vpop.f32.mrb[9].mxu1  ;;  %v1213_v48 = vpop.f32.mrb[17].mxu0  ;;  %v2766_v27 = vld [vmem:[#allocation3 + $0x152] sm:$0xff]  ;;  %2802 = vst.msk [vmem:[#allocation5 + $0x480] sm:$0xff] %vm487_vm0, %v2770_v56  ;;  %v1268_v56 = vld [vmem:[%s14250_s6 + $0x40] sm:$0xff] }
 0x1fc   : > { %v7662_v44 = vadd.f32 %v7661_v51, %v7660_v43  ;;  %v1214_v8 = vadd.f32 %v1213_v48, %v10894_v46  ;;  %3460 = vmatprep.mubr.f32.mxu0 %v2839_v1  ;;  %v2396_v4 = vpop.permute.xlu1 %2395  ;;  %2798 = vst.msk [vmem:[#allocation5 + $0x3e0] sm:$0xff] %vm487_vm0, %v2766_v27  ;;  %v2853_v43 = vld [vmem:[#allocation5 + $0x178] sm:$0xff]  ;;  %v2772_v51 = vld [vmem:[#allocation3 + $0x19a] sm:$0xff] }
 0x1fd   : > { %v1253_v3 = vmax.f32 %v1219_v29, 0.0  ;;  %2472 = vst.msk [vmem:[#allocation5 + $0x308] sm:$0xff] %vm576_vm3, %v2396_v4  ;;  %v2655_v61 = vpop.permute.xlu0 %2654  ;;  %v3031_v4 = vld [vmem:[%s14248_s4 + $0x208] sm:$0xff] }
 0x1fe   : > { %v1252_v53 = vmax.f32 %v1214_v8, 0.0  ;;  %v7663_v38 = vpop.f32.mrb[10].mxu1  ;;  %v7925_v62 = vpop.f32.mrb[18].mxu0  ;;  %v1129_v10 = vadd.f32 %v7662_v44, %v1024_v23  ;;  %2730 = vst.msk [vmem:[#allocation5 + $0x338] sm:$0xff] %vm576_vm3, %v2655_v61  ;;  %v2773_v23 = vld [vmem:[#allocation3 + $0x1a2] sm:$0xff] }
 0x1ff   : > { %v1229_v2 = vadd.f32 %v7925_v62, %v1124_v5  ;;  %3461 = vmatmul.mubr.f32.gmra.mrb[36].mxu0 %v2838_v45  ;;  %v7664_v46 = vpop.f32.mrb[11].mxu1  ;;  %v1223_v25 = vpop.f32.mrb[19].mxu0  ;;  %2804 = vst.msk [vmem:[#allocation5 + $0x4d0] sm:$0xff] %vm487_vm0, %v2772_v51  ;;  %2805 = vst.msk [vmem:[#allocation5 + $0x4f8] sm:$0xff] %vm487_vm0, %v2773_v23  ;;  %v2864_v8 = vld [vmem:[#allocation5 + $0x1d0] sm:$0xff] }
 0x200   : > { %v8300_v58 = vpack.c.bf16 %v1253_v3, %v1252_v53  ;;  %v7665_v55 = vadd.f32 %v7664_v46, %v7663_v38  ;;  %v1224_v15 = vadd.f32 %v1223_v25, %v10922_v59  ;;  %3465 = vmatprep.mubr.f32.mxu0 %v2844_v33  ;;  %v2398_v36 = vpop.permute.xlu1 %2397  ;;  %v1034_v59 = vadd.f32 %v10927_v11, %v10883_v40  ;;  %v3030_v45 = vld [vmem:[%s14248_s4 + $0x200] sm:$0xff]  ;;  %v2863_v53 = vld [vmem:[#allocation5 + $0x1c8] sm:$0xff]  ;;  %v1261_v25 = vld [vmem:[%s14250_s6 + $0x8] sm:$0xff] }
 0x201   : > { %v1255_v63 = vmax.f32 %v1229_v2, 0.0  ;;  %2473 = vst.msk [vmem:[#allocation5 + $0x330] sm:$0xff] %vm576_vm3, %v2398_v36  ;;  %v2657_v9 = vpop.permute.xlu0 %2656  ;;  %v8412_v38 = vpack.c.bf16 %v3031_v4, %v3030_v45  ;;  %v3032_v2 = vld [vmem:[%s14248_s4 + $0x210] sm:$0xff]  ;;  %v3033_v46 = vld [vmem:[%s14248_s4 + $0x218] sm:$0xff]  ;;  %v1277_v4 = vld [vmem:[%s14250_s6 + $0x88] sm:$0xff] }
 0x202   : > { %v1254_v34 = vmax.f32 %v1224_v15, 0.0  ;;  %v7666_v12 = vpop.f32.mrb[12].mxu1  ;;  %v1134_v35 = vadd.f32 %v7665_v55, %v1029_v47  ;;  %v7928_v42 = vpop.f32.mrb[20].mxu0  ;;  %8301 = vmatprep.subr.bf16.mxu1 %v8300_v58  ;;  %2731 = vst.msk [vmem:[#allocation5 + $0x360] sm:$0xff] %vm576_vm3, %v2657_v9  ;;  %v2868_v47 = vld [vmem:[#allocation5 + $0x1f0] sm:$0xff]  ;;  %v2874_v15 = vld [vmem:[#allocation5 + $0x220] sm:$0xff] }
 0x203   : > { %3466 = vmatmul.mubr.f32.gmra.mrb[38].mxu0 %v2843_v17  ;;  %v7667_v41 = vpop.f32.mrb[13].mxu1  ;;  %v1233_v22 = vpop.f32.mrb[21].mxu0  ;;  %8303 = vmatpush3.bf16.msra.mxu1 %v8300_v58  ;;  %v1262_v58 = vld [vmem:[%s14250_s6 + $0x10] sm:$0xff]  ;;  %v8416_v17 = vpack.c.bf16 %v3033_v46, %v3032_v2  ;;  %v1263_v9 = vld [vmem:[%s14250_s6 + $0x18] sm:$0xff] }
 0x204   : > { %v8304_v54 = vpack.c.bf16 %v1255_v63, %v1254_v34  ;;  %v1239_v28 = vadd.f32 %v7928_v42, %v1134_v35  ;;  %v7668_v57 = vadd.f32 %v7667_v41, %v7666_v12  ;;  %v1234_v19 = vadd.f32 %v1233_v22, %v1129_v10  ;;  %3470 = vmatprep.mubr.f32.mxu0 %v2849_v21  ;;  %v2400_v50 = vpop.permute.xlu1 %2399  ;;  %v2869_v10 = vld [vmem:[#allocation5 + $0x1f8] sm:$0xff]  ;;  %v3034_v63 = vld [vmem:[%s14248_s4 + $0x220] sm:$0xff]  ;;  %v2879_v35 = vld [vmem:[#allocation5 + $0x248] sm:$0xff] }
 0x205   : > { %2474 = vst.msk [vmem:[#allocation5 + $0x358] sm:$0xff] %vm576_vm3, %v2400_v50  ;;  %v2659_v24 = vpop.permute.xlu0 %2658  ;;  %v3035_v21 = vld [vmem:[%s14248_s4 + $0x228] sm:$0xff]  ;;  %v1264_v34 = vld [vmem:[%s14250_s6 + $0x20] sm:$0xff]  ;;  %v3037_v41 = vld [vmem:[%s14248_s4 + $0x238] sm:$0xff] }
 0x206   : > { %v1257_v16 = vmax.f32 %v1239_v28, 0.0  ;;  %v1256_v11 = vmax.f32 %v1234_v19, 0.0  ;;  %v7669_v6 = vpop.f32.mrb[14].mxu1  ;;  %v7931_v26 = vpop.f32.mrb[22].mxu0  ;;  %8305 = vmatprep.subr.bf16.mxu1 %v8304_v54  ;;  %v1139_v5 = vadd.f32 %v7668_v57, %v1034_v59  ;;  %2732 = vst.msk [vmem:[#allocation5 + $0x388] sm:$0xff] %vm576_vm3, %v2659_v24  ;;  %v8420_v42 = vpack.c.bf16 %v3035_v21, %v3034_v63  ;;  %v3036_v59 = vld [vmem:[%s14248_s4 + $0x230] sm:$0xff] }
 0x207   : > { %3471 = vmatmul.mubr.f32.gmra.mrb[40].mxu0 %v2848_v39  ;;  %v7670_v60 = vpop.f32.mrb[15].mxu1  ;;  %v1243_v32 = vpop.f32.mrb[23].mxu0  ;;  %8307 = vmatpush3.bf16.msra.mxu1 %v8304_v54  ;;  %v1265_v22 = vld [vmem:[%s14250_s6 + $0x28] sm:$0xff]  ;;  %v2878_v54 = vld [vmem:[#allocation5 + $0x240] sm:$0xff]  ;;  %v2884_v19 = vld [vmem:[#allocation5 + $0x270] sm:$0xff]  ;;  %v8424_v50 = vpack.c.bf16 %v3037_v41, %v3036_v59 }
 0x208   : > { %v8308_v1 = vpack.c.bf16 %v1257_v16, %v1256_v11  ;;  %v7671_v0 = vadd.f32 %v7670_v60, %v7669_v6  ;;  %v1244_v7 = vadd.f32 %v1243_v32, %v1139_v5  ;;  %3475 = vmatprep.mubr.f32.mxu0 %v2854_v20  ;;  %v2402_v31 = vpop.permute.xlu1 %2401  ;;  %v1266_v28 = vld [vmem:[%s14250_s6 + $0x30] sm:$0xff]  ;;  %v1267_v20 = vld [vmem:[%s14250_s6 + $0x38] sm:$0xff]  ;;  %v2889_v11 = vld [vmem:[#allocation5 + $0x298] sm:$0xff] }
 0x209   : > { %2475 = vst.msk [vmem:[#allocation5 + $0x380] sm:$0xff] %vm576_vm3, %v2402_v31  ;;  %v2661_v29 = vpop.permute.xlu0 %2660  ;;  %v2883_v24 = vld [vmem:[#allocation5 + $0x268] sm:$0xff]  ;;  %v2888_v5 = vld [vmem:[#allocation5 + $0x290] sm:$0xff]  ;;  %v2894_v32 = vld [vmem:[#allocation5 + $0x2c0] sm:$0xff] }
 0x20a   : > { %v1144_v48 = vadd.f32 %v7671_v0, %v1039_v30  ;;  %8309 = vmatprep.subr.bf16.mxu1 %v8308_v1  ;;  %2733 = vst.msk [vmem:[#allocation5 + $0x3b0] sm:$0xff] %vm576_vm3, %v2661_v29  ;;  %v1258_v33 = vmax.f32 %v1244_v7, 0.0  ;;  %v2893_v0 = vld [vmem:[#allocation5 + $0x2b8] sm:$0xff]  ;;  %v1272_v7 = vld [vmem:[%s14250_s6 + $0x60] sm:$0xff]  ;;  %v2899_v31 = vld [vmem:[#allocation5 + $0x2e8] sm:$0xff] }
 0x20b   : > { %3476 = vmatmul.mubr.f32.gmra.mrb[42].mxu0 %v2853_v43  ;;  %8311 = vmatpush3.bf16.msra.mxu1 %v8308_v1  ;;  %v1271_v1 = vld [vmem:[%s14250_s6 + $0x58] sm:$0xff]  ;;  %v1273_v29 = vld [vmem:[%s14250_s6 + $0x68] sm:$0xff]  ;;  %v2898_v51 = vld [vmem:[#allocation5 + $0x2e0] sm:$0xff] }
 0x20c   : > { %v1249_v40 = vadd.f32 %v7931_v26, %v1144_v48  ;;  %3480 = vmatprep.mubr.f32.mxu0 %v2859_v18  ;;  %v2404_v44 = vpop.permute.xlu1 %2403  ;;  %v1269_v26 = vld [vmem:[%s14250_s6 + $0x48] sm:$0xff]  ;;  %v1274_v48 = vld [vmem:[%s14250_s6 + $0x70] sm:$0xff]  ;;  %v1287_v21 = vld [vmem:[%s14250_s6 + $0xd8] sm:$0xff] }
 0x20d   : > { %2476 = vst.msk [vmem:[#allocation5 + $0x3a8] sm:$0xff] %vm576_vm3, %v2404_v44  ;;  %v2663_v3 = vpop.permute.xlu0 %2662  ;;  %v2903_v44 = vld [vmem:[#allocation5 + $0x308] sm:$0xff]  ;;  %v2909_v45 = vld [vmem:[#allocation5 + $0x338] sm:$0xff]  ;;  %v1282_v2 = vld [vmem:[%s14250_s6 + $0xb0] sm:$0xff] }
 0x20e   : > { %v1259_v61 = vmax.f32 %v1249_v40, 0.0  ;;  %2734 = vst.msk [vmem:[#allocation5 + $0x3d8] sm:$0xff] %vm576_vm3, %v2663_v3  ;;  %v2904_v40 = vld [vmem:[#allocation5 + $0x310] sm:$0xff]  ;;  %v1291_v59 = vld [vmem:[%s14250_s6 + $0xf8] sm:$0xff] }
 0x20f   : > { %3481 = vmatmul.mubr.f32.gmra.mrb[44].mxu0 %v2858_v37  ;;  %v1275_v37 = vld [vmem:[%s14250_s6 + $0x78] sm:$0xff]  ;;  %v2908_v3 = vld [vmem:[#allocation5 + $0x330] sm:$0xff] }
 0x210   : > { %v8312_v27 = vpack.c.bf16 %v1259_v61, %v1258_v33  ;;  %3485 = vmatprep.mubr.f32.mxu0 %v2864_v8  ;;  %v2406_v62 = vpop.permute.xlu1 %2405  ;;  %v1276_v8 = vld [vmem:[%s14250_s6 + $0x80] sm:$0xff]  ;;  %v1278_v33 = vld [vmem:[%s14250_s6 + $0x90] sm:$0xff] }
 0x211   : > { %2477 = vst.msk [vmem:[#allocation5 + $0x3d0] sm:$0xff] %vm576_vm3, %v2406_v62  ;;  %v2665_v49 = vpop.permute.xlu0 %2664  ;;  %v2914_v61 = vld [vmem:[#allocation5 + $0x360] sm:$0xff]  ;;  %v2919_v62 = vld [vmem:[#allocation5 + $0x388] sm:$0xff]  ;;  %v2924_v46 = vld [vmem:[#allocation5 + $0x3b0] sm:$0xff] }
 0x212   : > { %8313 = vmatprep.subr.bf16.mxu1 %v8312_v27  ;;  %2735 = vst.msk [vmem:[#allocation5 + $0x400] sm:$0xff] %vm576_vm3, %v2665_v49  ;;  %v2918_v49 = vld [vmem:[#allocation5 + $0x380] sm:$0xff] }
 0x213   : > { %3486 = vmatmul.mubr.f32.gmra.mrb[46].mxu0 %v2863_v53  ;;  %8315 = vmatpush3.bf16.msra.mxu1 %v8312_v27  ;;  %v1279_v27 = vld [vmem:[%s14250_s6 + $0x98] sm:$0xff]  ;;  %v2913_v53 = vld [vmem:[#allocation5 + $0x358] sm:$0xff] }
 0x214   : > { %3490 = vmatprep.mubr.f32.mxu0 %v2869_v10  ;;  %8413 = vmatprep.subr.bf16.mxu1 %v8412_v38  ;;  %v2408_v55 = vpop.permute.xlu1 %2407  ;;  %v1281_v10 = vld [vmem:[%s14250_s6 + $0xa8] sm:$0xff] }
 0x215   : > { %2478 = vst.msk [vmem:[#allocation5 + $0x3f8] sm:$0xff] %vm576_vm3, %v2408_v55  ;;  %v2667_v36 = vpop.permute.xlu0 %2666  ;;  %v2929_v55 = vld [vmem:[#allocation5 + $0x3d8] sm:$0xff] }
 0x216   : > { %7949 = vmatmul.mubr.msk.f32.vlgmr.msra.gmra.mrb[16].mxu1 %vm487_vm0, %v1261_v25  ;;  %2736 = vst.msk [vmem:[#allocation5 + $0x428] sm:$0xff] %vm576_vm3, %v2667_v36  ;;  %v1283_v25 = vld [vmem:[%s14250_s6 + $0xb8] sm:$0xff]  ;;  %v1286_v36 = vld [vmem:[%s14250_s6 + $0xd0] sm:$0xff] }
 0x217   : > { %3491 = vmatmul.mubr.f32.gmra.mrb[48].mxu0 %v2868_v47  ;;  %7951 = vmatprep.mubr.msk.f32.mxu1 %vm487_vm0, %v1262_v58  ;;  %v2923_v47 = vld [vmem:[#allocation5 + $0x3a8] sm:$0xff]  ;;  %v1284_v58 = vld [vmem:[%s14250_s6 + $0xc0] sm:$0xff] }
 0x218   : > { %3495 = vmatprep.mubr.f32.mxu0 %v2874_v15  ;;  %8415 = vmatpush3.bf16.msra.mxu1 %v8412_v38  ;;  %v2410_v12 = vpop.permute.xlu1 %2409  ;;  %v1280_v38 = vld [vmem:[%s14250_s6 + $0xa0] sm:$0xff]  ;;  %v1285_v15 = vld [vmem:[%s14250_s6 + $0xc8] sm:$0xff] }
 0x219   : > { %8417 = vmatprep.subr.bf16.mxu1 %v8416_v17  ;;  %2479 = vst.msk [vmem:[#allocation5 + $0x420] sm:$0xff] %vm576_vm3, %v2410_v12  ;;  %v2669_v52 = vpop.permute.xlu0 %2668  ;;  %v2934_v63 = vld [vmem:[#allocation5 + $0x400] sm:$0xff]  ;;  %v1289_v12 = vld [vmem:[%s14250_s6 + $0xe8] sm:$0xff] }
 0x21a   : > { %7952 = vmatmul.mubr.msk.f32.gmra.mrb[18].mxu1 %vm487_vm0, %v1263_v9  ;;  %2737 = vst.msk [vmem:[#allocation5 + $0x450] sm:$0xff] %vm576_vm3, %v2669_v52 }
 0x21b   : > { %3496 = vmatmul.mubr.f32.gmra.mrb[50].mxu0 %v2873_v13  ;;  %7954 = vmatprep.mubr.msk.f32.mxu1 %vm487_vm0, %v1264_v34  ;;  %v1288_v13 = vld [vmem:[%s14250_s6 + $0xe0] sm:$0xff] }
 0x21c   : > { %3500 = vmatprep.mubr.f32.mxu0 %v2879_v35  ;;  %8419 = vmatpush3.bf16.msra.mxu1 %v8416_v17  ;;  %v2412_v57 = vpop.permute.xlu1 %2411  ;;  %v2928_v17 = vld [vmem:[#allocation5 + $0x3d0] sm:$0xff]  ;;  %v2933_v9 = vld [vmem:[#allocation5 + $0x3f8] sm:$0xff] }
 0x21d   : > { %8421 = vmatprep.subr.bf16.mxu1 %v8420_v42  ;;  %2480 = vst.msk [vmem:[#allocation5 + $0x448] sm:$0xff] %vm576_vm3, %v2412_v57  ;;  %v2671_v39 = vpop.permute.xlu0 %2670  ;;  %v2939_v34 = vld [vmem:[#allocation5 + $0x428] sm:$0xff] }
 0x21e   : > { %7955 = vmatmul.mubr.msk.f32.gmra.mrb[20].mxu1 %vm487_vm0, %v1265_v22  ;;  %2738 = vst.msk [vmem:[#allocation5 + $0x478] sm:$0xff] %vm576_vm3, %v2671_v39  ;;  %v2810_v22 = vld [vmem:[#allocation5 + $0x20] sm:$0xff] }
 0x21f   : > { %3501 = vmatmul.mubr.f32.gmra.mrb[52].mxu0 %v2878_v54  ;;  %7957 = vmatprep.mubr.msk.f32.mxu1 %vm487_vm0, %v1266_v28  ;;  %v2815_v28 = vld [vmem:[#allocation5 + $0x48] sm:$0xff] }
 0x220   : > { %3505 = vmatprep.mubr.f32.mxu0 %v2884_v19  ;;  %8423 = vmatpush3.bf16.msra.mxu1 %v8420_v42  ;;  %v2414_v16 = vpop.permute.xlu1 %2413  ;;  %v2938_v35 = vld [vmem:[#allocation5 + $0x420] sm:$0xff]  ;;  %v2820_v19 = vld [vmem:[#allocation5 + $0x70] sm:$0xff] }
 0x221   : > { %2481 = vst.msk [vmem:[#allocation5 + $0x470] sm:$0xff] %vm576_vm3, %v2414_v16  ;;  %v2673_v6 = vpop.permute.xlu0 %2672  ;;  %8425 = vmatprep.subr.bf16.mxu1 %v8424_v50  ;;  %v1290_v42 = vld [vmem:[%s14250_s6 + $0xf0] sm:$0xff]  ;;  %v2944_v52 = vld [vmem:[#allocation5 + $0x450] sm:$0xff]  ;;  %v2835_v16 = vld [vmem:[#allocation5 + $0xe8] sm:$0xff] }
 0x222   : > { %7958 = vmatmul.mubr.msk.f32.gmra.mrb[22].mxu1 %vm487_vm0, %v1267_v20  ;;  %2739 = vst.msk [vmem:[#allocation5 + $0x4a0] sm:$0xff] %vm576_vm3, %v2673_v6  ;;  %v2840_v6 = vld [vmem:[#allocation5 + $0x110] sm:$0xff] }
 0x223   : > { %3506 = vmatmul.mubr.f32.gmra.mrb[54].mxu0 %v2883_v24  ;;  %7960 = vmatprep.mubr.msk.f32.mxu1 %vm487_vm0, %v1268_v56  ;;  %v2830_v24 = vld [vmem:[#allocation5 + $0xc0] sm:$0xff] }
 0x224   : > { %3510 = vmatprep.mubr.f32.mxu0 %v2889_v11  ;;  %v2416_v60 = vpop.permute.xlu1 %2415  ;;  %8427 = vmatpush3.bf16.msra.mxu1 %v8424_v50  ;;  %v2943_v41 = vld [vmem:[#allocation5 + $0x448] sm:$0xff]  ;;  %v2825_v50 = vld [vmem:[#allocation5 + $0x98] sm:$0xff] }
 0x225   : > { %2482 = vst.msk [vmem:[#allocation5 + $0x498] sm:$0xff] %vm576_vm3, %v2416_v60  ;;  %v2675_v30 = vpop.permute.xlu0 %2674  ;;  %v2949_v54 = vld [vmem:[#allocation5 + $0x478] sm:$0xff]  ;;  %v2850_v60 = vld [vmem:[#allocation5 + $0x160] sm:$0xff] }
 0x226   : > { %7961 = vmatmul.mubr.msk.f32.gmra.mrb[24].mxu1 %vm487_vm0, %v1269_v26  ;;  %2740 = vst.msk [vmem:[#allocation5 + $0x4c8] sm:$0xff] %vm576_vm3, %v2675_v30  ;;  %v2860_v30 = vld [vmem:[#allocation5 + $0x1b0] sm:$0xff] }
 0x227   : > { %3511 = vmatmul.mubr.f32.gmra.mrb[56].mxu0 %v2888_v5  ;;  %7963 = vmatprep.mubr.msk.f32.mxu1 %vm487_vm0, %v1270_v14  ;;  %v2845_v5 = vld [vmem:[#allocation5 + $0x138] sm:$0xff] }
 0x228   : > { %3515 = vmatprep.mubr.f32.mxu0 %v2894_v32  ;;  %v2418_v43 = vpop.permute.xlu1 %2417  ;;  %v2948_v57 = vld [vmem:[#allocation5 + $0x470] sm:$0xff]  ;;  %v2855_v32 = vld [vmem:[#allocation5 + $0x188] sm:$0xff] }
 0x229   : > { %2483 = vst.msk [vmem:[#allocation5 + $0x4c0] sm:$0xff] %vm576_vm3, %v2418_v43  ;;  %v2677_v18 = vpop.permute.xlu0 %2676  ;;  %v2954_v39 = vld [vmem:[#allocation5 + $0x4a0] sm:$0xff]  ;;  %v2880_v43 = vld [vmem:[#allocation5 + $0x250] sm:$0xff] }
 0x22a   : > { %7964 = vmatmul.mubr.msk.f32.gmra.mrb[26].mxu1 %vm487_vm0, %v1271_v1  ;;  %2741 = vst.msk [vmem:[#allocation5 + $0x4f0] sm:$0xff] %vm576_vm3, %v2677_v18  ;;  %v2865_v1 = vld [vmem:[#allocation5 + $0x1d8] sm:$0xff]  ;;  %v2890_v18 = vld [vmem:[#allocation5 + $0x2a0] sm:$0xff] }
 0x22b   : > { %3516 = vmatmul.mubr.f32.gmra.mrb[58].mxu0 %v2893_v0  ;;  %7966 = vmatprep.mubr.msk.f32.mxu1 %vm487_vm0, %v1272_v7  ;;  %v2870_v0 = vld [vmem:[#allocation5 + $0x200] sm:$0xff]  ;;  %v2875_v7 = vld [vmem:[#allocation5 + $0x228] sm:$0xff] }
 0x22c   : > { %3520 = vmatprep.mubr.f32.mxu0 %v2899_v31  ;;  %v2420_v23 = vpop.permute.xlu1 %2419  ;;  %v2953_v20 = vld [vmem:[#allocation5 + $0x498] sm:$0xff] }
 0x22d   : > { %2484 = vst.msk [vmem:[#allocation5 + $0x4e8] sm:$0xff] %vm576_vm3, %v2420_v23  ;;  %v2959_v56 = vld [vmem:[#allocation5 + $0x4c8] sm:$0xff]  ;;  %v2885_v31 = vld [vmem:[#allocation5 + $0x278] sm:$0xff]  ;;  %v2910_v23 = vld [vmem:[#allocation5 + $0x340] sm:$0xff] }
 0x22e   : > { %7967 = vmatmul.mubr.msk.f32.gmra.mrb[28].mxu1 %vm487_vm0, %v1273_v29  ;;  %v2895_v29 = vld [vmem:[#allocation5 + $0x2c8] sm:$0xff] }
 0x22f   : > { %3521 = vmatmul.mubr.f32.gmra.mrb[60].mxu0 %v2898_v51  ;;  %7969 = vmatprep.mubr.msk.f32.mxu1 %vm487_vm0, %v1274_v48  ;;  %v2900_v51 = vld [vmem:[#allocation5 + $0x2f0] sm:$0xff]  ;;  %v2905_v48 = vld [vmem:[#allocation5 + $0x318] sm:$0xff] }
 0x230   : > { %3525 = vmatprep.mubr.f32.mxu0 %v2904_v40  ;;  %v2958_v11 = vld [vmem:[#allocation5 + $0x4c0] sm:$0xff]  ;;  %v2915_v40 = vld [vmem:[#allocation5 + $0x368] sm:$0xff] }
 0x231   : > { %v2964_v26 = vld [vmem:[#allocation5 + $0x4f0] sm:$0xff] }
 0x232   : > { %7970 = vmatmul.mubr.msk.f32.gmra.mrb[30].mxu1 %vm487_vm0, %v1275_v37  ;;  %v2920_v37 = vld [vmem:[#allocation5 + $0x390] sm:$0xff] }
 0x233   : > { %3526 = vmatmul.mubr.f32.gmra.mrb[62].mxu0 %v2903_v44  ;;  %7972 = vmatprep.mubr.msk.f32.mxu1 %vm487_vm0, %v1276_v8  ;;  %v2925_v44 = vld [vmem:[#allocation5 + $0x3b8] sm:$0xff]  ;;  %v2930_v8 = vld [vmem:[#allocation5 + $0x3e0] sm:$0xff] }
 0x234   : > { %3530 = vmatprep.mubr.f32.mxu0 %v2909_v45  ;;  %v2963_v14 = vld [vmem:[#allocation5 + $0x4e8] sm:$0xff] }
 0x235   : > { %v2935_v45 = vld [vmem:[#allocation5 + $0x408] sm:$0xff] }
 0x236   : > { %7973 = vmatmul.mubr.msk.f32.gmra.mrb[32].mxu1 %vm487_vm0, %v1277_v4  ;;  %v2940_v4 = vld [vmem:[#allocation5 + $0x430] sm:$0xff] }
 0x237   : > { %3531 = vmatmul.mubr.f32.gmra.mrb[64].mxu0 %v2908_v3  ;;  %7975 = vmatprep.mubr.msk.f32.mxu1 %vm487_vm0, %v1278_v33  ;;  %v2945_v3 = vld [vmem:[#allocation5 + $0x458] sm:$0xff]  ;;  %v2950_v33 = vld [vmem:[#allocation5 + $0x480] sm:$0xff] }
 0x238   : > { %3535 = vmatprep.mubr.f32.mxu0 %v2914_v61  ;;  %v2955_v61 = vld [vmem:[#allocation5 + $0x4a8] sm:$0xff] }
 0x23a   : > { %7976 = vmatmul.mubr.msk.f32.gmra.mrb[34].mxu1 %vm487_vm0, %v1279_v27  ;;  %v2960_v27 = vld [vmem:[#allocation5 + $0x4d0] sm:$0xff] }
 0x23b   : > { %3536 = vmatmul.mubr.f32.gmra.mrb[66].mxu0 %v2913_v53  ;;  %7978 = vmatprep.mubr.msk.f32.mxu1 %vm487_vm0, %v1280_v38  ;;  %v2965_v53 = vld [vmem:[#allocation5 + $0x4f8] sm:$0xff] }
 0x23c   : > { %3540 = vmatprep.mubr.f32.mxu0 %v2919_v62 }
 0x23e   : > { %7979 = vmatmul.mubr.msk.f32.gmra.mrb[36].mxu1 %vm487_vm0, %v1281_v10 }
 0x23f   : > { %3541 = vmatmul.mubr.f32.gmra.mrb[68].mxu0 %v2918_v49  ;;  %7981 = vmatprep.mubr.msk.f32.mxu1 %vm487_vm0, %v1282_v2 }
 0x240   : > { %3545 = vmatprep.mubr.f32.mxu0 %v2924_v46 }
 0x242   : > { %7982 = vmatmul.mubr.msk.f32.gmra.mrb[38].mxu1 %vm487_vm0, %v1283_v25 }
 0x243   : > { %3546 = vmatmul.mubr.f32.gmra.mrb[70].mxu0 %v2923_v47  ;;  %7984 = vmatprep.mubr.msk.f32.mxu1 %vm487_vm0, %v1284_v58 }
 0x244   : > { %3550 = vmatprep.mubr.f32.mxu0 %v2929_v55 }
 0x246   : > { %7985 = vmatmul.mubr.msk.f32.gmra.mrb[40].mxu1 %vm487_vm0, %v1285_v15 }
 0x247   : > { %3551 = vmatmul.mubr.f32.gmra.mrb[72].mxu0 %v2928_v17  ;;  %7987 = vmatprep.mubr.msk.f32.mxu1 %vm487_vm0, %v1286_v36 }
 0x248   : > { %3555 = vmatprep.mubr.f32.mxu0 %v2934_v63 }
 0x24a   : > { %7988 = vmatmul.mubr.msk.f32.gmra.mrb[42].mxu1 %vm487_vm0, %v1287_v21 }
 0x24b   : > { %3556 = vmatmul.mubr.f32.gmra.mrb[74].mxu0 %v2933_v9  ;;  %7990 = vmatprep.mubr.msk.f32.mxu1 %vm487_vm0, %v1288_v13 }
 0x24c   : > { %3560 = vmatprep.mubr.f32.mxu0 %v2939_v34 }
 0x24e   : > { %7991 = vmatmul.mubr.msk.f32.gmra.mrb[44].mxu1 %vm487_vm0, %v1289_v12 }
 0x24f   : > { %3561 = vmatmul.mubr.f32.gmra.mrb[76].mxu0 %v2938_v35  ;;  %7993 = vmatprep.mubr.msk.f32.mxu1 %vm487_vm0, %v1290_v42 }
 0x250   : > { %3565 = vmatprep.mubr.f32.mxu0 %v2944_v52 }
 0x252   : > { %7994 = vmatmul.mubr.msk.f32.gmra.mrb[46].mxu1 %vm487_vm0, %v1291_v59 }
 0x253   : > { %3566 = vmatmul.mubr.f32.gmra.mrb[78].mxu0 %v2943_v41  ;;  %8012 = vmatprep.mubr.msk.f32.mxu1 %vm487_vm0, %v2810_v22 }
 0x254   : > { %3570 = vmatprep.mubr.f32.mxu0 %v2949_v54 }
 0x256   : > { %8013 = vmatmul.mubr.msk.f32.vlgmr.msra.gmra.mrb[48].mxu1 %vm487_vm0, %v2815_v28 }
 0x257   : > { %3571 = vmatmul.mubr.f32.gmra.mrb[80].mxu0 %v2948_v57  ;;  %8015 = vmatprep.mubr.msk.f32.mxu1 %vm487_vm0, %v2820_v19  ;;  %v4990_v19 = vld [vmem:[%s14252_s8] sm:$0xff] }
 0x258   : > { %3575 = vmatprep.mubr.f32.mxu0 %v2954_v39  ;;  %v4991_v39 = vld [vmem:[%s14252_s8 + $0x8] sm:$0xff] }
 0x25a   : > { %8016 = vmatmul.mubr.msk.f32.gmra.mrb[50].mxu1 %vm487_vm0, %v2825_v50  ;;  %v4992_v50 = vld [vmem:[%s14252_s8 + $0x10] sm:$0xff] }
 0x25b   : > { %3576 = vmatmul.mubr.f32.gmra.mrb[82].mxu0 %v2953_v20  ;;  %8018 = vmatprep.mubr.msk.f32.mxu1 %vm487_vm0, %v2830_v24  ;;  %v8428_v20 = vpack.c.bf16 %v4991_v39, %v4990_v19  ;;  %v4993_v24 = vld [vmem:[%s14252_s8 + $0x18] sm:$0xff] }
 0x25c   : > { %3580 = vmatprep.mubr.f32.mxu0 %v2959_v56 }
 0x25d   : > { %8429 = vmatprep.subr.bf16.mxu1 %v8428_v20 }
 0x25e   : > { %8019 = vmatmul.mubr.msk.f32.gmra.mrb[52].mxu1 %vm487_vm0, %v2835_v16  ;;  %v8432_v16 = vpack.c.bf16 %v4993_v24, %v4992_v50 }
 0x25f   : > { %3581 = vmatmul.mubr.f32.gmra.mrb[84].mxu0 %v2958_v11  ;;  %8021 = vmatprep.mubr.msk.f32.mxu1 %vm487_vm0, %v2840_v6  ;;  %v4994_v11 = vld [vmem:[%s14252_s8 + $0x20] sm:$0xff]  ;;  %v4995_v6 = vld [vmem:[%s14252_s8 + $0x28] sm:$0xff] }
 0x260   : > { %3585 = vmatprep.mubr.f32.mxu0 %v2964_v26  ;;  %8431 = vmatpush3.bf16.msra.mxu1 %v8428_v20 }
 0x261   : > { %8433 = vmatprep.subr.bf16.mxu1 %v8432_v16 }
 0x262   : > { %8022 = vmatmul.mubr.msk.f32.gmra.mrb[54].mxu1 %vm487_vm0, %v2845_v5 }
 0x263   : > { %3586 = vmatmul.mubr.f32.gmra.mrb[86].mxu0 %v2963_v14  ;;  %8024 = vmatprep.mubr.msk.f32.mxu1 %vm487_vm0, %v2850_v60  ;;  %v8436_v60 = vpack.c.bf16 %v4995_v6, %v4994_v11 }
 0x264   : > { %8435 = vmatpush3.bf16.msra.mxu1 %v8432_v16 }
 0x265   : > { %8437 = vmatprep.subr.bf16.mxu1 %v8436_v60 }
 0x266   : > { %8025 = vmatmul.mubr.msk.f32.gmra.mrb[56].mxu1 %vm487_vm0, %v2855_v32 }
 0x267   : > { %8027 = vmatprep.mubr.msk.f32.mxu1 %vm487_vm0, %v2860_v30  ;;  %v4996_v30 = vld [vmem:[%s14252_s8 + $0x30] sm:$0xff] }
 0x268   : > { %8439 = vmatpush3.bf16.msra.mxu1 %v8436_v60 }
 0x26a   : > { %8028 = vmatmul.mubr.msk.f32.gmra.mrb[58].mxu1 %vm487_vm0, %v2865_v1  ;;  %v4997_v1 = vld [vmem:[%s14252_s8 + $0x38] sm:$0xff] }
 0x26b   : > { %8030 = vmatprep.mubr.msk.f32.mxu1 %vm487_vm0, %v2870_v0 }
 0x26e   : > { %8031 = vmatmul.mubr.msk.f32.gmra.mrb[60].mxu1 %vm487_vm0, %v2875_v7 }
 0x26f   : > { %8033 = vmatprep.mubr.msk.f32.mxu1 %vm487_vm0, %v2880_v43 }
 0x272   : > { %8034 = vmatmul.mubr.msk.f32.gmra.mrb[62].mxu1 %vm487_vm0, %v2885_v31  ;;  %v8440_v31 = vpack.c.bf16 %v4997_v1, %v4996_v30 }
 0x273   : > { %8036 = vmatprep.mubr.msk.f32.mxu1 %vm487_vm0, %v2890_v18 }
 0x274   : > { %8441 = vmatprep.subr.bf16.mxu1 %v8440_v31 }
 0x275   : > { %8443 = vmatpush3.bf16.msra.mxu1 %v8440_v31 }
 0x276   : > { %8037 = vmatmul.mubr.msk.f32.gmra.mrb[64].mxu1 %vm487_vm0, %v2895_v29 }
 0x277   : > { %8039 = vmatprep.mubr.msk.f32.mxu1 %vm487_vm0, %v2900_v51 }
 0x27a   : > { %8040 = vmatmul.mubr.msk.f32.gmra.mrb[66].mxu1 %vm487_vm0, %v2905_v48 }
 0x27b   : > { %8042 = vmatprep.mubr.msk.f32.mxu1 %vm487_vm0, %v2910_v23 }
 0x27e   : > { %8043 = vmatmul.mubr.msk.f32.gmra.mrb[68].mxu1 %vm487_vm0, %v2915_v40 }
 0x27f   : > { %8045 = vmatprep.mubr.msk.f32.mxu1 %vm487_vm0, %v2920_v37 }
 0x282   : > { %8046 = vmatmul.mubr.msk.f32.gmra.mrb[70].mxu1 %vm487_vm0, %v2925_v44 }
 0x283   : > { %8048 = vmatprep.mubr.msk.f32.mxu1 %vm487_vm0, %v2930_v8 }
 0x286   : > { %8049 = vmatmul.mubr.msk.f32.gmra.mrb[72].mxu1 %vm487_vm0, %v2935_v45 }
 0x287   : > { %8051 = vmatprep.mubr.msk.f32.mxu1 %vm487_vm0, %v2940_v4 }
 0x28a   : > { %8052 = vmatmul.mubr.msk.f32.gmra.mrb[74].mxu1 %vm487_vm0, %v2945_v3 }
 0x28b   : > { %8054 = vmatprep.mubr.msk.f32.mxu1 %vm487_vm0, %v2950_v33 }
 0x28e   : > { %8055 = vmatmul.mubr.msk.f32.gmra.mrb[76].mxu1 %vm487_vm0, %v2955_v61 }
 0x28f   : > { %8057 = vmatprep.mubr.msk.f32.mxu1 %vm487_vm0, %v2960_v27 }
 0x292   : > { %8058 = vmatmul.mubr.msk.f32.gmra.mrb[78].mxu1 %vm487_vm0, %v2965_v53 }
 0x2ba   : > { %v11169_v38 = vpop.f32.mrb[24].mxu0 }
 0x2bb   : > { %v3434_v62 = vpop.f32.mrb[25].mxu0 }
 0x2be   : > { %v11171_v10 = vpop.f32.mrb[26].mxu0 }
 0x2bf   : > { %v3439_v49 = vpop.f32.mrb[27].mxu0 }
 0x2c2   : > { %v11173_v2 = vpop.f32.mrb[28].mxu0 }
 0x2c3   : > { %v3444_v46 = vpop.f32.mrb[29].mxu0 }
 0x2c6   : > { %v11175_v25 = vpop.f32.mrb[30].mxu0 }
 0x2c7   : > { %v3449_v47 = vpop.f32.mrb[31].mxu0 }
 0x2ca   : > { %v11177_v58 = vpop.f32.mrb[32].mxu0 }
 0x2cb   : > { %v3454_v55 = vpop.f32.mrb[33].mxu0 }
 0x2ce   : > { %v11179_v15 = vpop.f32.mrb[34].mxu0 }
 0x2cf   : > { %v3459_v17 = vpop.f32.mrb[35].mxu0 }
 0x2d2   : > { %v11181_v36 = vpop.f32.mrb[36].mxu0 }
 0x2d3   : > { %v3464_v63 = vpop.f32.mrb[37].mxu0 }
 0x2d6   : > { %v11183_v21 = vpop.f32.mrb[38].mxu0 }
 0x2d7   : > { %v3469_v9 = vpop.f32.mrb[39].mxu0 }
 0x2da   : > { %v11185_v13 = vpop.f32.mrb[40].mxu0 }
 0x2db   : > { %v3474_v34 = vpop.f32.mrb[41].mxu0 }
 0x2de   : > { %v11187_v12 = vpop.f32.mrb[42].mxu0 }
 0x2df   : > { %v3479_v35 = vpop.f32.mrb[43].mxu0 }
 0x2e2   : > { %v11189_v42 = vpop.f32.mrb[44].mxu0 }
 0x2e3   : > { %v3484_v52 = vpop.f32.mrb[45].mxu0 }
 0x2e6   : > { %v11191_v59 = vpop.f32.mrb[46].mxu0 }
 0x2e7   : > { %v3489_v41 = vpop.f32.mrb[47].mxu0 }
 0x2e9   : > { %v7950_v22 = vpop.f32.mrb[16].mxu1 }
 0x2ea   : > { %v11193_v54 = vpop.f32.mrb[48].mxu0  ;;  %3895 = vst.msk [vmem:[#allocation6 + $0x3a] sm:$0xff] %vm487_vm0, %v7950_v22  ;;  %v1454_v28 = vpop.f32.mrb[17].mxu1 }
 0x2eb   : > { %v3494_v57 = vpop.f32.mrb[49].mxu0  ;;  %3894 = vst.msk [vmem:[#allocation6 + $0x32] sm:$0xff] %vm487_vm0, %v1454_v28 }
 0x2ed   : > { %v7953_v56 = vpop.f32.mrb[18].mxu1 }
 0x2ee   : > { %v11215_v26 = vpop.f32.mrb[50].mxu0  ;;  %3897 = vst.msk [vmem:[#allocation6 + $0x52] sm:$0xff] %vm487_vm0, %v7953_v56  ;;  %v1464_v5 = vpop.f32.mrb[19].mxu1 }
 0x2ef   : > { %v3499_v14 = vpop.f32.mrb[51].mxu0  ;;  %3896 = vst.msk [vmem:[#allocation6 + $0x4a] sm:$0xff] %vm487_vm0, %v1464_v5 }
 0x2f1   : > { %v7956_v32 = vpop.f32.mrb[20].mxu1 }
 0x2f2   : > { %v11225_v0 = vpop.f32.mrb[52].mxu0  ;;  %3899 = vst.msk [vmem:[#allocation6 + $0x6a] sm:$0xff] %vm487_vm0, %v7956_v32  ;;  %v1474_v7 = vpop.f32.mrb[21].mxu1 }
 0x2f3   : > { %v3504_v43 = vpop.f32.mrb[53].mxu0  ;;  %3898 = vst.msk [vmem:[#allocation6 + $0x62] sm:$0xff] %vm487_vm0, %v1474_v7 }
 0x2f5   : > { %v7959_v18 = vpop.f32.mrb[22].mxu1 }
 0x2f6   : > { %v11229_v29 = vpop.f32.mrb[54].mxu0  ;;  %3901 = vst.msk [vmem:[#allocation6 + $0x82] sm:$0xff] %vm487_vm0, %v7959_v18  ;;  %v1484_v51 = vpop.f32.mrb[23].mxu1  ;;  %v4998_v18 = vld [vmem:[%s14252_s8 + $0x40] sm:$0xff] }
 0x2f7   : > { %v3509_v48 = vpop.f32.mrb[55].mxu0  ;;  %3900 = vst.msk [vmem:[#allocation6 + $0x7a] sm:$0xff] %vm487_vm0, %v1484_v51  ;;  %v4999_v51 = vld [vmem:[%s14252_s8 + $0x48] sm:$0xff] }
 0x2f8   : > { %v11286_v48 = vld [vmem:[%s14249_s5] ss:$0 sm:$0xff] }
 0x2f9   : > { %v7962_v23 = vpop.f32.mrb[24].mxu1 }
 0x2fa   : > { %v11233_v40 = vpop.f32.mrb[56].mxu0  ;;  %3903 = vst.msk [vmem:[#allocation6 + $0x9a] sm:$0xff] %vm487_vm0, %v7962_v23  ;;  %v1494_v37 = vpop.f32.mrb[25].mxu1 }
 0x2fb   : > { %v3514_v44 = vpop.f32.mrb[57].mxu0  ;;  %3902 = vst.msk [vmem:[#allocation6 + $0x92] sm:$0xff] %vm487_vm0, %v1494_v37 }
 0x2fc   : > { %v8444_v44 = vpack.c.bf16 %v4999_v51, %v4998_v18  ;;  %v8787_v18 = vadd.f32 %v11286_v48, %v11183_v21  ;;  %v8789_v21 = vadd.f32 %v11286_v48, %v11187_v12  ;;  %v8790_v12 = vadd.f32 %v11286_v48, %v11189_v42 }
 0x2fd   : > { %v7965_v8 = vpop.f32.mrb[26].mxu1 }
 0x2fe   : > { %v11237_v45 = vpop.f32.mrb[58].mxu0  ;;  %3905 = vst.msk [vmem:[#allocation6 + $0xb2] sm:$0xff] %vm487_vm0, %v7965_v8  ;;  %v1504_v4 = vpop.f32.mrb[27].mxu1  ;;  %8445 = vmatprep.subr.bf16.mxu1 %v8444_v44 }
 0x2ff   : > { %v3519_v3 = vpop.f32.mrb[59].mxu0  ;;  %3904 = vst.msk [vmem:[#allocation6 + $0xaa] sm:$0xff] %vm487_vm0, %v1504_v4  ;;  %v8781_v4 = vadd.f32 %v11286_v48, %v11171_v10  ;;  %8447 = vmatpush3.bf16.msra.mxu1 %v8444_v44  ;;  %v5001_v10 = vld [vmem:[%s14252_s8 + $0x58] sm:$0xff]  ;;  %v8786_v44 = vadd.f32 %v11286_v48, %v11181_v36  ;;  %v8788_v36 = vadd.f32 %v11286_v48, %v11185_v13 }
 0x300   : > { %v8780_v3 = vadd.f32 %v11286_v48, %v11169_v38 }
 0x301   : > { %v7968_v33 = vpop.f32.mrb[28].mxu1 }
 0x302   : > { %v11241_v61 = vpop.f32.mrb[60].mxu0  ;;  %3907 = vst.msk [vmem:[#allocation6 + $0xca] sm:$0xff] %vm487_vm0, %v7968_v33  ;;  %v1514_v27 = vpop.f32.mrb[29].mxu1 }
 0x303   : > { %v3524_v53 = vpop.f32.mrb[61].mxu0  ;;  %3906 = vst.msk [vmem:[#allocation6 + $0xc2] sm:$0xff] %vm487_vm0, %v1514_v27 }
 0x305   : > { %v7971_v62 = vpop.f32.mrb[30].mxu1 }
 0x306   : > { %v11245_v49 = vpop.f32.mrb[62].mxu0  ;;  %3909 = vst.msk [vmem:[#allocation6 + $0xe2] sm:$0xff] %vm487_vm0, %v7971_v62  ;;  %v1524_v46 = vpop.f32.mrb[31].mxu1 }
 0x307   : > { %v3529_v47 = vpop.f32.mrb[63].mxu0  ;;  %3908 = vst.msk [vmem:[#allocation6 + $0xda] sm:$0xff] %vm487_vm0, %v1524_v46 }
 0x309   : > { %v7974_v55 = vpop.f32.mrb[32].mxu1 }
 0x30a   : > { %v11249_v17 = vpop.f32.mrb[64].mxu0  ;;  %3911 = vst.msk [vmem:[#allocation6 + $0xfa] sm:$0xff] %vm487_vm0, %v7974_v55  ;;  %v1534_v63 = vpop.f32.mrb[33].mxu1  ;;  %v5000_v55 = vld [vmem:[%s14252_s8 + $0x50] sm:$0xff] }
 0x30b   : > { %v3534_v9 = vpop.f32.mrb[65].mxu0  ;;  %3910 = vst.msk [vmem:[#allocation6 + $0xf2] sm:$0xff] %vm487_vm0, %v1534_v63  ;;  %v8783_v63 = vadd.f32 %v11286_v48, %v11175_v25  ;;  %v5002_v25 = vld [vmem:[%s14252_s8 + $0x60] sm:$0xff] }
 0x30c   : > { %v8448_v9 = vpack.c.bf16 %v5001_v10, %v5000_v55 }
 0x30d   : > { %v7977_v34 = vpop.f32.mrb[34].mxu1 }
 0x30e   : > { %v11253_v35 = vpop.f32.mrb[66].mxu0  ;;  %3913 = vst.msk [vmem:[#allocation6 + $0x112] sm:$0xff] %vm487_vm0, %v7977_v34  ;;  %v1544_v52 = vpop.f32.mrb[35].mxu1  ;;  %v8782_v34 = vadd.f32 %v11286_v48, %v11173_v2  ;;  %8449 = vmatprep.subr.bf16.mxu1 %v8448_v9  ;;  %v5003_v2 = vld [vmem:[%s14252_s8 + $0x68] sm:$0xff] }
 0x30f   : > { %v3539_v41 = vpop.f32.mrb[67].mxu0  ;;  %3912 = vst.msk [vmem:[#allocation6 + $0x10a] sm:$0xff] %vm487_vm0, %v1544_v52  ;;  %8451 = vmatpush3.bf16.msra.mxu1 %v8448_v9 }
 0x311   : > { %v7980_v22 = vpop.f32.mrb[36].mxu1 }
 0x312   : > { %v11257_v28 = vpop.f32.mrb[68].mxu0  ;;  %3915 = vst.msk [vmem:[#allocation6 + $0x12a] sm:$0xff] %vm487_vm0, %v7980_v22  ;;  %v1554_v57 = vpop.f32.mrb[37].mxu1 }
 0x313   : > { %v3544_v19 = vpop.f32.mrb[69].mxu0  ;;  %3914 = vst.msk [vmem:[#allocation6 + $0x122] sm:$0xff] %vm487_vm0, %v1554_v57 }
 0x315   : > { %v7983_v39 = vpop.f32.mrb[38].mxu1 }
 0x316   : > { %v11261_v50 = vpop.f32.mrb[70].mxu0  ;;  %3917 = vst.msk [vmem:[#allocation6 + $0x142] sm:$0xff] %vm487_vm0, %v7983_v39  ;;  %v1564_v20 = vpop.f32.mrb[39].mxu1 }
 0x317   : > { %v3549_v24 = vpop.f32.mrb[71].mxu0  ;;  %3916 = vst.msk [vmem:[#allocation6 + $0x13a] sm:$0xff] %vm487_vm0, %v1564_v20 }
 0x318   : > { %v8785_v24 = vadd.f32 %v11286_v48, %v11179_v15  ;;  %v5004_v15 = vld [vmem:[%s14252_s8 + $0x70] sm:$0xff] }
 0x319   : > { %v7986_v56 = vpop.f32.mrb[40].mxu1 }
 0x31a   : > { %v11265_v16 = vpop.f32.mrb[72].mxu0  ;;  %3919 = vst.msk [vmem:[#allocation6 + $0x15a] sm:$0xff] %vm487_vm0, %v7986_v56  ;;  %v1574_v11 = vpop.f32.mrb[41].mxu1 }
 0x31b   : > { %v3554_v6 = vpop.f32.mrb[73].mxu0  ;;  %3918 = vst.msk [vmem:[#allocation6 + $0x152] sm:$0xff] %vm487_vm0, %v1574_v11  ;;  %v8452_v11 = vpack.c.bf16 %v5003_v2, %v5002_v25 }
 0x31c   : > { %v8784_v6 = vadd.f32 %v11286_v48, %v11177_v58  ;;  %v5005_v58 = vld [vmem:[%s14252_s8 + $0x78] sm:$0xff] }
 0x31d   : > { %v7989_v5 = vpop.f32.mrb[42].mxu1  ;;  %8453 = vmatprep.subr.bf16.mxu1 %v8452_v11 }
 0x31e   : > { %v11269_v14 = vpop.f32.mrb[74].mxu0  ;;  %3921 = vst.msk [vmem:[#allocation6 + $0x172] sm:$0xff] %vm487_vm0, %v7989_v5  ;;  %v1584_v60 = vpop.f32.mrb[43].mxu1  ;;  %8455 = vmatpush3.bf16.msra.mxu1 %v8452_v11 }
 0x31f   : > { %v3559_v32 = vpop.f32.mrb[75].mxu0  ;;  %3920 = vst.msk [vmem:[#allocation6 + $0x16a] sm:$0xff] %vm487_vm0, %v1584_v60 }
 0x321   : > { %v7992_v30 = vpop.f32.mrb[44].mxu1 }
 0x322   : > { %v11273_v1 = vpop.f32.mrb[76].mxu0  ;;  %3923 = vst.msk [vmem:[#allocation6 + $0x18a] sm:$0xff] %vm487_vm0, %v7992_v30  ;;  %v1594_v7 = vpop.f32.mrb[45].mxu1 }
 0x323   : > { %v3564_v43 = vpop.f32.mrb[77].mxu0  ;;  %3922 = vst.msk [vmem:[#allocation6 + $0x182] sm:$0xff] %vm487_vm0, %v1594_v7 }
 0x325   : > { %v7995_v31 = vpop.f32.mrb[46].mxu1 }
 0x326   : > { %v11288_v23 = vpop.f32.mrb[78].mxu0  ;;  %3925 = vst.msk [vmem:[#allocation6 + $0x1a2] sm:$0xff] %vm487_vm0, %v7995_v31  ;;  %v1604_v37 = vpop.f32.mrb[47].mxu1 }
 0x327   : > { %v3569_v8 = vpop.f32.mrb[79].mxu0  ;;  %3924 = vst.msk [vmem:[#allocation6 + $0x19a] sm:$0xff] %vm487_vm0, %v1604_v37  ;;  %v8456_v37 = vpack.c.bf16 %v5005_v58, %v5004_v15 }
 0x329   : > { %v8014_v33 = vpop.f32.mrb[48].mxu1  ;;  %8457 = vmatprep.subr.bf16.mxu1 %v8456_v37 }
 0x32a   : > { %v11296_v27 = vpop.f32.mrb[80].mxu0  ;;  %v3663_v53 = vadd.f32 %v8781_v4, %v8014_v33  ;;  %v3657_v62 = vpop.f32.mrb[49].mxu1  ;;  %8459 = vmatpush3.bf16.msra.mxu1 %v8456_v37 }
 0x32b   : > { %v3574_v46 = vpop.f32.mrb[81].mxu0  ;;  %v3658_v47 = vadd.f32 %v8780_v3, %v3657_v62 }
 0x32c   : > { %v3817_v38 = vmax.f32 %v3663_v53, 0.0 }
 0x32d   : > { %v3816_v52 = vmax.f32 %v3658_v47, 0.0  ;;  %v8017_v41 = vpop.f32.mrb[50].mxu1 }
 0x32e   : > { %v11308_v22 = vpop.f32.mrb[82].mxu0  ;;  %v3673_v57 = vadd.f32 %v8783_v63, %v8017_v41  ;;  %3960 = vrot.lane.b32.xlu1 %v3817_v38, %s14277_s24  ;;  %v3667_v19 = vpop.f32.mrb[51].mxu1 }
 0x32f   : > { %v3579_v39 = vpop.f32.mrb[83].mxu0  ;;  %v3668_v20 = vadd.f32 %v8782_v34, %v3667_v19  ;;  %3958 = vrot.lane.b32.xlu0 %v3816_v52, %s14277_s24  ;;  %v8791_v34 = vadd.f32 %v11286_v48, %v11191_v59  ;;  %v8792_v59 = vadd.f32 %v11286_v48, %v11193_v54 }
 0x330   : > { %v3819_v56 = vmax.f32 %v3673_v57, 0.0 }
 0x331   : > { %v3818_v5 = vmax.f32 %v3668_v20, 0.0  ;;  %v8020_v60 = vpop.f32.mrb[52].mxu1  ;;  %v8793_v20 = vadd.f32 %v11286_v48, %v11215_v26  ;;  %v8794_v26 = vadd.f32 %v11286_v48, %v11225_v0 }
 0x332   : > { %v11322_v32 = vpop.f32.mrb[84].mxu0  ;;  %v3683_v30 = vadd.f32 %v8785_v24, %v8020_v60  ;;  %3964 = vrot.lane.b32.xlu1 %v3819_v56, %s14277_s24  ;;  %v3677_v7 = vpop.f32.mrb[53].mxu1 }
 0x333   : > { %v3584_v43 = vpop.f32.mrb[85].mxu0  ;;  %v3678_v31 = vadd.f32 %v8784_v6, %v3677_v7  ;;  %3962 = vrot.lane.b32.xlu0 %v3818_v5, %s14277_s24  ;;  %v8795_v6 = vadd.f32 %v11286_v48, %v11229_v29  ;;  %v8796_v29 = vadd.f32 %v11286_v48, %v11233_v40 }
 0x334   : > { %v3821_v51 = vmax.f32 %v3683_v30, 0.0 }
 0x335   : > { %v3820_v8 = vmax.f32 %v3678_v31, 0.0  ;;  %v8023_v4 = vpop.f32.mrb[54].mxu1  ;;  %v8797_v31 = vadd.f32 %v11286_v48, %v11237_v45  ;;  %v8798_v45 = vadd.f32 %v11286_v48, %v11241_v61 }
 0x336   : > { %v11336_v3 = vpop.f32.mrb[86].mxu0  ;;  %v3693_v33 = vadd.f32 %v8787_v18, %v8023_v4  ;;  %3968 = vrot.lane.b32.xlu1 %v3821_v51, %s14277_s24  ;;  %v3687_v53 = vpop.f32.mrb[55].mxu1 }
 0x337   : > { %v3589_v62 = vpop.f32.mrb[87].mxu0  ;;  %v3688_v46 = vadd.f32 %v8786_v44, %v3687_v53  ;;  %3966 = vrot.lane.b32.xlu0 %v3820_v8, %s14277_s24  ;;  %v8799_v44 = vadd.f32 %v11286_v48, %v11245_v49  ;;  %v8800_v49 = vadd.f32 %v11286_v48, %v11249_v17  ;;  %v8803_v17 = vadd.f32 %v11286_v48, %v11261_v50 }
 0x338   : > { %v3823_v47 = vmax.f32 %v3693_v33, 0.0  ;;  %v8805_v50 = vadd.f32 %v11286_v48, %v11269_v14  ;;  %v8806_v14 = vadd.f32 %v11286_v48, %v11273_v1 }
 0x339   : > { %v3822_v55 = vmax.f32 %v3688_v46, 0.0  ;;  %v8026_v10 = vpop.f32.mrb[56].mxu1  ;;  %v8801_v46 = vadd.f32 %v11286_v48, %v11253_v35  ;;  %v7535_v35 = vld [vmem:[%s14252_s8 + $0x88] sm:$0xff] }
 0x33a   : > { %v3703_v63 = vadd.f32 %v8789_v21, %v8026_v10  ;;  %3972 = vrot.lane.b32.xlu1 %v3823_v47, %s14277_s24  ;;  %v3697_v38 = vpop.f32.mrb[57].mxu1 }
 0x33b   : > { %v3698_v9 = vadd.f32 %v8788_v36, %v3697_v38  ;;  %3970 = vrot.lane.b32.xlu0 %v3822_v55, %s14277_s24 }
 0x33c   : > { %v3825_v52 = vmax.f32 %v3703_v63, 0.0  ;;  %v7534_v63 = vld [vmem:[%s14252_s8 + $0x80] sm:$0xff] }
 0x33d   : > { %v3824_v41 = vmax.f32 %v3698_v9, 0.0  ;;  %v8029_v57 = vpop.f32.mrb[58].mxu1  ;;  %v11390_v9 = vpack.c.bf16 %v7535_v35, %v7534_v63  ;;  %v4289_v63 = vld [vmem:[#allocation6 + $0x1b] sm:$0xff] }
 0x33e   : > { %v3713_v19 = vadd.f32 %v8791_v34, %v8029_v57  ;;  %3976 = vrot.lane.b32.xlu1 %v3825_v52, %s14277_s24  ;;  %v3707_v13 = vpop.f32.mrb[59].mxu1  ;;  %v8802_v34 = vadd.f32 %v11286_v48, %v11257_v28 }
 0x33f   : > { %v3708_v39 = vadd.f32 %v8790_v12, %v3707_v13  ;;  %3974 = vrot.lane.b32.xlu0 %v3824_v41, %s14277_s24  ;;  %8461 = vmatprep.subr.bf16.mxu1 %v11390_v9 }
 0x340   : > { %v3827_v25 = vmax.f32 %v3713_v19, 0.0 }
 0x341   : > { %v3826_v2 = vmax.f32 %v3708_v39, 0.0  ;;  %v8032_v24 = vpop.f32.mrb[60].mxu1  ;;  %v8804_v39 = vadd.f32 %v11286_v48, %v11265_v16 }
 0x342   : > { %v3723_v56 = vadd.f32 %v8793_v20, %v8032_v24  ;;  %3980 = vrot.lane.b32.xlu1 %v3827_v25, %s14277_s24  ;;  %v3717_v42 = vpop.f32.mrb[61].mxu1  ;;  %v8807_v24 = vadd.f32 %v11286_v48, %v11288_v23  ;;  %v8808_v23 = vadd.f32 %v11286_v48, %v11296_v27 }
 0x343   : > { %v3718_v11 = vadd.f32 %v8792_v59, %v3717_v42  ;;  %3978 = vrot.lane.b32.xlu0 %v3826_v2, %s14277_s24 }
 0x344   : > { %v3829_v5 = vmax.f32 %v3723_v56, 0.0 }
 0x345   : > { %v3828_v60 = vmax.f32 %v3718_v11, 0.0  ;;  %v8035_v30 = vpop.f32.mrb[62].mxu1 }
 0x346   : > { %v3733_v7 = vadd.f32 %v8795_v6, %v8035_v30  ;;  %3984 = vrot.lane.b32.xlu1 %v3829_v5, %s14277_s24  ;;  %v3727_v54 = vpop.f32.mrb[63].mxu1 }
 0x347   : > { %v3728_v43 = vadd.f32 %v8794_v26, %v3727_v54  ;;  %3982 = vrot.lane.b32.xlu0 %v3828_v60, %s14277_s24  ;;  %v8809_v26 = vadd.f32 %v11286_v48, %v11308_v22  ;;  %v8810_v22 = vadd.f32 %v11286_v48, %v11322_v32 }
 0x348   : > { %v3831_v15 = vmax.f32 %v3733_v7, 0.0 }
 0x349   : > { %v3830_v58 = vmax.f32 %v3728_v43, 0.0  ;;  %v8038_v18 = vpop.f32.mrb[64].mxu1 }
 0x34a   : > { %v3743_v51 = vadd.f32 %v8797_v31, %v8038_v18  ;;  %3988 = vrot.lane.b32.xlu1 %v3831_v15, %s14277_s24  ;;  %v3737_v0 = vpop.f32.mrb[65].mxu1  ;;  %v8811_v31 = vadd.f32 %v11286_v48, %v11336_v3  ;;  %v4121_v3 = vlaneseq }
 0x34b   : > { %v3738_v37 = vadd.f32 %v8796_v29, %v3737_v0  ;;  %3986 = vrot.lane.b32.xlu0 %v3830_v58, %s14277_s24 }
 0x34c   : > { %v3833_v8 = vmax.f32 %v3743_v51, 0.0 }
 0x34d   : > { %v3832_v4 = vmax.f32 %v3738_v37, 0.0  ;;  %v8041_v33 = vpop.f32.mrb[66].mxu1 }
 0x34e   : > { %v3753_v53 = vadd.f32 %v8799_v44, %v8041_v33  ;;  %3992 = vrot.lane.b32.xlu1 %v3833_v8, %s14277_s24  ;;  %v3747_v40 = vpop.f32.mrb[67].mxu1  ;;  %v11423_v44 = vshrl.u32 %v4121_v3, 7  ;;  %v4086_v8 = vld [vmem:[%s14251_s7] sm:$0xff] }
 0x34f   : > { %v3748_v62 = vadd.f32 %v8798_v45, %v3747_v40  ;;  %3990 = vrot.lane.b32.xlu0 %v3832_v4, %s14277_s24  ;;  %v11433_v45 = vld [vmem:[%s14251_s7 + $0x10] sm:$0xff] }
 0x350   : > { %v3835_v21 = vmax.f32 %v3753_v53, 0.0  ;;  %v4123_v48 = vsub.s32 0, %v11423_v44  ;;  %v4223_v32 = vsub.s32 1, %v11423_v44  ;;  %v4323_v53 = vsub.s32 2, %v11423_v44  ;;  %v4089_v40 = vld [vmem:[#allocation6 + $0x19] sm:$0xff] }
 0x351   : > { %v3834_v47 = vmax.f32 %v3748_v62, 0.0  ;;  %v8044_v36 = vpop.f32.mrb[68].mxu1  ;;  %v4189_v62 = vld [vmem:[#allocation6 + $0x1a] sm:$0xff] }
 0x352   : > { %v3763_v55 = vadd.f32 %v8801_v46, %v8044_v36  ;;  %3996 = vrot.lane.b32.xlu1 %v3835_v21, %s14277_s24  ;;  %v3757_v61 = vpop.f32.mrb[69].mxu1  ;;  %v11435_v4 = vrot.slane %v4086_v8, %v4123_v48  ;;  %v11437_v33 = vrot.slane %v4086_v8, %v4223_v32  ;;  %v4090_v46 = vld [vmem:[#allocation6 + $0x21] sm:$0xff] }
 0x353   : > { %v3758_v10 = vadd.f32 %v8800_v49, %v3757_v61  ;;  %3994 = vrot.lane.b32.xlu0 %v3834_v47, %s14277_s24  ;;  %v4190_v21 = vld [vmem:[#allocation6 + $0x22] sm:$0xff]  ;;  %v11441_v49 = vrot.slane %v11433_v45, %v4123_v48  ;;  %v11444_v47 = vrot.slane %v11433_v45, %v4223_v32 }
 0x354   : > { %v3837_v38 = vmax.f32 %v3763_v55, 0.0  ;;  %v5373_v36 = vld [vmem:[#allocation6 + $0x2] sm:$0xff]  ;;  %v4125_v55 = vmul.f32 %v11435_v4, %v4089_v40  ;;  %v4225_v61 = vmul.f32 %v11437_v33, %v4189_v62  ;;  %v4126_v35 = vmul.f32 %v11435_v4, %v4090_v46 }
 0x355   : > { %v3836_v52 = vmax.f32 %v3758_v10, 0.0  ;;  %v8047_v12 = vpop.f32.mrb[70].mxu1  ;;  %v11448_v10 = vrot.slane %v4086_v8, %v4323_v53 }
 0x356   : > { %v3773_v41 = vadd.f32 %v8803_v17, %v8047_v12  ;;  %4000 = vrot.lane.b32.xlu1 %v3837_v38, %s14277_s24  ;;  %v3767_v57 = vpop.f32.mrb[71].mxu1  ;;  %v4226_v17 = vmul.f32 %v11437_v33, %v4190_v21 }
 0x357   : > { %v3768_v19 = vadd.f32 %v8802_v34, %v3767_v57  ;;  %3998 = vrot.lane.b32.xlu0 %v3836_v52, %s14277_s24  ;;  %v4290_v34 = vld [vmem:[#allocation6 + $0x23] sm:$0xff]  ;;  %v11457_v57 = vrot.slane %v11433_v45, %v4323_v53 }
 0x358   : > { %v3839_v13 = vmax.f32 %v3773_v41, 0.0  ;;  %v9011_v52 = vld [vmem:[#allocation6] sm:$0xff]  ;;  %v5409_v41 = vmul.f32 %v11444_v47, %v5373_v36 }
 0x359   : > { %v3838_v20 = vmax.f32 %v3768_v19, 0.0  ;;  %v8050_v28 = vpop.f32.mrb[72].mxu1  ;;  %v11453_v12 = vmul.f32 %v9011_v52, %v11441_v49 }
 0x35a   : > { %v3783_v25 = vadd.f32 %v8805_v50, %v8050_v28  ;;  %4004 = vrot.lane.b32.xlu1 %v3839_v13, %s14277_s24  ;;  %v3777_v59 = vpop.f32.mrb[73].mxu1  ;;  %v4523_v50 = vsub.s32 4, %v11423_v44  ;;  %v5473_v13 = vld [vmem:[#allocation6 + $0x4] sm:$0xff]  ;;  %v4423_v28 = vsub.s32 3, %v11423_v44 }
 0x35b   : > { %v3778_v2 = vadd.f32 %v8804_v39, %v3777_v59  ;;  %4002 = vrot.lane.b32.xlu0 %v3838_v20, %s14277_s24  ;;  %v4257_v39 = vadd.f32 %v4225_v61, %v4125_v55  ;;  %v4325_v20 = vmul.f32 %v11448_v10, %v4289_v63  ;;  %v4724_v59 = vsub.s32 6, %v11423_v44 }
 0x35c   : > { %v3841_v56 = vmax.f32 %v3783_v25, 0.0  ;;  %v4623_v25 = vsub.s32 5, %v11423_v44  ;;  %v11517_v48 = vrot.slane %v11433_v45, %v4423_v28  ;;  %v11525_v21 = vrot.slane %v11433_v45, %v4523_v50 }
 0x35d   : > { %v3840_v42 = vmax.f32 %v3778_v2, 0.0  ;;  %v8053_v11 = vpop.f32.mrb[74].mxu1  ;;  %v4824_v2 = vsub.s32 7, %v11423_v44 }
 0x35e   : > { %v3793_v6 = vadd.f32 %v8807_v24, %v8053_v11  ;;  %4008 = vrot.lane.b32.xlu1 %v3841_v56, %s14277_s24  ;;  %v3787_v16 = vpop.f32.mrb[75].mxu1  ;;  %v4258_v24 = vadd.f32 %v4226_v17, %v4126_v35  ;;  %v4326_v56 = vmul.f32 %v11448_v10, %v4290_v34  ;;  %v7537_v11 = vld [vmem:[%s14252_s8 + $0x98] sm:$0xff]  ;;  %v11528_v36 = vrot.slane %v11433_v45, %v4623_v25 }
 0x35f   : > { %v3788_v5 = vadd.f32 %v8806_v14, %v3787_v16  ;;  %4006 = vrot.lane.b32.xlu0 %v3840_v42, %s14277_s24  ;;  %v7536_v42 = vld [vmem:[%s14252_s8 + $0x90] sm:$0xff]  ;;  %v5509_v16 = vmul.f32 %v11457_v57, %v5473_v13  ;;  %v7545_v45 = vld [vmem:[%s14252_s8 + $0xd8] sm:$0xff] }
 0x360   : > { %v3843_v60 = vmax.f32 %v3793_v6, 0.0  ;;  %v5441_v6 = vadd.f32 %v5409_v41, %v11453_v12 }
 0x361   : > { %v3842_v30 = vmax.f32 %v3788_v5, 0.0  ;;  %v8056_v7 = vpop.f32.mrb[76].mxu1 }
 0x362   : > { %v3803_v54 = vadd.f32 %v8809_v26, %v8056_v7  ;;  %4012 = vrot.lane.b32.xlu1 %v3843_v60, %s14277_s24  ;;  %v3797_v1 = vpop.f32.mrb[77].mxu1  ;;  %v7538_v26 = vld [vmem:[%s14252_s8 + $0xa0] sm:$0xff]  ;;  %v7539_v60 = vld [vmem:[%s14252_s8 + $0xa8] sm:$0xff]  ;;  %v11489_v7 = vrot.slane %v4086_v8, %v4523_v50  ;;  %v11514_v3 = vadd.f32 %v5509_v16, %v5441_v6 }
 0x363   : > { %v3798_v43 = vadd.f32 %v8808_v23, %v3797_v1  ;;  %4010 = vrot.lane.b32.xlu0 %v3842_v30, %s14277_s24  ;;  %v7540_v23 = vld [vmem:[%s14252_s8 + $0xb0] sm:$0xff]  ;;  %v11487_v30 = vrot.slane %v4086_v8, %v4423_v28  ;;  %v7541_v1 = vld [vmem:[%s14252_s8 + $0xb8] sm:$0xff] }
 0x364   : > { %v3845_v15 = vmax.f32 %v3803_v54, 0.0  ;;  %v11491_v54 = vrot.slane %v4086_v8, %v4623_v25  ;;  %v11520_v62 = vpack.c.bf16 %v7541_v1, %v7540_v23 }
 0x365   : > { %v3844_v29 = vmax.f32 %v3798_v43, 0.0  ;;  %v8059_v58 = vpop.f32.mrb[78].mxu1  ;;  %v7542_v43 = vld [vmem:[%s14252_s8 + $0xc0] sm:$0xff] }
 0x366   : > { %v3813_v18 = vadd.f32 %v8811_v31, %v8059_v58  ;;  %4016 = vrot.lane.b32.xlu1 %v3845_v15, %s14277_s24  ;;  %v3807_v27 = vpop.f32.mrb[79].mxu1  ;;  %v7543_v31 = vld [vmem:[%s14252_s8 + $0xc8] sm:$0xff]  ;;  %v4357_v15 = vadd.f32 %v4325_v20, %v4257_v39  ;;  %v4358_v58 = vadd.f32 %v4326_v56, %v4258_v24 }
 0x367   : > { %v3808_v51 = vadd.f32 %v8810_v22, %v3807_v27  ;;  %4014 = vrot.lane.b32.xlu0 %v3844_v29, %s14277_s24  ;;  %v11504_v22 = vrot.slane %v4086_v8, %v4724_v59  ;;  %v11508_v29 = vrot.slane %v4086_v8, %v4824_v2  ;;  %v11522_v46 = vpack.c.bf16 %v7543_v31, %v7542_v43  ;;  %v11548_v39 = vld [vmem:[%s14251_s7 + $0x8] ss:$0 sm:$0xff] }
 0x368   : > { %v3847_v0 = vmax.f32 %v3813_v18, 0.0 }
 0x369   : > { %v3846_v37 = vmax.f32 %v3808_v51, 0.0 }
 0x36a   : > { %4020 = vrot.lane.b32.xlu1 %v3847_v0, %s14277_s24  ;;  %v11510_v0 = vpack.c.bf16 %v7537_v11, %v7536_v42 }
 0x36b   : > { %4018 = vrot.lane.b32.xlu0 %v3846_v37, %s14277_s24  ;;  %v11512_v37 = vpack.c.bf16 %v7539_v60, %v7538_v26 }
 0x3a0   : > { %v3961_v38 = vpop.permute.xlu1 %3960 }
 0x3a1   : > { %4055 = vst.msk [vmem:[#allocation6 + $0x3a] sm:$0xff] %vm576_vm3, %v3961_v38  ;;  %v3959_v19 = vpop.permute.xlu0 %3958  ;;  %v7544_v38 = vld [vmem:[%s14252_s8 + $0xd0] sm:$0xff] }
 0x3a2   : > { %4054 = vst.msk [vmem:[#allocation6 + $0x32] sm:$0xff] %vm576_vm3, %v3959_v19  ;;  %v11559_v26 = vpack.c.bf16 %v7545_v45, %v7544_v38 }
 0x3a4   : > { %v3965_v14 = vpop.permute.xlu1 %3964 }
 0x3a5   : > { %4057 = vst.msk [vmem:[#allocation6 + $0x52] sm:$0xff] %vm576_vm3, %v3965_v14  ;;  %v3963_v5 = vpop.permute.xlu0 %3962 }
 0x3a6   : > { %4056 = vst.msk [vmem:[#allocation6 + $0x4a] sm:$0xff] %vm576_vm3, %v3963_v5 }
 0x3a8   : > { %v3969_v18 = vpop.permute.xlu1 %3968  ;;  %v4490_v27 = vld [vmem:[#allocation6 + $0x3a] sm:$0xff] }
 0x3a9   : > { %v4590_v51 = vld [vmem:[#allocation6 + $0x3b] sm:$0xff]  ;;  %4059 = vst.msk [vmem:[#allocation6 + $0x6a] sm:$0xff] %vm576_vm3, %v3969_v18  ;;  %v3967_v32 = vpop.permute.xlu0 %3966  ;;  %v4389_v53 = vld [vmem:[#allocation6 + $0x31] sm:$0xff]  ;;  %v4526_v63 = vmul.f32 %v11489_v7, %v4490_v27  ;;  %v4228_v41 = vmul.f32 %v4490_v27, %v11437_v33 }
 0x3aa   : > { %v4489_v40 = vld [vmem:[#allocation6 + $0x32] sm:$0xff]  ;;  %4058 = vst.msk [vmem:[#allocation6 + $0x62] sm:$0xff] %vm576_vm3, %v3967_v32  ;;  %v4425_v55 = vmul.f32 %v11487_v30, %v4389_v53  ;;  %v4626_v35 = vmul.f32 %v11491_v54, %v4590_v51  ;;  %v4127_v17 = vmul.f32 %v4389_v53, %v11435_v4  ;;  %v4328_v19 = vmul.f32 %v4590_v51, %v11448_v10 }
 0x3ab   : > { %v4589_v8 = vld [vmem:[#allocation6 + $0x33] sm:$0xff]  ;;  %v4227_v52 = vmul.f32 %v4489_v40, %v11437_v33  ;;  %v4525_v28 = vmul.f32 %v11489_v7, %v4489_v40 }
 0x3ac   : > { %v4390_v61 = vld [vmem:[#allocation6 + $0x39] sm:$0xff]  ;;  %v5573_v50 = vld [vmem:[#allocation6 + $0x30] sm:$0xff]  ;;  %v3973_v13 = vpop.permute.xlu1 %3972  ;;  %v4457_v20 = vadd.f32 %v4425_v55, %v4357_v15  ;;  %v4625_v25 = vmul.f32 %v11491_v54, %v4589_v8  ;;  %v4327_v5 = vmul.f32 %v4589_v8, %v11448_v10  ;;  %v11570_v15 = vmul.f32 %v11525_v21, %v4489_v40 }
 0x3ad   : > { %v4426_v34 = vmul.f32 %v11487_v30, %v4390_v61  ;;  %v11552_v24 = vld [vmem:[#allocation6 + $0x52] sm:$0xff]  ;;  %v4128_v14 = vmul.f32 %v4390_v61, %v11435_v4  ;;  %4061 = vst.msk [vmem:[#allocation6 + $0x82] sm:$0xff] %vm576_vm3, %v3973_v13  ;;  %v3971_v42 = vpop.permute.xlu0 %3970  ;;  %v4690_v11 = vld [vmem:[#allocation6 + $0x49] sm:$0xff]  ;;  %v4259_v16 = vadd.f32 %v4227_v52, %v4127_v17  ;;  %v11567_v31 = vmul.f32 %v11517_v48, %v5573_v50 }
 0x3ae   : > { %v11554_v56 = vld [vmem:[#allocation6 + $0x53] sm:$0xff]  ;;  %4060 = vst.msk [vmem:[#allocation6 + $0x7a] sm:$0xff] %vm576_vm3, %v3971_v42  ;;  %v4557_v60 = vadd.f32 %v4525_v28, %v4457_v20  ;;  %v4790_v23 = vld [vmem:[#allocation6 + $0x4a] sm:$0xff]  ;;  %v4827_v43 = vmul.f32 %v11508_v29, %v11552_v24  ;;  %v4427_v32 = vmul.f32 %v4690_v11, %v11487_v30  ;;  %v4726_v55 = vmul.f32 %v11504_v22, %v4690_v11 }
 0x3af   : > { %v4458_v6 = vadd.f32 %v4426_v34, %v4358_v58  ;;  %v11562_v1 = vld [vmem:[#allocation6 + $0x51] sm:$0xff]  ;;  %v4927_v27 = vmul.f32 %v11548_v39, %v11554_v56  ;;  %v4359_v51 = vadd.f32 %v4327_v5, %v4259_v16  ;;  %v4260_v17 = vadd.f32 %v4228_v41, %v4128_v14 }
 0x3b0   : > { %v4890_v58 = vld [vmem:[#allocation6 + $0x4b] sm:$0xff]  ;;  %v3977_v53 = vpop.permute.xlu1 %3976  ;;  %v4657_v8 = vadd.f32 %v4625_v25, %v4557_v60  ;;  %v4727_v61 = vmul.f32 %v11504_v22, %v11562_v1  ;;  %v4428_v13 = vmul.f32 %v11562_v1, %v11487_v30  ;;  %v4826_v41 = vmul.f32 %v11508_v29, %v4790_v23 }
 0x3b1   : > { %v4558_v18 = vadd.f32 %v4526_v63, %v4458_v6  ;;  %4063 = vst.msk [vmem:[#allocation6 + $0x9a] sm:$0xff] %vm576_vm3, %v3977_v53  ;;  %v3975_v40 = vpop.permute.xlu0 %3974  ;;  %v4459_v45 = vadd.f32 %v4427_v32, %v4359_v51  ;;  %v4527_v63 = vmul.f32 %v4790_v23, %v11489_v7  ;;  %v11580_v34 = vld [vmem:[#allocation6 + $0x61] sm:$0xff]  ;;  %v4926_v28 = vmul.f32 %v11548_v39, %v4890_v58  ;;  %v11594_v16 = vld [vmem:[#allocation6 + $0x69] sm:$0xff] }
 0x3b2   : > { %v11582_v52 = vld [vmem:[#allocation6 + $0x62] sm:$0xff]  ;;  %4062 = vst.msk [vmem:[#allocation6 + $0x92] sm:$0xff] %vm576_vm3, %v3975_v40  ;;  %v4758_v20 = vadd.f32 %v4726_v55, %v4657_v8  ;;  %v4360_v42 = vadd.f32 %v4328_v19, %v4260_v17  ;;  %v4528_v6 = vmul.f32 %v11552_v24, %v11489_v7  ;;  %v11602_v53 = vld [vmem:[#allocation6 + $0x6a] sm:$0xff]  ;;  %v4129_v40 = vmul.f32 %v4690_v11, %v11435_v4 }
 0x3b3   : > { %v4658_v38 = vadd.f32 %v4626_v35, %v4558_v18  ;;  %v11584_v50 = vld [vmem:[#allocation6 + $0x63] sm:$0xff]  ;;  %v4627_v35 = vmul.f32 %v4890_v58, %v11491_v54  ;;  %v4559_v14 = vadd.f32 %v4527_v63, %v4459_v45  ;;  %v4728_v18 = vmul.f32 %v11504_v22, %v11580_v34  ;;  %v11605_v17 = vld [vmem:[#allocation6 + $0x6b] sm:$0xff] }
 0x3b4   : > { %v3981_v5 = vpop.permute.xlu1 %3980  ;;  %v4858_v60 = vadd.f32 %v4826_v41, %v4758_v20  ;;  %v4828_v51 = vmul.f32 %v11508_v29, %v11582_v52  ;;  %v4928_v32 = vmul.f32 %v11548_v39, %v11584_v50  ;;  %v4628_v45 = vmul.f32 %v11554_v56, %v11491_v54  ;;  %v12320_v44 = vld [vmem:[#allocation6 + $0x62] sm:$0xff] }
 0x3b5   : > { %v4759_v25 = vadd.f32 %v4727_v61, %v4658_v38  ;;  %4065 = vst.msk [vmem:[#allocation6 + $0xb2] sm:$0xff] %vm576_vm3, %v3981_v5  ;;  %v3979_v19 = vpop.permute.xlu0 %3978  ;;  %v4659_v55 = vadd.f32 %v4627_v35, %v4559_v14  ;;  %v4460_v61 = vadd.f32 %v4428_v13, %v4360_v42  ;;  %v4729_v63 = vmul.f32 %v11504_v22, %v11594_v16  ;;  %v11616_v35 = vld [vmem:[#allocation6 + $0x79] sm:$0xff] }
 0x3b6   : > { %4064 = vst.msk [vmem:[#allocation6 + $0xaa] sm:$0xff] %vm576_vm3, %v3979_v19  ;;  %v4958_v38 = vadd.f32 %v4926_v28, %v4858_v60  ;;  %v4229_v20 = vmul.f32 %v4790_v23, %v11437_v33  ;;  %v4829_v13 = vmul.f32 %v11508_v29, %v11602_v53  ;;  %v4929_v28 = vmul.f32 %v11548_v39, %v11605_v17  ;;  %v11623_v23 = vld [vmem:[#allocation6 + $0x7a] sm:$0xff] }
 0x3b7   : > { %v4859_v8 = vadd.f32 %v4827_v43, %v4759_v25  ;;  %v4760_v5 = vadd.f32 %v4728_v18, %v4659_v55  ;;  %v4560_v43 = vadd.f32 %v4528_v6, %v4460_v61  ;;  %v4329_v14 = vmul.f32 %v4890_v58, %v11448_v10 }
 0x3b8   : > { %v3985_v11 = vpop.permute.xlu1 %3984  ;;  %8092 = vmatprep.mubr.f32.mxu1 %v4958_v38  ;;  %v4261_v25 = vadd.f32 %v4229_v20, %v4129_v40  ;;  %v4429_v42 = vmul.f32 %v11580_v34, %v11487_v30  ;;  %v4529_v19 = vmul.f32 %v11582_v52, %v11489_v7  ;;  %v4629_v55 = vmul.f32 %v11584_v50, %v11491_v54  ;;  %v11646_v20 = vld [vmem:[#allocation6 + $0x81] sm:$0xff] }
 0x3b9   : > { %v4959_v41 = vadd.f32 %v4927_v27, %v4859_v8  ;;  %v11625_v27 = vld [vmem:[#allocation6 + $0x7b] sm:$0xff]  ;;  %4067 = vst.msk [vmem:[#allocation6 + $0xca] sm:$0xff] %vm576_vm3, %v3985_v11  ;;  %v3983_v6 = vpop.permute.xlu0 %3982  ;;  %v4860_v60 = vadd.f32 %v4828_v51, %v4760_v5  ;;  %v4660_v18 = vadd.f32 %v4628_v45, %v4560_v43  ;;  %v4130_v8 = vmul.f32 %v11562_v1, %v11435_v4 }
 0x3ba   : > { %4066 = vst.msk [vmem:[#allocation6 + $0xc2] sm:$0xff] %vm576_vm3, %v3983_v6  ;;  %v4361_v58 = vadd.f32 %v4329_v14, %v4261_v25  ;;  %v4730_v61 = vmul.f32 %v11504_v22, %v11616_v35  ;;  %v4230_v40 = vmul.f32 %v11552_v24, %v11437_v33  ;;  %v4830_v45 = vmul.f32 %v11508_v29, %v11623_v23  ;;  %v11656_v25 = vld [vmem:[#allocation6 + $0x82] sm:$0xff] }
 0x3bb   : > { %8093 = vmatmul.mubr.f32.vlgmr.msra.gmra.mrb[80].mxu1 %v4959_v41  ;;  %v4960_v51 = vadd.f32 %v4928_v32, %v4860_v60  ;;  %v4761_v38 = vadd.f32 %v4729_v63, %v4660_v18  ;;  %v11644_v1 = vmul.f32 %v11548_v39, %v11625_v27  ;;  %v4330_v24 = vmul.f32 %v11554_v56, %v11448_v10  ;;  %v11658_v14 = vld [vmem:[#allocation6 + $0x83] sm:$0xff] }
 0x3bc   : > { %8463 = vmatpush3.bf16.msra.mxu1 %v11390_v9  ;;  %v3989_v41 = vpop.permute.xlu1 %3988  ;;  %v4461_v5 = vadd.f32 %v4429_v42, %v4361_v58  ;;  %v4262_v43 = vadd.f32 %v4230_v40, %v4130_v8  ;;  %v4430_v9 = vmul.f32 %v11594_v16, %v11487_v30  ;;  %v4530_v11 = vmul.f32 %v11602_v53, %v11489_v7  ;;  %v11674_v40 = vld [vmem:[#allocation6 + $0x91] sm:$0xff] }
 0x3bd   : > { %8465 = vmatprep.subr.bf16.mxu1 %v11510_v0  ;;  %4069 = vst.msk [vmem:[#allocation6 + $0xe2] sm:$0xff] %vm576_vm3, %v3989_v41  ;;  %8095 = vmatprep.mubr.f32.mxu1 %v4960_v51  ;;  %v4861_v32 = vadd.f32 %v4829_v13, %v4761_v38  ;;  %v3987_v63 = vpop.permute.xlu0 %3986  ;;  %v4131_v42 = vmul.f32 %v11580_v34, %v11435_v4 }
 0x3be   : > { %v4231_v56 = vmul.f32 %v11582_v52, %v11437_v33  ;;  %4068 = vst.msk [vmem:[#allocation6 + $0xda] sm:$0xff] %vm576_vm3, %v3987_v63  ;;  %v4561_v6 = vadd.f32 %v4529_v19, %v4461_v5  ;;  %v4362_v60 = vadd.f32 %v4330_v24, %v4262_v43  ;;  %v4630_v13 = vmul.f32 %v11605_v17, %v11491_v54  ;;  %v11684_v43 = vld [vmem:[#allocation6 + $0x92] sm:$0xff] }
 0x3bf   : > { %v4731_v18 = vmul.f32 %v11504_v22, %v11646_v20  ;;  %v4961_v8 = vadd.f32 %v4929_v28, %v4861_v32  ;;  %v4331_v34 = vmul.f32 %v11584_v50, %v11448_v10  ;;  %v4431_v52 = vmul.f32 %v11616_v35, %v11487_v30  ;;  %v11686_v24 = vld [vmem:[#allocation6 + $0x93] sm:$0xff] }
 0x3c0   : > { %8467 = vmatpush3.bf16.msra.mxu1 %v11510_v0  ;;  %v4263_v58 = vadd.f32 %v4231_v56, %v4131_v42  ;;  %v3993_v19 = vpop.permute.xlu1 %3992  ;;  %v4661_v51 = vadd.f32 %v4629_v55, %v4561_v6  ;;  %v4462_v38 = vadd.f32 %v4430_v9, %v4362_v60  ;;  %v4831_v41 = vmul.f32 %v11508_v29, %v11656_v25 }
 0x3c1   : > { %8469 = vmatprep.subr.bf16.mxu1 %v11512_v37  ;;  %v4931_v0 = vmul.f32 %v11548_v39, %v11658_v14  ;;  %8096 = vmatmul.mubr.f32.gmra.mrb[82].mxu1 %v4961_v8  ;;  %4071 = vst.msk [vmem:[#allocation6 + $0xfa] sm:$0xff] %vm576_vm3, %v3993_v19  ;;  %v3991_v50 = vpop.permute.xlu0 %3990  ;;  %v4531_v5 = vmul.f32 %v11623_v23, %v11489_v7 }
 0x3c2   : > { %v4363_v28 = vadd.f32 %v4331_v34, %v4263_v58  ;;  %v4132_v55 = vmul.f32 %v11594_v16, %v11435_v4  ;;  %v4232_v9 = vmul.f32 %v11602_v53, %v11437_v33  ;;  %v4762_v32 = vadd.f32 %v4730_v61, %v4661_v51  ;;  %4070 = vst.msk [vmem:[#allocation6 + $0xf2] sm:$0xff] %vm576_vm3, %v3991_v50 }
 0x3c3   : > { %v4562_v63 = vadd.f32 %v4530_v11, %v4462_v38  ;;  %v4631_v42 = vmul.f32 %v11625_v27, %v11491_v54  ;;  %v4732_v56 = vmul.f32 %v11504_v22, %v11674_v40  ;;  %v4332_v16 = vmul.f32 %v11605_v17, %v11448_v10 }
 0x3c4   : > { %8471 = vmatpush3.bf16.msra.mxu1 %v11512_v37  ;;  %v4463_v6 = vadd.f32 %v4431_v52, %v4363_v28  ;;  %v4264_v60 = vadd.f32 %v4232_v9, %v4132_v55  ;;  %v4432_v53 = vmul.f32 %v11646_v20, %v11487_v30  ;;  %v4862_v61 = vadd.f32 %v4830_v45, %v4762_v32  ;;  %v3997_v8 = vpop.permute.xlu1 %3996  ;;  %v11707_v37 = vld [vmem:[#allocation6 + $0x99] sm:$0xff] }
 0x3c5   : > { %8473 = vmatprep.subr.bf16.mxu1 %v11520_v62  ;;  %v4662_v11 = vadd.f32 %v4630_v13, %v4562_v63  ;;  %v4832_v58 = vmul.f32 %v11508_v29, %v11684_v43  ;;  %v4932_v34 = vmul.f32 %v11548_v39, %v11686_v24  ;;  %v11709_v52 = vld [vmem:[#allocation6 + $0x9a] sm:$0xff]  ;;  %4073 = vst.msk [vmem:[#allocation6 + $0x112] sm:$0xff] %vm576_vm3, %v3997_v8  ;;  %v3995_v45 = vpop.permute.xlu0 %3994 }
 0x3c6   : > { %v4563_v17 = vadd.f32 %v4531_v5, %v4463_v6  ;;  %v4364_v19 = vadd.f32 %v4332_v16, %v4264_v60  ;;  %v4532_v51 = vmul.f32 %v11656_v25, %v11489_v7  ;;  %v4133_v13 = vmul.f32 %v11616_v35, %v11435_v4  ;;  %v11719_v55 = vld [vmem:[#allocation6 + $0x9b] sm:$0xff]  ;;  %4072 = vst.msk [vmem:[#allocation6 + $0x10a] sm:$0xff] %vm576_vm3, %v3995_v45 }
 0x3c7   : > { %v4962_v38 = vadd.f32 %v11644_v1, %v4862_v61  ;;  %v4763_v50 = vadd.f32 %v4731_v18, %v4662_v11  ;;  %v4632_v28 = vmul.f32 %v11658_v14, %v11491_v54  ;;  %v4233_v5 = vmul.f32 %v11623_v23, %v11437_v33  ;;  %v11734_v23 = vld [vmem:[#allocation6 + $0xa9] sm:$0xff] }
 0x3c8   : > { %8475 = vmatpush3.bf16.msra.mxu1 %v11520_v62  ;;  %v4663_v9 = vadd.f32 %v4631_v42, %v4563_v17  ;;  %v4464_v32 = vadd.f32 %v4432_v53, %v4364_v19  ;;  %v4733_v35 = vmul.f32 %v11504_v22, %v11707_v37  ;;  %v4833_v1 = vmul.f32 %v11508_v29, %v11709_v52  ;;  %v4001_v63 = vpop.permute.xlu1 %4000  ;;  %v11741_v17 = vld [vmem:[#allocation6 + $0xaa] sm:$0xff] }
 0x3c9   : > { %8477 = vmatprep.subr.bf16.mxu1 %v11522_v46  ;;  %8098 = vmatprep.mubr.f32.mxu1 %v4962_v38  ;;  %v4863_v18 = vadd.f32 %v4831_v41, %v4763_v50  ;;  %v4265_v6 = vadd.f32 %v4233_v5, %v4133_v13  ;;  %v4333_v60 = vmul.f32 %v11625_v27, %v11448_v10  ;;  %v3999_v61 = vpop.permute.xlu0 %3998  ;;  %v11743_v27 = vld [vmem:[#allocation6 + $0xab] sm:$0xff] }
 0x3ca   : > { %v4433_v62 = vmul.f32 %v11674_v40, %v11487_v30  ;;  %v4764_v42 = vadd.f32 %v4732_v56, %v4663_v9  ;;  %v4564_v16 = vadd.f32 %v4532_v51, %v4464_v32  ;;  %v4933_v53 = vmul.f32 %v11548_v39, %v11719_v55  ;;  %4075 = vst.msk [vmem:[#allocation6 + $0x12a] sm:$0xff] %vm576_vm3, %v4001_v63  ;;  %v11768_v63 = vld [vmem:[#allocation6 + $0xb3] sm:$0xff] }
 0x3cb   : > { %v4533_v41 = vmul.f32 %v11684_v43, %v11489_v7  ;;  %v4963_v11 = vadd.f32 %v4931_v0, %v4863_v18  ;;  %v4365_v8 = vadd.f32 %v4333_v60, %v4265_v6  ;;  %v4134_v19 = vmul.f32 %v11646_v20, %v11435_v4  ;;  %4074 = vst.msk [vmem:[#allocation6 + $0x122] sm:$0xff] %vm576_vm3, %v3999_v61  ;;  %v11766_v18 = vld [vmem:[#allocation6 + $0xb2] sm:$0xff] }
 0x3cc   : > { %v4234_v56 = vmul.f32 %v11656_v25, %v11437_v33  ;;  %8479 = vmatpush3.bf16.msra.mxu1 %v11522_v46  ;;  %v4864_v51 = vadd.f32 %v4832_v58, %v4764_v42  ;;  %v4664_v45 = vadd.f32 %v4632_v28, %v4564_v16  ;;  %v4633_v0 = vmul.f32 %v11686_v24, %v11491_v54  ;;  %v11760_v46 = vld [vmem:[#allocation6 + $0xb1] sm:$0xff]  ;;  %v4005_v58 = vpop.permute.xlu1 %4004 }
 0x3cd   : > { %v4734_v13 = vmul.f32 %v11504_v22, %v11734_v23  ;;  %8481 = vmatprep.subr.bf16.mxu1 %v11559_v26  ;;  %8099 = vmatmul.mubr.f32.gmra.mrb[84].mxu1 %v4963_v11  ;;  %v4465_v38 = vadd.f32 %v4433_v62, %v4365_v8  ;;  %v4334_v25 = vmul.f32 %v11658_v14, %v11448_v10  ;;  %v4003_v14 = vpop.permute.xlu0 %4002 }
 0x3ce   : > { %v4266_v20 = vadd.f32 %v4234_v56, %v4134_v19  ;;  %v4434_v50 = vmul.f32 %v11707_v37, %v11487_v30  ;;  %v4964_v28 = vadd.f32 %v4932_v34, %v4864_v51  ;;  %v4765_v5 = vadd.f32 %v4733_v35, %v4664_v45  ;;  %4077 = vst.msk [vmem:[#allocation6 + $0x142] sm:$0xff] %vm576_vm3, %v4005_v58 }
 0x3cf   : > { %v4834_v9 = vmul.f32 %v11508_v29, %v11741_v17  ;;  %v4934_v32 = vmul.f32 %v11548_v39, %v11743_v27  ;;  %v4565_v6 = vadd.f32 %v4533_v41, %v4465_v38  ;;  %v4534_v62 = vmul.f32 %v11709_v52, %v11489_v7  ;;  %4076 = vst.msk [vmem:[#allocation6 + $0x13a] sm:$0xff] %vm576_vm3, %v4003_v14 }
 0x3d0   : > { %v4366_v60 = vadd.f32 %v4334_v25, %v4266_v20  ;;  %v4135_v34 = vmul.f32 %v11674_v40, %v11435_v4  ;;  %8483 = vmatpush3.bf16.msra.mxu1 %v11559_v26  ;;  %8101 = vmatprep.mubr.f32.mxu1 %v4964_v28  ;;  %v4865_v35 = vadd.f32 %v4833_v1, %v4765_v5  ;;  %v11787_v26 = vld [vmem:[#allocation6 + $0xc1] sm:$0xff]  ;;  %v4009_v1 = vpop.permute.xlu1 %4008 }
 0x3d1   : > { %v4634_v42 = vmul.f32 %v11719_v55, %v11491_v54  ;;  %v4735_v16 = vmul.f32 %v11504_v22, %v11760_v46  ;;  %v4235_v41 = vmul.f32 %v11684_v43, %v11437_v33  ;;  %v4665_v61 = vadd.f32 %v4633_v0, %v4565_v6  ;;  %v11793_v43 = vld [vmem:[#allocation6 + $0xc2] sm:$0xff]  ;;  %4079 = vst.msk [vmem:[#allocation6 + $0x15a] sm:$0xff] %vm576_vm3, %v4009_v1  ;;  %v4007_v38 = vpop.permute.xlu0 %4006 }
 0x3d2   : > { %v4466_v11 = vadd.f32 %v4434_v50, %v4366_v60  ;;  %v4835_v40 = vmul.f32 %v11508_v29, %v11766_v18  ;;  %v4935_v8 = vmul.f32 %v11548_v39, %v11768_v63  ;;  %v4965_v19 = vadd.f32 %v4933_v53, %v4865_v35  ;;  %v11795_v0 = vld [vmem:[#allocation6 + $0xc3] sm:$0xff]  ;;  %4078 = vst.msk [vmem:[#allocation6 + $0x152] sm:$0xff] %vm576_vm3, %v4007_v38 }
 0x3d3   : > { %v4267_v56 = vadd.f32 %v4235_v41, %v4135_v34  ;;  %v4335_v51 = vmul.f32 %v11686_v24, %v11448_v10  ;;  %v4435_v45 = vmul.f32 %v11734_v23, %v11487_v30  ;;  %v4766_v20 = vadd.f32 %v4734_v13, %v4665_v61  ;;  %v11819_v61 = vld [vmem:[#allocation6 + $0xc9] sm:$0xff] }
 0x3d4   : > { %v4566_v25 = vadd.f32 %v4534_v62, %v4466_v11  ;;  %v4535_v50 = vmul.f32 %v11741_v17, %v11489_v7  ;;  %v4136_v53 = vmul.f32 %v11707_v37, %v11435_v4  ;;  %8102 = vmatmul.mubr.f32.gmra.mrb[86].mxu1 %v4965_v19  ;;  %v4635_v58 = vmul.f32 %v11743_v27, %v11491_v54  ;;  %v4013_v60 = vpop.permute.xlu1 %4012 }
 0x3d5   : > { %v4367_v24 = vadd.f32 %v4335_v51, %v4267_v56  ;;  %v4736_v28 = vmul.f32 %v11504_v22, %v11787_v26  ;;  %v4236_v13 = vmul.f32 %v11709_v52, %v11437_v33  ;;  %v4866_v5 = vadd.f32 %v4834_v9, %v4766_v20  ;;  %v11821_v52 = vld [vmem:[#allocation6 + $0xca] sm:$0xff]  ;;  %4081 = vst.msk [vmem:[#allocation6 + $0x172] sm:$0xff] %vm576_vm3, %v4013_v60  ;;  %v4011_v9 = vpop.permute.xlu0 %4010 }
 0x3d6   : > { %v4666_v14 = vadd.f32 %v4634_v42, %v4566_v25  ;;  %v4836_v6 = vmul.f32 %v11508_v29, %v11793_v43  ;;  %v11813_v37 = vmul.f32 %v11548_v39, %v11795_v0  ;;  %v4336_v35 = vmul.f32 %v11719_v55, %v11448_v10  ;;  %4080 = vst.msk [vmem:[#allocation6 + $0x16a] sm:$0xff] %vm576_vm3, %v4011_v9 }
 0x3d7   : > { %v4467_v62 = vadd.f32 %v4435_v45, %v4367_v24  ;;  %v4268_v34 = vadd.f32 %v4236_v13, %v4136_v53  ;;  %v4436_v41 = vmul.f32 %v11760_v46, %v11487_v30  ;;  %v4966_v42 = vadd.f32 %v4934_v32, %v4866_v5  ;;  %v11831_v45 = vld [vmem:[#allocation6 + $0xcb] sm:$0xff]  ;;  %v11843_v5 = vld [vmem:[#allocation6 + $0xd9] sm:$0xff] }
 0x3d8   : > { %v4767_v11 = vadd.f32 %v4735_v16, %v4666_v14  ;;  %v4536_v1 = vmul.f32 %v11766_v18, %v11489_v7  ;;  %v4137_v19 = vmul.f32 %v11734_v23, %v11435_v4  ;;  %v4636_v51 = vmul.f32 %v11768_v63, %v11491_v54  ;;  %v4017_v25 = vpop.permute.xlu1 %4016 }
 0x3d9   : > { %v4567_v55 = vadd.f32 %v4535_v50, %v4467_v62  ;;  %v4368_v56 = vadd.f32 %v4336_v35, %v4268_v34  ;;  %v4237_v38 = vmul.f32 %v11741_v17, %v11437_v33  ;;  %8104 = vmatprep.mubr.f32.mxu1 %v4966_v42  ;;  %v4737_v16 = vmul.f32 %v11504_v22, %v11819_v61  ;;  %v4015_v17 = vpop.permute.xlu0 %4014  ;;  %v11853_v35 = vld [vmem:[#allocation6 + $0xda] sm:$0xff] }
 0x3da   : > { %v4867_v32 = vadd.f32 %v4835_v40, %v4767_v11  ;;  %v4837_v23 = vmul.f32 %v11508_v29, %v11821_v52  ;;  %v4337_v20 = vmul.f32 %v11743_v27, %v11448_v10  ;;  %v4437_v13 = vmul.f32 %v11787_v26, %v11487_v30  ;;  %4083 = vst.msk [vmem:[#allocation6 + $0x18a] sm:$0xff] %vm576_vm3, %v4017_v25 }
 0x3db   : > { %v4667_v50 = vadd.f32 %v4635_v58, %v4567_v55  ;;  %v4468_v53 = vadd.f32 %v4436_v41, %v4368_v56  ;;  %v4269_v24 = vadd.f32 %v4237_v38, %v4137_v19  ;;  %v4937_v14 = vmul.f32 %v11548_v39, %v11831_v45  ;;  %4082 = vst.msk [vmem:[#allocation6 + $0x182] sm:$0xff] %vm576_vm3, %v4015_v17  ;;  %v11855_v41 = vld [vmem:[#allocation6 + $0xdb] sm:$0xff] }
 0x3dc   : > { %v4967_v40 = vadd.f32 %v4935_v8, %v4867_v32  ;;  %v4537_v60 = vmul.f32 %v11793_v43, %v11489_v7  ;;  %v4138_v27 = vmul.f32 %v11760_v46, %v11435_v4  ;;  %v4238_v8 = vmul.f32 %v11766_v18, %v11437_v33  ;;  %v4021_v11 = vpop.permute.xlu1 %4020  ;;  %v11867_v38 = vld [vmem:[#allocation6 + $0xe1] sm:$0xff] }
 0x3dd   : > { %v4768_v58 = vadd.f32 %v4736_v28, %v4667_v50  ;;  %v4568_v62 = vadd.f32 %v4536_v1, %v4468_v53  ;;  %v4369_v34 = vadd.f32 %v4337_v20, %v4269_v24  ;;  %v4637_v9 = vmul.f32 %v11795_v0, %v11491_v54  ;;  %v11869_v18 = vld [vmem:[#allocation6 + $0xe2] sm:$0xff]  ;;  %4085 = vst.msk [vmem:[#allocation6 + $0x1a2] sm:$0xff] %vm576_vm3, %v4021_v11  ;;  %v4019_v32 = vpop.permute.xlu0 %4018 }
 0x3de   : > { %8105 = vmatmul.mubr.f32.gmra.mrb[88].mxu1 %v4967_v40  ;;  %v4738_v42 = vmul.f32 %v11504_v22, %v11843_v5  ;;  %v4338_v46 = vmul.f32 %v11768_v63, %v11448_v10  ;;  %v4438_v28 = vmul.f32 %v11819_v61, %v11487_v30  ;;  %v4270_v56 = vadd.f32 %v4238_v8, %v4138_v27 }
 0x3df   : > { %v4868_v1 = vadd.f32 %v4836_v6, %v4768_v58  ;;  %v4668_v19 = vadd.f32 %v4636_v51, %v4568_v62  ;;  %v4469_v55 = vadd.f32 %v4437_v13, %v4369_v34  ;;  %v4838_v20 = vmul.f32 %v11508_v29, %v11853_v35  ;;  %v11878_v6 = vld [vmem:[#allocation6 + $0xe3] sm:$0xff]  ;;  %4084 = vst.msk [vmem:[#allocation6 + $0x19a] sm:$0xff] %vm576_vm3, %v4019_v32 }
 0x3e0   : > { %v4938_v63 = vmul.f32 %v11548_v39, %v11855_v41  ;;  %v4538_v25 = vmul.f32 %v11821_v52, %v11489_v7  ;;  %v4139_v51 = vmul.f32 %v11787_v26, %v11435_v4  ;;  %v4370_v13 = vadd.f32 %v4338_v46, %v4270_v56 }
 0x3e1   : > { %v4968_v50 = vadd.f32 %v11813_v37, %v4868_v1  ;;  %v4769_v53 = vadd.f32 %v4737_v16, %v4668_v19  ;;  %v4569_v24 = vadd.f32 %v4537_v60, %v4469_v55  ;;  %v4638_v17 = vmul.f32 %v11831_v45, %v11491_v54  ;;  %v11894_v16 = vld [vmem:[#allocation6 + $0xf1] sm:$0xff] }
 0x3e2   : > { %v4739_v40 = vmul.f32 %v11504_v22, %v11867_v38  ;;  %v4839_v27 = vmul.f32 %v11508_v29, %v11869_v18  ;;  %v4239_v58 = vmul.f32 %v11793_v43, %v11437_v33  ;;  %v4470_v34 = vadd.f32 %v4438_v28, %v4370_v13  ;;  %v11902_v43 = vld [vmem:[#allocation6 + $0xf2] sm:$0xff] }
 0x3e3   : > { %8107 = vmatprep.mubr.f32.mxu1 %v4968_v50  ;;  %v4869_v26 = vadd.f32 %v4837_v23, %v4769_v53  ;;  %v4669_v62 = vadd.f32 %v4637_v9, %v4569_v24  ;;  %v4939_v37 = vmul.f32 %v11548_v39, %v11878_v6  ;;  %v4339_v8 = vmul.f32 %v11795_v0, %v11448_v10  ;;  %v11904_v23 = vld [vmem:[#allocation6 + $0xf3] sm:$0xff] }
 0x3e4   : > { %v4271_v60 = vadd.f32 %v4239_v58, %v4139_v51  ;;  %v4439_v46 = vmul.f32 %v11843_v5, %v11487_v30  ;;  %v4539_v11 = vmul.f32 %v11853_v35, %v11489_v7  ;;  %v4570_v1 = vadd.f32 %v4538_v25, %v4470_v34  ;;  %v11922_v13 = vld [vmem:[#allocation6 + $0xf9] sm:$0xff] }
 0x3e5   : > { %v4969_v9 = vadd.f32 %v4937_v14, %v4869_v26  ;;  %v4770_v28 = vadd.f32 %v4738_v42, %v4669_v62  ;;  %v4140_v19 = vmul.f32 %v11819_v61, %v11435_v4  ;;  %v4639_v0 = vmul.f32 %v11855_v41, %v11491_v54 }
 0x3e6   : > { %v4371_v55 = vadd.f32 %v4339_v8, %v4271_v60  ;;  %v4740_v56 = vmul.f32 %v11504_v22, %v11894_v16  ;;  %v4240_v32 = vmul.f32 %v11821_v52, %v11437_v33  ;;  %v4670_v50 = vadd.f32 %v4638_v17, %v4570_v1  ;;  %v11924_v52 = vld [vmem:[#allocation6 + $0xfa] sm:$0xff] }
 0x3e7   : > { %8108 = vmatmul.mubr.f32.gmra.mrb[90].mxu1 %v4969_v9  ;;  %v4870_v51 = vadd.f32 %v4838_v20, %v4770_v28  ;;  %v4840_v14 = vmul.f32 %v11508_v29, %v11902_v43  ;;  %v4940_v42 = vmul.f32 %v11548_v39, %v11904_v23  ;;  %v4340_v53 = vmul.f32 %v11831_v45, %v11448_v10  ;;  %v11932_v60 = vld [vmem:[#allocation6 + $0xfb] sm:$0xff] }
 0x3e8   : > { %v4471_v61 = vadd.f32 %v4439_v46, %v4371_v55  ;;  %v4272_v25 = vadd.f32 %v4240_v32, %v4140_v19  ;;  %v4440_v24 = vmul.f32 %v11867_v38, %v11487_v30  ;;  %v4771_v17 = vadd.f32 %v4739_v40, %v4670_v50  ;;  %v11944_v19 = vld [vmem:[#allocation6 + $0x109] sm:$0xff] }
 0x3e9   : > { %v4970_v20 = vadd.f32 %v4938_v63, %v4870_v51  ;;  %v4540_v58 = vmul.f32 %v11869_v18, %v11489_v7  ;;  %v4141_v26 = vmul.f32 %v11843_v5, %v11435_v4  ;;  %v4640_v45 = vmul.f32 %v11878_v6, %v11491_v54  ;;  %v11952_v50 = vld [vmem:[#allocation6 + $0x10a] sm:$0xff] }
 0x3ea   : > { %v4571_v62 = vadd.f32 %v4539_v11, %v4471_v61  ;;  %v4372_v34 = vadd.f32 %v4340_v53, %v4272_v25  ;;  %v4241_v8 = vmul.f32 %v11853_v35, %v11437_v33  ;;  %v4871_v46 = vadd.f32 %v4839_v27, %v4771_v17  ;;  %v11954_v61 = vld [vmem:[#allocation6 + $0x10b] sm:$0xff] }
 0x3eb   : > { %8110 = vmatprep.mubr.f32.mxu1 %v4970_v20  ;;  %v4741_v63 = vmul.f32 %v11504_v22, %v11922_v13  ;;  %v4841_v40 = vmul.f32 %v11508_v29, %v11924_v52  ;;  %v4341_v5 = vmul.f32 %v11855_v41, %v11448_v10  ;;  %v4441_v1 = vmul.f32 %v11894_v16, %v11487_v30 }
 0x3ec   : > { %v4671_v11 = vadd.f32 %v4639_v0, %v4571_v62  ;;  %v4472_v9 = vadd.f32 %v4440_v24, %v4372_v34  ;;  %v4273_v28 = vadd.f32 %v4241_v8, %v4141_v26  ;;  %v4971_v35 = vadd.f32 %v4939_v37, %v4871_v46  ;;  %v11966_v26 = vld [vmem:[#allocation6 + $0x111] sm:$0xff] }
 0x3ed   : > { %v4941_v27 = vmul.f32 %v11548_v39, %v11932_v60  ;;  %v4541_v55 = vmul.f32 %v11902_v43, %v11489_v7  ;;  %v4142_v32 = vmul.f32 %v11867_v38, %v11435_v4  ;;  %v4242_v25 = vmul.f32 %v11869_v18, %v11437_v33  ;;  %v11968_v18 = vld [vmem:[#allocation6 + $0x112] sm:$0xff] }
 0x3ee   : > { %v4772_v51 = vadd.f32 %v4740_v56, %v4671_v11  ;;  %v4572_v41 = vadd.f32 %v4540_v58, %v4472_v9  ;;  %v4373_v0 = vadd.f32 %v4341_v5, %v4273_v28  ;;  %8111 = vmatmul.mubr.f32.gmra.mrb[92].mxu1 %v4971_v35  ;;  %v4641_v37 = vmul.f32 %v11904_v23, %v11491_v54  ;;  %v11976_v8 = vld [vmem:[#allocation6 + $0x113] sm:$0xff] }
 0x3ef   : > { %v4742_v53 = vmul.f32 %v11504_v22, %v11944_v19  ;;  %v4342_v38 = vmul.f32 %v11878_v6, %v11448_v10  ;;  %v4442_v56 = vmul.f32 %v11922_v13, %v11487_v30  ;;  %v4274_v58 = vadd.f32 %v4242_v25, %v4142_v32 }
 0x3f0   : > { %v4872_v24 = vadd.f32 %v4840_v14, %v4772_v51  ;;  %v4672_v20 = vadd.f32 %v4640_v45, %v4572_v41  ;;  %v4473_v17 = vadd.f32 %v4441_v1, %v4373_v0  ;;  %v4842_v62 = vmul.f32 %v11508_v29, %v11952_v50 }
 0x3f1   : > { %v4942_v34 = vmul.f32 %v11548_v39, %v11954_v61  ;;  %v4542_v6 = vmul.f32 %v11924_v52, %v11489_v7  ;;  %v4143_v14 = vmul.f32 %v11894_v16, %v11435_v4  ;;  %v4374_v11 = vadd.f32 %v4342_v38, %v4274_v58 }
 0x3f2   : > { %v4972_v45 = vadd.f32 %v4940_v42, %v4872_v24  ;;  %v4773_v46 = vadd.f32 %v4741_v63, %v4672_v20  ;;  %v4573_v5 = vadd.f32 %v4541_v55, %v4473_v17  ;;  %v4642_v9 = vmul.f32 %v11932_v60, %v11491_v54  ;;  %v11990_v63 = vld [vmem:[#allocation6 + $0x121] sm:$0xff] }
 0x3f3   : > { %v4743_v28 = vmul.f32 %v11504_v22, %v11966_v26  ;;  %v4843_v1 = vmul.f32 %v11508_v29, %v11968_v18  ;;  %v4243_v35 = vmul.f32 %v11902_v43, %v11437_v33  ;;  %v4474_v16 = vadd.f32 %v4442_v56, %v4374_v11  ;;  %v11998_v43 = vld [vmem:[#allocation6 + $0x122] sm:$0xff] }
 0x3f4   : > { %8113 = vmatprep.mubr.f32.mxu1 %v4972_v45  ;;  %v4873_v32 = vadd.f32 %v4841_v40, %v4773_v46  ;;  %v4673_v51 = vadd.f32 %v4641_v37, %v4573_v5  ;;  %v4943_v42 = vmul.f32 %v11548_v39, %v11976_v8  ;;  %v4343_v41 = vmul.f32 %v11904_v23, %v11448_v10  ;;  %v12000_v40 = vld [vmem:[#allocation6 + $0x123] sm:$0xff] }
 0x3f5   : > { %v4275_v55 = vadd.f32 %v4243_v35, %v4143_v14  ;;  %v4443_v0 = vmul.f32 %v11944_v19, %v11487_v30  ;;  %v4543_v25 = vmul.f32 %v11952_v50, %v11489_v7  ;;  %v4574_v56 = vadd.f32 %v4542_v6, %v4474_v16  ;;  %v12018_v11 = vld [vmem:[#allocation6 + $0x129] sm:$0xff] }
 0x3f6   : > { %v4973_v37 = vadd.f32 %v4941_v27, %v4873_v32  ;;  %v4774_v38 = vadd.f32 %v4742_v53, %v4673_v51  ;;  %v4144_v24 = vmul.f32 %v11922_v13, %v11435_v4  ;;  %v4643_v23 = vmul.f32 %v11954_v61, %v11491_v54 }
 0x3f7   : > { %v4375_v20 = vadd.f32 %v4343_v41, %v4275_v55  ;;  %v4744_v17 = vmul.f32 %v11504_v22, %v11990_v63  ;;  %v4244_v58 = vmul.f32 %v11924_v52, %v11437_v33  ;;  %v4674_v45 = vadd.f32 %v4642_v9, %v4574_v56  ;;  %v12020_v52 = vld [vmem:[#allocation6 + $0x12a] sm:$0xff] }
 0x3f8   : > { %8114 = vmatmul.mubr.f32.gmra.mrb[94].mxu1 %v4973_v37  ;;  %v4874_v14 = vadd.f32 %v4842_v62, %v4774_v38  ;;  %v4844_v27 = vmul.f32 %v11508_v29, %v11998_v43  ;;  %v4944_v53 = vmul.f32 %v11548_v39, %v12000_v40  ;;  %v4344_v46 = vmul.f32 %v11932_v60, %v11448_v10  ;;  %v12028_v55 = vld [vmem:[#allocation6 + $0x12b] sm:$0xff] }
 0x3f9   : > { %v4475_v13 = vadd.f32 %v4443_v0, %v4375_v20  ;;  %v4276_v6 = vadd.f32 %v4244_v58, %v4144_v24  ;;  %v4444_v5 = vmul.f32 %v11966_v26, %v11487_v30  ;;  %v4775_v9 = vadd.f32 %v4743_v28, %v4674_v45  ;;  %v12040_v24 = vld [vmem:[#allocation6 + $0x139] sm:$0xff] }
 0x3fa   : > { %v4974_v62 = vadd.f32 %v4942_v34, %v4874_v14  ;;  %v4544_v35 = vmul.f32 %v11968_v18, %v11489_v7  ;;  %v4145_v32 = vmul.f32 %v11944_v19, %v11435_v4  ;;  %v4644_v60 = vmul.f32 %v11976_v8, %v11491_v54  ;;  %v12048_v45 = vld [vmem:[#allocation6 + $0x13a] sm:$0xff] }
 0x3fb   : > { %v4575_v51 = vadd.f32 %v4543_v25, %v4475_v13  ;;  %v4376_v16 = vadd.f32 %v4344_v46, %v4276_v6  ;;  %v4245_v41 = vmul.f32 %v11952_v50, %v11437_v33  ;;  %v4875_v0 = vadd.f32 %v4843_v1, %v4775_v9  ;;  %v12050_v13 = vld [vmem:[#allocation6 + $0x13b] sm:$0xff] }
 0x3fc   : > { %8116 = vmatprep.mubr.f32.mxu1 %v4974_v62  ;;  %v4745_v34 = vmul.f32 %v11504_v22, %v12018_v11  ;;  %v4845_v28 = vmul.f32 %v11508_v29, %v12020_v52  ;;  %v4345_v19 = vmul.f32 %v11954_v61, %v11448_v10  ;;  %v4445_v56 = vmul.f32 %v11990_v63, %v11487_v30 }
 0x3fd   : > { %v4675_v25 = vadd.f32 %v4643_v23, %v4575_v51  ;;  %v4476_v37 = vadd.f32 %v4444_v5, %v4376_v16  ;;  %v4277_v38 = vadd.f32 %v4245_v41, %v4145_v32  ;;  %v4975_v50 = vadd.f32 %v4943_v42, %v4875_v0  ;;  %v12062_v32 = vld [vmem:[#allocation6 + $0x141] sm:$0xff] }
 0x3fe   : > { %v4945_v1 = vmul.f32 %v11548_v39, %v12028_v55  ;;  %v4545_v20 = vmul.f32 %v11998_v43, %v11489_v7  ;;  %v4146_v58 = vmul.f32 %v11966_v26, %v11435_v4  ;;  %v4246_v6 = vmul.f32 %v11968_v18, %v11437_v33  ;;  %v12064_v18 = vld [vmem:[#allocation6 + $0x142] sm:$0xff] }
 0x3ff   : > { %v4776_v14 = vadd.f32 %v4744_v17, %v4675_v25  ;;  %v4576_v61 = vadd.f32 %v4544_v35, %v4476_v37  ;;  %v4377_v23 = vadd.f32 %v4345_v19, %v4277_v38  ;;  %8117 = vmatmul.mubr.f32.gmra.mrb[96].mxu1 %v4975_v50  ;;  %v4645_v42 = vmul.f32 %v12000_v40, %v11491_v54  ;;  %v12072_v41 = vld [vmem:[#allocation6 + $0x143] sm:$0xff] }
 0x400   : > { %v4746_v46 = vmul.f32 %v11504_v22, %v12040_v24  ;;  %v4346_v26 = vmul.f32 %v11976_v8, %v11448_v10  ;;  %v4446_v17 = vmul.f32 %v12018_v11, %v11487_v30  ;;  %v4278_v35 = vadd.f32 %v4246_v6, %v4146_v58 }
 0x401   : > { %v4876_v5 = vadd.f32 %v4844_v27, %v4776_v14  ;;  %v4676_v62 = vadd.f32 %v4644_v60, %v4576_v61  ;;  %v4477_v9 = vadd.f32 %v4445_v56, %v4377_v23  ;;  %v4846_v51 = vmul.f32 %v11508_v29, %v12048_v45 }
 0x402   : > { %v4946_v16 = vmul.f32 %v11548_v39, %v12050_v13  ;;  %v4546_v8 = vmul.f32 %v12020_v52, %v11489_v7  ;;  %v4147_v27 = vmul.f32 %v11990_v63, %v11435_v4  ;;  %v4378_v25 = vadd.f32 %v4346_v26, %v4278_v35 }
 0x403   : > { %v4976_v60 = vadd.f32 %v4944_v53, %v4876_v5  ;;  %v4777_v0 = vadd.f32 %v4745_v34, %v4676_v62  ;;  %v4577_v19 = vadd.f32 %v4545_v20, %v4477_v9  ;;  %v4646_v37 = vmul.f32 %v12028_v55, %v11491_v54  ;;  %v12086_v34 = vld [vmem:[#allocation6 + $0x151] sm:$0xff] }
 0x404   : > { %v4747_v38 = vmul.f32 %v11504_v22, %v12062_v32  ;;  %v4847_v56 = vmul.f32 %v11508_v29, %v12064_v18  ;;  %v4247_v50 = vmul.f32 %v11998_v43, %v11437_v33  ;;  %v4478_v63 = vadd.f32 %v4446_v17, %v4378_v25  ;;  %v12094_v43 = vld [vmem:[#allocation6 + $0x152] sm:$0xff] }
 0x405   : > { %8119 = vmatprep.mubr.f32.mxu1 %v4976_v60  ;;  %v4877_v58 = vadd.f32 %v4845_v28, %v4777_v0  ;;  %v4677_v14 = vadd.f32 %v4645_v42, %v4577_v19  ;;  %v4947_v53 = vmul.f32 %v11548_v39, %v12072_v41  ;;  %v4347_v61 = vmul.f32 %v12000_v40, %v11448_v10  ;;  %v12096_v28 = vld [vmem:[#allocation6 + $0x153] sm:$0xff] }
 0x406   : > { %v4279_v20 = vadd.f32 %v4247_v50, %v4147_v27  ;;  %v4447_v23 = vmul.f32 %v12040_v24, %v11487_v30  ;;  %v4547_v6 = vmul.f32 %v12048_v45, %v11489_v7  ;;  %v4578_v17 = vadd.f32 %v4546_v8, %v4478_v63  ;;  %v12121_v19 = vld [vmem:[#allocation6 + $0x15a] sm:$0xff] }
 0x407   : > { %v4977_v42 = vadd.f32 %v4945_v1, %v4877_v58  ;;  %v4778_v26 = vadd.f32 %v4746_v46, %v4677_v14  ;;  %v4148_v39 = vmul.f32 %v12018_v11, %v11435_v4  ;;  %v4647_v40 = vmul.f32 %v12050_v13, %v11491_v54  ;;  %v12111_v11 = vld [vmem:[%s14251_s7 + $0x8] ss:$0 sm:$0xff] }
 0x408   : > { %v4379_v5 = vadd.f32 %v4347_v61, %v4279_v20  ;;  %v4748_v62 = vmul.f32 %v11504_v22, %v12086_v34  ;;  %v4248_v9 = vmul.f32 %v12020_v52, %v11437_v33  ;;  %v4678_v27 = vadd.f32 %v4646_v37, %v4578_v17  ;;  %v12129_v20 = vld [vmem:[#allocation6 + $0x15b] sm:$0xff] }
 0x409   : > { %8120 = vmatmul.mubr.f32.gmra.mrb[98].mxu1 %v4977_v42  ;;  %v4878_v35 = vadd.f32 %v4846_v51, %v4778_v26  ;;  %v4848_v1 = vmul.f32 %v11508_v29, %v12094_v43  ;;  %v4948_v46 = vmul.f32 %v12111_v11, %v12096_v28  ;;  %v4348_v0 = vmul.f32 %v12028_v55, %v11448_v10  ;;  %v12119_v51 = vld [vmem:[#allocation6 + $0x159] sm:$0xff] }
 0x40a   : > { %v4479_v8 = vadd.f32 %v4447_v23, %v4379_v5  ;;  %v4280_v60 = vadd.f32 %v4248_v9, %v4148_v39  ;;  %v4448_v52 = vmul.f32 %v12062_v32, %v11487_v30  ;;  %v4779_v37 = vadd.f32 %v4747_v38, %v4678_v27  ;;  %v12141_v39 = vld [vmem:[#allocation6 + $0x169] sm:$0xff] }
 0x40b   : > { %v4978_v25 = vadd.f32 %v4946_v16, %v4878_v35  ;;  %v4548_v50 = vmul.f32 %v12064_v18, %v11489_v7  ;;  %v4149_v58 = vmul.f32 %v12040_v24, %v11435_v4  ;;  %v4648_v55 = vmul.f32 %v12072_v41, %v11491_v54  ;;  %v12149_v27 = vld [vmem:[#allocation6 + $0x16a] sm:$0xff] }
 0x40c   : > { %v4579_v14 = vadd.f32 %v4547_v6, %v4479_v8  ;;  %v4380_v63 = vadd.f32 %v4348_v0, %v4280_v60  ;;  %v4249_v61 = vmul.f32 %v12048_v45, %v11437_v33  ;;  %v4879_v23 = vadd.f32 %v4847_v56, %v4779_v37  ;;  %v12151_v8 = vld [vmem:[#allocation6 + $0x16b] sm:$0xff] }
 0x40d   : > { %8122 = vmatprep.mubr.f32.mxu1 %v4978_v25  ;;  %v4749_v16 = vmul.f32 %v11504_v22, %v12119_v51  ;;  %v4849_v38 = vmul.f32 %v11508_v29, %v12121_v19  ;;  %v4349_v24 = vmul.f32 %v12050_v13, %v11448_v10  ;;  %v4449_v17 = vmul.f32 %v12086_v34, %v11487_v30 }
 0x40e   : > { %v4679_v6 = vadd.f32 %v4647_v40, %v4579_v14  ;;  %v4480_v42 = vadd.f32 %v4448_v52, %v4380_v63  ;;  %v4281_v26 = vadd.f32 %v4249_v61, %v4149_v58  ;;  %v4979_v45 = vadd.f32 %v4947_v53, %v4879_v23  ;;  %v12163_v58 = vld [vmem:[#allocation6 + $0x171] sm:$0xff] }
 0x40f   : > { %v4949_v56 = vmul.f32 %v12111_v11, %v12129_v20  ;;  %v4549_v5 = vmul.f32 %v12094_v43, %v11489_v7  ;;  %v4150_v9 = vmul.f32 %v12062_v32, %v11435_v4  ;;  %v4250_v60 = vmul.f32 %v12064_v18, %v11437_v33  ;;  %v12165_v18 = vld [vmem:[#allocation6 + $0x172] sm:$0xff] }
 0x410   : > { %v4780_v35 = vadd.f32 %v4748_v62, %v4679_v6  ;;  %v4580_v13 = vadd.f32 %v4548_v50, %v4480_v42  ;;  %v4381_v40 = vadd.f32 %v4349_v24, %v4281_v26  ;;  %8123 = vmatmul.mubr.f32.gmra.mrb[100].mxu1 %v4979_v45  ;;  %v4649_v53 = vmul.f32 %v12096_v28, %v11491_v54  ;;  %v12173_v61 = vld [vmem:[#allocation6 + $0x173] sm:$0xff] }
 0x411   : > { %v4750_v0 = vmul.f32 %v11504_v22, %v12141_v39  ;;  %v4350_v32 = vmul.f32 %v12072_v41, %v11448_v10  ;;  %v4450_v62 = vmul.f32 %v12119_v51, %v11487_v30  ;;  %v4282_v50 = vadd.f32 %v4250_v60, %v4150_v9 }
 0x412   : > { %v4880_v52 = vadd.f32 %v4848_v1, %v4780_v35  ;;  %v4680_v25 = vadd.f32 %v4648_v55, %v4580_v13  ;;  %v4481_v37 = vadd.f32 %v4449_v17, %v4381_v40  ;;  %v4850_v14 = vmul.f32 %v11508_v29, %v12149_v27 }
 0x413   : > { %v4950_v63 = vmul.f32 %v12111_v11, %v12151_v8  ;;  %v4550_v41 = vmul.f32 %v12121_v19, %v11489_v7  ;;  %v4151_v1 = vmul.f32 %v12086_v34, %v11435_v4  ;;  %v4382_v6 = vadd.f32 %v4350_v32, %v4282_v50 }
 0x414   : > { %v4980_v55 = vadd.f32 %v4948_v46, %v4880_v52  ;;  %v4781_v23 = vadd.f32 %v4749_v16, %v4680_v25  ;;  %v4581_v24 = vadd.f32 %v4549_v5, %v4481_v37  ;;  %v4650_v42 = vmul.f32 %v12129_v20, %v11491_v54  ;;  %v12187_v16 = vld [vmem:[#allocation6 + $0x181] sm:$0xff] }
 0x415   : > { %v4751_v26 = vmul.f32 %v11504_v22, %v12163_v58  ;;  %v4851_v17 = vmul.f32 %v11508_v29, %v12165_v18  ;;  %v4251_v45 = vmul.f32 %v12094_v43, %v11437_v33  ;;  %v4482_v34 = vadd.f32 %v4450_v62, %v4382_v6  ;;  %v12195_v43 = vld [vmem:[#allocation6 + $0x182] sm:$0xff] }
 0x416   : > { %8125 = vmatprep.mubr.f32.mxu1 %v4980_v55  ;;  %v4881_v9 = vadd.f32 %v4849_v38, %v4781_v23  ;;  %v4681_v35 = vadd.f32 %v4649_v53, %v4581_v24  ;;  %v4951_v46 = vmul.f32 %v12111_v11, %v12173_v61  ;;  %v4351_v13 = vmul.f32 %v12096_v28, %v11448_v10  ;;  %v12197_v38 = vld [vmem:[#allocation6 + $0x183] sm:$0xff] }
 0x417   : > { %v4283_v5 = vadd.f32 %v4251_v45, %v4151_v1  ;;  %v4451_v40 = vmul.f32 %v12141_v39, %v11487_v30  ;;  %v4551_v60 = vmul.f32 %v12149_v27, %v11489_v7  ;;  %v4582_v62 = vadd.f32 %v4550_v41, %v4482_v34  ;;  %v12215_v6 = vld [vmem:[#allocation6 + $0x189] sm:$0xff] }
 0x418   : > { %v4981_v53 = vadd.f32 %v4949_v56, %v4881_v9  ;;  %v4782_v32 = vadd.f32 %v4750_v0, %v4681_v35  ;;  %v4152_v52 = vmul.f32 %v12119_v51, %v11435_v4  ;;  %v4651_v28 = vmul.f32 %v12151_v8, %v11491_v54 }
 0x419   : > { %v4383_v25 = vadd.f32 %v4351_v13, %v4283_v5  ;;  %v4752_v37 = vmul.f32 %v11504_v22, %v12187_v16  ;;  %v4252_v50 = vmul.f32 %v12121_v19, %v11437_v33  ;;  %v4682_v55 = vadd.f32 %v4650_v42, %v4582_v62  ;;  %v12217_v19 = vld [vmem:[#allocation6 + $0x18a] sm:$0xff] }
 0x41a   : > { %8126 = vmatmul.mubr.f32.gmra.mrb[102].mxu1 %v4981_v53  ;;  %v4882_v1 = vadd.f32 %v4850_v14, %v4782_v32  ;;  %v4852_v56 = vmul.f32 %v11508_v29, %v12195_v43  ;;  %v4952_v0 = vmul.f32 %v12111_v11, %v12197_v38  ;;  %v4352_v23 = vmul.f32 %v12129_v20, %v11448_v10  ;;  %v12225_v5 = vld [vmem:[#allocation6 + $0x18b] sm:$0xff] }
 0x41b   : > { %v4483_v51 = vadd.f32 %v4451_v40, %v4383_v25  ;;  %v4284_v41 = vadd.f32 %v4252_v50, %v4152_v52  ;;  %v4452_v24 = vmul.f32 %v12163_v58, %v11487_v30  ;;  %v4783_v42 = vadd.f32 %v4751_v26, %v4682_v55  ;;  %v4718_v52 = vld [vmem:[#allocation6 + $0x199] sm:$0xff] }
 0x41c   : > { %v4982_v14 = vadd.f32 %v4950_v63, %v4882_v1  ;;  %v4552_v45 = vmul.f32 %v12165_v18, %v11489_v7  ;;  %v4153_v9 = vmul.f32 %v12141_v39, %v11435_v4  ;;  %v4652_v20 = vmul.f32 %v12173_v61, %v11491_v54 }
 0x41d   : > { %v4583_v35 = vadd.f32 %v4551_v60, %v4483_v51  ;;  %v4384_v34 = vadd.f32 %v4352_v23, %v4284_v41  ;;  %v4253_v13 = vmul.f32 %v12149_v27, %v11437_v33  ;;  %v4883_v40 = vadd.f32 %v4851_v17, %v4783_v42  ;;  %v4818_v51 = vld [vmem:[#allocation6 + $0x19a] sm:$0xff] }
 0x41e   : > { %8128 = vmatprep.mubr.f32.mxu1 %v4982_v14  ;;  %v4753_v63 = vmul.f32 %v11504_v22, %v12215_v6  ;;  %v4853_v26 = vmul.f32 %v11508_v29, %v12217_v19  ;;  %v4353_v39 = vmul.f32 %v12151_v8, %v11448_v10  ;;  %v4453_v62 = vmul.f32 %v12187_v16, %v11487_v30  ;;  %v7546_v8 = vld [vmem:[%s14252_s8 + $0xe0] sm:$0xff]  ;;  %v4918_v41 = vld [vmem:[#allocation6 + $0x19b] sm:$0xff] }
 0x41f   : > { %v4683_v60 = vadd.f32 %v4651_v28, %v4583_v35  ;;  %v4484_v53 = vadd.f32 %v4452_v24, %v4384_v34  ;;  %v4285_v32 = vadd.f32 %v4253_v13, %v4153_v9  ;;  %v4983_v25 = vadd.f32 %v4951_v46, %v4883_v40  ;;  %v7547_v23 = vld [vmem:[%s14252_s8 + $0xe8] sm:$0xff]  ;;  %v4719_v35 = vld [vmem:[#allocation6 + $0x1a1] sm:$0xff] }
 0x420   : > { %v4953_v27 = vmul.f32 %v12111_v11, %v12225_v5  ;;  %v4553_v17 = vmul.f32 %v12195_v43, %v11489_v7  ;;  %v4154_v50 = vmul.f32 %v12163_v58, %v11435_v4  ;;  %v4254_v46 = vmul.f32 %v12165_v18, %v11437_v33 }
 0x421   : > { %v4784_v28 = vadd.f32 %v4752_v37, %v4683_v60  ;;  %v4584_v1 = vadd.f32 %v4552_v45, %v4484_v53  ;;  %v4385_v55 = vadd.f32 %v4353_v39, %v4285_v32  ;;  %8129 = vmatmul.mubr.f32.gmra.mrb[104].mxu1 %v4983_v25  ;;  %v4653_v58 = vmul.f32 %v12197_v38, %v11491_v54  ;;  %v4819_v25 = vld [vmem:[#allocation6 + $0x1a2] sm:$0xff] }
 0x422   : > { %v4754_v24 = vmul.f32 %v11504_v22, %v4718_v52  ;;  %v4354_v37 = vmul.f32 %v12173_v61, %v11448_v10  ;;  %v4454_v14 = vmul.f32 %v12215_v6, %v11487_v30  ;;  %v4286_v18 = vadd.f32 %v4254_v46, %v4154_v50 }
 0x423   : > { %v4884_v42 = vadd.f32 %v4852_v56, %v4784_v28  ;;  %v4684_v45 = vadd.f32 %v4652_v20, %v4584_v1  ;;  %v4485_v9 = vadd.f32 %v4453_v62, %v4385_v55  ;;  %v4854_v34 = vmul.f32 %v11508_v29, %v4818_v51  ;;  %v4919_v62 = vld [vmem:[#allocation6 + $0x1a3] sm:$0xff] }
 0x424   : > { %v4954_v13 = vmul.f32 %v12111_v11, %v4918_v41  ;;  %v4554_v40 = vmul.f32 %v12217_v19, %v11489_v7  ;;  %v8484_v39 = vpack.c.bf16 %v7547_v23, %v7546_v8  ;;  %v4386_v61 = vadd.f32 %v4354_v37, %v4286_v18  ;;  %v4720_v23 = vld [vmem:[#allocation6 + $0x1b1] sm:$0xff] }
 0x425   : > { %v4984_v60 = vadd.f32 %v4952_v0, %v4884_v42  ;;  %v4785_v53 = vadd.f32 %v4753_v63, %v4684_v45  ;;  %v4585_v32 = vadd.f32 %v4553_v17, %v4485_v9  ;;  %v4654_v56 = vmul.f32 %v12225_v5, %v11491_v54 }
 0x426   : > { %v4755_v20 = vmul.f32 %v11504_v22, %v4719_v35  ;;  %8485 = vmatprep.subr.bf16.mxu1 %v8484_v39  ;;  %v4155_v50 = vmul.f32 %v12187_v16, %v11435_v4  ;;  %v4255_v28 = vmul.f32 %v12195_v43, %v11437_v33  ;;  %v4486_v63 = vadd.f32 %v4454_v14, %v4386_v61  ;;  %v4920_v14 = vld [vmem:[#allocation6 + $0x1b3] sm:$0xff] }
 0x427   : > { %8131 = vmatprep.mubr.f32.mxu1 %v4984_v60  ;;  %v4885_v8 = vadd.f32 %v4853_v26, %v4785_v53  ;;  %v4685_v0 = vadd.f32 %v4653_v58, %v4585_v32  ;;  %8487 = vmatpush3.bf16.msra.mxu1 %v8484_v39  ;;  %v4855_v17 = vmul.f32 %v11508_v29, %v4819_v25  ;;  %v4820_v58 = vld [vmem:[#allocation6 + $0x1b2] sm:$0xff] }
 0x428   : > { %v4287_v1 = vadd.f32 %v4255_v28, %v4155_v50  ;;  %v4355_v55 = vmul.f32 %v12197_v38, %v11448_v10  ;;  %v4455_v46 = vmul.f32 %v4718_v52, %v11487_v30  ;;  %v4586_v16 = vadd.f32 %v4554_v40, %v4486_v63  ;;  %v7548_v40 = vld [vmem:[%s14252_s8 + $0xf0] sm:$0xff]  ;;  %v12292_v53 = vld [vmem:[#allocation6 + $0x34] sm:$0xff] }
 0x429   : > { %v4985_v37 = vadd.f32 %v4953_v27, %v4885_v8  ;;  %v4786_v42 = vadd.f32 %v4754_v24, %v4685_v0  ;;  %v4955_v45 = vmul.f32 %v12111_v11, %v4919_v62  ;;  %v4555_v26 = vmul.f32 %v4818_v51, %v11489_v7  ;;  %v7549_v51 = vld [vmem:[%s14252_s8 + $0xf8] sm:$0xff]  ;;  %v12295_v28 = vld [vmem:[#allocation6 + $0x60] sm:$0xff] }
 0x42a   : > { %v4387_v43 = vadd.f32 %v4355_v55, %v4287_v1  ;;  %v4156_v9 = vmul.f32 %v12215_v6, %v11435_v4  ;;  %v4256_v18 = vmul.f32 %v12217_v19, %v11437_v33  ;;  %v4686_v52 = vadd.f32 %v4654_v56, %v4586_v16  ;;  %v5374_v8 = vld [vmem:[#allocation6 + $0xa] sm:$0xff] }
 0x42b   : > { %8132 = vmatmul.mubr.f32.gmra.mrb[106].mxu1 %v4985_v37  ;;  %v4886_v38 = vadd.f32 %v4854_v34, %v4786_v42  ;;  %v4655_v27 = vmul.f32 %v4918_v41, %v11491_v54  ;;  %v4756_v24 = vmul.f32 %v11504_v22, %v4720_v23  ;;  %v4356_v33 = vmul.f32 %v12225_v5, %v11448_v10  ;;  %v4721_v5 = vld [vmem:[#allocation6 + $0x1b9] sm:$0xff] }
 0x42c   : > { %v4487_v39 = vadd.f32 %v4455_v46, %v4387_v43  ;;  %v4288_v4 = vadd.f32 %v4256_v18, %v4156_v9  ;;  %v4456_v6 = vmul.f32 %v4719_v35, %v11487_v30  ;;  %v4787_v34 = vadd.f32 %v4755_v20, %v4686_v52  ;;  %v4921_v37 = vld [vmem:[#allocation6 + $0x1bb] sm:$0xff]  ;;  %v12332_v9 = vld [vmem:[#allocation6 + $0x64] sm:$0xff] }
 0x42d   : > { %v4986_v19 = vadd.f32 %v4954_v13, %v4886_v38  ;;  %v4856_v41 = vmul.f32 %v11508_v29, %v4820_v58  ;;  %v4956_v60 = vmul.f32 %v12111_v11, %v4920_v14  ;;  %v4556_v56 = vmul.f32 %v4819_v25, %v11489_v7  ;;  %v9013_v13 = vld [vmem:[%s14251_s7 + $0x10] sm:$0xff]  ;;  %v5474_v7 = vld [vmem:[#allocation6 + $0xc] sm:$0xff] }
 0x42e   : > { %v4587_v32 = vadd.f32 %v4555_v26, %v4487_v39  ;;  %v4388_v61 = vadd.f32 %v4356_v33, %v4288_v4  ;;  %v8488_v50 = vpack.c.bf16 %v7549_v51, %v7548_v40  ;;  %v4887_v10 = vadd.f32 %v4855_v17, %v4787_v34  ;;  %v5475_v43 = vld [vmem:[#allocation6 + $0x1c] sm:$0xff]  ;;  %v12339_v40 = vld [vmem:[#allocation6 + $0x48] sm:$0xff] }
 0x42f   : > { %8134 = vmatprep.mubr.f32.mxu1 %v4986_v19  ;;  %v4656_v30 = vmul.f32 %v4919_v62, %v11491_v54  ;;  %v5641_v35 = vadd.f32 %v11567_v31, %v11514_v3  ;;  %v12305_v20 = vrot.slane %v9013_v13, %v4724_v59  ;;  %v5777_v63 = vmul.f32 %v11528_v36, %v12292_v53  ;;  %v12313_v3 = vld [vmem:[#allocation6 + $0x38] sm:$0xff]  ;;  %v12341_v39 = vld [vmem:[#allocation6 + $0x68] sm:$0xff] }
 0x430   : > { %v4687_v25 = vadd.f32 %v4655_v27, %v4587_v32  ;;  %v4488_v0 = vadd.f32 %v4456_v6, %v4388_v61  ;;  %8489 = vmatprep.subr.bf16.mxu1 %v8488_v50  ;;  %v12311_v54 = vrot.slane %v9013_v13, %v4824_v2  ;;  %v4987_v31 = vadd.f32 %v4955_v45, %v4887_v10  ;;  %v4821_v62 = vld [vmem:[#allocation6 + $0x1ba] sm:$0xff]  ;;  %v12343_v4 = vld [vmem:[#allocation6 + $0x6a] sm:$0xff] }
 0x431   : > { %8491 = vmatpush3.bf16.msra.mxu1 %v8488_v50  ;;  %v5709_v17 = vadd.f32 %v11570_v15, %v5641_v35  ;;  %v5878_v59 = vmul.f32 %v12305_v20, %v12295_v28  ;;  %v5410_v1 = vmul.f32 %v11444_v47, %v5374_v8  ;;  %v4757_v23 = vmul.f32 %v11504_v22, %v4721_v5  ;;  %v5375_v45 = vld [vmem:[#allocation6 + $0x1a] sm:$0xff]  ;;  %v12330_v22 = vld [vmem:[%s14251_s7 + $0x18] ss:$0 sm:$0xff]  ;;  %v12345_v33 = vld [vmem:[#allocation6 + $0x6c] sm:$0xff] }
 0x432   : > { %v4788_v55 = vadd.f32 %v4756_v24, %v4687_v25  ;;  %v4588_v46 = vadd.f32 %v4556_v56, %v4488_v0  ;;  %v5510_v2 = vmul.f32 %v11457_v57, %v5474_v7  ;;  %8135 = vmatmul.mubr.f32.gmra.mrb[108].mxu1 %v4987_v31  ;;  %v5610_v15 = vmul.f32 %v11517_v48, %v12313_v3  ;;  %v12337_v24 = vld [vmem:[#allocation6 + $0x3c] sm:$0xff]  ;;  %v5476_v56 = vld [vmem:[#allocation6 + $0x24] sm:$0xff]  ;;  %v12357_v5 = vld [vmem:[#allocation6 + $0x4c] sm:$0xff] }
 0x433   : > { %v5809_v42 = vadd.f32 %v5777_v63, %v5709_v17  ;;  %v5442_v16 = vadd.f32 %v5410_v1, %v11453_v12  ;;  %v4857_v14 = vmul.f32 %v11508_v29, %v4821_v62  ;;  %v4957_v18 = vmul.f32 %v12111_v11, %v4921_v37  ;;  %v9014_v32 = vld [vmem:[#allocation6 + $0x3a] sm:$0xff]  ;;  %v12367_v63 = vld [vmem:[#allocation6 + $0x50] sm:$0xff] }
 0x434   : > { %v4888_v26 = vadd.f32 %v4856_v41, %v4788_v55  ;;  %v4688_v58 = vadd.f32 %v4656_v30, %v4588_v46  ;;  %v5978_v52 = vmul.f32 %v12311_v54, %v12320_v44  ;;  %v5411_v6 = vmul.f32 %v11444_v47, %v5375_v45  ;;  %v12365_v0 = vld [vmem:[#allocation6 + $0x78] sm:$0xff]  ;;  %v9015_v37 = vld [vmem:[#allocation6 + $0x4a] sm:$0xff] }
 0x435   : > { %v5910_v38 = vadd.f32 %v5878_v59, %v5809_v42  ;;  %v5542_v27 = vadd.f32 %v5510_v2, %v5442_v16  ;;  %v5511_v11 = vmul.f32 %v11457_v57, %v5475_v43  ;;  %v6078_v34 = vmul.f32 %v12330_v22, %v12332_v9  ;;  %v12369_v17 = vld [vmem:[#allocation6 + $0x7a] sm:$0xff]  ;;  %v5377_v55 = vld [vmem:[#allocation6 + $0x32] sm:$0xff] }
 0x436   : > { %v4988_v51 = vadd.f32 %v4956_v60, %v4888_v26  ;;  %v4789_v29 = vadd.f32 %v4757_v23, %v4688_v58  ;;  %v5678_v61 = vmul.f32 %v9014_v32, %v11525_v21  ;;  %v5376_v60 = vld [vmem:[#allocation6 + $0x22] sm:$0xff]  ;;  %v5778_v8 = vmul.f32 %v11528_v36, %v12337_v24 }
 0x437   : > { %v6010_v19 = vadd.f32 %v5978_v52, %v5910_v38  ;;  %v5642_v41 = vadd.f32 %v5610_v15, %v5542_v27  ;;  %v5443_v10 = vadd.f32 %v5411_v6, %v11453_v12  ;;  %v5611_v30 = vmul.f32 %v11517_v48, %v12339_v40  ;;  %v12376_v16 = vld [vmem:[#allocation6 + $0x7c] sm:$0xff]  ;;  %v9016_v52 = vld [vmem:[#allocation6 + $0x30] sm:$0xff]  ;;  %v12396_v32 = vld [vmem:[#allocation6 + $0x84] sm:$0xff] }
 0x438   : > { %8137 = vmatprep.mubr.f32.mxu1 %v4988_v51  ;;  %v4889_v50 = vadd.f32 %v4857_v14, %v4789_v29  ;;  %v5879_v13 = vmul.f32 %v12305_v20, %v12341_v39  ;;  %v5979_v7 = vmul.f32 %v12311_v54, %v12343_v4  ;;  %v6079_v25 = vmul.f32 %v12330_v22, %v12345_v33  ;;  %v12387_v38 = vld [vmem:[#allocation6 + $0x80] sm:$0xff] }
 0x439   : > { %v5710_v35 = vadd.f32 %v5678_v61, %v5642_v41  ;;  %v5543_v62 = vadd.f32 %v5511_v11, %v5443_v10  ;;  %v5412_v59 = vmul.f32 %v11444_v47, %v5376_v60  ;;  %v5512_v1 = vmul.f32 %v11457_v57, %v5476_v56  ;;  %v9017_v11 = vld [vmem:[#allocation6 + $0x52] sm:$0xff] }
 0x43a   : > { %v4989_v31 = vadd.f32 %v4957_v18, %v4889_v50  ;;  %v6110_v46 = vadd.f32 %v6078_v34, %v6010_v19  ;;  %v5679_v2 = vmul.f32 %v9015_v37, %v11525_v21  ;;  %v5779_v42 = vmul.f32 %v11528_v36, %v12357_v5  ;;  %v12385_v18 = vld [vmem:[#allocation6 + $0x54] sm:$0xff]  ;;  %v12394_v34 = vld [vmem:[#allocation6 + $0x82] sm:$0xff] }
 0x43b   : > { %v5810_v23 = vadd.f32 %v5778_v8, %v5710_v35  ;;  %v5643_v15 = vadd.f32 %v5611_v30, %v5543_v62  ;;  %v5880_v45 = vmul.f32 %v12305_v20, %v12365_v0  ;;  %v5444_v43 = vadd.f32 %v5412_v59, %v11453_v12  ;;  %v5378_v50 = vld [vmem:[#allocation6 + $0x3a] sm:$0xff]  ;;  %v9018_v37 = vld [vmem:[#allocation6 + $0x62] sm:$0xff] }
 0x43c   : > { %8138 = vmatmul.mubr.f32.gmra.mrb[110].mxu1 %v4989_v31  ;;  %v5612_v26 = vmul.f32 %v11517_v48, %v12367_v63  ;;  %v5980_v14 = vmul.f32 %v12311_v54, %v12369_v17  ;;  %v5313_v27 = vmul.f32 %v9016_v52, %v11441_v49  ;;  %v5413_v51 = vmul.f32 %v11444_v47, %v5377_v55  ;;  %v12412_v55 = vld [vmem:[#allocation6 + $0x90] sm:$0xff] }
 0x43d   : > { %8172 = vmatprep.mubr.f32.mxu1 %v6110_v46  ;;  %v5911_v58 = vadd.f32 %v5879_v13, %v5810_v23  ;;  %v5711_v29 = vadd.f32 %v5679_v2, %v5643_v15  ;;  %v6080_v12 = vmul.f32 %v12330_v22, %v12376_v16  ;;  %v5544_v6 = vadd.f32 %v5512_v1, %v5444_v43  ;;  %v12414_v46 = vld [vmem:[#allocation6 + $0x92] sm:$0xff]  ;;  %v5379_v15 = vld [vmem:[#allocation6 + $0x4a] sm:$0xff] }
 0x43e   : > { %v5680_v19 = vmul.f32 %v9017_v11, %v11525_v21  ;;  %v5445_v61 = vadd.f32 %v5413_v51, %v5313_v27  ;;  %v5513_v60 = vmul.f32 %v12292_v53, %v11457_v57  ;;  %v5613_v56 = vmul.f32 %v12295_v28, %v11517_v48 }
 0x43f   : > { %v6011_v41 = vadd.f32 %v5979_v7, %v5911_v58  ;;  %v5811_v8 = vadd.f32 %v5779_v42, %v5711_v29  ;;  %v5644_v10 = vadd.f32 %v5612_v26, %v5544_v6  ;;  %v5780_v30 = vmul.f32 %v11528_v36, %v12385_v18  ;;  %v12422_v26 = vld [vmem:[#allocation6 + $0x94] sm:$0xff] }
 0x440   : > { %v5881_v35 = vmul.f32 %v12305_v20, %v12387_v38  ;;  %v5981_v7 = vmul.f32 %v12311_v54, %v12394_v34  ;;  %v5545_v31 = vadd.f32 %v5513_v60, %v5445_v61  ;;  %v5314_v53 = vmul.f32 %v12313_v3, %v11441_v49 }
 0x441   : > { %v6111_v13 = vadd.f32 %v6079_v25, %v6011_v41  ;;  %v5912_v62 = vadd.f32 %v5880_v45, %v5811_v8  ;;  %v5712_v59 = vadd.f32 %v5680_v19, %v5644_v10  ;;  %v6081_v1 = vmul.f32 %v12330_v22, %v12396_v32  ;;  %v12432_v19 = vld [vmem:[#allocation6 + $0x98] sm:$0xff] }
 0x442   : > { %v5414_v23 = vmul.f32 %v11444_v47, %v5378_v50  ;;  %v5645_v25 = vadd.f32 %v5613_v56, %v5545_v31  ;;  %v5681_v2 = vmul.f32 %v9018_v37, %v11525_v21  ;;  %v5781_v42 = vmul.f32 %v12332_v9, %v11528_v36  ;;  %v12434_v41 = vld [vmem:[#allocation6 + $0x9a] sm:$0xff]  ;;  %v9019_v50 = vld [vmem:[#allocation6 + $0x6a] sm:$0xff]  ;;  %v5380_v31 = vld [vmem:[#allocation6 + $0x52] sm:$0xff] }
 0x443   : > { %8173 = vmatmul.mubr.f32.vlgmr.msra.gmra.mrb[112].mxu1 %v6111_v13  ;;  %v5514_v3 = vmul.f32 %v12337_v24, %v11457_v57  ;;  %v6012_v45 = vadd.f32 %v5980_v14, %v5912_v62  ;;  %v5812_v43 = vadd.f32 %v5780_v30, %v5712_v59  ;;  %v5614_v52 = vmul.f32 %v12341_v39, %v11517_v48  ;;  %v12442_v30 = vld [vmem:[#allocation6 + $0x9c] sm:$0xff] }
 0x444   : > { %v5446_v58 = vadd.f32 %v5414_v23, %v5314_v53  ;;  %v5713_v27 = vadd.f32 %v5681_v2, %v5645_v25  ;;  %v5882_v51 = vmul.f32 %v12305_v20, %v12412_v55  ;;  %v5982_v29 = vmul.f32 %v12311_v54, %v12414_v46  ;;  %v12452_v23 = vld [vmem:[#allocation6 + $0xa8] sm:$0xff] }
 0x445   : > { %v5315_v6 = vmul.f32 %v12339_v40, %v11441_v49  ;;  %v6112_v24 = vadd.f32 %v6080_v12, %v6012_v45  ;;  %v5913_v11 = vadd.f32 %v5881_v35, %v5812_v43  ;;  %v5415_v61 = vmul.f32 %v11444_v47, %v5379_v15  ;;  %v9020_v15 = vld [vmem:[#allocation6 + $0x7a] sm:$0xff]  ;;  %v12459_v43 = vld [vmem:[#allocation6 + $0xaa] sm:$0xff] }
 0x446   : > { %v5546_v14 = vadd.f32 %v5514_v3, %v5446_v58  ;;  %v5813_v60 = vadd.f32 %v5781_v42, %v5713_v27  ;;  %v6082_v56 = vmul.f32 %v12330_v22, %v12422_v26  ;;  %v5682_v8 = vmul.f32 %v9019_v50, %v11525_v21 }
 0x447   : > { %v5515_v10 = vmul.f32 %v12357_v5, %v11457_v57  ;;  %8175 = vmatprep.mubr.f32.mxu1 %v6112_v24  ;;  %v6013_v40 = vadd.f32 %v5981_v7, %v5913_v11  ;;  %v5447_v35 = vadd.f32 %v5415_v61, %v5315_v6  ;;  %v5615_v13 = vmul.f32 %v12365_v0, %v11517_v48 }
 0x448   : > { %v5646_v12 = vadd.f32 %v5614_v52, %v5546_v14  ;;  %v5914_v53 = vadd.f32 %v5882_v51, %v5813_v60  ;;  %v5782_v62 = vmul.f32 %v12345_v33, %v11528_v36  ;;  %v5883_v59 = vmul.f32 %v12305_v20, %v12432_v19  ;;  %v12466_v51 = vld [vmem:[#allocation6 + $0xac] sm:$0xff] }
 0x449   : > { %v5983_v5 = vmul.f32 %v12311_v54, %v12434_v41  ;;  %v6113_v7 = vadd.f32 %v6081_v1, %v6013_v40  ;;  %v5547_v37 = vadd.f32 %v5515_v10, %v5447_v35  ;;  %v5316_v2 = vmul.f32 %v12367_v63, %v11441_v49  ;;  %v12472_v14 = vld [vmem:[#allocation6 + $0xb0] sm:$0xff]  ;;  %v9021_v40 = vld [vmem:[#allocation6 + $0x82] sm:$0xff] }
 0x44a   : > { %v5714_v25 = vadd.f32 %v5682_v8, %v5646_v12  ;;  %v6014_v42 = vadd.f32 %v5982_v29, %v5914_v53  ;;  %v6083_v3 = vmul.f32 %v12330_v22, %v12442_v30  ;;  %v5683_v45 = vmul.f32 %v9020_v15, %v11525_v21  ;;  %v12481_v12 = vld [vmem:[#allocation6 + $0xb2] sm:$0xff] }
 0x44b   : > { %v5416_v58 = vmul.f32 %v11444_v47, %v5380_v31  ;;  %8176 = vmatmul.mubr.f32.gmra.mrb[114].mxu1 %v6113_v7  ;;  %v5647_v27 = vadd.f32 %v5615_v13, %v5547_v37  ;;  %v5783_v1 = vmul.f32 %v12376_v16, %v11528_v36  ;;  %v5884_v63 = vmul.f32 %v12305_v20, %v12452_v23 }
 0x44c   : > { %v5814_v52 = vadd.f32 %v5782_v62, %v5714_v25  ;;  %v6114_v29 = vadd.f32 %v6082_v56, %v6014_v42  ;;  %v5516_v24 = vmul.f32 %v12385_v18, %v11457_v57  ;;  %v5616_v11 = vmul.f32 %v12387_v38, %v11517_v48  ;;  %v12489_v62 = vld [vmem:[#allocation6 + $0xb4] sm:$0xff] }
 0x44d   : > { %v5448_v6 = vadd.f32 %v5416_v58, %v5316_v2  ;;  %v5715_v60 = vadd.f32 %v5683_v45, %v5647_v27  ;;  %v5984_v50 = vmul.f32 %v12311_v54, %v12459_v43  ;;  %v5317_v8 = vmul.f32 %v12295_v28, %v11441_v49  ;;  %v12503_v27 = vld [vmem:[#allocation6 + $0xc2] sm:$0xff] }
 0x44e   : > { %v5915_v61 = vadd.f32 %v5883_v59, %v5814_v52  ;;  %8178 = vmatprep.mubr.f32.mxu1 %v6114_v29  ;;  %v6084_v56 = vmul.f32 %v12330_v22, %v12466_v51  ;;  %v5684_v18 = vmul.f32 %v9021_v40, %v11525_v21  ;;  %v5417_v35 = vmul.f32 %v12320_v44, %v11444_v47  ;;  %v12501_v52 = vld [vmem:[#allocation6 + $0xc0] sm:$0xff] }
 0x44f   : > { %v5548_v10 = vadd.f32 %v5516_v24, %v5448_v6  ;;  %v5815_v31 = vadd.f32 %v5783_v1, %v5715_v60  ;;  %v5784_v53 = vmul.f32 %v12396_v32, %v11528_v36  ;;  %v5885_v28 = vmul.f32 %v12305_v20, %v12472_v14  ;;  %v9022_v1 = vld [vmem:[#allocation6 + $0x92] sm:$0xff] }
 0x450   : > { %v6015_v13 = vadd.f32 %v5983_v5, %v5915_v61  ;;  %v5449_v7 = vadd.f32 %v5417_v35, %v5317_v8  ;;  %v5517_v25 = vmul.f32 %v12332_v9, %v11457_v57  ;;  %v5617_v37 = vmul.f32 %v12412_v55, %v11517_v48  ;;  %v12522_v35 = vld [vmem:[#allocation6 + $0xc8] sm:$0xff] }
 0x451   : > { %v5648_v59 = vadd.f32 %v5616_v11, %v5548_v10  ;;  %v5916_v44 = vadd.f32 %v5884_v63, %v5815_v31  ;;  %v5985_v5 = vmul.f32 %v12311_v54, %v12481_v12  ;;  %v5318_v42 = vmul.f32 %v12341_v39, %v11441_v49  ;;  %v12512_v11 = vld [vmem:[#allocation6 + $0xc4] sm:$0xff] }
 0x452   : > { %v6115_v2 = vadd.f32 %v6083_v3, %v6015_v13  ;;  %v6085_v45 = vmul.f32 %v12330_v22, %v12489_v62  ;;  %v5549_v58 = vadd.f32 %v5517_v25, %v5449_v7  ;;  %v5418_v9 = vmul.f32 %v12343_v4, %v11444_v47  ;;  %v12524_v13 = vld [vmem:[#allocation6 + $0xca] sm:$0xff] }
 0x453   : > { %v5716_v15 = vadd.f32 %v5684_v18, %v5648_v59  ;;  %v6016_v3 = vadd.f32 %v5984_v50, %v5916_v44  ;;  %v5685_v63 = vmul.f32 %v9022_v1, %v11525_v21  ;;  %v5785_v39 = vmul.f32 %v12422_v26, %v11528_v36 }
 0x454   : > { %8179 = vmatmul.mubr.f32.gmra.mrb[116].mxu1 %v6115_v2  ;;  %v5518_v29 = vmul.f32 %v12345_v33, %v11457_v57  ;;  %v5649_v24 = vadd.f32 %v5617_v37, %v5549_v58  ;;  %v5450_v61 = vadd.f32 %v5418_v9, %v5318_v42  ;;  %v5618_v60 = vmul.f32 %v12432_v19, %v11517_v48  ;;  %v12535_v2 = vld [vmem:[#allocation6 + $0xcc] sm:$0xff]  ;;  %v12543_v58 = vld [vmem:[#allocation6 + $0xd8] sm:$0xff] }
 0x455   : > { %v5816_v6 = vadd.f32 %v5784_v53, %v5716_v15  ;;  %v6116_v4 = vadd.f32 %v6084_v56, %v6016_v3  ;;  %v5886_v50 = vmul.f32 %v12305_v20, %v12501_v52  ;;  %v5986_v8 = vmul.f32 %v12311_v54, %v12503_v27  ;;  %v9023_v53 = vld [vmem:[#allocation6 + $0x9a] sm:$0xff] }
 0x456   : > { %v5319_v10 = vmul.f32 %v12365_v0, %v11441_v49  ;;  %v5717_v33 = vadd.f32 %v5685_v63, %v5649_v24  ;;  %v5550_v18 = vadd.f32 %v5518_v29, %v5450_v61  ;;  %v5419_v31 = vmul.f32 %v12369_v17, %v11444_v47  ;;  %v12547_v63 = vld [vmem:[#allocation6 + $0xda] sm:$0xff]  ;;  %v9024_v29 = vld [vmem:[#allocation6 + $0xaa] sm:$0xff] }
 0x457   : > { %v5917_v40 = vadd.f32 %v5885_v28, %v5816_v6  ;;  %8181 = vmatprep.mubr.f32.mxu1 %v6116_v4  ;;  %v6086_v56 = vmul.f32 %v12330_v22, %v12512_v11  ;;  %v5686_v59 = vmul.f32 %v9023_v53, %v11525_v21  ;;  %v5519_v0 = vmul.f32 %v12376_v16, %v11457_v57 }
 0x458   : > { %v5619_v28 = vmul.f32 %v12452_v23, %v11517_v48  ;;  %v5817_v25 = vadd.f32 %v5785_v39, %v5717_v33  ;;  %v5650_v37 = vadd.f32 %v5618_v60, %v5550_v18  ;;  %v5451_v44 = vadd.f32 %v5419_v31, %v5319_v10 }
 0x459   : > { %v6017_v7 = vadd.f32 %v5985_v5, %v5917_v40  ;;  %v5786_v17 = vmul.f32 %v12442_v30, %v11528_v36  ;;  %v5887_v42 = vmul.f32 %v12305_v20, %v12522_v35  ;;  %v5987_v15 = vmul.f32 %v12311_v54, %v12524_v13 }
 0x45a   : > { %v5320_v16 = vmul.f32 %v12387_v38, %v11441_v49  ;;  %v5918_v9 = vadd.f32 %v5886_v50, %v5817_v25  ;;  %v5718_v3 = vadd.f32 %v5686_v59, %v5650_v37  ;;  %v5551_v1 = vadd.f32 %v5519_v0, %v5451_v44  ;;  %v12558_v50 = vld [vmem:[#allocation6 + $0xdc] sm:$0xff] }
 0x45b   : > { %v6117_v5 = vadd.f32 %v6085_v45, %v6017_v7  ;;  %v6087_v39 = vmul.f32 %v12330_v22, %v12535_v2  ;;  %v5687_v6 = vmul.f32 %v9024_v29, %v11525_v21  ;;  %v5787_v24 = vmul.f32 %v12466_v51, %v11528_v36  ;;  %v9025_v7 = vld [vmem:[#allocation6 + $0xb2] sm:$0xff]  ;;  %v12573_v37 = vld [vmem:[#allocation6 + $0xe2] sm:$0xff] }
 0x45c   : > { %v5420_v61 = vmul.f32 %v12394_v34, %v11444_v47  ;;  %v6018_v38 = vadd.f32 %v5986_v8, %v5918_v9  ;;  %v5818_v45 = vadd.f32 %v5786_v17, %v5718_v3  ;;  %v5651_v60 = vadd.f32 %v5619_v28, %v5551_v1  ;;  %v12566_v34 = vld [vmem:[#allocation6 + $0xe0] sm:$0xff] }
 0x45d   : > { %8182 = vmatmul.mubr.f32.gmra.mrb[118].mxu1 %v6117_v5  ;;  %v5888_v4 = vmul.f32 %v12305_v20, %v12543_v58  ;;  %v5988_v10 = vmul.f32 %v12311_v54, %v12547_v63  ;;  %v5520_v33 = vmul.f32 %v12396_v32, %v11457_v57  ;;  %v5620_v18 = vmul.f32 %v12472_v14, %v11517_v48 }
 0x45e   : > { %v5452_v40 = vadd.f32 %v5420_v61, %v5320_v16  ;;  %v6118_v8 = vadd.f32 %v6086_v56, %v6018_v38  ;;  %v5919_v31 = vadd.f32 %v5887_v42, %v5818_v45  ;;  %v5719_v53 = vadd.f32 %v5687_v6, %v5651_v60  ;;  %v12581_v42 = vld [vmem:[#allocation6 + $0xe4] sm:$0xff]  ;;  %v12593_v38 = vld [vmem:[#allocation6 + $0xf0] sm:$0xff] }
 0x45f   : > { %v5321_v59 = vmul.f32 %v12412_v55, %v11441_v49  ;;  %v6088_v0 = vmul.f32 %v12330_v22, %v12558_v50  ;;  %v5688_v25 = vmul.f32 %v9025_v7, %v11525_v21  ;;  %v5421_v32 = vmul.f32 %v12414_v46, %v11444_v47  ;;  %v12595_v45 = vld [vmem:[#allocation6 + $0xf2] sm:$0xff]  ;;  %v9026_v60 = vld [vmem:[#allocation6 + $0xc2] sm:$0xff] }
 0x460   : > { %v5552_v28 = vadd.f32 %v5520_v33, %v5452_v40  ;;  %8184 = vmatprep.mubr.f32.mxu1 %v6118_v8  ;;  %v6019_v44 = vadd.f32 %v5987_v15, %v5919_v31  ;;  %v5819_v56 = vadd.f32 %v5787_v24, %v5719_v53  ;;  %v5788_v17 = vmul.f32 %v12489_v62, %v11528_v36  ;;  %v12604_v8 = vld [vmem:[#allocation6 + $0xf4] sm:$0xff] }
 0x461   : > { %v5889_v55 = vmul.f32 %v12305_v20, %v12566_v34  ;;  %v5453_v5 = vadd.f32 %v5421_v32, %v5321_v59  ;;  %v5521_v9 = vmul.f32 %v12422_v26, %v11457_v57  ;;  %v5621_v3 = vmul.f32 %v12501_v52, %v11517_v48  ;;  %v12614_v32 = vld [vmem:[#allocation6 + $0xf8] sm:$0xff] }
 0x462   : > { %v5652_v16 = vadd.f32 %v5620_v18, %v5552_v28  ;;  %v6119_v46 = vadd.f32 %v6087_v39, %v6019_v44  ;;  %v5920_v1 = vadd.f32 %v5888_v4, %v5819_v56  ;;  %v5989_v15 = vmul.f32 %v12311_v54, %v12573_v37  ;;  %v12616_v44 = vld [vmem:[#allocation6 + $0xfa] sm:$0xff] }
 0x463   : > { %v5322_v29 = vmul.f32 %v12432_v19, %v11441_v49  ;;  %v6089_v24 = vmul.f32 %v12330_v22, %v12581_v42  ;;  %v5553_v61 = vadd.f32 %v5521_v9, %v5453_v5  ;;  %v5422_v26 = vmul.f32 %v12434_v41, %v11444_v47 }
 0x464   : > { %v5720_v6 = vadd.f32 %v5688_v25, %v5652_v16  ;;  %8185 = vmatmul.mubr.f32.gmra.mrb[120].mxu1 %v6119_v46  ;;  %v6020_v39 = vadd.f32 %v5988_v10, %v5920_v1  ;;  %v5689_v4 = vmul.f32 %v9026_v60, %v11525_v21  ;;  %v5789_v19 = vmul.f32 %v12512_v11, %v11528_v36  ;;  %v12627_v46 = vld [vmem:[#allocation6 + $0xfc] sm:$0xff] }
 0x465   : > { %v5522_v40 = vmul.f32 %v12442_v30, %v11457_v57  ;;  %v5653_v18 = vadd.f32 %v5621_v3, %v5553_v61  ;;  %v5454_v31 = vadd.f32 %v5422_v26, %v5322_v29  ;;  %v5622_v53 = vmul.f32 %v12522_v35, %v11517_v48  ;;  %v12635_v61 = vld [vmem:[#allocation6 + $0x108] sm:$0xff] }
 0x466   : > { %v5820_v33 = vadd.f32 %v5788_v17, %v5720_v6  ;;  %v6120_v41 = vadd.f32 %v6088_v0, %v6020_v39  ;;  %v5890_v10 = vmul.f32 %v12305_v20, %v12593_v38  ;;  %v5990_v59 = vmul.f32 %v12311_v54, %v12595_v45  ;;  %v9027_v17 = vld [vmem:[#allocation6 + $0xca] sm:$0xff] }
 0x467   : > { %v5323_v28 = vmul.f32 %v12452_v23, %v11441_v49  ;;  %v5721_v30 = vadd.f32 %v5689_v4, %v5653_v18  ;;  %v5554_v25 = vadd.f32 %v5522_v40, %v5454_v31  ;;  %v5423_v56 = vmul.f32 %v12459_v43, %v11444_v47  ;;  %v12639_v4 = vld [vmem:[#allocation6 + $0x10a] sm:$0xff]  ;;  %v9028_v40 = vld [vmem:[#allocation6 + $0xda] sm:$0xff] }
 0x468   : > { %v5921_v7 = vadd.f32 %v5889_v55, %v5820_v33  ;;  %8187 = vmatprep.mubr.f32.mxu1 %v6120_v41  ;;  %v6090_v0 = vmul.f32 %v12330_v22, %v12604_v8  ;;  %v5690_v16 = vmul.f32 %v9027_v17, %v11525_v21  ;;  %v5523_v23 = vmul.f32 %v12466_v51, %v11457_v57 }
 0x469   : > { %v5623_v55 = vmul.f32 %v12543_v58, %v11517_v48  ;;  %v5821_v9 = vadd.f32 %v5789_v19, %v5721_v30  ;;  %v5654_v3 = vadd.f32 %v5622_v53, %v5554_v25  ;;  %v5455_v1 = vadd.f32 %v5423_v56, %v5323_v28 }
 0x46a   : > { %v6021_v5 = vadd.f32 %v5989_v15, %v5921_v7  ;;  %v5790_v43 = vmul.f32 %v12535_v2, %v11528_v36  ;;  %v5891_v29 = vmul.f32 %v12305_v20, %v12614_v32  ;;  %v5991_v6 = vmul.f32 %v12311_v54, %v12616_v44 }
 0x46b   : > { %v5324_v51 = vmul.f32 %v12472_v14, %v11441_v49  ;;  %v5922_v26 = vadd.f32 %v5890_v10, %v5821_v9  ;;  %v5722_v39 = vadd.f32 %v5690_v16, %v5654_v3  ;;  %v5555_v60 = vadd.f32 %v5523_v23, %v5455_v1  ;;  %v12650_v10 = vld [vmem:[#allocation6 + $0x10c] sm:$0xff] }
 0x46c   : > { %v6121_v15 = vadd.f32 %v6089_v24, %v6021_v5  ;;  %v6091_v19 = vmul.f32 %v12330_v22, %v12627_v46  ;;  %v5691_v33 = vmul.f32 %v9028_v40, %v11525_v21  ;;  %v5791_v18 = vmul.f32 %v12558_v50, %v11528_v36  ;;  %v9029_v5 = vld [vmem:[#allocation6 + $0xe2] sm:$0xff]  ;;  %v12665_v3 = vld [vmem:[#allocation6 + $0x112] sm:$0xff] }
 0x46d   : > { %v5424_v31 = vmul.f32 %v12481_v12, %v11444_v47  ;;  %v6022_v14 = vadd.f32 %v5990_v59, %v5922_v26  ;;  %v5822_v24 = vadd.f32 %v5790_v43, %v5722_v39  ;;  %v5655_v53 = vadd.f32 %v5623_v55, %v5555_v60  ;;  %v12658_v12 = vld [vmem:[#allocation6 + $0x110] sm:$0xff] }
 0x46e   : > { %8188 = vmatmul.mubr.f32.gmra.mrb[122].mxu1 %v6121_v15  ;;  %v5892_v41 = vmul.f32 %v12305_v20, %v12635_v61  ;;  %v5992_v28 = vmul.f32 %v12311_v54, %v12639_v4  ;;  %v5524_v30 = vmul.f32 %v12489_v62, %v11457_v57  ;;  %v5624_v25 = vmul.f32 %v12566_v34, %v11517_v48 }
 0x46f   : > { %v5456_v7 = vadd.f32 %v5424_v31, %v5324_v51  ;;  %v6122_v59 = vadd.f32 %v6090_v0, %v6022_v14  ;;  %v5923_v56 = vadd.f32 %v5891_v29, %v5822_v24  ;;  %v5723_v17 = vadd.f32 %v5691_v33, %v5655_v53  ;;  %v12673_v29 = vld [vmem:[#allocation6 + $0x114] sm:$0xff]  ;;  %v12685_v14 = vld [vmem:[#allocation6 + $0x120] sm:$0xff] }
 0x470   : > { %v5325_v16 = vmul.f32 %v12501_v52, %v11441_v49  ;;  %v6092_v23 = vmul.f32 %v12330_v22, %v12650_v10  ;;  %v5692_v9 = vmul.f32 %v9029_v5, %v11525_v21  ;;  %v5425_v62 = vmul.f32 %v12503_v27, %v11444_v47  ;;  %v12687_v24 = vld [vmem:[#allocation6 + $0x122] sm:$0xff]  ;;  %v9030_v53 = vld [vmem:[#allocation6 + $0xf2] sm:$0xff] }
 0x471   : > { %v5556_v55 = vadd.f32 %v5524_v30, %v5456_v7  ;;  %8190 = vmatprep.mubr.f32.mxu1 %v6122_v59  ;;  %v6023_v1 = vadd.f32 %v5991_v6, %v5923_v56  ;;  %v5823_v0 = vadd.f32 %v5791_v18, %v5723_v17  ;;  %v5792_v43 = vmul.f32 %v12581_v42, %v11528_v36  ;;  %v12696_v59 = vld [vmem:[#allocation6 + $0x124] sm:$0xff] }
 0x472   : > { %v5893_v52 = vmul.f32 %v12305_v20, %v12658_v12  ;;  %v5457_v15 = vadd.f32 %v5425_v62, %v5325_v16  ;;  %v5525_v26 = vmul.f32 %v12512_v11, %v11457_v57  ;;  %v5625_v39 = vmul.f32 %v12593_v38, %v11517_v48  ;;  %v12706_v62 = vld [vmem:[#allocation6 + $0x128] sm:$0xff] }
 0x473   : > { %v5656_v51 = vadd.f32 %v5624_v25, %v5556_v55  ;;  %v6123_v27 = vadd.f32 %v6091_v19, %v6023_v1  ;;  %v5924_v60 = vadd.f32 %v5892_v41, %v5823_v0  ;;  %v5993_v6 = vmul.f32 %v12311_v54, %v12665_v3  ;;  %v12708_v1 = vld [vmem:[#allocation6 + $0x12a] sm:$0xff] }
 0x474   : > { %v5326_v40 = vmul.f32 %v12522_v35, %v11441_v49  ;;  %v6093_v18 = vmul.f32 %v12330_v22, %v12673_v29  ;;  %v5557_v31 = vadd.f32 %v5525_v26, %v5457_v15  ;;  %v5426_v11 = vmul.f32 %v12524_v13, %v11444_v47 }
 0x475   : > { %v5724_v33 = vadd.f32 %v5692_v9, %v5656_v51  ;;  %8191 = vmatmul.mubr.f32.gmra.mrb[124].mxu1 %v6123_v27  ;;  %v6024_v19 = vadd.f32 %v5992_v28, %v5924_v60  ;;  %v5693_v41 = vmul.f32 %v9030_v53, %v11525_v21  ;;  %v5793_v35 = vmul.f32 %v12604_v8, %v11528_v36  ;;  %v12719_v27 = vld [vmem:[#allocation6 + $0x12c] sm:$0xff] }
 0x476   : > { %v5526_v7 = vmul.f32 %v12535_v2, %v11457_v57  ;;  %v5657_v25 = vadd.f32 %v5625_v39, %v5557_v31  ;;  %v5458_v56 = vadd.f32 %v5426_v11, %v5326_v40  ;;  %v5626_v17 = vmul.f32 %v12614_v32, %v11517_v48  ;;  %v12727_v31 = vld [vmem:[#allocation6 + $0x138] sm:$0xff] }
 0x477   : > { %v5824_v30 = vadd.f32 %v5792_v43, %v5724_v33  ;;  %v6124_v13 = vadd.f32 %v6092_v23, %v6024_v19  ;;  %v5894_v28 = vmul.f32 %v12305_v20, %v12685_v14  ;;  %v5994_v16 = vmul.f32 %v12311_v54, %v12687_v24  ;;  %v9031_v43 = vld [vmem:[#allocation6 + $0xfa] sm:$0xff] }
 0x478   : > { %v5327_v55 = vmul.f32 %v12543_v58, %v11441_v49  ;;  %v5725_v2 = vadd.f32 %v5693_v41, %v5657_v25  ;;  %v5558_v9 = vadd.f32 %v5526_v7, %v5458_v56  ;;  %v5427_v0 = vmul.f32 %v12547_v63, %v11444_v47  ;;  %v12731_v41 = vld [vmem:[#allocation6 + $0x13a] sm:$0xff]  ;;  %v9032_v7 = vld [vmem:[#allocation6 + $0x10a] sm:$0xff] }
 0x479   : > { %v5925_v5 = vadd.f32 %v5893_v52, %v5824_v30  ;;  %8193 = vmatprep.mubr.f32.mxu1 %v6124_v13  ;;  %v6094_v23 = vmul.f32 %v12330_v22, %v12696_v59  ;;  %v5694_v51 = vmul.f32 %v9031_v43, %v11525_v21  ;;  %v5527_v58 = vmul.f32 %v12558_v50, %v11457_v57 }
 0x47a   : > { %v5627_v52 = vmul.f32 %v12635_v61, %v11517_v48  ;;  %v5825_v26 = vadd.f32 %v5793_v35, %v5725_v2  ;;  %v5658_v39 = vadd.f32 %v5626_v17, %v5558_v9  ;;  %v5459_v60 = vadd.f32 %v5427_v0, %v5327_v55 }
 0x47b   : > { %v6025_v15 = vadd.f32 %v5993_v6, %v5925_v5  ;;  %v5794_v63 = vmul.f32 %v12627_v46, %v11528_v36  ;;  %v5895_v40 = vmul.f32 %v12305_v20, %v12706_v62  ;;  %v5995_v33 = vmul.f32 %v12311_v54, %v12708_v1 }
 0x47c   : > { %v5328_v50 = vmul.f32 %v12566_v34, %v11441_v49  ;;  %v5926_v11 = vadd.f32 %v5894_v28, %v5825_v26  ;;  %v5726_v19 = vadd.f32 %v5694_v51, %v5658_v39  ;;  %v5559_v53 = vadd.f32 %v5527_v58, %v5459_v60  ;;  %v12742_v28 = vld [vmem:[#allocation6 + $0x13c] sm:$0xff] }
 0x47d   : > { %v6125_v6 = vadd.f32 %v6093_v18, %v6025_v15  ;;  %v6095_v35 = vmul.f32 %v12330_v22, %v12719_v27  ;;  %v5695_v30 = vmul.f32 %v9032_v7, %v11525_v21  ;;  %v5795_v25 = vmul.f32 %v12650_v10, %v11528_v36  ;;  %v9033_v15 = vld [vmem:[#allocation6 + $0x112] sm:$0xff]  ;;  %v12757_v39 = vld [vmem:[#allocation6 + $0x142] sm:$0xff] }
 0x47e   : > { %v5428_v56 = vmul.f32 %v12573_v37, %v11444_v47  ;;  %v6026_v34 = vadd.f32 %v5994_v16, %v5926_v11  ;;  %v5826_v18 = vadd.f32 %v5794_v63, %v5726_v19  ;;  %v5659_v17 = vadd.f32 %v5627_v52, %v5559_v53  ;;  %v12750_v37 = vld [vmem:[#allocation6 + $0x140] sm:$0xff] }
 0x47f   : > { %8194 = vmatmul.mubr.f32.gmra.mrb[126].mxu1 %v6125_v6  ;;  %v5896_v13 = vmul.f32 %v12305_v20, %v12727_v31  ;;  %v5996_v55 = vmul.f32 %v12311_v54, %v12731_v41  ;;  %v5528_v2 = vmul.f32 %v12581_v42, %v11457_v57  ;;  %v5628_v9 = vmul.f32 %v12658_v12, %v11517_v48 }
 0x480   : > { %v5460_v5 = vadd.f32 %v5428_v56, %v5328_v50  ;;  %v6126_v16 = vadd.f32 %v6094_v23, %v6026_v34  ;;  %v5927_v0 = vadd.f32 %v5895_v40, %v5826_v18  ;;  %v5727_v43 = vadd.f32 %v5695_v30, %v5659_v17  ;;  %v12765_v40 = vld [vmem:[#allocation6 + $0x144] sm:$0xff]  ;;  %v12777_v34 = vld [vmem:[#allocation6 + $0x150] sm:$0xff] }
 0x481   : > { %v5329_v51 = vmul.f32 %v12593_v38, %v11441_v49  ;;  %v6096_v58 = vmul.f32 %v12330_v22, %v12742_v28  ;;  %v5696_v26 = vmul.f32 %v9033_v15, %v11525_v21  ;;  %v5429_v42 = vmul.f32 %v12595_v45, %v11444_v47  ;;  %v12779_v18 = vld [vmem:[#allocation6 + $0x152] sm:$0xff]  ;;  %v9034_v17 = vld [vmem:[#allocation6 + $0x122] sm:$0xff] }
 0x482   : > { %v5560_v52 = vadd.f32 %v5528_v2, %v5460_v5  ;;  %8196 = vmatprep.mubr.f32.mxu1 %v6126_v16  ;;  %v6027_v60 = vadd.f32 %v5995_v33, %v5927_v0  ;;  %v5827_v23 = vadd.f32 %v5795_v25, %v5727_v43  ;;  %v5796_v63 = vmul.f32 %v12673_v29, %v11528_v36  ;;  %v12788_v16 = vld [vmem:[#allocation6 + $0x154] sm:$0xff] }
 0x483   : > { %v5897_v38 = vmul.f32 %v12305_v20, %v12750_v37  ;;  %v5461_v6 = vadd.f32 %v5429_v42, %v5329_v51  ;;  %v5529_v11 = vmul.f32 %v12604_v8, %v11457_v57  ;;  %v5629_v19 = vmul.f32 %v12685_v14, %v11517_v48  ;;  %v12798_v42 = vld [vmem:[#allocation6 + $0x158] sm:$0xff] }
 0x484   : > { %v5660_v50 = vadd.f32 %v5628_v9, %v5560_v52  ;;  %v6127_v45 = vadd.f32 %v6095_v35, %v6027_v60  ;;  %v5928_v53 = vadd.f32 %v5896_v13, %v5827_v23  ;;  %v5997_v33 = vmul.f32 %v12311_v54, %v12757_v39  ;;  %v12800_v60 = vld [vmem:[#allocation6 + $0x15a] sm:$0xff] }
 0x485   : > { %v5330_v7 = vmul.f32 %v12614_v32, %v11441_v49  ;;  %v6097_v25 = vmul.f32 %v12330_v22, %v12765_v40  ;;  %v5561_v56 = vadd.f32 %v5529_v11, %v5461_v6  ;;  %v5430_v8 = vmul.f32 %v12616_v44, %v11444_v47 }
 0x486   : > { %v5728_v30 = vadd.f32 %v5696_v26, %v5660_v50  ;;  %8197 = vmatmul.mubr.f32.gmra.mrb[128].mxu1 %v6127_v45  ;;  %v6028_v35 = vadd.f32 %v5996_v55, %v5928_v53  ;;  %v5697_v13 = vmul.f32 %v9034_v17, %v11525_v21  ;;  %v5797_v32 = vmul.f32 %v12696_v59, %v11528_v36  ;;  %v12811_v45 = vld [vmem:[#allocation6 + $0x15c] sm:$0xff] }
 0x487   : > { %v5530_v5 = vmul.f32 %v12627_v46, %v11457_v57  ;;  %v5661_v9 = vadd.f32 %v5629_v19, %v5561_v56  ;;  %v5462_v0 = vadd.f32 %v5430_v8, %v5330_v7  ;;  %v5630_v43 = vmul.f32 %v12706_v62, %v11517_v48  ;;  %v12819_v56 = vld [vmem:[#allocation6 + $0x168] sm:$0xff] }
 0x488   : > { %v5828_v2 = vadd.f32 %v5796_v63, %v5728_v30  ;;  %v6128_v44 = vadd.f32 %v6096_v58, %v6028_v35  ;;  %v5898_v55 = vmul.f32 %v12305_v20, %v12777_v34  ;;  %v5998_v51 = vmul.f32 %v12311_v54, %v12779_v18  ;;  %v9035_v63 = vld [vmem:[#allocation6 + $0x12a] sm:$0xff] }
 0x489   : > { %v5331_v52 = vmul.f32 %v12635_v61, %v11441_v49  ;;  %v5729_v46 = vadd.f32 %v5697_v13, %v5661_v9  ;;  %v5562_v26 = vadd.f32 %v5530_v5, %v5462_v0  ;;  %v5431_v23 = vmul.f32 %v12639_v4, %v11444_v47  ;;  %v12823_v13 = vld [vmem:[#allocation6 + $0x16a] sm:$0xff] }
 0x48a   : > { %v5929_v15 = vadd.f32 %v5897_v38, %v5828_v2  ;;  %8199 = vmatprep.mubr.f32.mxu1 %v6128_v44  ;;  %v6098_v58 = vmul.f32 %v12330_v22, %v12788_v16  ;;  %v5698_v50 = vmul.f32 %v9035_v63, %v11525_v21  ;;  %v5531_v61 = vmul.f32 %v12650_v10, %v11457_v57  ;;  %v9036_v2 = vld [vmem:[#allocation6 + $0x13a] sm:$0xff]  ;;  %v12846_v63 = vld [vmem:[#allocation6 + $0x170] sm:$0xff] }
 0x48b   : > { %v5631_v38 = vmul.f32 %v12727_v31, %v11517_v48  ;;  %v5829_v11 = vadd.f32 %v5797_v32, %v5729_v46  ;;  %v5662_v19 = vadd.f32 %v5630_v43, %v5562_v26  ;;  %v5463_v53 = vadd.f32 %v5431_v23, %v5331_v52 }
 0x48c   : > { %v6029_v6 = vadd.f32 %v5997_v33, %v5929_v15  ;;  %v5798_v4 = vmul.f32 %v12719_v27, %v11528_v36  ;;  %v5899_v7 = vmul.f32 %v12305_v20, %v12798_v42  ;;  %v5999_v30 = vmul.f32 %v12311_v54, %v12800_v60  ;;  %v12838_v15 = vld [vmem:[#allocation6 + $0x16c] sm:$0xff] }
 0x48d   : > { %v5332_v10 = vmul.f32 %v12658_v12, %v11441_v49  ;;  %v5930_v8 = vadd.f32 %v5898_v55, %v5829_v11  ;;  %v5730_v35 = vadd.f32 %v5698_v50, %v5662_v19  ;;  %v5563_v17 = vadd.f32 %v5531_v61, %v5463_v53  ;;  %v9037_v19 = vld [vmem:[#allocation6 + $0x142] sm:$0xff] }
 0x48e   : > { %v6129_v33 = vadd.f32 %v6097_v25, %v6029_v6  ;;  %v12825_v32 = vpop.f32.mrb[80].mxu1  ;;  %v6099_v5 = vmul.f32 %v12330_v22, %v12811_v45  ;;  %v5699_v9 = vmul.f32 %v9036_v2, %v11525_v21  ;;  %v5799_v0 = vmul.f32 %v12742_v28, %v11528_v36 }
 0x48f   : > { %v5432_v12 = vmul.f32 %v12665_v3, %v11444_v47  ;;  %v12834_v25 = vpop.f32.mrb[81].mxu1  ;;  %v6030_v43 = vadd.f32 %v5998_v51, %v5930_v8  ;;  %v5830_v44 = vadd.f32 %v5798_v4, %v5730_v35  ;;  %v5663_v55 = vadd.f32 %v5631_v38, %v5563_v17  ;;  %v12853_v4 = vld [vmem:[#allocation6 + $0x172] sm:$0xff] }
 0x490   : > { %8200 = vmatmul.mubr.f32.gmra.mrb[130].mxu1 %v6129_v33  ;;  %v5900_v52 = vmul.f32 %v12305_v20, %v12819_v56  ;;  %v6000_v46 = vmul.f32 %v12311_v54, %v12823_v13  ;;  %v5532_v23 = vmul.f32 %v12673_v29, %v11457_v57  ;;  %v5632_v3 = vmul.f32 %v12750_v37, %v11517_v48  ;;  %v12861_v33 = vld [vmem:[#allocation6 + $0x174] sm:$0xff] }
 0x491   : > { %v5464_v26 = vadd.f32 %v5432_v12, %v5332_v10  ;;  %v6130_v51 = vadd.f32 %v6098_v58, %v6030_v43  ;;  %v5931_v50 = vadd.f32 %v5899_v7, %v5830_v44  ;;  %v5731_v61 = vadd.f32 %v5699_v9, %v5663_v55 }
 0x492   : > { %v5333_v38 = vmul.f32 %v12685_v14, %v11441_v49  ;;  %v6100_v6 = vmul.f32 %v12330_v22, %v12838_v15  ;;  %v5700_v53 = vmul.f32 %v9037_v19, %v11525_v21  ;;  %v5433_v29 = vmul.f32 %v12687_v24, %v11444_v47 }
 0x493   : > { %v5564_v11 = vadd.f32 %v5532_v23, %v5464_v26  ;;  %8202 = vmatprep.mubr.f32.mxu1 %v6130_v51  ;;  %v6031_v10 = vadd.f32 %v5999_v30, %v5931_v50  ;;  %v5831_v58 = vadd.f32 %v5799_v0, %v5731_v61  ;;  %v5800_v7 = vmul.f32 %v12765_v40, %v11528_v36  ;;  %v12875_v26 = vld [vmem:[#allocation6 + $0x180] sm:$0xff] }
 0x494   : > { %v5901_v14 = vmul.f32 %v12305_v20, %v12846_v63  ;;  %v5465_v35 = vadd.f32 %v5433_v29, %v5333_v38  ;;  %v5533_v17 = vmul.f32 %v12696_v59, %v11457_v57  ;;  %v5633_v2 = vmul.f32 %v12777_v34, %v11517_v48  ;;  %v12871_v12 = vpop.f32.mrb[82].mxu1  ;;  %v5966_v59 = vld [vmem:[#allocation6 + $0x182] sm:$0xff] }
 0x495   : > { %v5664_v8 = vadd.f32 %v5632_v3, %v5564_v11  ;;  %v6131_v24 = vadd.f32 %v6099_v5, %v6031_v10  ;;  %v5932_v9 = vadd.f32 %v5900_v52, %v5831_v58  ;;  %v6001_v30 = vmul.f32 %v12311_v54, %v12853_v4  ;;  %v12879_v52 = vpop.f32.mrb[83].mxu1  ;;  %v9038_v3 = vld [vmem:[#allocation6 + $0x152] sm:$0xff]  ;;  %v12886_v38 = vld [vmem:[#allocation6 + $0x184] sm:$0xff] }
 0x496   : > { %v5334_v0 = vmul.f32 %v12706_v62, %v11441_v49  ;;  %v6101_v44 = vmul.f32 %v12330_v22, %v12861_v33  ;;  %v5565_v55 = vadd.f32 %v5533_v17, %v5465_v35  ;;  %v5434_v5 = vmul.f32 %v12708_v1, %v11444_v47 }
 0x497   : > { %v5732_v43 = vadd.f32 %v5700_v53, %v5664_v8  ;;  %8203 = vmatmul.mubr.f32.gmra.mrb[132].mxu1 %v6131_v24  ;;  %v6032_v23 = vadd.f32 %v6000_v46, %v5932_v9  ;;  %v5701_v62 = vmul.f32 %v9038_v3, %v11525_v21  ;;  %v5801_v51 = vmul.f32 %v12788_v16, %v11528_v36  ;;  %v5967_v8 = vld [vmem:[#allocation6 + $0x18a] sm:$0xff]  ;;  %v12918_v3 = vld [vmem:[#allocation6 + $0x198] sm:$0xff] }
 0x498   : > { %v5534_v22 = vmul.f32 %v12719_v27, %v11457_v57  ;;  %v5665_v61 = vadd.f32 %v5633_v2, %v5565_v55  ;;  %v5466_v11 = vadd.f32 %v5434_v5, %v5334_v0  ;;  %v5634_v1 = vmul.f32 %v12798_v42, %v11517_v48  ;;  %v9040_v2 = vld [vmem:[#allocation6 + $0x15a] sm:$0xff] }
 0x499   : > { %v5832_v50 = vadd.f32 %v5800_v7, %v5732_v43  ;;  %v6132_v19 = vadd.f32 %v6100_v6, %v6032_v23  ;;  %v5902_v46 = vmul.f32 %v12305_v20, %v12875_v26  ;;  %v6002_v53 = vmul.f32 %v12311_v54, %v5966_v59  ;;  %v12895_v7 = vld [vmem:[#allocation6 + $0x188] sm:$0xff] }
 0x49a   : > { %v5335_v29 = vmul.f32 %v12727_v31, %v11441_v49  ;;  %v5733_v58 = vadd.f32 %v5701_v62, %v5665_v61  ;;  %v5566_v27 = vadd.f32 %v5534_v22, %v5466_v11  ;;  %v5435_v35 = vmul.f32 %v12731_v41, %v11444_v47  ;;  %v12902_v6 = vld [vmem:[%s14251_s7 + $0x18] ss:$0 sm:$0xff]  ;;  %v12911_v43 = vld [vmem:[#allocation6 + $0x18c] sm:$0xff] }
 0x49b   : > { %v5933_v10 = vadd.f32 %v5901_v14, %v5832_v50  ;;  %8205 = vmatprep.mubr.f32.mxu1 %v6132_v19  ;;  %v6102_v17 = vmul.f32 %v12902_v6, %v12886_v38  ;;  %v5702_v31 = vmul.f32 %v9040_v2, %v11525_v21  ;;  %v5535_v14 = vmul.f32 %v12742_v28, %v11457_v57  ;;  %v5968_v50 = vld [vmem:[#allocation6 + $0x19a] sm:$0xff]  ;;  %v9041_v11 = vld [vmem:[#allocation6 + $0x16a] sm:$0xff] }
 0x49c   : > { %v5635_v24 = vmul.f32 %v12819_v56, %v11517_v48  ;;  %v5833_v41 = vadd.f32 %v5801_v51, %v5733_v58  ;;  %v5666_v0 = vadd.f32 %v5634_v1, %v5566_v27  ;;  %v5467_v55 = vadd.f32 %v5435_v35, %v5335_v29  ;;  %v12931_v58 = vld [vmem:[#allocation6 + $0x19c] sm:$0xff] }
 0x49d   : > { %v6033_v9 = vadd.f32 %v6001_v30, %v5933_v10  ;;  %v5802_v59 = vmul.f32 %v12811_v45, %v11528_v36  ;;  %v5903_v5 = vmul.f32 %v12305_v20, %v12895_v7  ;;  %v6003_v23 = vmul.f32 %v12311_v54, %v5967_v8 }
 0x49e   : > { %v5336_v28 = vmul.f32 %v12750_v37, %v11441_v49  ;;  %v5934_v30 = vadd.f32 %v5902_v46, %v5833_v41  ;;  %v5734_v51 = vadd.f32 %v5702_v31, %v5666_v0  ;;  %v5567_v22 = vadd.f32 %v5535_v14, %v5467_v55  ;;  %v12940_v31 = vld [vmem:[#allocation6 + $0x1a0] sm:$0xff] }
 0x49f   : > { %v6133_v62 = vadd.f32 %v6101_v44, %v6033_v9  ;;  %v6103_v61 = vmul.f32 %v12902_v6, %v12911_v43  ;;  %v5703_v1 = vmul.f32 %v9041_v11, %v11525_v21  ;;  %v5803_v19 = vmul.f32 %v12838_v15, %v11528_v36 }
 0x4a0   : > { %v5436_v29 = vmul.f32 %v12757_v39, %v11444_v47  ;;  %v6034_v10 = vadd.f32 %v6002_v53, %v5934_v30  ;;  %v5834_v37 = vadd.f32 %v5802_v59, %v5734_v51  ;;  %v5667_v44 = vadd.f32 %v5635_v24, %v5567_v22  ;;  %v12933_v27 = vpop.f32.mrb[84].mxu1  ;;  %v9042_v59 = vld [vmem:[#allocation6 + $0x172] sm:$0xff] }
 0x4a1   : > { %8206 = vmatmul.mubr.f32.gmra.mrb[134].mxu1 %v6133_v62  ;;  %v5904_v46 = vmul.f32 %v12305_v20, %v12918_v3  ;;  %v6004_v8 = vmul.f32 %v12311_v54, %v5968_v50  ;;  %v5536_v2 = vmul.f32 %v12765_v40, %v11457_v57  ;;  %v5636_v39 = vmul.f32 %v12846_v63, %v11517_v48  ;;  %v12942_v53 = vpop.f32.mrb[85].mxu1 }
 0x4a2   : > { %v5468_v35 = vadd.f32 %v5436_v29, %v5336_v28  ;;  %v6134_v14 = vadd.f32 %v6102_v17, %v6034_v10  ;;  %v5935_v24 = vadd.f32 %v5903_v5, %v5834_v37  ;;  %v5735_v9 = vadd.f32 %v5703_v1, %v5667_v44  ;;  %v5969_v28 = vld [vmem:[#allocation6 + $0x1a2] sm:$0xff] }
 0x4a3   : > { %v5337_v41 = vmul.f32 %v12777_v34, %v11441_v49  ;;  %v6104_v0 = vmul.f32 %v12902_v6, %v12931_v58  ;;  %v5704_v40 = vmul.f32 %v9042_v59, %v11525_v21  ;;  %v5437_v62 = vmul.f32 %v12779_v18, %v11444_v47  ;;  %v12955_v5 = vld [vmem:[#allocation6 + $0x1a4] sm:$0xff] }
 0x4a4   : > { %v5568_v55 = vadd.f32 %v5536_v2, %v5468_v35  ;;  %8208 = vmatprep.mubr.f32.mxu1 %v6134_v14  ;;  %v6035_v30 = vadd.f32 %v6003_v23, %v5935_v24  ;;  %v5835_v51 = vadd.f32 %v5803_v19, %v5735_v9  ;;  %v5804_v17 = vmul.f32 %v12861_v33, %v11528_v36  ;;  %v9044_v59 = vld [vmem:[#allocation6] sm:$0xff] }
 0x4a5   : > { %v5905_v34 = vmul.f32 %v12305_v20, %v12940_v31  ;;  %v5469_v50 = vadd.f32 %v5437_v62, %v5337_v41  ;;  %v5537_v11 = vmul.f32 %v12788_v16, %v11457_v57  ;;  %v5637_v1 = vmul.f32 %v12875_v26, %v11517_v48  ;;  %v9043_v26 = vld [vmem:[#allocation6 + $0x182] sm:$0xff]  ;;  %v6070_v41 = vld [vmem:[#allocation6 + $0x1b4] sm:$0xff] }
 0x4a6   : > { %v5668_v22 = vadd.f32 %v5636_v39, %v5568_v55  ;;  %v6135_v18 = vadd.f32 %v6103_v61, %v6035_v30  ;;  %v5936_v29 = vadd.f32 %v5904_v46, %v5835_v51  ;;  %v6005_v23 = vmul.f32 %v12311_v54, %v5969_v28  ;;  %v5970_v39 = vld [vmem:[#allocation6 + $0x1b2] sm:$0xff] }
 0x4a7   : > { %v5338_v19 = vmul.f32 %v12798_v42, %v11441_v49  ;;  %v6105_v37 = vmul.f32 %v12902_v6, %v12955_v5  ;;  %v5569_v44 = vadd.f32 %v5537_v11, %v5469_v50  ;;  %v5438_v35 = vmul.f32 %v12800_v60, %v11444_v47  ;;  %v12968_v2 = vpop.f32.mrb[86].mxu1  ;;  %v9045_v11 = vld [vmem:[#allocation6 + $0x18a] sm:$0xff] }
 0x4a8   : > { %v5736_v10 = vadd.f32 %v5704_v40, %v5668_v22  ;;  %8209 = vmatmul.mubr.f32.gmra.mrb[136].mxu1 %v6135_v18  ;;  %v6036_v16 = vadd.f32 %v6004_v8, %v5936_v29  ;;  %v5705_v61 = vmul.f32 %v9043_v26, %v11525_v21  ;;  %v5805_v46 = vmul.f32 %v12886_v38, %v11528_v36  ;;  %v12975_v14 = vpop.f32.mrb[87].mxu1 }
 0x4a9   : > { %v5538_v42 = vmul.f32 %v12811_v45, %v11457_v57  ;;  %v5669_v9 = vadd.f32 %v5637_v1, %v5569_v44  ;;  %v5470_v60 = vadd.f32 %v5438_v35, %v5338_v19  ;;  %v5638_v55 = vmul.f32 %v12895_v7, %v11517_v48  ;;  %v5971_v1 = vld [vmem:[#allocation6 + $0x1ba] sm:$0xff] }
 0x4aa   : > { %v5836_v24 = vadd.f32 %v5804_v17, %v5736_v10  ;;  %v6136_v8 = vadd.f32 %v6104_v0, %v6036_v16  ;;  %v12980_v40 = vmul.f32 %v9044_v59, %v12305_v20  ;;  %v5339_v38 = vmul.f32 %v12819_v56, %v11441_v49  ;;  %v9046_v10 = vld [vmem:[#allocation6 + $0x19a] sm:$0xff] }
 0x4ab   : > { %v5439_v45 = vmul.f32 %v12823_v13, %v11444_v47  ;;  %v5737_v62 = vadd.f32 %v5705_v61, %v5669_v9  ;;  %v6006_v30 = vmul.f32 %v12311_v54, %v5970_v39  ;;  %v5570_v51 = vadd.f32 %v5538_v42, %v5470_v60  ;;  %v6071_v35 = vld [vmem:[#allocation6 + $0x1bc] sm:$0xff] }
 0x4ac   : > { %v5937_v28 = vadd.f32 %v5905_v34, %v5836_v24  ;;  %8211 = vmatprep.mubr.f32.mxu1 %v6136_v8  ;;  %v6106_v17 = vmul.f32 %v12902_v6, %v6070_v41  ;;  %v5539_v0 = vmul.f32 %v12838_v15, %v11457_v57  ;;  %v5639_v20 = vmul.f32 %v12918_v3, %v11517_v48 }
 0x4ad   : > { %v5471_v7 = vadd.f32 %v5439_v45, %v5339_v38  ;;  %v5837_v56 = vadd.f32 %v5805_v46, %v5737_v62  ;;  %v5670_v50 = vadd.f32 %v5638_v55, %v5570_v51  ;;  %v5706_v13 = vmul.f32 %v9045_v11, %v11525_v21  ;;  %v9047_v55 = vld [vmem:[#allocation6 + $0x1a2] sm:$0xff]  ;;  %v5973_v38 = vld [vmem:[#allocation6 + $0x1d2] sm:$0xff] }
 0x4ae   : > { %v6037_v22 = vadd.f32 %v6005_v23, %v5937_v28  ;;  %v5806_v34 = vmul.f32 %v12911_v43, %v11528_v36  ;;  %v5340_v29 = vmul.f32 %v12846_v63, %v11441_v49  ;;  %v5440_v15 = vmul.f32 %v12853_v4, %v11444_v47  ;;  %v6073_v51 = vld [vmem:[#allocation6 + $0x1d4] sm:$0xff] }
 0x4af   : > { %v5571_v18 = vadd.f32 %v5539_v0, %v5471_v7  ;;  %v5938_v3 = vadd.f32 %v12980_v40, %v5837_v56  ;;  %v5738_v23 = vadd.f32 %v5706_v13, %v5670_v50  ;;  %v5707_v44 = vmul.f32 %v9046_v10, %v11525_v21 }
 0x4b0   : > { %v6137_v19 = vadd.f32 %v6105_v37, %v6037_v22  ;;  %v5472_v26 = vadd.f32 %v5440_v15, %v5340_v29  ;;  %v5540_v43 = vmul.f32 %v12861_v33, %v11457_v57  ;;  %v5640_v61 = vmul.f32 %v12940_v31, %v11517_v48  ;;  %v5972_v37 = vld [vmem:[#allocation6 + $0x1ca] sm:$0xff] }
 0x4b1   : > { %v5671_v16 = vadd.f32 %v5639_v20, %v5571_v18  ;;  %v13005_v49 = vpop.f32.mrb[88].mxu1  ;;  %v6038_v47 = vadd.f32 %v6006_v30, %v5938_v3  ;;  %v5838_v63 = vadd.f32 %v5806_v34, %v5738_v23  ;;  %v6007_v4 = vmul.f32 %v12311_v54, %v5971_v1  ;;  %v6072_v33 = vld [vmem:[#allocation6 + $0x1cc] sm:$0xff] }
 0x4b2   : > { %8212 = vmatmul.mubr.f32.gmra.mrb[138].mxu1 %v6137_v19  ;;  %v13008_v46 = vpop.f32.mrb[89].mxu1  ;;  %v5807_v42 = vmul.f32 %v12931_v58, %v11528_v36  ;;  %v5572_v24 = vadd.f32 %v5540_v43, %v5472_v26  ;;  %v6107_v48 = vmul.f32 %v12902_v6, %v6071_v35  ;;  %v6008_v41 = vmul.f32 %v12311_v54, %v5972_v37 }
 0x4b3   : > { %v5739_v39 = vadd.f32 %v5707_v44, %v5671_v16  ;;  %v6138_v9 = vadd.f32 %v6106_v17, %v6038_v47  ;;  %v5939_v57 = vadd.f32 %v12980_v40, %v5838_v63  ;;  %v5708_v8 = vmul.f32 %v9047_v55, %v11525_v21  ;;  %v13070_v47 = vld [vmem:[%s14253_s9 + $0x1] ss:$0 sm:$0xff] }
 0x4b4   : > { %v5672_v60 = vadd.f32 %v5640_v61, %v5572_v24  ;;  %v6108_v58 = vmul.f32 %v12902_v6, %v6072_v33  ;;  %v5808_v62 = vmul.f32 %v12955_v5, %v11528_v36  ;;  %v6009_v0 = vmul.f32 %v12311_v54, %v5973_v38 }
 0x4b5   : > { %v5839_v31 = vadd.f32 %v5807_v42, %v5739_v39  ;;  %8214 = vmatprep.mubr.f32.mxu1 %v6138_v9  ;;  %v6039_v59 = vadd.f32 %v6007_v4, %v5939_v57  ;;  %v6109_v56 = vmul.f32 %v12902_v6, %v6073_v51 }
 0x4b6   : > { %v5740_v28 = vadd.f32 %v5708_v8, %v5672_v60 }
 0x4b7   : > { %v5940_v45 = vadd.f32 %v12980_v40, %v5839_v31  ;;  %v6139_v30 = vadd.f32 %v6107_v48, %v6039_v59 }
 0x4b8   : > { %v5840_v7 = vadd.f32 %v5808_v62, %v5740_v28 }
 0x4b9   : > { %v6040_v17 = vadd.f32 %v6008_v41, %v5940_v45  ;;  %8215 = vmatmul.mubr.f32.gmra.mrb[140].mxu1 %v6139_v30 }
 0x4ba   : > { %v13021_v20 = vpop.f32.mrb[90].mxu1  ;;  %v5941_v22 = vadd.f32 %v12980_v40, %v5840_v7 }
 0x4bb   : > { %v6140_v21 = vadd.f32 %v6108_v58, %v6040_v17  ;;  %v13025_v50 = vpop.f32.mrb[91].mxu1 }
 0x4bc   : > { %v6041_v11 = vadd.f32 %v6009_v0, %v5941_v22 }
 0x4bd   : > { %8217 = vmatprep.mubr.f32.mxu1 %v6140_v21 }
 0x4be   : > { %v6141_v13 = vadd.f32 %v6109_v56, %v6041_v11 }
 0x4c0   : > { %8218 = vmatmul.mubr.f32.gmra.mrb[142].mxu1 %v6141_v13 }
 0x4c1   : > { %v13027_v36 = vpop.f32.mrb[92].mxu1 }
 0x4c2   : > { %v13029_v5 = vpop.f32.mrb[93].mxu1 }
 0x4cb   : > { %v13031_v34 = vpop.f32.mrb[94].mxu1 }
 0x4cc   : > { %v13033_v54 = vpop.f32.mrb[95].mxu1 }
 0x4d2   : > { %v13035_v1 = vpop.f32.mrb[96].mxu1 }
 0x4d3   : > { %v13037_v18 = vpop.f32.mrb[97].mxu1 }
 0x4dc   : > { %v13039_v40 = vpop.f32.mrb[98].mxu1 }
 0x4dd   : > { %v13041_v6 = vpop.f32.mrb[99].mxu1 }
 0x4e3   : > { %v13043_v29 = vpop.f32.mrb[100].mxu1 }
 0x4e4   : > { %v13045_v15 = vpop.f32.mrb[101].mxu1 }
 0x4ed   : > { %v13047_v19 = vpop.f32.mrb[102].mxu1 }
 0x4ee   : > { %v13049_v3 = vpop.f32.mrb[103].mxu1 }
 0x4f4   : > { %v13051_v23 = vpop.f32.mrb[104].mxu1 }
 0x4f5   : > { %v13053_v10 = vpop.f32.mrb[105].mxu1 }
 0x4fe   : > { %v13055_v44 = vpop.f32.mrb[106].mxu1 }
 0x4ff   : > { %v13057_v35 = vpop.f32.mrb[107].mxu1 }
 0x505   : > { %v13059_v16 = vpop.f32.mrb[108].mxu1 }
 0x506   : > { %v13061_v26 = vpop.f32.mrb[109].mxu1 }
 0x50f   : > { %v13063_v43 = vpop.f32.mrb[110].mxu1 }
 0x510   : > { %v13065_v61 = vpop.f32.mrb[111].mxu1 }
 0x516   : > { %v8174_v63 = vpop.f32.mrb[112].mxu1 }
 0x517   : > { %v6239_v4 = vadd.f32 %v8174_v63, %v13070_v47  ;;  %v6233_v37 = vpop.f32.mrb[113].mxu1 }
 0x518   : > { %v6234_v39 = vadd.f32 %v13070_v47, %v6233_v37 }
 0x519   : > { %v6393_v42 = vmax.f32 %v6239_v4, 0.0 }
 0x51a   : > { %v6392_v24 = vmax.f32 %v6234_v39, 0.0 }
 0x51c   : > { %v8934_v9 = vpack.i.bf16 %v6393_v42, %v6392_v24 }
 0x51e   : > { %8935 = vrot.lane.b32.xlu1 %v8934_v9, %s14277_s24  ;;  %v8177_v57 = vpop.f32.mrb[114].mxu1 }
 0x51f   : > { %v6249_v48 = vadd.f32 %v8177_v57, %v13070_v47  ;;  %v6243_v33 = vpop.f32.mrb[115].mxu1 }
 0x520   : > { %v6244_v31 = vadd.f32 %v13070_v47, %v6243_v33 }
 0x521   : > { %v6395_v41 = vmax.f32 %v6249_v48, 0.0 }
 0x522   : > { %v6394_v60 = vmax.f32 %v6244_v31, 0.0 }
 0x524   : > { %v8944_v55 = vpack.i.bf16 %v6395_v41, %v6394_v60 }
 0x526   : > { %8945 = vrot.lane.b32.xlu1 %v8944_v55, %s14277_s24 }
 0x527   : > { %v8180_v8 = vpop.f32.mrb[116].mxu1 }
 0x528   : > { %v6259_v59 = vadd.f32 %v8180_v8, %v13070_v47  ;;  %v6253_v38 = vpop.f32.mrb[117].mxu1 }
 0x529   : > { %v6254_v45 = vadd.f32 %v13070_v47, %v6253_v38 }
 0x52a   : > { %v6397_v58 = vmax.f32 %v6259_v59, 0.0 }
 0x52b   : > { %v6396_v28 = vmax.f32 %v6254_v45, 0.0 }
 0x52d   : > { %v8954_v62 = vpack.i.bf16 %v6397_v58, %v6396_v28 }
 0x52f   : > { %8955 = vrot.lane.b32.xlu1 %v8954_v62, %s14277_s24 }
 0x530   : > { %v8183_v30 = vpop.f32.mrb[118].mxu1 }
 0x531   : > { %v6269_v51 = vadd.f32 %v8183_v30, %v13070_v47  ;;  %v6263_v17 = vpop.f32.mrb[119].mxu1 }
 0x532   : > { %v6264_v7 = vadd.f32 %v13070_v47, %v6263_v17 }
 0x533   : > { %v6399_v0 = vmax.f32 %v6269_v51, 0.0 }
 0x534   : > { %v6398_v21 = vmax.f32 %v6264_v7, 0.0 }
 0x536   : > { %v8964_v22 = vpack.i.bf16 %v6399_v0, %v6398_v21 }
 0x537   : > { %v8186_v56 = vpop.f32.mrb[120].mxu1 }
 0x538   : > { %8965 = vrot.lane.b32.xlu1 %v8964_v22, %s14277_s24  ;;  %v6279_v11 = vadd.f32 %v8186_v56, %v13070_v47  ;;  %v6273_v13 = vpop.f32.mrb[121].mxu1 }
 0x539   : > { %v6274_v63 = vadd.f32 %v13070_v47, %v6273_v13 }
 0x53a   : > { %v6401_v4 = vmax.f32 %v6279_v11, 0.0 }
 0x53b   : > { %v6400_v37 = vmax.f32 %v6274_v63, 0.0 }
 0x53d   : > { %v8974_v39 = vpack.i.bf16 %v6401_v4, %v6400_v37 }
 0x53f   : > { %8975 = vrot.lane.b32.xlu1 %v8974_v39, %s14277_s24 }
 0x541   : > { %v8189_v42 = vpop.f32.mrb[122].mxu1 }
 0x542   : > { %v6289_v24 = vadd.f32 %v8189_v42, %v13070_v47  ;;  %v6283_v9 = vpop.f32.mrb[123].mxu1 }
 0x543   : > { %v6284_v57 = vadd.f32 %v13070_v47, %v6283_v9 }
 0x544   : > { %v6403_v48 = vmax.f32 %v6289_v24, 0.0 }
 0x545   : > { %v6402_v33 = vmax.f32 %v6284_v57, 0.0 }
 0x547   : > { %v8984_v31 = vpack.i.bf16 %v6403_v48, %v6402_v33 }
 0x548   : > { %v8192_v41 = vpop.f32.mrb[124].mxu1 }
 0x549   : > { %8985 = vrot.lane.b32.xlu1 %v8984_v31, %s14277_s24  ;;  %v6299_v60 = vadd.f32 %v8192_v41, %v13070_v47  ;;  %v6293_v55 = vpop.f32.mrb[125].mxu1 }
 0x54a   : > { %v6294_v8 = vadd.f32 %v13070_v47, %v6293_v55 }
 0x54b   : > { %v6405_v59 = vmax.f32 %v6299_v60, 0.0 }
 0x54c   : > { %v6404_v38 = vmax.f32 %v6294_v8, 0.0 }
 0x54e   : > { %v8994_v45 = vpack.i.bf16 %v6405_v59, %v6404_v38 }
 0x550   : > { %8995 = vrot.lane.b32.xlu1 %v8994_v45, %s14277_s24 }
 0x552   : > { %v8195_v58 = vpop.f32.mrb[126].mxu1 }
 0x553   : > { %v6309_v28 = vadd.f32 %v8195_v58, %v13070_v47  ;;  %v6303_v62 = vpop.f32.mrb[127].mxu1 }
 0x554   : > { %v6304_v30 = vadd.f32 %v13070_v47, %v6303_v62 }
 0x555   : > { %v6407_v51 = vmax.f32 %v6309_v28, 0.0 }
 0x556   : > { %v6406_v17 = vmax.f32 %v6304_v30, 0.0 }
 0x558   : > { %v9004_v7 = vpack.i.bf16 %v6407_v51, %v6406_v17 }
 0x559   : > { %v8198_v0 = vpop.f32.mrb[128].mxu1 }
 0x55a   : > { %9005 = vrot.lane.b32.xlu1 %v9004_v7, %s14277_s24  ;;  %v6319_v21 = vadd.f32 %v8198_v0, %v13070_v47  ;;  %v6313_v22 = vpop.f32.mrb[129].mxu1 }
 0x55b   : > { %v6314_v56 = vadd.f32 %v13070_v47, %v6313_v22 }
 0x55c   : > { %v6409_v11 = vmax.f32 %v6319_v21, 0.0 }
 0x55d   : > { %v6408_v13 = vmax.f32 %v6314_v56, 0.0 }
 0x55f   : > { %v8929_v63 = vpack.i.bf16 %v6409_v11, %v6408_v13 }
 0x561   : > { %8930 = vrot.lane.b32.xlu0 %v8929_v63, %s14277_s24 }
 0x563   : > { %v8201_v4 = vpop.f32.mrb[130].mxu1 }
 0x564   : > { %v6329_v37 = vadd.f32 %v8201_v4, %v13070_v47  ;;  %v6323_v39 = vpop.f32.mrb[131].mxu1 }
 0x565   : > { %v6324_v42 = vadd.f32 %v13070_v47, %v6323_v39  ;;  %v13116_v39 = vld [vmem:[%s14253_s9] ss:$0 sm:$0xff] }
 0x566   : > { %v6411_v24 = vmax.f32 %v6329_v37, 0.0 }
 0x567   : > { %v6410_v9 = vmax.f32 %v6324_v42, 0.0 }
 0x569   : > { %v8939_v57 = vpack.i.bf16 %v6411_v24, %v6410_v9  ;;  %v5085_v9 = vadd.f32 %v12825_v32, %v13116_v39 }
 0x56a   : > { %v8204_v48 = vpop.f32.mrb[132].mxu1 }
 0x56b   : > { %8940 = vrot.lane.b32.xlu0 %v8939_v57, %s14277_s24  ;;  %v6339_v33 = vadd.f32 %v8204_v48, %v13070_v47  ;;  %v6333_v31 = vpop.f32.mrb[133].mxu1  ;;  %v5080_v57 = vadd.f32 %v13116_v39, %v12834_v25 }
 0x56c   : > { %v6334_v41 = vadd.f32 %v13070_v47, %v6333_v31 }
 0x56d   : > { %v6413_v60 = vmax.f32 %v6339_v33, 0.0 }
 0x56e   : > { %v6412_v55 = vmax.f32 %v6334_v41, 0.0 }
 0x570   : > { %v8949_v8 = vpack.i.bf16 %v6413_v60, %v6412_v55  ;;  %v5239_v60 = vmax.f32 %v5085_v9, 0.0  ;;  %v5105_v9 = vadd.f32 %v12933_v27, %v13116_v39  ;;  %v5115_v27 = vadd.f32 %v12968_v2, %v13116_v39  ;;  %v6685_v2 = vld [vmem:[%s14254_s10 + $0x40] sm:$0xff] }
 0x572   : > { %8950 = vrot.lane.b32.xlu0 %v8949_v8, %s14277_s24 }
 0x574   : > { %v8207_v59 = vpop.f32.mrb[134].mxu1 }
 0x575   : > { %v6349_v38 = vadd.f32 %v8207_v59, %v13070_v47  ;;  %v6343_v45 = vpop.f32.mrb[135].mxu1  ;;  %v5238_v59 = vmax.f32 %v5080_v57, 0.0  ;;  %v5100_v57 = vadd.f32 %v13116_v39, %v12942_v53  ;;  %v5110_v53 = vadd.f32 %v13116_v39, %v12975_v14  ;;  %v6694_v14 = vld [vmem:[%s14254_s10 + $0x88] sm:$0xff] }
 0x576   : > { %v6344_v58 = vadd.f32 %v13070_v47, %v6343_v45 }
 0x577   : > { %v6415_v28 = vmax.f32 %v6349_v38, 0.0 }
 0x578   : > { %v6414_v62 = vmax.f32 %v6344_v58, 0.0 }
 0x57a   : > { %v8959_v30 = vpack.i.bf16 %v6415_v28, %v6414_v62 }
 0x57b   : > { %v8210_v51 = vpop.f32.mrb[136].mxu1 }
 0x57c   : > { %8960 = vrot.lane.b32.xlu0 %v8959_v30, %s14277_s24  ;;  %v6359_v17 = vadd.f32 %v8210_v51, %v13070_v47  ;;  %v6353_v7 = vpop.f32.mrb[137].mxu1  ;;  %v5095_v51 = vadd.f32 %v12871_v12, %v13116_v39 }
 0x57d   : > { %v6354_v0 = vadd.f32 %v13070_v47, %v6353_v7 }
 0x57e   : > { %v6417_v21 = vmax.f32 %v6359_v17, 0.0  ;;  %v5241_v12 = vmax.f32 %v5095_v51, 0.0 }
 0x57f   : > { %v6416_v22 = vmax.f32 %v6354_v0, 0.0  ;;  %v5090_v0 = vadd.f32 %v13116_v39, %v12879_v52 }
 0x581   : > { %v8969_v56 = vpack.i.bf16 %v6417_v21, %v6416_v22  ;;  %v13143_v22 = vld [vmem:[%s14255_s11] sm:$0xff] }
 0x582   : > { %7896 = vmatprep.mubr.f32.mxu1 %v13143_v22 }
 0x583   : > { %8970 = vrot.lane.b32.xlu0 %v8969_v56, %s14277_s24 }
 0x585   : > { %v8213_v11 = vpop.f32.mrb[138].mxu1 }
 0x586   : > { %v6369_v13 = vadd.f32 %v8213_v11, %v13070_v47  ;;  %v6363_v63 = vpop.f32.mrb[139].mxu1 }
 0x587   : > { %v6364_v4 = vadd.f32 %v13070_v47, %v6363_v63  ;;  %v5240_v63 = vmax.f32 %v5090_v0, 0.0 }
 0x588   : > { %v6419_v37 = vmax.f32 %v6369_v13, 0.0 }
 0x589   : > { %v6418_v42 = vmax.f32 %v6364_v4, 0.0 }
 0x58b   : > { %v8979_v24 = vpack.i.bf16 %v6419_v37, %v6418_v42 }
 0x58c   : > { %v8216_v48 = vpop.f32.mrb[140].mxu1 }
 0x58d   : > { %8980 = vrot.lane.b32.xlu0 %v8979_v24, %s14277_s24  ;;  %v6379_v33 = vadd.f32 %v8216_v48, %v13070_v47  ;;  %v6373_v31 = vpop.f32.mrb[141].mxu1 }
 0x58e   : > { %v6374_v41 = vadd.f32 %v13070_v47, %v6373_v31  ;;  %v5242_v31 = vmax.f32 %v5100_v57, 0.0 }
 0x58f   : > { %v6421_v55 = vmax.f32 %v6379_v33, 0.0  ;;  %v5243_v33 = vmax.f32 %v5105_v9, 0.0 }
 0x590   : > { %v8936_v8 = vpop.permute.xlu1 %8935  ;;  %v6420_v38 = vmax.f32 %v6374_v41, 0.0 }
 0x591   : > { %v8938_v45 = vunpack.i.h.bf16 %v8936_v8  ;;  %v8937_v58 = vunpack.i.l.bf16 %v8936_v8 }
 0x592   : > { %v8989_v28 = vpack.i.bf16 %v6421_v55, %v6420_v38  ;;  %v6678_v38 = vld [vmem:[%s14254_s10 + $0x8] sm:$0xff] }
 0x593   : > { %v13126_v32 = vsel %vm487_vm0, %v5239_v60, %v8938_v45  ;;  %v13129_v25 = vsel %vm487_vm0, %v5238_v59, %v8937_v58  ;;  %v8219_v62 = vpop.f32.mrb[142].mxu1  ;;  %v6686_v45 = vld [vmem:[%s14254_s10 + $0x48] sm:$0xff]  ;;  %v6677_v58 = vld [vmem:[%s14254_s10] sm:$0xff] }
 0x594   : > { %v8494_v30 = vpack.c.bf16 %v13126_v32, %v13129_v25  ;;  %v6389_v17 = vadd.f32 %v8219_v62, %v13070_v47  ;;  %v6383_v7 = vpop.f32.mrb[143].mxu1  ;;  %8990 = vrot.lane.b32.xlu0 %v8989_v28, %s14277_s24  ;;  %v5245_v28 = vmax.f32 %v5115_v27, 0.0  ;;  %v5244_v62 = vmax.f32 %v5110_v53, 0.0  ;;  %v6726_v27 = vld [vmem:[%s14254_s10 + $0x188] sm:$0xff]  ;;  %v6901_v32 = vld [vmem:[%s14254_s10 + $0x700] sm:$0xff] }
 0x595   : > { %v6384_v21 = vadd.f32 %v13070_v47, %v6383_v7  ;;  %v6702_v7 = vld [vmem:[%s14254_s10 + $0xc8] sm:$0xff]  ;;  %v6909_v25 = vld [vmem:[%s14254_s10 + $0x740] sm:$0xff] }
 0x596   : > { %v6423_v56 = vmax.f32 %v6389_v17, 0.0  ;;  %v8524_v17 = vpack.c.bf16 %v6686_v45, %v6678_v38  ;;  %v6734_v53 = vld [vmem:[%s14254_s10 + $0x1c8] sm:$0xff] }
 0x597   : > { %v6422_v11 = vmax.f32 %v6384_v21, 0.0 }
 0x598   : > { %v8946_v13 = vpop.permute.xlu1 %8945  ;;  %8525 = vmatprep.subr.bf16.mxu0 %v8524_v17 }
 0x599   : > { %v8999_v4 = vpack.i.bf16 %v6423_v56, %v6422_v11  ;;  %v8948_v37 = vunpack.i.h.bf16 %v8946_v13  ;;  %v8947_v42 = vunpack.i.l.bf16 %v8946_v13  ;;  %v8526_v56 = vpack.c.bf16 %v6685_v2, %v6677_v58  ;;  %v6701_v13 = vld [vmem:[%s14254_s10 + $0xc0] sm:$0xff]  ;;  %v6742_v2 = vld [vmem:[%s14254_s10 + $0x208] sm:$0xff] }
 0x59a   : > { %v8528_v11 = vpack.c.bf16 %v6702_v7, %v6694_v14  ;;  %v8536_v58 = vpack.c.bf16 %v6734_v53, %v6726_v27  ;;  %v6750_v14 = vld [vmem:[%s14254_s10 + $0x248] sm:$0xff] }
 0x59b   : > { %9000 = vrot.lane.b32.xlu0 %v8999_v4, %s14277_s24  ;;  %v13148_v52 = vsel %vm487_vm0, %v5241_v12, %v8948_v37  ;;  %v13151_v47 = vsel %vm487_vm0, %v5240_v63, %v8947_v42  ;;  %v6693_v12 = vld [vmem:[%s14254_s10 + $0x80] sm:$0xff]  ;;  %v6710_v63 = vld [vmem:[%s14254_s10 + $0x108] sm:$0xff]  ;;  %8527 = vmatpush1.bf16.msra.mxu0 %v8526_v56 }
 0x59c   : > { %v8498_v24 = vpack.c.bf16 %v13148_v52, %v13151_v47  ;;  %v6718_v4 = vld [vmem:[%s14254_s10 + $0x148] sm:$0xff]  ;;  %v8530_v9 = vpack.c.bf16 %v6701_v13, %v6693_v12  ;;  %8529 = vmatprep.subr.bf16.mxu0 %v8528_v11  ;;  %v8540_v11 = vpack.c.bf16 %v6750_v14, %v6742_v2  ;;  %v6741_v12 = vld [vmem:[%s14254_s10 + $0x200] sm:$0xff]  ;;  %v5190_v52 = vadd.f32 %v13116_v39, %v13049_v3 }
 0x59d   : > { %v6749_v13 = vld [vmem:[%s14254_s10 + $0x240] sm:$0xff]  ;;  %v6790_v14 = vld [vmem:[%s14254_s10 + $0x388] sm:$0xff]  ;;  %v5200_v3 = vadd.f32 %v13116_v39, %v13053_v10  ;;  %v5210_v10 = vadd.f32 %v13116_v39, %v13057_v35  ;;  %v5220_v35 = vadd.f32 %v13116_v39, %v13061_v26  ;;  %v5230_v26 = vadd.f32 %v13116_v39, %v13065_v61 }
 0x59f   : > { %8531 = vmatpush1.bf16.msra.mxu0 %v8530_v9  ;;  %v5135_v9 = vadd.f32 %v13021_v20, %v13116_v39  ;;  %v6774_v20 = vld [vmem:[%s14254_s10 + $0x308] sm:$0xff] }
 0x5a1   : > { %v8956_v48 = vpop.permute.xlu1 %8955  ;;  %v5249_v53 = vmax.f32 %v5135_v9, 0.0  ;;  %v6797_v9 = vld [vmem:[%s14254_s10 + $0x3c0] sm:$0xff] }
 0x5a2   : > { %v8958_v41 = vunpack.i.h.bf16 %v8956_v48  ;;  %v8957_v60 = vunpack.i.l.bf16 %v8956_v48  ;;  %v8532_v48 = vpack.c.bf16 %v6718_v4, %v6710_v63  ;;  %v6758_v63 = vld [vmem:[%s14254_s10 + $0x288] sm:$0xff] }
 0x5a3   : > { %v6766_v4 = vld [vmem:[%s14254_s10 + $0x2c8] sm:$0xff] }
 0x5a4   : > { %v13160_v55 = vsel %vm487_vm0, %v5243_v33, %v8958_v41  ;;  %v13163_v8 = vsel %vm487_vm0, %v5242_v31, %v8957_v60  ;;  %v6709_v33 = vld [vmem:[%s14254_s10 + $0x100] sm:$0xff]  ;;  %v5125_v41 = vadd.f32 %v13005_v49, %v13116_v39  ;;  %v5120_v60 = vadd.f32 %v13116_v39, %v13008_v46  ;;  %8533 = vmatprep.subr.bf16.mxu0 %v8532_v48 }
 0x5a5   : > { %v8502_v59 = vpack.c.bf16 %v13160_v55, %v13163_v8  ;;  %v6717_v31 = vld [vmem:[%s14254_s10 + $0x140] sm:$0xff]  ;;  %v5130_v48 = vadd.f32 %v13116_v39, %v13025_v50  ;;  %v6782_v50 = vld [vmem:[%s14254_s10 + $0x348] sm:$0xff] }
 0x5a6   : > { %v8534_v38 = vpack.c.bf16 %v6717_v31, %v6709_v33  ;;  %v6725_v49 = vld [vmem:[%s14254_s10 + $0x180] sm:$0xff]  ;;  %v8542_v33 = vpack.c.bf16 %v6749_v13, %v6741_v12  ;;  %v8544_v31 = vpack.c.bf16 %v6766_v4, %v6758_v63  ;;  %v5140_v12 = vadd.f32 %v13116_v39, %v13029_v5  ;;  %v6814_v5 = vld [vmem:[%s14254_s10 + $0x448] sm:$0xff] }
 0x5a7   : > { %v6733_v46 = vld [vmem:[%s14254_s10 + $0x1c0] sm:$0xff] }
 0x5a8   : > { %8535 = vmatpush1.bf16.msra.mxu0 %v8534_v38  ;;  %v5248_v38 = vmax.f32 %v5130_v48, 0.0  ;;  %v6789_v4 = vld [vmem:[%s14254_s10 + $0x380] sm:$0xff] }
 0x5a9   : > { %8537 = vmatprep.subr.bf16.mxu0 %v8536_v58 }
 0x5aa   : > { %v8966_v51 = vpop.permute.xlu1 %8965 }
 0x5ab   : > { %v8968_v0 = vunpack.i.h.bf16 %v8966_v51  ;;  %v8967_v21 = vunpack.i.l.bf16 %v8966_v51 }
 0x5ad   : > { %v13202_v37 = vsel %vm487_vm0, %v5245_v28, %v8968_v0  ;;  %v13205_v42 = vsel %vm487_vm0, %v5244_v62, %v8967_v21  ;;  %v5247_v28 = vmax.f32 %v5125_v41, 0.0  ;;  %v5246_v62 = vmax.f32 %v5120_v60, 0.0  ;;  %v6757_v41 = vld [vmem:[%s14254_s10 + $0x280] sm:$0xff] }
 0x5ae   : > { %v8506_v57 = vpack.c.bf16 %v13202_v37, %v13205_v42  ;;  %v8538_v21 = vpack.c.bf16 %v6733_v46, %v6725_v49  ;;  %v6765_v60 = vld [vmem:[%s14254_s10 + $0x2c0] sm:$0xff] }
 0x5af   : > { %v8546_v49 = vpack.c.bf16 %v6765_v60, %v6757_v41 }
 0x5b0   : > { %8539 = vmatpush1.bf16.msra.mxu0 %v8538_v21  ;;  %v6798_v21 = vld [vmem:[%s14254_s10 + $0x3c8] sm:$0xff] }
 0x5b1   : > { %v8976_v45 = vpop.permute.xlu1 %8975  ;;  %8541 = vmatprep.subr.bf16.mxu0 %v8540_v11  ;;  %v5145_v11 = vadd.f32 %v13027_v36, %v13116_v39  ;;  %v8552_v63 = vpack.c.bf16 %v6798_v21, %v6790_v14  ;;  %v6806_v36 = vld [vmem:[%s14254_s10 + $0x408] sm:$0xff] }
 0x5b2   : > { %v8978_v51 = vunpack.i.h.bf16 %v8976_v45  ;;  %v8977_v17 = vunpack.i.l.bf16 %v8976_v45 }
 0x5b4   : > { %v13238_v7 = vsel %vm487_vm0, %v5247_v28, %v8978_v51  ;;  %v13241_v0 = vsel %vm487_vm0, %v5246_v62, %v8977_v17  ;;  %8543 = vmatpush1.bf16.msra.mxu0 %v8542_v33  ;;  %v8548_v62 = vpack.c.bf16 %v6782_v50, %v6774_v20  ;;  %v6773_v51 = vld [vmem:[%s14254_s10 + $0x300] sm:$0xff]  ;;  %v5251_v33 = vmax.f32 %v5145_v11, 0.0 }
 0x5b5   : > { %v8510_v56 = vpack.c.bf16 %v13238_v7, %v13241_v0  ;;  %8545 = vmatprep.subr.bf16.mxu0 %v8544_v31  ;;  %v6781_v17 = vld [vmem:[%s14254_s10 + $0x340] sm:$0xff]  ;;  %v5250_v31 = vmax.f32 %v5140_v12, 0.0 }
 0x5b6   : > { %v8550_v13 = vpack.c.bf16 %v6781_v17, %v6773_v51  ;;  %v5155_v51 = vadd.f32 %v13031_v34, %v13116_v39  ;;  %v5150_v17 = vadd.f32 %v13116_v39, %v13033_v54  ;;  %v6821_v11 = vld [vmem:[%s14254_s10 + $0x480] sm:$0xff]  ;;  %v6846_v34 = vld [vmem:[%s14254_s10 + $0x548] sm:$0xff] }
 0x5b7   : > { %v6829_v12 = vld [vmem:[%s14254_s10 + $0x4c0] sm:$0xff] }
 0x5b8   : > { %8547 = vmatpush1.bf16.msra.mxu0 %v8546_v49  ;;  %v6822_v49 = vld [vmem:[%s14254_s10 + $0x488] sm:$0xff]  ;;  %v5253_v54 = vmax.f32 %v5155_v51, 0.0 }
 0x5b9   : > { %8549 = vmatprep.subr.bf16.mxu0 %v8548_v62  ;;  %v6830_v62 = vld [vmem:[%s14254_s10 + $0x4c8] sm:$0xff] }
 0x5ba   : > { %v8560_v21 = vpack.c.bf16 %v6830_v62, %v6822_v49  ;;  %v5160_v49 = vadd.f32 %v13116_v39, %v13037_v18  ;;  %v6878_v18 = vld [vmem:[%s14254_s10 + $0x648] sm:$0xff] }
 0x5bb   : > { %v8986_v27 = vpop.permute.xlu1 %8985 }
 0x5bc   : > { %v8988_v45 = vunpack.i.h.bf16 %v8986_v27  ;;  %v8987_v58 = vunpack.i.l.bf16 %v8986_v27  ;;  %8551 = vmatpush1.bf16.msra.mxu0 %v8550_v13  ;;  %v8554_v27 = vpack.c.bf16 %v6797_v9, %v6789_v4  ;;  %v6838_v13 = vld [vmem:[%s14254_s10 + $0x508] sm:$0xff]  ;;  %v5252_v4 = vmax.f32 %v5150_v17, 0.0  ;;  %v6853_v17 = vld [vmem:[%s14254_s10 + $0x580] sm:$0xff] }
 0x5bd   : > { %8553 = vmatprep.subr.bf16.mxu0 %v8552_v63 }
 0x5be   : > { %v13274_v46 = vsel %vm487_vm0, %v5249_v53, %v8988_v45  ;;  %v13277_v28 = vsel %vm487_vm0, %v5248_v38, %v8987_v58  ;;  %v8556_v53 = vpack.c.bf16 %v6814_v5, %v6806_v36  ;;  %v6805_v38 = vld [vmem:[%s14254_s10 + $0x400] sm:$0xff]  ;;  %v8562_v36 = vpack.c.bf16 %v6829_v12, %v6821_v11 }
 0x5bf   : > { %v8514_v2 = vpack.c.bf16 %v13274_v46, %v13277_v28  ;;  %v6813_v45 = vld [vmem:[%s14254_s10 + $0x440] sm:$0xff]  ;;  %v8564_v5 = vpack.c.bf16 %v6846_v34, %v6838_v13  ;;  %v5254_v12 = vmax.f32 %v5160_v49, 0.0  ;;  %v5268_v28 = vmax.f32 %v5230_v26, 0.0  ;;  %v6807_v26 = vld [vmem:[%s14254_s10 + $0x410] sm:$0xff] }
 0x5c0   : > { %8555 = vmatpush1.bf16.msra.mxu0 %v8554_v27  ;;  %v8558_v14 = vpack.c.bf16 %v6813_v45, %v6805_v38  ;;  %v6854_v27 = vld [vmem:[%s14254_s10 + $0x588] sm:$0xff]  ;;  %v5165_v38 = vadd.f32 %v13035_v1, %v13116_v39 }
 0x5c1   : > { %8557 = vmatprep.subr.bf16.mxu0 %v8556_v53  ;;  %v6862_v53 = vld [vmem:[%s14254_s10 + $0x5c8] sm:$0xff] }
 0x5c2   : > { %v8996_v48 = vpop.permute.xlu1 %8995  ;;  %v8568_v51 = vpack.c.bf16 %v6862_v53, %v6854_v27  ;;  %v6870_v1 = vld [vmem:[%s14254_s10 + $0x608] sm:$0xff]  ;;  %v5175_v27 = vadd.f32 %v13039_v40, %v13116_v39 }
 0x5c3   : > { %v8998_v41 = vunpack.i.h.bf16 %v8996_v48  ;;  %v8997_v60 = vunpack.i.l.bf16 %v8996_v48  ;;  %v6902_v40 = vld [vmem:[%s14254_s10 + $0x708] sm:$0xff] }
 0x5c4   : > { %8559 = vmatpush1.bf16.msra.mxu0 %v8558_v14  ;;  %v6861_v14 = vld [vmem:[%s14254_s10 + $0x5c0] sm:$0xff] }
 0x5c5   : > { %v13310_v20 = vsel %vm487_vm0, %v5251_v33, %v8998_v41  ;;  %v13313_v50 = vsel %vm487_vm0, %v5250_v31, %v8997_v60  ;;  %8561 = vmatprep.subr.bf16.mxu0 %v8560_v21  ;;  %v6837_v33 = vld [vmem:[%s14254_s10 + $0x500] sm:$0xff]  ;;  %v5255_v21 = vmax.f32 %v5165_v38, 0.0  ;;  %v5170_v38 = vadd.f32 %v13116_v39, %v13041_v6  ;;  %v6910_v6 = vld [vmem:[%s14254_s10 + $0x748] sm:$0xff] }
 0x5c6   : > { %v8518_v58 = vpack.c.bf16 %v13310_v20, %v13313_v50  ;;  %v6845_v31 = vld [vmem:[%s14254_s10 + $0x540] sm:$0xff]  ;;  %v6679_v20 = vld [vmem:[%s14254_s10 + $0x10] sm:$0xff] }
 0x5c7   : > { %v8566_v62 = vpack.c.bf16 %v6845_v31, %v6837_v33  ;;  %v6894_v33 = vld [vmem:[%s14254_s10 + $0x6c8] sm:$0xff]  ;;  %v6687_v50 = vld [vmem:[%s14254_s10 + $0x50] sm:$0xff] }
 0x5c8   : > { %8563 = vmatpush1.bf16.msra.mxu0 %v8562_v36 }
 0x5c9   : > { %8565 = vmatprep.subr.bf16.mxu0 %v8564_v5  ;;  %v6886_v5 = vld [vmem:[%s14254_s10 + $0x688] sm:$0xff] }
 0x5ca   : > { %v8576_v49 = vpack.c.bf16 %v6894_v33, %v6886_v5  ;;  %v6917_v5 = vld [vmem:[%s14254_s10 + $0x780] sm:$0xff] }
 0x5cb   : > { %v6925_v33 = vld [vmem:[%s14254_s10 + $0x7c0] sm:$0xff] }
 0x5cc   : > { %v9006_v63 = vpop.permute.xlu1 %9005  ;;  %8567 = vmatpush1.bf16.msra.mxu0 %v8566_v62  ;;  %v6885_v62 = vld [vmem:[%s14254_s10 + $0x680] sm:$0xff] }
 0x5cd   : > { %v9008_v9 = vunpack.i.h.bf16 %v9006_v63  ;;  %v9007_v48 = vunpack.i.l.bf16 %v9006_v63  ;;  %8569 = vmatprep.subr.bf16.mxu0 %v8568_v51  ;;  %v8572_v63 = vpack.c.bf16 %v6878_v18, %v6870_v1  ;;  %v6893_v51 = vld [vmem:[%s14254_s10 + $0x6c0] sm:$0xff]  ;;  %v5256_v18 = vmax.f32 %v5170_v38, 0.0 }
 0x5ce   : > { %v8578_v1 = vpack.c.bf16 %v6893_v51, %v6885_v62 }
 0x5cf   : > { %v13352_v41 = vsel %vm487_vm0, %v5253_v54, %v9008_v9  ;;  %v13355_v60 = vsel %vm487_vm0, %v5252_v4, %v9007_v48  ;;  %v8570_v54 = vpack.c.bf16 %v6861_v14, %v6853_v17  ;;  %v6869_v4 = vld [vmem:[%s14254_s10 + $0x600] sm:$0xff]  ;;  %v5257_v17 = vmax.f32 %v5175_v27, 0.0 }
 0x5d0   : > { %v8522_v45 = vpack.c.bf16 %v13352_v41, %v13355_v60  ;;  %v6877_v9 = vld [vmem:[%s14254_s10 + $0x640] sm:$0xff]  ;;  %v6585_v41 = vld [vmem:[%s14255_s11 + $0x8] sm:$0xff] }
 0x5d1   : > { %8571 = vmatpush1.bf16.msra.mxu0 %v8570_v54  ;;  %v8574_v53 = vpack.c.bf16 %v6877_v9, %v6869_v4  ;;  %v8582_v4 = vpack.c.bf16 %v6909_v25, %v6901_v32  ;;  %v5185_v9 = vadd.f32 %v13043_v29, %v13116_v39  ;;  %v8586_v29 = vpack.c.bf16 %v6925_v33, %v6917_v5 }
 0x5d2   : > { %8573 = vmatprep.subr.bf16.mxu0 %v8572_v63 }
 0x5d3   : > { %v8931_v11 = vpop.permute.xlu0 %8930  ;;  %v5259_v27 = vmax.f32 %v5185_v9, 0.0 }
 0x5d4   : > { %v8933_v13 = vunpack.i.h.bf16 %v8931_v11  ;;  %v8932_v34 = vunpack.i.l.bf16 %v8931_v11 }
 0x5d5   : > { %8575 = vmatpush1.bf16.msra.mxu0 %v8574_v53 }
 0x5d6   : > { %v6568_v48 = vsel %vm487_vm0, %v5254_v12, %v8932_v34  ;;  %v6569_v36 = vsel %vm487_vm0, %v5255_v21, %v8933_v13  ;;  %8577 = vmatprep.subr.bf16.mxu0 %v8576_v49  ;;  %v8580_v12 = vpack.c.bf16 %v6910_v6, %v6902_v40  ;;  %v6926_v13 = vld [vmem:[%s14254_s10 + $0x7c8] sm:$0xff]  ;;  %v5195_v40 = vadd.f32 %v13047_v19, %v13116_v39 }
 0x5d7   : > { %v8492_v31 = vpack.c.bf16 %v6569_v36, %v6568_v48  ;;  %v5180_v48 = vadd.f32 %v13116_v39, %v13045_v15  ;;  %v5260_v6 = vmax.f32 %v5190_v52, 0.0  ;;  %v5205_v19 = vadd.f32 %v13051_v23, %v13116_v39 }
 0x5d8   : > { %v5215_v23 = vadd.f32 %v13055_v44, %v13116_v39  ;;  %v5225_v44 = vadd.f32 %v13059_v16, %v13116_v39  ;;  %v5235_v16 = vadd.f32 %v13063_v43, %v13116_v39  ;;  %v6688_v43 = vld [vmem:[%s14254_s10 + $0x58] sm:$0xff] }
 0x5d9   : > { %8493 = vmatprep.subr.bf16.mxu1 %v8492_v31  ;;  %8579 = vmatpush1.bf16.msra.mxu0 %v8578_v1  ;;  %v5258_v15 = vmax.f32 %v5180_v48, 0.0  ;;  %v5263_v8 = vmax.f32 %v5205_v19, 0.0  ;;  %v6727_v19 = vld [vmem:[%s14254_s10 + $0x190] sm:$0xff] }
 0x5da   : > { %8495 = vmatpush3.bf16.xpose.msra.mxu1 %v8494_v30  ;;  %v6918_v30 = vld [vmem:[%s14254_s10 + $0x788] sm:$0xff]  ;;  %8581 = vmatprep.subr.bf16.mxu0 %v8580_v12  ;;  %v5265_v42 = vmax.f32 %v5215_v23, 0.0  ;;  %v5267_v0 = vmax.f32 %v5225_v44, 0.0  ;;  %v5269_v46 = vmax.f32 %v5235_v16, 0.0  ;;  %v6792_v44 = vld [vmem:[%s14254_s10 + $0x398] sm:$0xff] }
 0x5db   : > { %v8584_v36 = vpack.c.bf16 %v6926_v13, %v6918_v30 }
 0x5dd   : > { %v8941_v14 = vpop.permute.xlu0 %8940  ;;  %8583 = vmatpush1.bf16.msra.mxu0 %v8582_v4 }
 0x5de   : > { %v8943_v21 = vunpack.i.h.bf16 %v8941_v14  ;;  %v8942_v11 = vunpack.i.l.bf16 %v8941_v14  ;;  %8585 = vmatprep.subr.bf16.mxu0 %v8584_v36 }
 0x5e0   : > { %v6570_v34 = vsel %vm487_vm0, %v5256_v18, %v8942_v11  ;;  %v6571_v54 = vsel %vm487_vm0, %v5257_v17, %v8943_v21 }
 0x5e1   : > { %v8496_v63 = vpack.c.bf16 %v6571_v54, %v6570_v34  ;;  %8587 = vmatpush1.bf16.msra.mxu0 %v8586_v29 }
 0x5e3   : > { %8497 = vmatprep.subr.bf16.mxu1 %v8496_v63 }
 0x5e4   : > { %8499 = vmatpush3.bf16.xpose.msra.mxu1 %v8498_v24  ;;  %v8951_v31 = vpop.permute.xlu0 %8950  ;;  %v5261_v24 = vmax.f32 %v5195_v40, 0.0  ;;  %v6720_v40 = vld [vmem:[%s14254_s10 + $0x158] sm:$0xff] }
 0x5e5   : > { %v8953_v53 = vunpack.i.h.bf16 %v8951_v31  ;;  %v8952_v38 = vunpack.i.l.bf16 %v8951_v31 }
 0x5e7   : > { %v6572_v49 = vsel %vm487_vm0, %v5258_v15, %v8952_v38  ;;  %v6573_v62 = vsel %vm487_vm0, %v5259_v27, %v8953_v53  ;;  %v6680_v27 = vld [vmem:[%s14254_s10 + $0x18] sm:$0xff] }
 0x5e8   : > { %v8500_v51 = vpack.c.bf16 %v6573_v62, %v6572_v49  ;;  %v8588_v53 = vpack.c.bf16 %v6688_v43, %v6680_v27  ;;  %v6704_v38 = vld [vmem:[%s14254_s10 + $0xd8] sm:$0xff]  ;;  %v8590_v49 = vpack.c.bf16 %v6687_v50, %v6679_v20  ;;  %v6703_v62 = vld [vmem:[%s14254_s10 + $0xd0] sm:$0xff] }
 0x5e9   : > { %v6831_v27 = vld [vmem:[%s14254_s10 + $0x4d0] sm:$0xff]  ;;  %v6840_v43 = vld [vmem:[%s14254_s10 + $0x518] sm:$0xff] }
 0x5ea   : > { %8501 = vmatprep.subr.bf16.mxu1 %v8500_v51  ;;  %v6712_v51 = vld [vmem:[%s14254_s10 + $0x118] sm:$0xff]  ;;  %v6847_v20 = vld [vmem:[%s14254_s10 + $0x550] sm:$0xff] }
 0x5eb   : > { %v6856_v50 = vld [vmem:[%s14254_s10 + $0x598] sm:$0xff] }
 0x5ec   : > { %8503 = vmatpush3.bf16.xpose.msra.mxu1 %v8502_v59  ;;  %v5262_v59 = vmax.f32 %v5200_v3, 0.0  ;;  %v6735_v3 = vld [vmem:[%s14254_s10 + $0x1d0] sm:$0xff] }
 0x5ee   : > { %v8961_v47 = vpop.permute.xlu0 %8960 }
 0x5ef   : > { %v8963_v17 = vunpack.i.h.bf16 %v8961_v47  ;;  %v8962_v14 = vunpack.i.l.bf16 %v8961_v47  ;;  %v6586_v47 = vld [vmem:[%s14255_s11 + $0x10] sm:$0xff] }
 0x5f1   : > { %v6574_v1 = vsel %vm487_vm0, %v5260_v6, %v8962_v14  ;;  %v6575_v18 = vsel %vm487_vm0, %v5261_v24, %v8963_v17  ;;  %v8596_v24 = vpack.c.bf16 %v6720_v40, %v6712_v51  ;;  %v6711_v6 = vld [vmem:[%s14254_s10 + $0x110] sm:$0xff]  ;;  %v6736_v14 = vld [vmem:[%s14254_s10 + $0x1d8] sm:$0xff] }
 0x5f2   : > { %v8504_v21 = vpack.c.bf16 %v6575_v18, %v6574_v1  ;;  %v6719_v17 = vld [vmem:[%s14254_s10 + $0x150] sm:$0xff]  ;;  %v6587_v18 = vld [vmem:[%s14255_s11 + $0x18] sm:$0xff] }
 0x5f3   : > { %v8598_v1 = vpack.c.bf16 %v6719_v17, %v6711_v6  ;;  %v6896_v6 = vld [vmem:[%s14254_s10 + $0x6d8] sm:$0xff] }
 0x5f4   : > { %8505 = vmatprep.subr.bf16.mxu1 %v8504_v21 }
 0x5f5   : > { %8507 = vmatpush3.bf16.xpose.msra.mxu1 %v8506_v57  ;;  %v8971_v55 = vpop.permute.xlu0 %8970  ;;  %v5264_v57 = vmax.f32 %v5210_v10, 0.0 }
 0x5f6   : > { %v8973_v11 = vunpack.i.h.bf16 %v8971_v55  ;;  %v8972_v12 = vunpack.i.l.bf16 %v8971_v55  ;;  %v6744_v55 = vld [vmem:[%s14254_s10 + $0x218] sm:$0xff] }
 0x5f8   : > { %v6576_v32 = vsel %vm487_vm0, %v5262_v59, %v8972_v12  ;;  %v6577_v25 = vsel %vm487_vm0, %v5263_v8, %v8973_v11  ;;  %v6752_v8 = vld [vmem:[%s14254_s10 + $0x258] sm:$0xff]  ;;  %v8602_v59 = vpack.c.bf16 %v6735_v3, %v6727_v19  ;;  %v6743_v12 = vld [vmem:[%s14254_s10 + $0x210] sm:$0xff] }
 0x5f9   : > { %v8508_v30 = vpack.c.bf16 %v6577_v25, %v6576_v32  ;;  %v8604_v11 = vpack.c.bf16 %v6752_v8, %v6744_v55  ;;  %v6751_v32 = vld [vmem:[%s14254_s10 + $0x250] sm:$0xff]  ;;  %v6760_v25 = vld [vmem:[%s14254_s10 + $0x298] sm:$0xff] }
 0x5fa   : > { %v8606_v23 = vpack.c.bf16 %v6751_v32, %v6743_v12  ;;  %v6903_v55 = vld [vmem:[%s14254_s10 + $0x710] sm:$0xff] }
 0x5fb   : > { %8509 = vmatprep.subr.bf16.mxu1 %v8508_v30  ;;  %v6768_v30 = vld [vmem:[%s14254_s10 + $0x2d8] sm:$0xff]  ;;  %v6911_v8 = vld [vmem:[%s14254_s10 + $0x750] sm:$0xff] }
 0x5fc   : > { %v8608_v10 = vpack.c.bf16 %v6768_v30, %v6760_v25  ;;  %v8646_v12 = vpack.c.bf16 %v6911_v8, %v6903_v55  ;;  %v6919_v25 = vld [vmem:[%s14254_s10 + $0x790] sm:$0xff] }
 0x5fd   : > { %8511 = vmatpush3.bf16.xpose.msra.mxu1 %v8510_v56  ;;  %v5266_v56 = vmax.f32 %v5220_v35, 0.0  ;;  %v6800_v35 = vld [vmem:[%s14254_s10 + $0x3d8] sm:$0xff]  ;;  %v6927_v30 = vld [vmem:[%s14254_s10 + $0x7d0] sm:$0xff] }
 0x5fe   : > { %v6731_v55 = vld [vmem:[%s14254_s10 + $0x1b0] sm:$0xff] }
 0x5ff   : > { %v8981_v37 = vpop.permute.xlu0 %8980  ;;  %v6739_v8 = vld [vmem:[%s14254_s10 + $0x1f0] sm:$0xff] }
 0x600   : > { %v8983_v13 = vunpack.i.h.bf16 %v8981_v37  ;;  %v8982_v34 = vunpack.i.l.bf16 %v8981_v37  ;;  %v6759_v37 = vld [vmem:[%s14254_s10 + $0x290] sm:$0xff] }
 0x602   : > { %v6578_v54 = vsel %vm487_vm0, %v5264_v57, %v8982_v34  ;;  %v6579_v63 = vsel %vm487_vm0, %v5265_v42, %v8983_v13  ;;  %v6767_v42 = vld [vmem:[%s14254_s10 + $0x2d0] sm:$0xff]  ;;  %v6776_v57 = vld [vmem:[%s14254_s10 + $0x318] sm:$0xff] }
 0x603   : > { %v8512_v4 = vpack.c.bf16 %v6579_v63, %v6578_v54  ;;  %v6784_v13 = vld [vmem:[%s14254_s10 + $0x358] sm:$0xff]  ;;  %v8610_v34 = vpack.c.bf16 %v6767_v42, %v6759_v37  ;;  %v6775_v63 = vld [vmem:[%s14254_s10 + $0x310] sm:$0xff]  ;;  %v6690_v37 = vld [vmem:[%s14254_s10 + $0x68] sm:$0xff] }
 0x604   : > { %v8612_v54 = vpack.c.bf16 %v6784_v13, %v6776_v57  ;;  %v6684_v42 = vld [vmem:[%s14254_s10 + $0x38] sm:$0xff] }
 0x605   : > { %8513 = vmatprep.subr.bf16.mxu1 %v8512_v4  ;;  %v6783_v4 = vld [vmem:[%s14254_s10 + $0x350] sm:$0xff]  ;;  %v6692_v13 = vld [vmem:[%s14254_s10 + $0x78] sm:$0xff] }
 0x606   : > { %8515 = vmatpush3.bf16.xpose.msra.mxu1 %v8514_v2  ;;  %v8991_v7 = vpop.permute.xlu0 %8990 }
 0x607   : > { %v8993_v9 = vunpack.i.h.bf16 %v8991_v7  ;;  %v8992_v48 = vunpack.i.l.bf16 %v8991_v7  ;;  %v8614_v7 = vpack.c.bf16 %v6783_v4, %v6775_v63  ;;  %v6934_v63 = vld [vmem:[%s14256_s12 + $0x8] sm:$0xff]  ;;  %v9152_v4 = vmov 0  }
 0x608   : > { %9009 = vset.pattern.permute.xlu0 %v9152_v4  ;;  %9010 = vset.pattern.permute.xlu1 %v9152_v4  ;;  %v6770_v4 = vld [vmem:[%s14254_s10 + $0x2e8] sm:$0xff] }
 0x609   : > { %v6580_v36 = vsel %vm487_vm0, %v5266_v56, %v8992_v48  ;;  %v6581_v5 = vsel %vm487_vm0, %v5267_v0, %v8993_v9  ;;  %v8616_v0 = vpack.c.bf16 %v6800_v35, %v6792_v44  ;;  %v6791_v56 = vld [vmem:[%s14254_s10 + $0x390] sm:$0xff]  ;;  %v6808_v48 = vld [vmem:[%s14254_s10 + $0x418] sm:$0xff]  ;;  %6944 = vperm.xlu1 %9010, %v6934_v63  }
 0x60a   : > { %v8516_v33 = vpack.c.bf16 %v6581_v5, %v6580_v36  ;;  %v6799_v9 = vld [vmem:[%s14254_s10 + $0x3d0] sm:$0xff]  ;;  %v6816_v36 = vld [vmem:[%s14254_s10 + $0x458] sm:$0xff] }
 0x60b   : > { %v8618_v5 = vpack.c.bf16 %v6799_v9, %v6791_v56  ;;  %v8620_v16 = vpack.c.bf16 %v6816_v36, %v6808_v48  ;;  %v6935_v44 = vld [vmem:[%s14256_s12 + $0x10] sm:$0xff]  ;;  %v6936_v35 = vld [vmem:[%s14256_s12 + $0x18] sm:$0xff]  ;;  %v6698_v48 = vld [vmem:[%s14254_s10 + $0xa8] sm:$0xff] }
 0x60c   : > { %8517 = vmatprep.subr.bf16.mxu1 %v8516_v33  ;;  %v6815_v33 = vld [vmem:[%s14254_s10 + $0x450] sm:$0xff]  ;;  %v6706_v36 = vld [vmem:[%s14254_s10 + $0xe8] sm:$0xff] }
 0x60d   : > { %v9001_v31 = vpop.permute.xlu0 %9000  ;;  %6949 = vperm.xlu1 %9010, %v6935_v44   ;;  %v6683_v56 = vld [vmem:[%s14254_s10 + $0x30] sm:$0xff]  ;;  %v6764_v44 = vld [vmem:[%s14254_s10 + $0x2b8] sm:$0xff] }
 0x60e   : > { %8519 = vmatpush3.bf16.xpose.msra.mxu1 %v8518_v58  ;;  %v9003_v2 = vunpack.i.h.bf16 %v9001_v31  ;;  %v9002_v29 = vunpack.i.l.bf16 %v9001_v31  ;;  %v6696_v58 = vld [vmem:[%s14254_s10 + $0x98] sm:$0xff]  ;;  %v6691_v9 = vld [vmem:[%s14254_s10 + $0x70] sm:$0xff] }
 0x60f   : > { %v8592_v60 = vpack.c.bf16 %v6704_v38, %v6696_v58  ;;  %v6824_v31 = vld [vmem:[%s14254_s10 + $0x498] sm:$0xff] }
 0x610   : > { %v6582_v61 = vsel %vm487_vm0, %v5268_v28, %v9002_v29  ;;  %v6583_v39 = vsel %vm487_vm0, %v5269_v46, %v9003_v2  ;;  %v6832_v46 = vld [vmem:[%s14254_s10 + $0x4d8] sm:$0xff]  ;;  %v8622_v28 = vpack.c.bf16 %v6815_v33, %v6807_v26  ;;  %v6823_v29 = vld [vmem:[%s14254_s10 + $0x490] sm:$0xff] }
 0x611   : > { %v8520_v15 = vpack.c.bf16 %v6583_v39, %v6582_v61  ;;  %v8624_v2 = vpack.c.bf16 %v6832_v46, %v6824_v31  ;;  %v6848_v61 = vld [vmem:[%s14254_s10 + $0x558] sm:$0xff]  ;;  %v8626_v39 = vpack.c.bf16 %v6831_v27, %v6823_v29  ;;  %v8718_v31 = vpack.c.bf16 %v6691_v9, %v6683_v56  ;;  %v6697_v46 = vld [vmem:[%s14254_s10 + $0xa0] sm:$0xff] }
 0x612   : > { %v6864_v58 = vld [vmem:[%s14254_s10 + $0x5d8] sm:$0xff]  ;;  %v8656_v29 = vpack.c.bf16 %v6706_v36, %v6698_v48  ;;  %v6761_v56 = vld [vmem:[%s14254_s10 + $0x2a0] sm:$0xff] }
 0x613   : > { %8521 = vmatprep.subr.bf16.mxu1 %v8520_v15  ;;  %v8628_v15 = vpack.c.bf16 %v6848_v61, %v6840_v43  ;;  %v6699_v43 = vld [vmem:[%s14254_s10 + $0xb0] sm:$0xff]  ;;  %v6769_v9 = vld [vmem:[%s14254_s10 + $0x2e0] sm:$0xff] }
 0x614   : > { %v6707_v61 = vld [vmem:[%s14254_s10 + $0xf0] sm:$0xff] }
 0x616   : > { %8523 = vmatpush3.bf16.xpose.msra.mxu1 %v8522_v45  ;;  %v6695_v45 = vld [vmem:[%s14254_s10 + $0x90] sm:$0xff] }
 0x617   : > { %8589 = vmatprep.subr.bf16.mxu1 %v8588_v53  ;;  %v8594_v52 = vpack.c.bf16 %v6703_v62, %v6695_v45  ;;  %v6839_v53 = vld [vmem:[%s14254_s10 + $0x510] sm:$0xff]  ;;  %v6872_v45 = vld [vmem:[%s14254_s10 + $0x618] sm:$0xff] }
 0x618   : > { %v8630_v38 = vpack.c.bf16 %v6847_v20, %v6839_v53  ;;  %v6880_v62 = vld [vmem:[%s14254_s10 + $0x658] sm:$0xff] }
 0x619   : > { %v8636_v40 = vpack.c.bf16 %v6880_v62, %v6872_v45  ;;  %v6716_v53 = vld [vmem:[%s14254_s10 + $0x138] sm:$0xff] }
 0x61a   : > { %v6724_v20 = vld [vmem:[%s14254_s10 + $0x178] sm:$0xff] }
 0x61b   : > { %v8724_v62 = vpack.c.bf16 %v6724_v20, %v6716_v53  ;;  %v6787_v53 = vld [vmem:[%s14254_s10 + $0x370] sm:$0xff]  ;;  %v6794_v20 = vld [vmem:[%s14254_s10 + $0x3a8] sm:$0xff] }
 0x61d   : > { %7897 = vmatmul.mubr.f32.vlgmr.msra.gmra.mrb[144].mxu1 %v13143_v22  ;;  %v6728_v22 = vld [vmem:[%s14254_s10 + $0x198] sm:$0xff] }
 0x61e   : > { %7898 = vmatprep.mubr.f32.mxu1 %v6585_v41  ;;  %8591 = vmatpush1.bf16.msra.mxu1 %v8590_v49  ;;  %v8600_v21 = vpack.c.bf16 %v6736_v14, %v6728_v22  ;;  %v8632_v49 = vpack.c.bf16 %v6864_v58, %v6856_v50  ;;  %v6887_v14 = vld [vmem:[%s14254_s10 + $0x690] sm:$0xff] }
 0x61f   : > { %8593 = vmatprep.subr.bf16.mxu1 %v8592_v60  ;;  %v6863_v60 = vld [vmem:[%s14254_s10 + $0x5d0] sm:$0xff] }
 0x621   : > { %7899 = vmatmul.mubr.f32.gmra.mrb[146].mxu1 %v6585_v41  ;;  %v6855_v41 = vld [vmem:[%s14254_s10 + $0x590] sm:$0xff] }
 0x622   : > { %7900 = vmatprep.mubr.f32.mxu1 %v6586_v47  ;;  %8595 = vmatpush1.bf16.msra.mxu1 %v8594_v52  ;;  %v8634_v51 = vpack.c.bf16 %v6863_v60, %v6855_v41  ;;  %v6871_v52 = vld [vmem:[%s14254_s10 + $0x610] sm:$0xff]  ;;  %v6721_v41 = vld [vmem:[%s14254_s10 + $0x160] sm:$0xff] }
 0x623   : > { %8597 = vmatprep.subr.bf16.mxu1 %v8596_v24  ;;  %v6888_v24 = vld [vmem:[%s14254_s10 + $0x698] sm:$0xff] }
 0x624   : > { %v8640_v22 = vpack.c.bf16 %v6896_v6, %v6888_v24  ;;  %v6732_v24 = vld [vmem:[%s14254_s10 + $0x1b8] sm:$0xff] }
 0x625   : > { %7901 = vmatmul.mubr.f32.gmra.mrb[148].mxu1 %v6586_v47  ;;  %v6879_v47 = vld [vmem:[%s14254_s10 + $0x650] sm:$0xff]  ;;  %v6740_v6 = vld [vmem:[%s14254_s10 + $0x1f8] sm:$0xff] }
 0x626   : > { %7902 = vmatprep.mubr.f32.mxu1 %v6587_v18  ;;  %8599 = vmatpush1.bf16.msra.mxu1 %v8598_v1  ;;  %v8638_v17 = vpack.c.bf16 %v6879_v47, %v6871_v52  ;;  %v6895_v1 = vld [vmem:[%s14254_s10 + $0x6d0] sm:$0xff]  ;;  %v6730_v52 = vld [vmem:[%s14254_s10 + $0x1a8] sm:$0xff] }
 0x627   : > { %8601 = vmatprep.subr.bf16.mxu1 %v8600_v21  ;;  %v6912_v21 = vld [vmem:[%s14254_s10 + $0x758] sm:$0xff]  ;;  %v8642_v19 = vpack.c.bf16 %v6895_v1, %v6887_v14  ;;  %v6738_v47 = vld [vmem:[%s14254_s10 + $0x1e8] sm:$0xff]  ;;  %v6729_v1 = vld [vmem:[%s14254_s10 + $0x1a0] sm:$0xff] }
 0x629   : > { %7903 = vmatmul.mubr.f32.gmra.mrb[150].mxu1 %v6587_v18  ;;  %v6904_v18 = vld [vmem:[%s14254_s10 + $0x718] sm:$0xff] }
 0x62a   : > { %8603 = vmatpush1.bf16.msra.mxu1 %v8602_v59  ;;  %v8644_v3 = vpack.c.bf16 %v6912_v21, %v6904_v18  ;;  %v6920_v59 = vld [vmem:[%s14254_s10 + $0x798] sm:$0xff]  ;;  %v8664_v21 = vpack.c.bf16 %v6738_v47, %v6730_v52  ;;  %v6795_v47 = vld [vmem:[%s14254_s10 + $0x3b0] sm:$0xff] }
 0x62b   : > { %8605 = vmatprep.subr.bf16.mxu1 %v8604_v11  ;;  %v6928_v11 = vld [vmem:[%s14254_s10 + $0x7d8] sm:$0xff] }
 0x62c   : > { %v8648_v32 = vpack.c.bf16 %v6928_v11, %v6920_v59  ;;  %v6746_v59 = vld [vmem:[%s14254_s10 + $0x228] sm:$0xff] }
 0x62d   : > { %v6754_v11 = vld [vmem:[%s14254_s10 + $0x268] sm:$0xff] }
 0x62e   : > { %8607 = vmatpush1.bf16.msra.mxu1 %v8606_v23  ;;  %v8650_v23 = vpack.c.bf16 %v6927_v30, %v6919_v25 }
 0x62f   : > { %8609 = vmatprep.subr.bf16.mxu1 %v8608_v10  ;;  %v6682_v10 = vld [vmem:[%s14254_s10 + $0x28] sm:$0xff] }
 0x630   : > { %v8652_v57 = vpack.c.bf16 %v6690_v37, %v6682_v10  ;;  %v6745_v10 = vld [vmem:[%s14254_s10 + $0x220] sm:$0xff] }
 0x631   : > { %v6753_v37 = vld [vmem:[%s14254_s10 + $0x260] sm:$0xff] }
 0x632   : > { %8611 = vmatpush1.bf16.msra.mxu1 %v8610_v34  ;;  %v8716_v34 = vpack.c.bf16 %v6692_v13, %v6684_v42  ;;  %8653 = vmatprep.subr.bf16.mxu0 %v8652_v57  ;;  %v6747_v57 = vld [vmem:[%s14254_s10 + $0x230] sm:$0xff] }
 0x633   : > { %8613 = vmatprep.subr.bf16.mxu1 %v8612_v54  ;;  %v6933_v54 = vld [vmem:[%s14256_s12] sm:$0xff]  ;;  %v6755_v13 = vld [vmem:[%s14254_s10 + $0x270] sm:$0xff] }
 0x634   : > { %6939 = vperm.xlu0 %9009, %v6933_v54   ;;  %v8668_v54 = vpack.c.bf16 %v6754_v11, %v6746_v59  ;;  %v6811_v11 = vld [vmem:[%s14254_s10 + $0x430] sm:$0xff] }
 0x636   : > { %8615 = vmatpush1.bf16.msra.mxu1 %v8614_v7  ;;  %v6681_v7 = vld [vmem:[%s14254_s10 + $0x20] sm:$0xff] }
 0x637   : > { %8617 = vmatprep.subr.bf16.mxu1 %v8616_v0  ;;  %v6689_v0 = vld [vmem:[%s14254_s10 + $0x60] sm:$0xff] }
 0x638   : > { %6954 = vperm.xlu0 %9009, %v6936_v35   ;;  %v8654_v33 = vpack.c.bf16 %v6689_v0, %v6681_v7  ;;  %v6772_v35 = vld [vmem:[%s14254_s10 + $0x2f8] sm:$0xff]  ;;  %v8670_v7 = vpack.c.bf16 %v6753_v37, %v6745_v10  ;;  %v8734_v0 = vpack.c.bf16 %v6755_v13, %v6747_v57  ;;  %v6825_v13 = vld [vmem:[%s14254_s10 + $0x4a0] sm:$0xff] }
 0x639   : > { %v8736_v36 = vpack.c.bf16 %v6772_v35, %v6764_v44  ;;  %v6836_v10 = vld [vmem:[%s14254_s10 + $0x4f8] sm:$0xff]  ;;  %v6835_v44 = vld [vmem:[%s14254_s10 + $0x4f0] sm:$0xff]  ;;  %v6842_v35 = vld [vmem:[%s14254_s10 + $0x528] sm:$0xff] }
 0x63a   : > { %8619 = vmatpush1.bf16.msra.mxu1 %v8618_v5  ;;  %v6700_v5 = vld [vmem:[%s14254_s10 + $0xb8] sm:$0xff] }
 0x63b   : > { %8621 = vmatprep.subr.bf16.mxu1 %v8620_v16  ;;  %v6708_v16 = vld [vmem:[%s14254_s10 + $0xf8] sm:$0xff] }
 0x63c   : > { %v8720_v27 = vpack.c.bf16 %v6708_v16, %v6700_v5  ;;  %v6763_v5 = vld [vmem:[%s14254_s10 + $0x2b0] sm:$0xff] }
 0x63d   : > { %v6771_v16 = vld [vmem:[%s14254_s10 + $0x2f0] sm:$0xff] }
 0x63e   : > { %8623 = vmatpush1.bf16.msra.mxu1 %v8622_v28  ;;  %v6705_v28 = vld [vmem:[%s14254_s10 + $0xe0] sm:$0xff] }
 0x63f   : > { %8625 = vmatprep.subr.bf16.mxu1 %v8624_v2  ;;  %v8658_v58 = vpack.c.bf16 %v6705_v28, %v6697_v46  ;;  %v6780_v46 = vld [vmem:[%s14254_s10 + $0x338] sm:$0xff] }
 0x640   : > { %v6788_v28 = vld [vmem:[%s14254_s10 + $0x378] sm:$0xff] }
 0x642   : > { %8627 = vmatpush1.bf16.msra.mxu1 %v8626_v39  ;;  %v6714_v39 = vld [vmem:[%s14254_s10 + $0x128] sm:$0xff] }
 0x643   : > { %8629 = vmatprep.subr.bf16.mxu1 %v8628_v15  ;;  %v6722_v15 = vld [vmem:[%s14254_s10 + $0x168] sm:$0xff] }
 0x644   : > { %v8660_v45 = vpack.c.bf16 %v6722_v15, %v6714_v39  ;;  %v8740_v39 = vpack.c.bf16 %v6788_v28, %v6780_v46  ;;  %v6779_v15 = vld [vmem:[%s14254_s10 + $0x330] sm:$0xff]  ;;  %v6858_v28 = vld [vmem:[%s14254_s10 + $0x5a8] sm:$0xff] }
 0x645   : > { %v6851_v46 = vld [vmem:[%s14254_s10 + $0x570] sm:$0xff] }
 0x646   : > { %8631 = vmatpush1.bf16.msra.mxu1 %v8630_v38  ;;  %v8722_v38 = vpack.c.bf16 %v6707_v61, %v6699_v43  ;;  %v6785_v43 = vld [vmem:[%s14254_s10 + $0x360] sm:$0xff] }
 0x647   : > { %8633 = vmatprep.subr.bf16.mxu1 %v8632_v49  ;;  %v6713_v49 = vld [vmem:[%s14254_s10 + $0x120] sm:$0xff] }
 0x64a   : > { %8635 = vmatpush1.bf16.msra.mxu1 %v8634_v51  ;;  %v6715_v51 = vld [vmem:[%s14254_s10 + $0x130] sm:$0xff] }
 0x64b   : > { %8637 = vmatprep.subr.bf16.mxu1 %v8636_v40  ;;  %v6723_v40 = vld [vmem:[%s14254_s10 + $0x170] sm:$0xff] }
 0x64c   : > { %v8726_v14 = vpack.c.bf16 %v6723_v40, %v6715_v51  ;;  %v6801_v51 = vld [vmem:[%s14254_s10 + $0x3e0] sm:$0xff] }
 0x64e   : > { %8639 = vmatpush1.bf16.msra.mxu1 %v8638_v17 }
 0x64f   : > { %8641 = vmatprep.subr.bf16.mxu1 %v8640_v22  ;;  %v8662_v22 = vpack.c.bf16 %v6721_v41, %v6713_v49  ;;  %v6804_v49 = vld [vmem:[%s14254_s10 + $0x3f8] sm:$0xff] }
 0x652   : > { %8643 = vmatpush1.bf16.msra.mxu1 %v8642_v19  ;;  %v8728_v19 = vpack.c.bf16 %v6740_v6, %v6732_v24  ;;  %v6803_v24 = vld [vmem:[%s14254_s10 + $0x3f0] sm:$0xff]  ;;  %v6810_v6 = vld [vmem:[%s14254_s10 + $0x428] sm:$0xff] }
 0x653   : > { %8645 = vmatprep.subr.bf16.mxu1 %v8644_v3  ;;  %v6737_v3 = vld [vmem:[%s14254_s10 + $0x1e0] sm:$0xff] }
 0x654   : > { %v8666_v30 = vpack.c.bf16 %v6737_v3, %v6729_v1  ;;  %v6820_v1 = vld [vmem:[%s14254_s10 + $0x478] sm:$0xff]  ;;  %v6809_v3 = vld [vmem:[%s14254_s10 + $0x420] sm:$0xff] }
 0x656   : > { %8647 = vmatpush1.bf16.msra.mxu1 %v8646_v12  ;;  %v6748_v12 = vld [vmem:[%s14254_s10 + $0x238] sm:$0xff] }
 0x657   : > { %8649 = vmatprep.subr.bf16.mxu1 %v8648_v32  ;;  %v6756_v32 = vld [vmem:[%s14254_s10 + $0x278] sm:$0xff] }
 0x658   : > { %v8732_v63 = vpack.c.bf16 %v6756_v32, %v6748_v12  ;;  %v6819_v12 = vld [vmem:[%s14254_s10 + $0x470] sm:$0xff]  ;;  %v6826_v32 = vld [vmem:[%s14254_s10 + $0x4a8] sm:$0xff] }
 0x659   : > { %v8750_v57 = vpack.c.bf16 %v6819_v12, %v6811_v11  ;;  %v6897_v11 = vld [vmem:[%s14254_s10 + $0x6e0] sm:$0xff] }
 0x65a   : > { %8651 = vmatpush1.bf16.msra.mxu1 %v8650_v23  ;;  %v8730_v23 = vpack.c.bf16 %v6739_v8, %v6731_v55  ;;  %v6817_v55 = vld [vmem:[%s14254_s10 + $0x460] sm:$0xff] }
 0x65b   : > { %8717 = vmatprep.subr.bf16.mxu1 %v8716_v34  ;;  %v6762_v34 = vld [vmem:[%s14254_s10 + $0x2a8] sm:$0xff]  ;;  %v8686_v37 = vpack.c.bf16 %v6817_v55, %v6809_v3  ;;  %v6900_v3 = vld [vmem:[%s14254_s10 + $0x6f8] sm:$0xff] }
 0x65c   : > { %v8672_v48 = vpack.c.bf16 %v6770_v4, %v6762_v34  ;;  %v6833_v34 = vld [vmem:[%s14254_s10 + $0x4e0] sm:$0xff]  ;;  %v6827_v4 = vld [vmem:[%s14254_s10 + $0x4b0] sm:$0xff] }
 0x6f0   : > { %v13741_v26 = vpop.f32.mrb[144].mxu1 }
 0x6f1   : > { %v13749_v2 = vpop.f32.mrb[145].mxu1 }
 0x6f2   : > { %7021 = vmatprep.mubr.f32.mxu0 %v13749_v2  ;;  %7110 = vmatprep.mubr.f32.mxu1 %v13749_v2 }
 0x6f3   : > { %7022 = vmatmul.mubr.f32.vlgmr.msra.gmra.mrb[88].mxu0 %v13741_v26  ;;  %7111 = vmatmul.mubr.f32.vlgmr.msra.gmra.mrb[152].mxu1 %v13741_v26 }
 0x6f4   : > { %8655 = vmatpush1.bf16.msra.mxu0 %v8654_v33  ;;  %8719 = vmatpush1.bf16.msra.mxu1 %v8718_v31  ;;  %v13773_v50 = vpop.f32.mrb[146].mxu1  ;;  %v6778_v33 = vld [vmem:[%s14254_s10 + $0x328] sm:$0xff] }
 0x6f5   : > { %v13781_v60 = vpop.f32.mrb[147].mxu1  ;;  %8657 = vmatprep.subr.bf16.mxu0 %v8656_v29  ;;  %8721 = vmatprep.subr.bf16.mxu1 %v8720_v27  ;;  %v6786_v31 = vld [vmem:[%s14254_s10 + $0x368] sm:$0xff]  ;;  %v8738_v29 = vpack.c.bf16 %v6771_v16, %v6763_v5  ;;  %v6777_v27 = vld [vmem:[%s14254_s10 + $0x320] sm:$0xff] }
 0x6f6   : > { %7027 = vmatprep.mubr.f32.mxu0 %v13781_v60  ;;  %7116 = vmatprep.mubr.f32.mxu1 %v13781_v60  ;;  %v8676_v61 = vpack.c.bf16 %v6786_v31, %v6778_v33  ;;  %v8678_v41 = vpack.c.bf16 %v6785_v43, %v6777_v27  ;;  %v6849_v5 = vld [vmem:[%s14254_s10 + $0x560] sm:$0xff]  ;;  %v6843_v31 = vld [vmem:[%s14254_s10 + $0x530] sm:$0xff]  ;;  %v6868_v27 = vld [vmem:[%s14254_s10 + $0x5f8] sm:$0xff] }
 0x6f7   : > { %7028 = vmatmul.mubr.f32.gmra.mrb[90].mxu0 %v13773_v50  ;;  %7117 = vmatmul.mubr.f32.gmra.mrb[154].mxu1 %v13773_v50 }
 0x6f8   : > { %8659 = vmatpush1.bf16.msra.mxu0 %v8658_v58  ;;  %8723 = vmatpush1.bf16.msra.mxu1 %v8722_v38  ;;  %v13805_v17 = vpop.f32.mrb[148].mxu1  ;;  %v6802_v58 = vld [vmem:[%s14254_s10 + $0x3e8] sm:$0xff]  ;;  %v6796_v38 = vld [vmem:[%s14254_s10 + $0x3b8] sm:$0xff] }
 0x6f9   : > { %v13810_v18 = vpop.f32.mrb[149].mxu1  ;;  %8661 = vmatprep.subr.bf16.mxu0 %v8660_v45  ;;  %8725 = vmatprep.subr.bf16.mxu1 %v8724_v62  ;;  %v8742_v45 = vpack.c.bf16 %v6787_v53, %v6779_v15  ;;  %v6793_v62 = vld [vmem:[%s14254_s10 + $0x3a0] sm:$0xff]  ;;  %v8680_v40 = vpack.c.bf16 %v6802_v58, %v6794_v20  ;;  %v8744_v52 = vpack.c.bf16 %v6804_v49, %v6796_v38  ;;  %v6859_v58 = vld [vmem:[%s14254_s10 + $0x5b0] sm:$0xff]  ;;  %v6874_v49 = vld [vmem:[%s14254_s10 + $0x628] sm:$0xff] }
 0x6fa   : > { %7033 = vmatprep.mubr.f32.mxu0 %v13810_v18  ;;  %7122 = vmatprep.mubr.f32.mxu1 %v13810_v18  ;;  %v6865_v15 = vld [vmem:[%s14254_s10 + $0x5e0] sm:$0xff]  ;;  %v6867_v38 = vld [vmem:[%s14254_s10 + $0x5f0] sm:$0xff] }
 0x6fb   : > { %7034 = vmatmul.mubr.f32.gmra.mrb[92].mxu0 %v13805_v17  ;;  %7123 = vmatmul.mubr.f32.gmra.mrb[156].mxu1 %v13805_v17 }
 0x6fc   : > { %8663 = vmatpush1.bf16.msra.mxu0 %v8662_v22  ;;  %8727 = vmatpush1.bf16.msra.mxu1 %v8726_v14  ;;  %v13837_v25 = vpop.f32.mrb[150].mxu1  ;;  %v6818_v22 = vld [vmem:[%s14254_s10 + $0x468] sm:$0xff]  ;;  %v6812_v14 = vld [vmem:[%s14254_s10 + $0x438] sm:$0xff] }
 0x6fd   : > { %v13845_v42 = vpop.f32.mrb[151].mxu1  ;;  %8665 = vmatprep.subr.bf16.mxu0 %v8664_v21  ;;  %8729 = vmatprep.subr.bf16.mxu1 %v8728_v19  ;;  %v8682_v21 = vpack.c.bf16 %v6801_v51, %v6793_v62  ;;  %v8746_v19 = vpack.c.bf16 %v6803_v24, %v6795_v47  ;;  %v8684_v8 = vpack.c.bf16 %v6818_v22, %v6810_v6  ;;  %v6884_v62 = vld [vmem:[%s14254_s10 + $0x678] sm:$0xff]  ;;  %v6881_v47 = vld [vmem:[%s14254_s10 + $0x660] sm:$0xff]  ;;  %v6875_v22 = vld [vmem:[%s14254_s10 + $0x630] sm:$0xff] }
 0x6fe   : > { %7039 = vmatprep.mubr.f32.mxu0 %v13845_v42  ;;  %7128 = vmatprep.mubr.f32.mxu1 %v13845_v42  ;;  %v8748_v59 = vpack.c.bf16 %v6820_v1, %v6812_v14  ;;  %v6883_v14 = vld [vmem:[%s14254_s10 + $0x670] sm:$0xff]  ;;  %v6890_v1 = vld [vmem:[%s14254_s10 + $0x6a8] sm:$0xff] }
 0x6ff   : > { %7040 = vmatmul.mubr.f32.gmra.mrb[94].mxu0 %v13837_v25  ;;  %7129 = vmatmul.mubr.f32.gmra.mrb[158].mxu1 %v13837_v25 }
 0x700   : > { %8667 = vmatpush1.bf16.msra.mxu0 %v8666_v30  ;;  %8731 = vmatpush1.bf16.msra.mxu1 %v8730_v23  ;;  %v6834_v30 = vld [vmem:[%s14254_s10 + $0x4e8] sm:$0xff]  ;;  %v6828_v23 = vld [vmem:[%s14254_s10 + $0x4b8] sm:$0xff] }
 0x701   : > { %7199 = vmatprep.mubr.f32.mxu0 %v13749_v2  ;;  %7288 = vmatprep.mubr.f32.mxu1 %v13749_v2  ;;  %v8674_v2 = vpack.c.bf16 %v6769_v9, %v6761_v56  ;;  %v6852_v56 = vld [vmem:[%s14254_s10 + $0x578] sm:$0xff]  ;;  %v8690_v9 = vpack.c.bf16 %v6833_v34, %v6825_v13 }
 0x702   : > { %8669 = vmatprep.subr.bf16.mxu0 %v8668_v54  ;;  %8733 = vmatprep.subr.bf16.mxu1 %v8732_v63  ;;  %v8688_v54 = vpack.c.bf16 %v6834_v30, %v6826_v32  ;;  %v8752_v63 = vpack.c.bf16 %v6836_v10, %v6828_v23  ;;  %v6891_v30 = vld [vmem:[%s14254_s10 + $0x6b0] sm:$0xff]  ;;  %v6906_v10 = vld [vmem:[%s14254_s10 + $0x728] sm:$0xff]  ;;  %v6916_v13 = vld [vmem:[%s14254_s10 + $0x778] sm:$0xff] }
 0x703   : > { %v6899_v23 = vld [vmem:[%s14254_s10 + $0x6f0] sm:$0xff] }
 0x704   : > { %8671 = vmatpush1.bf16.msra.mxu0 %v8670_v7  ;;  %8735 = vmatpush1.bf16.msra.mxu1 %v8734_v0  ;;  %v6850_v7 = vld [vmem:[%s14254_s10 + $0x568] sm:$0xff]  ;;  %v6844_v0 = vld [vmem:[%s14254_s10 + $0x538] sm:$0xff] }
 0x705   : > { %8673 = vmatprep.subr.bf16.mxu0 %v8672_v48  ;;  %8737 = vmatprep.subr.bf16.mxu1 %v8736_v36  ;;  %v8754_v48 = vpack.c.bf16 %v6835_v44, %v6827_v4  ;;  %v6841_v36 = vld [vmem:[%s14254_s10 + $0x520] sm:$0xff]  ;;  %v8692_v16 = vpack.c.bf16 %v6850_v7, %v6842_v35  ;;  %v8756_v33 = vpack.c.bf16 %v6852_v56, %v6844_v0  ;;  %v6907_v7 = vld [vmem:[%s14254_s10 + $0x730] sm:$0xff]  ;;  %v6922_v56 = vld [vmem:[%s14254_s10 + $0x7a8] sm:$0xff] }
 0x706   : > { %v8694_v43 = vpack.c.bf16 %v6849_v5, %v6841_v36  ;;  %v6913_v4 = vld [vmem:[%s14254_s10 + $0x760] sm:$0xff]  ;;  %v6915_v0 = vld [vmem:[%s14254_s10 + $0x770] sm:$0xff]  ;;  %v6932_v36 = vld [vmem:[%s14254_s10 + $0x7f8] sm:$0xff] }
 0x708   : > { %8675 = vmatpush1.bf16.msra.mxu0 %v8674_v2  ;;  %8739 = vmatpush1.bf16.msra.mxu1 %v8738_v29  ;;  %v6866_v2 = vld [vmem:[%s14254_s10 + $0x5e8] sm:$0xff]  ;;  %v6860_v29 = vld [vmem:[%s14254_s10 + $0x5b8] sm:$0xff] }
 0x709   : > { %8677 = vmatprep.subr.bf16.mxu0 %v8676_v61  ;;  %8741 = vmatprep.subr.bf16.mxu1 %v8740_v39  ;;  %v8758_v61 = vpack.c.bf16 %v6851_v46, %v6843_v31  ;;  %v6857_v39 = vld [vmem:[%s14254_s10 + $0x5a0] sm:$0xff]  ;;  %v8696_v53 = vpack.c.bf16 %v6866_v2, %v6858_v28  ;;  %v8760_v20 = vpack.c.bf16 %v6868_v27, %v6860_v29  ;;  %v6923_v2 = vld [vmem:[%s14254_s10 + $0x7b0] sm:$0xff] }
 0x70a   : > { %v8698_v51 = vpack.c.bf16 %v6865_v15, %v6857_v39  ;;  %v6929_v28 = vld [vmem:[%s14254_s10 + $0x7e0] sm:$0xff]  ;;  %v6931_v29 = vld [vmem:[%s14254_s10 + $0x7f0] sm:$0xff] }
 0x70c   : > { %8679 = vmatpush1.bf16.msra.mxu0 %v8678_v41  ;;  %8743 = vmatpush1.bf16.msra.mxu1 %v8742_v45  ;;  %v6882_v41 = vld [vmem:[%s14254_s10 + $0x668] sm:$0xff]  ;;  %v6876_v45 = vld [vmem:[%s14254_s10 + $0x638] sm:$0xff] }
 0x70d   : > { %8681 = vmatprep.subr.bf16.mxu0 %v8680_v40  ;;  %8745 = vmatprep.subr.bf16.mxu1 %v8744_v52  ;;  %v8762_v40 = vpack.c.bf16 %v6867_v38, %v6859_v58  ;;  %v6873_v52 = vld [vmem:[%s14254_s10 + $0x620] sm:$0xff]  ;;  %v8700_v24 = vpack.c.bf16 %v6882_v41, %v6874_v49  ;;  %v8764_v6 = vpack.c.bf16 %v6884_v62, %v6876_v45 }
 0x70e   : > { %v8702_v55 = vpack.c.bf16 %v6881_v47, %v6873_v52 }
 0x710   : > { %8683 = vmatpush1.bf16.msra.mxu0 %v8682_v21  ;;  %8747 = vmatpush1.bf16.msra.mxu1 %v8746_v19  ;;  %v6898_v21 = vld [vmem:[%s14254_s10 + $0x6e8] sm:$0xff]  ;;  %v6892_v19 = vld [vmem:[%s14254_s10 + $0x6b8] sm:$0xff] }
 0x711   : > { %8685 = vmatprep.subr.bf16.mxu0 %v8684_v8  ;;  %8749 = vmatprep.subr.bf16.mxu1 %v8748_v59  ;;  %v8766_v8 = vpack.c.bf16 %v6883_v14, %v6875_v22  ;;  %v6889_v59 = vld [vmem:[%s14254_s10 + $0x6a0] sm:$0xff]  ;;  %v8704_v12 = vpack.c.bf16 %v6898_v21, %v6890_v1  ;;  %v8768_v32 = vpack.c.bf16 %v6900_v3, %v6892_v19 }
 0x712   : > { %v8706_v34 = vpack.c.bf16 %v6897_v11, %v6889_v59 }
 0x714   : > { %8687 = vmatpush1.bf16.msra.mxu0 %v8686_v37  ;;  %8751 = vmatpush1.bf16.msra.mxu1 %v8750_v57  ;;  %v6914_v37 = vld [vmem:[%s14254_s10 + $0x768] sm:$0xff]  ;;  %v6908_v57 = vld [vmem:[%s14254_s10 + $0x738] sm:$0xff] }
 0x715   : > { %8689 = vmatprep.subr.bf16.mxu0 %v8688_v54  ;;  %8753 = vmatprep.subr.bf16.mxu1 %v8752_v63  ;;  %v8770_v54 = vpack.c.bf16 %v6899_v23, %v6891_v30  ;;  %v6905_v63 = vld [vmem:[%s14254_s10 + $0x720] sm:$0xff]  ;;  %v8708_v44 = vpack.c.bf16 %v6914_v37, %v6906_v10  ;;  %v8772_v35 = vpack.c.bf16 %v6916_v13, %v6908_v57 }
 0x716   : > { %v8710_v5 = vpack.c.bf16 %v6913_v4, %v6905_v63 }
 0x718   : > { %8691 = vmatpush1.bf16.msra.mxu0 %v8690_v9  ;;  %8755 = vmatpush1.bf16.msra.mxu1 %v8754_v48  ;;  %v6930_v9 = vld [vmem:[%s14254_s10 + $0x7e8] sm:$0xff]  ;;  %v6924_v48 = vld [vmem:[%s14254_s10 + $0x7b8] sm:$0xff] }
 0x719   : > { %8693 = vmatprep.subr.bf16.mxu0 %v8692_v16  ;;  %8757 = vmatprep.subr.bf16.mxu1 %v8756_v33  ;;  %v8774_v16 = vpack.c.bf16 %v6915_v0, %v6907_v7  ;;  %v6921_v33 = vld [vmem:[%s14254_s10 + $0x7a0] sm:$0xff]  ;;  %v8712_v31 = vpack.c.bf16 %v6930_v9, %v6922_v56  ;;  %v8776_v46 = vpack.c.bf16 %v6932_v36, %v6924_v48 }
 0x71a   : > { %v8714_v27 = vpack.c.bf16 %v6929_v28, %v6921_v33 }
 0x71c   : > { %8695 = vmatpush1.bf16.msra.mxu0 %v8694_v43  ;;  %8759 = vmatpush1.bf16.msra.mxu1 %v8758_v61  ;;  %v8778_v43 = vpack.c.bf16 %v6931_v29, %v6923_v2 }
 0x71d   : > { %8697 = vmatprep.subr.bf16.mxu0 %v8696_v53  ;;  %8761 = vmatprep.subr.bf16.mxu1 %v8760_v20 }
 0x720   : > { %8699 = vmatpush1.bf16.msra.mxu0 %v8698_v51  ;;  %8763 = vmatpush1.bf16.msra.mxu1 %v8762_v40 }
 0x721   : > { %8701 = vmatprep.subr.bf16.mxu0 %v8700_v24  ;;  %8765 = vmatprep.subr.bf16.mxu1 %v8764_v6 }
 0x724   : > { %8703 = vmatpush1.bf16.msra.mxu0 %v8702_v55  ;;  %8767 = vmatpush1.bf16.msra.mxu1 %v8766_v8 }
 0x725   : > { %8705 = vmatprep.subr.bf16.mxu0 %v8704_v12  ;;  %8769 = vmatprep.subr.bf16.mxu1 %v8768_v32 }
 0x728   : > { %8707 = vmatpush1.bf16.msra.mxu0 %v8706_v34  ;;  %8771 = vmatpush1.bf16.msra.mxu1 %v8770_v54 }
 0x729   : > { %8709 = vmatprep.subr.bf16.mxu0 %v8708_v44  ;;  %8773 = vmatprep.subr.bf16.mxu1 %v8772_v35 }
 0x72c   : > { %8711 = vmatpush1.bf16.msra.mxu0 %v8710_v5  ;;  %8775 = vmatpush1.bf16.msra.mxu1 %v8774_v16 }
 0x72d   : > { %8713 = vmatprep.subr.bf16.mxu0 %v8712_v31  ;;  %8777 = vmatprep.subr.bf16.mxu1 %v8776_v46 }
 0x730   : > { %8715 = vmatpush1.bf16.msra.mxu0 %v8714_v27  ;;  %8779 = vmatpush1.bf16.msra.mxu1 %v8778_v43 }
 0x733   : > { %7200 = vmatmul.mubr.f32.vlgmr.msra.gmra.mrb[96].mxu0 %v13741_v26  ;;  %7289 = vmatmul.mubr.f32.vlgmr.msra.gmra.mrb[160].mxu1 %v13741_v26  ;;  %v6940_v26 = vpop.permute.xlu0 %6939 }
 0x734   : > { %7205 = vmatprep.mubr.f32.mxu0 %v13781_v60  ;;  %7294 = vmatprep.mubr.f32.mxu1 %v13781_v60  ;;  %v14138_v60 = vpop.permute.xlu1 %6944 }
 0x737   : > { %7206 = vmatmul.mubr.f32.gmra.mrb[98].mxu0 %v13773_v50  ;;  %7295 = vmatmul.mubr.f32.gmra.mrb[162].mxu1 %v13773_v50  ;;  %v14154_v21 = vpop.permute.xlu0 %6954 }
 0x738   : > { %7211 = vmatprep.mubr.f32.mxu0 %v13810_v18  ;;  %7300 = vmatprep.mubr.f32.mxu1 %v13810_v18  ;;  %v6950_v51 = vpop.permute.xlu1 %6949 }
 0x73b   : > { %7212 = vmatmul.mubr.f32.gmra.mrb[100].mxu0 %v13805_v17  ;;  %7301 = vmatmul.mubr.f32.gmra.mrb[164].mxu1 %v13805_v17 }
 0x73c   : > { %7217 = vmatprep.mubr.f32.mxu0 %v13845_v42  ;;  %7306 = vmatprep.mubr.f32.mxu1 %v13845_v42 }
 0x73f   : > { %7218 = vmatmul.mubr.f32.gmra.mrb[102].mxu0 %v13837_v25  ;;  %7307 = vmatmul.mubr.f32.gmra.mrb[166].mxu1 %v13837_v25 }
 0x7c6   : > { %v7023_v50 = vpop.f32.mrb[88].mxu0  ;;  %v7112_v61 = vpop.f32.mrb[152].mxu1 }
 0x7c7   : > { %v7024_v39 = vadd.f32 %v7023_v50, %v6940_v26  ;;  %v7113_v18 = vadd.f32 %v7112_v61, %v6940_v26  ;;  %v7025_v15 = vpop.f32.mrb[89].mxu0  ;;  %v7114_v53 = vpop.f32.mrb[153].mxu1 }
 0x7c8   : > { %v7026_v20 = vadd.f32 %v7025_v15, %v6940_v26  ;;  %v7115_v17 = vadd.f32 %v7114_v53, %v6940_v26 }
 0x7c9   : > { %7313 = vst [vmem:[%s14140_s22] sm:$0xff] %v7024_v39  ;;  %7315 = vst [vmem:[%s14140_s22 + $0x10] sm:$0xff] %v7113_v18 }
 0x7ca   : > { %7314 = vst [vmem:[%s14140_s22 + $0x8] sm:$0xff] %v7026_v20  ;;  %7316 = vst [vmem:[%s14140_s22 + $0x18] sm:$0xff] %v7115_v17  ;;  %v7029_v25 = vpop.f32.mrb[90].mxu0  ;;  %v7118_v42 = vpop.f32.mrb[154].mxu1 }
 0x7cb   : > { %v7031_v58 = vpop.f32.mrb[91].mxu0  ;;  %v7120_v38 = vpop.f32.mrb[155].mxu1  ;;  %v7030_v49 = vadd.f32 %v7029_v25, %v14138_v60  ;;  %v7119_v41 = vadd.f32 %v7118_v42, %v14138_v60 }
 0x7cc   : > { %v7032_v45 = vadd.f32 %v7031_v58, %v14138_v60  ;;  %v7121_v62 = vadd.f32 %v7120_v38, %v14138_v60 }
 0x7cd   : > { %7321 = vst [vmem:[%s14140_s22 + $0x40] sm:$0xff] %v7030_v49  ;;  %7323 = vst [vmem:[%s14140_s22 + $0x50] sm:$0xff] %v7119_v41 }
 0x7ce   : > { %v7035_v40 = vpop.f32.mrb[92].mxu0  ;;  %v7124_v52 = vpop.f32.mrb[156].mxu1  ;;  %7322 = vst [vmem:[%s14140_s22 + $0x48] sm:$0xff] %v7032_v45  ;;  %7324 = vst [vmem:[%s14140_s22 + $0x58] sm:$0xff] %v7121_v62 }
 0x7cf   : > { %v7037_v47 = vpop.f32.mrb[93].mxu0  ;;  %v7126_v24 = vpop.f32.mrb[157].mxu1  ;;  %v7036_v6 = vadd.f32 %v7035_v40, %v6950_v51  ;;  %v7125_v22 = vadd.f32 %v7124_v52, %v6950_v51 }
 0x7d0   : > { %v7038_v14 = vadd.f32 %v7037_v47, %v6950_v51  ;;  %v7127_v1 = vadd.f32 %v7126_v24, %v6950_v51 }
 0x7d1   : > { %7329 = vst [vmem:[%s14140_s22 + $0x80] sm:$0xff] %v7036_v6  ;;  %7331 = vst [vmem:[%s14140_s22 + $0x90] sm:$0xff] %v7125_v22 }
 0x7d2   : > { %v7041_v19 = vpop.f32.mrb[94].mxu0  ;;  %v7130_v3 = vpop.f32.mrb[158].mxu1  ;;  %7330 = vst [vmem:[%s14140_s22 + $0x88] sm:$0xff] %v7038_v14  ;;  %7332 = vst [vmem:[%s14140_s22 + $0x98] sm:$0xff] %v7127_v1 }
 0x7d3   : > { %v7043_v55 = vpop.f32.mrb[95].mxu0  ;;  %v7132_v8 = vpop.f32.mrb[159].mxu1  ;;  %v7042_v59 = vadd.f32 %v7041_v19, %v14154_v21  ;;  %v7131_v11 = vadd.f32 %v7130_v3, %v14154_v21 }
 0x7d4   : > { %v7044_v12 = vadd.f32 %v7043_v55, %v14154_v21  ;;  %v7133_v32 = vadd.f32 %v7132_v8, %v14154_v21 }
 0x7d5   : > { %7337 = vst [vmem:[%s14140_s22 + $0xc0] sm:$0xff] %v7042_v59  ;;  %7339 = vst [vmem:[%s14140_s22 + $0xd0] sm:$0xff] %v7131_v11 }
 0x7d6   : > { %7338 = vst [vmem:[%s14140_s22 + $0xc8] sm:$0xff] %v7044_v12  ;;  %7340 = vst [vmem:[%s14140_s22 + $0xd8] sm:$0xff] %v7133_v32 }
 0x806   : > { %v7201_v30 = vpop.f32.mrb[96].mxu0  ;;  %v7290_v23 = vpop.f32.mrb[160].mxu1 }
 0x807   : > { %v7202_v10 = vadd.f32 %v7201_v30, %v6940_v26  ;;  %v7291_v37 = vadd.f32 %v7290_v23, %v6940_v26  ;;  %v7203_v57 = vpop.f32.mrb[97].mxu0  ;;  %v7292_v13 = vpop.f32.mrb[161].mxu1 }
 0x808   : > { %v7204_v34 = vadd.f32 %v7203_v57, %v6940_v26  ;;  %v7293_v54 = vadd.f32 %v7292_v13, %v6940_v26 }
 0x809   : > { %7317 = vst [vmem:[%s14140_s22 + $0x20] sm:$0xff] %v7202_v10  ;;  %7319 = vst [vmem:[%s14140_s22 + $0x30] sm:$0xff] %v7291_v37 }
 0x80a   : > { %7318 = vst [vmem:[%s14140_s22 + $0x28] sm:$0xff] %v7204_v34  ;;  %7320 = vst [vmem:[%s14140_s22 + $0x38] sm:$0xff] %v7293_v54  ;;  %v7207_v63 = vpop.f32.mrb[98].mxu0  ;;  %v7296_v4 = vpop.f32.mrb[162].mxu1 }
 0x80b   : > { %v7208_v44 = vadd.f32 %v7207_v63, %v14138_v60  ;;  %v7297_v35 = vadd.f32 %v7296_v4, %v14138_v60  ;;  %v7209_v7 = vpop.f32.mrb[99].mxu0  ;;  %v7298_v0 = vpop.f32.mrb[163].mxu1 }
 0x80c   : > { %v7210_v56 = vadd.f32 %v7209_v7, %v14138_v60  ;;  %v7299_v9 = vadd.f32 %v7298_v0, %v14138_v60 }
 0x80d   : > { %7325 = vst [vmem:[%s14140_s22 + $0x60] sm:$0xff] %v7208_v44  ;;  %7327 = vst [vmem:[%s14140_s22 + $0x70] sm:$0xff] %v7297_v35 }
 0x80e   : > { %7326 = vst [vmem:[%s14140_s22 + $0x68] sm:$0xff] %v7210_v56  ;;  %7328 = vst [vmem:[%s14140_s22 + $0x78] sm:$0xff] %v7299_v9  ;;  %v7213_v48 = vpop.f32.mrb[100].mxu0  ;;  %v7302_v36 = vpop.f32.mrb[164].mxu1 }
 0x80f   : > { %v7214_v5 = vadd.f32 %v7213_v48, %v6950_v51  ;;  %v7303_v16 = vadd.f32 %v7302_v36, %v6950_v51  ;;  %v7215_v33 = vpop.f32.mrb[101].mxu0  ;;  %v7304_v31 = vpop.f32.mrb[165].mxu1 }
 0x810   : > { %v7216_v46 = vadd.f32 %v7215_v33, %v6950_v51  ;;  %v7305_v28 = vadd.f32 %v7304_v31, %v6950_v51 }
 0x811   : > { %7333 = vst [vmem:[%s14140_s22 + $0xa0] sm:$0xff] %v7214_v5  ;;  %7335 = vst [vmem:[%s14140_s22 + $0xb0] sm:$0xff] %v7303_v16 }
 0x812   : > { %7334 = vst [vmem:[%s14140_s22 + $0xa8] sm:$0xff] %v7216_v46  ;;  %7336 = vst [vmem:[%s14140_s22 + $0xb8] sm:$0xff] %v7305_v28  ;;  %v7219_v2 = vpop.f32.mrb[102].mxu0  ;;  %v7308_v29 = vpop.f32.mrb[166].mxu1 }
 0x813   : > { %v7220_v27 = vadd.f32 %v7219_v2, %v14154_v21  ;;  %v7309_v43 = vadd.f32 %v7308_v29, %v14154_v21  ;;  %v7221_v26 = vpop.f32.mrb[103].mxu0  ;;  %v7310_v60 = vpop.f32.mrb[167].mxu1 }
 0x814   : > { %v7222_v50 = vadd.f32 %v7221_v26, %v14154_v21  ;;  %v7311_v61 = vadd.f32 %v7310_v60, %v14154_v21 }
 0x815   : > { %7341 = vst [vmem:[%s14140_s22 + $0xe0] sm:$0xff] %v7220_v27  ;;  %7343 = vst [vmem:[%s14140_s22 + $0xf0] sm:$0xff] %v7309_v43 }
 0x816   : > { %7342 = vst [vmem:[%s14140_s22 + $0xe8] sm:$0xff] %v7222_v50  ;;  %7344 = vst [vmem:[%s14140_s22 + $0xf8] sm:$0xff] %v7311_v61 }
 0x817   : > { %9091 = shalt.err (!%p9088_p4)
}
 0x818   : > { %s9092_s19 = scalar_lea.hbm %s14191_s18, 4096  ;;  %s9096_s16 = scalar_lea.hbm %s14257_s13, 8192 }
 0x819   : > { %p9093_p5 = scmp.ne.s32.totalorder %s14191_s18, %s9092_s19  ;;  %p9097_p1 = scmp.lt.u32.totalorder %s14191_s18, %s14257_s13 }
 0x81a   : > { %p9098_p3 = scmp.lt.u32.totalorder %s9096_s16, %s9092_s19  ;;  %p9100_p11 = scmp.lt.u32.totalorder %s9092_s19, %s14191_s18 }
 0x81b   : > { %p9094_p7 = pnand %p9093_p5, %p14279_p12 }
 0x81c   : > { %p9099_p6 = por %p9098_p3, %p9097_p1 }
 0x81d   : > { %p9095_p9 = pneg %p9094_p7 }
 0x81e   : > { %p9101_p13 = por %p9100_p11, %p9099_p6 }
 0x820   : > { %p9102_p8 = pnand %p9101_p13, %p9095_p9 }
 0x822   : > { %9105 = shalt.err (!%p9102_p8)
}
 0x823   : > { %s9154_s25 = smov 1024  }
 0x824   : > { %8878 = dma.vmem_to_hbm [thread:$0]  (%p14279_p12), %s14195_s15, 4096, %s14191_s18, %s7346_s27, %s9154_s25, %s9154_s25, %s14277_s24  }
 0x825 PF: > { %s14280_s0 = sld [smem:[#allocation13_spill]]  ;;  %p14281_p10 = scmp.ne.s32.totalorder %s14274_s21, 0 }
 0x826   : > { %p14282_p0 = scmp.ge.s32.totalorder %s9144_s28, 2 }
 0x828   : > { %p8885_p2 = pnand %p14282_p0, %p14281_p10 }
 0x82b   : > { %s7374_s14 = sand.u32 1, %s14280_s0  }
 0x82c   : > { %s7375_s17 = scalar_lea.sflag [#allocation9], %s7374_s14 }
 0x82d   : > { %9127 = dma.done.wait (!%p8885_p2), %s7375_s17, 4096  }
 0x82e   : > { %9129 = vsyncadd (!%p8885_p2), %s7375_s17, 4294963200  ;;  %s14283_s28 = sld [smem:[#allocation15_spill]]  ;;  %s14284_s20 = sld [smem:[#allocation14_spill]] }
 0x82f   : > { %s14285_s27 = sld [smem:[#allocation16_spill]]  ;;  %s14286_s25 = smov %s9136_s26 }
 0x834   : > { %p26_p4 = scmp.ge.s32.totalorder %s14283_s28, 4   ;;  %s14287_s26 = smov %s14284_s20 }
 0x836   :  { %28 = sbr.rel (!%p26_p4) target bundleno = 8 (0x8), region = 134 }
 0x83d   :  { %7380 = vsyncpa [#allocation8], 1 }
 0x83e   :  { %7382 = vsyncpa [#allocation8 + $0x1], 1 }
 0x83f   :  { %7383 = vsyncpa [#allocation9], 1 }
 0x840   :  { %7385 = vsyncpa [#allocation9 + $0x1], 1 }

</bundles_post_ra>
